<compile_context>
chip_gen: v7x
topology: tpu7x:2x2x1
jax: 0.10.0
libtpu: 0.0.40
codegen_flags: <defaults>
</compile_context>

<pallas_src>
import numpy as np
import jax
import jax.numpy as jnp
from jax.experimental import pallas as pl
from jax.experimental.pallas import tpu as pltpu

# Model dimensions fixed by Linear(16*100*2, 200) in the PyTorch module.
N = 2                    # batch
H, W = 200, 4            # input spatial
C1, C2 = 32, 16          # conv1 / conv2 output channels
HP, WP = H // 2, W // 2  # pooled spatial (100, 2)
J = 200                  # linear output features
JP = 256                 # j padded to a lane-aligned block
KROWS = 128              # hp (=100) padded contraction length for the linear
PB = HP + 2              # pair-rows per image (1 zero pad pair top + bottom)


# --------------------------------- kernel ---------------------------------- #

def _cnn_kernel(xp_ref, a1_ref, a2_ref, wls_hbm, b1_ref, b2_ref, bl_ref,
                out_ref, y1p_ref, y2_ref, wls_vmem, wls_sem):
    # Kick off the largest weight DMA (linear weight, ~2 MB) immediately so it
    # overlaps all of the conv compute; wait only right before the final dot.
    wls_cp = pltpu.make_async_copy(wls_hbm, wls_vmem, wls_sem)
    wls_cp.start()

    # Zero scratch: padding pair-rows of y1 and hp-padding rows of y2 must be 0
    # (scratch is uninitialized; NaN garbage would otherwise propagate).
    y1p_ref[...] = jnp.zeros(y1p_ref.shape, y1p_ref.dtype)
    y2_ref[...] = jnp.zeros(y2_ref.shape, y2_ref.dtype)

    for n_i in range(N):
        base = n_i * PB

        # ---- conv1 (1->32, 3x3, pad 1) + ReLU: 3 banded row-shifted matmuls.
        acc1 = jnp.zeros((HP, 2 * W * C1), jnp.float32)
        for t in range(3):
            xs = xp_ref[base + t: base + t + HP, :].astype(jnp.bfloat16)
            acc1 = acc1 + jnp.dot(xs, a1_ref[t],
                                  preferred_element_type=jnp.float32)
        y1 = jnp.maximum(acc1 + b1_ref[...], 0.0)                 # (100, 256)
        y1p_ref[base + 1: base + 1 + HP, :] = y1

        # ---- conv2 (32->16, 3x3, pad 1) + ReLU fused with 2x2 max-pool.
        acc2 = jnp.zeros((HP, 2 * W * C2), jnp.float32)
        for t in range(3):
            ys = y1p_ref[base + t: base + t + HP, :].astype(jnp.bfloat16)
            acc2 = acc2 + jnp.dot(ys, a2_ref[t],
                                  preferred_element_type=jnp.float32)
        # Columns ordered (h-parity, w-parity, wp, co): pool = max of 4 blocks.
        m = jnp.maximum(jnp.maximum(acc2[:, 0:32], acc2[:, 32:64]),
                        jnp.maximum(acc2[:, 64:96], acc2[:, 96:128]))
        y2 = jnp.maximum(m + b2_ref[...], 0.0).astype(jnp.bfloat16)  # (100, 32)
        y2_ref[n_i, 0:HP, :] = y2

    # ---- linear: out[n, j] = sum_{hp, l} y2[n, hp, l] * WL[hp, l, j] + b[j]
    # Contract the padded hp axis once on the MXU for all (l, l') pairs, then
    # accumulate the l == l' diagonal 256-lane blocks.
    wls_cp.wait()
    ycat = jnp.concatenate([y2_ref[0], y2_ref[1]], axis=1)        # (128, 64)
    g = jax.lax.dot_general(ycat, wls_vmem[...],
                            (((0,), (0,)), ((), ())),
                            preferred_element_type=jnp.float32)   # (64, 32*256)
    rows = []
    for n_i in range(N):
        acc = g[n_i * 32: n_i * 32 + 1, 0:JP]
        for l in range(1, WP * C2):
            acc = acc + g[n_i * 32 + l: n_i * 32 + l + 1, l * JP:(l + 1) * JP]
        rows.append(acc)
    out = jnp.concatenate(rows, axis=0)                           # (2, 256)
    out_ref[...] = out[:, 0:J] + bl_ref[...]


def _pallas_cnn(xp, a1, a2, wls, b1f, b2f, blf):
    vmem = pl.BlockSpec(memory_space=pltpu.MemorySpace.VMEM)
    return pl.pallas_call(
        _cnn_kernel,
        out_shape=jax.ShapeDtypeStruct((N, J), jnp.float32),
        in_specs=[vmem,                                  # xp
                  vmem,                                  # a1 (conv1 taps)
                  vmem,                                  # a2 (conv2 taps)
                  pl.BlockSpec(memory_space=pl.ANY),     # wls: manual DMA
                  vmem, vmem, vmem],                     # biases
        out_specs=pl.BlockSpec(memory_space=pltpu.MemorySpace.VMEM),
        scratch_shapes=[
            pltpu.VMEM((N * PB, 2 * W * C1), jnp.float32),      # y1 (pair rows)
            pltpu.VMEM((N, KROWS, WP * C2), jnp.bfloat16),      # pooled y2
            pltpu.VMEM((KROWS, WP * C2 * JP), jnp.bfloat16),    # wls landing buf
            pltpu.SemaphoreType.DMA,                            # wls DMA sem
        ],
        compiler_params=pltpu.CompilerParams(
            vmem_limit_bytes=32 * 1024 * 1024),
    )(xp, a1, a2, wls, b1f, b2f, blf)


# --------------------- one-time parameter repacking ------------------------ #

def prepare_params(params):
    """Repack PyTorch-layout parameters into kernel-friendly matrices (once)."""
    w1, b1, w2, b2, wl, bl = [np.asarray(p, dtype=np.float32) for p in params]

    # conv1: 3 banded tap matrices (2*W, 2*W*C1); lane order (h-parity, w, co).
    a1 = np.zeros((3, 2 * W, 2 * W * C1), np.float32)
    for t in range(3):
        for hi in range(2):
            for ho in range(2):
                kh = 2 * t + hi - ho - 1
                if not 0 <= kh < 3:
                    continue
                for wi in range(W):
                    for wo in range(W):
                        kw = wi - wo + 1
                        if not 0 <= kw < 3:
                            continue
                        col = ho * W * C1 + wo * C1
                        a1[t, hi * W + wi, col:col + C1] = w1[:, 0, kh, kw]

    # conv2: 3 banded tap matrices (2*W*C1, 2*W*C2);
    # output lane order (h-parity, w-parity, wp, co) -> pool = max of 4 blocks.
    a2 = np.zeros((3, 2 * W * C1, 2 * W * C2), np.float32)
    for t in range(3):
        for hi in range(2):
            for ho in range(2):
                kh = 2 * t + hi - ho - 1
                if not 0 <= kh < 3:
                    continue
                for wi in range(W):
                    for wo in range(W):
                        kw = wi - wo + 1
                        if not 0 <= kw < 3:
                            continue
                        wpar, wp = wo % 2, wo // 2
                        col = ho * (2 * WP * C2) + wpar * (WP * C2) + wp * C2
                        row = hi * W * C1 + wi * C1
                        a2[t, row:row + C1, col:col + C2] = w2[:, :, kh, kw].T

    # linear: permute to (hp, l = wp*16 + co, j), pad hp->128 and j->256.
    wl3 = wl.reshape(J, C2, HP, WP).transpose(2, 3, 1, 0)   # (hp, wp, co, j)
    wl3 = wl3.reshape(HP, WP * C2, J)
    wls3 = np.zeros((KROWS, WP * C2, JP), np.float32)
    wls3[:HP, :, :J] = wl3
    wls = wls3.reshape(KROWS, WP * C2 * JP)

    b1f = np.tile(b1, 2 * W)[None, :]                       # (1, 256)
    b2f = np.tile(b2, WP)[None, :]                          # (1, 32)
    blf = bl[None, :]                                       # (1, 200)

    return (jnp.asarray(a1, jnp.bfloat16),
            jnp.asarray(a2, jnp.bfloat16),
            jnp.asarray(wls, jnp.bfloat16),
            jnp.asarray(b1f, jnp.float32),
            jnp.asarray(b2f, jnp.float32),
            jnp.asarray(blf, jnp.float32))


# ------------------------------- forward ----------------------------------- #

@jax.jit
def cnn_forward(x, prepped):
    a1, a2, wls, b1f, b2f, blf = prepped
    # Pair-row layout of the H-zero-padded input: row = (n, h//2 with pad),
    # lanes = (h%2, w).  One pad + one reshape; everything else is in-kernel.
    xp = jnp.pad(x[:, 0, :, :], ((0, 0), (2, 2), (0, 0)))   # (N, H+4, W)
    xp = xp.reshape(N * PB, 2 * W).astype(jnp.float32)      # (204, 8)
    return _pallas_cnn(xp, a1, a2, wls, b1f, b2f, blf)


def ref_forward(x, params):
    w1, b1, w2, b2, wl, bl = params
    dn = ('NCHW', 'OIHW', 'NCHW')
    p = jax.lax.Precision.HIGHEST
    y = jax.lax.conv_general_dilated(x, w1, (1, 1), ((1, 1), (1, 1)),
                                     dimension_numbers=dn, precision=p)
    y = jax.nn.relu(y + b1[None, :, None, None])
    y = jax.lax.conv_general_dilated(y, w2, (1, 1), ((1, 1), (1, 1)),
                                     dimension_numbers=dn, precision=p)
    y = jax.nn.relu(y + b2[None, :, None, None])
    y = jax.lax.reduce_window(y, -jnp.inf, jax.lax.max,
                              (1, 1, 2, 2), (1, 1, 2, 2), 'VALID')
    y = y.reshape(y.shape[0], -1)
    return jnp.dot(y, wl.T, precision=p) + bl


# --------------------------------- main ------------------------------------ #

if __name__ == "__main__":
    key = jax.random.PRNGKey(0)
    kx, k1, k2, k3, k4, k5, k6 = jax.random.split(key, 7)

    x = jax.random.normal(kx, (N, 1, H, W), jnp.float32)

    # Deterministic synthetic parameters (PyTorch layouts: OIHW convs, (out,in) linear)
    w1 = 0.20 * jax.random.normal(k1, (C1, 1, 3, 3), jnp.float32)
    b1 = 0.10 * jax.random.normal(k2, (C1,), jnp.float32)
    w2 = 0.05 * jax.random.normal(k3, (C2, C1, 3, 3), jnp.float32)
    b2 = 0.10 * jax.random.normal(k4, (C2,), jnp.float32)
    wl = 0.02 * jax.random.normal(k5, (J, C2 * HP * WP), jnp.float32)
    bl = 0.10 * jax.random.normal(k6, (J,), jnp.float32)
    params = (w1, b1, w2, b2, wl, bl)

    prepped = prepare_params(params)        # one-time weight repack (host side)

    out = cnn_forward(x, prepped)
    jax.block_until_ready(out)
    assert out.shape == (N, J), out.shape

    ref = ref_forward(x, params)
    np.testing.assert_allclose(np.asarray(out), np.asarray(ref),
                               rtol=2e-2, atol=2e-2)

    print("KERNEL_OK")
</pallas_src>

<mosaic_0001>
module attributes {stable_mosaic.version = 11 : i64} {
  func.func @_cnn_kernel(%arg0: memref<204x8xf32, #tpu.memory_space<vmem>>, %arg1: memref<3x8x256xbf16, #tpu.memory_space<vmem>>, %arg2: memref<3x256x128xbf16, #tpu.memory_space<vmem>>, %arg3: memref<128x8192xbf16, #tpu.memory_space<any>>, %arg4: memref<1x256xf32, #tpu.memory_space<vmem>>, %arg5: memref<1x32xf32, #tpu.memory_space<vmem>>, %arg6: memref<1x200xf32, #tpu.memory_space<vmem>>, %arg7: memref<2x200xf32, #tpu.memory_space<vmem>>, %arg8: memref<204x256xf32, #tpu.memory_space<vmem>>, %arg9: memref<2x128x32xbf16, #tpu.memory_space<vmem>>, %arg10: memref<128x8192xbf16, #tpu.memory_space<vmem>>, %arg11: memref<!tpu.dma_semaphore, #tpu.memory_space<semaphore_mem>>) attributes {dimension_semantics = [], scalar_prefetch = 0 : i64, scratch_operands = 4 : i64, tpu.core_type = #tpu.core_type<tc>} {
    tpu.enqueue_dma source(%arg3 : memref<128x8192xbf16, #tpu.memory_space<any>>) target(%arg10 : memref<128x8192xbf16, #tpu.memory_space<vmem>>) target_semaphore(%arg11 : memref<!tpu.dma_semaphore, #tpu.memory_space<semaphore_mem>>)
    %cst = arith.constant 0.000000e+00 : f32
    %0 = vector.broadcast %cst : f32 to vector<204x256xf32>
    %c0 = arith.constant 0 : index
    %c0_0 = arith.constant 0 : index
    %1 = vector.load %arg8[%c0, %c0_0] : memref<204x256xf32, #tpu.memory_space<vmem>>, vector<204x256xf32>
    tpu.vector_store %arg8[%c0, %c0_0], %0 {strides = array<i32>} : memref<204x256xf32, #tpu.memory_space<vmem>>, vector<204x256xf32>,
    %cst_1 = arith.constant 0.000000e+00 : bf16
    %2 = vector.broadcast %cst_1 : bf16 to vector<2x128x32xbf16>
    %c0_2 = arith.constant 0 : index
    %c0_3 = arith.constant 0 : index
    %c0_4 = arith.constant 0 : index
    %3 = vector.load %arg9[%c0_2, %c0_3, %c0_4] : memref<2x128x32xbf16, #tpu.memory_space<vmem>>, vector<2x128x32xbf16>
    tpu.vector_store %arg9[%c0_2, %c0_3, %c0_4], %2 {strides = array<i32>} : memref<2x128x32xbf16, #tpu.memory_space<vmem>>, vector<2x128x32xbf16>,
    %cst_5 = arith.constant 0.000000e+00 : f32
    %4 = vector.broadcast %cst_5 : f32 to vector<100x256xf32>
    %c0_6 = arith.constant 0 : index
    %c0_7 = arith.constant 0 : index
    %5 = vector.load %arg0[%c0_6, %c0_7] : memref<204x8xf32, #tpu.memory_space<vmem>>, vector<100x8xf32>
    %6 = arith.truncf %5 : vector<100x8xf32> to vector<100x8xbf16>
    %c0_8 = arith.constant 0 : index
    %c0_9 = arith.constant 0 : index
    %c0_10 = arith.constant 0 : index
    %7 = vector.load %arg1[%c0_8, %c0_9, %c0_10] : memref<3x8x256xbf16, #tpu.memory_space<vmem>>, vector<1x8x256xbf16>
    %8 = vector.shape_cast %7 : vector<1x8x256xbf16> to vector<8x256xbf16>
    %cst_11 = arith.constant dense<0.000000e+00> : vector<100x256xf32>
    %9 = tpu.matmul %6, %8, %cst_11 {dimension_numbers = #tpu.dot_dimension_numbers<[1], [0], [0], [1], [0, 0, 1, 1], [], []>} : vector<100x8xbf16>, vector<8x256xbf16>, vector<100x256xf32> -> vector<100x256xf32>
    %10 = arith.addf %4, %9 : vector<100x256xf32>
    %c1 = arith.constant 1 : index
    %c0_12 = arith.constant 0 : index
    %11 = vector.load %arg0[%c1, %c0_12] : memref<204x8xf32, #tpu.memory_space<vmem>>, vector<100x8xf32>
    %12 = arith.truncf %11 : vector<100x8xf32> to vector<100x8xbf16>
    %c1_13 = arith.constant 1 : index
    %c0_14 = arith.constant 0 : index
    %c0_15 = arith.constant 0 : index
    %13 = vector.load %arg1[%c1_13, %c0_14, %c0_15] : memref<3x8x256xbf16, #tpu.memory_space<vmem>>, vector<1x8x256xbf16>
    %14 = vector.shape_cast %13 : vector<1x8x256xbf16> to vector<8x256xbf16>
    %cst_16 = arith.constant dense<0.000000e+00> : vector<100x256xf32>
    %15 = tpu.matmul %12, %14, %cst_16 {dimension_numbers = #tpu.dot_dimension_numbers<[1], [0], [0], [1], [0, 0, 1, 1], [], []>} : vector<100x8xbf16>, vector<8x256xbf16>, vector<100x256xf32> -> vector<100x256xf32>
    %16 = arith.addf %10, %15 : vector<100x256xf32>
    %c2 = arith.constant 2 : index
    %c0_17 = arith.constant 0 : index
    %17 = vector.load %arg0[%c2, %c0_17] : memref<204x8xf32, #tpu.memory_space<vmem>>, vector<100x8xf32>
    %18 = arith.truncf %17 : vector<100x8xf32> to vector<100x8xbf16>
    %c2_18 = arith.constant 2 : index
    %c0_19 = arith.constant 0 : index
    %c0_20 = arith.constant 0 : index
    %19 = vector.load %arg1[%c2_18, %c0_19, %c0_20] : memref<3x8x256xbf16, #tpu.memory_space<vmem>>, vector<1x8x256xbf16>
    %20 = vector.shape_cast %19 : vector<1x8x256xbf16> to vector<8x256xbf16>
    %cst_21 = arith.constant dense<0.000000e+00> : vector<100x256xf32>
    %21 = tpu.matmul %18, %20, %cst_21 {dimension_numbers = #tpu.dot_dimension_numbers<[1], [0], [0], [1], [0, 0, 1, 1], [], []>} : vector<100x8xbf16>, vector<8x256xbf16>, vector<100x256xf32> -> vector<100x256xf32>
    %22 = arith.addf %16, %21 : vector<100x256xf32>
    %c0_22 = arith.constant 0 : index
    %c0_23 = arith.constant 0 : index
    %23 = vector.load %arg4[%c0_22, %c0_23] : memref<1x256xf32, #tpu.memory_space<vmem>>, vector<1x256xf32>
    %24 = vector.broadcast %23 : vector<1x256xf32> to vector<100x256xf32>
    %25 = arith.addf %22, %24 : vector<100x256xf32>
    %cst_24 = arith.constant 0.000000e+00 : f32
    %26 = vector.broadcast %cst_24 : f32 to vector<100x256xf32>
    %27 = arith.maximumf %25, %26 : vector<100x256xf32>
    %c1_25 = arith.constant 1 : index
    %c0_26 = arith.constant 0 : index
    %28 = vector.load %arg8[%c1_25, %c0_26] : memref<204x256xf32, #tpu.memory_space<vmem>>, vector<100x256xf32>
    tpu.vector_store %arg8[%c1_25, %c0_26], %27 {strides = array<i32>} : memref<204x256xf32, #tpu.memory_space<vmem>>, vector<100x256xf32>,
    %cst_27 = arith.constant 0.000000e+00 : f32
    %29 = vector.broadcast %cst_27 : f32 to vector<100x128xf32>
    %c0_28 = arith.constant 0 : index
    %c0_29 = arith.constant 0 : index
    %30 = vector.load %arg8[%c0_28, %c0_29] : memref<204x256xf32, #tpu.memory_space<vmem>>, vector<100x256xf32>
    %31 = arith.truncf %30 : vector<100x256xf32> to vector<100x256xbf16>
    %c0_30 = arith.constant 0 : index
    %c0_31 = arith.constant 0 : index
    %c0_32 = arith.constant 0 : index
    %32 = vector.load %arg2[%c0_30, %c0_31, %c0_32] : memref<3x256x128xbf16, #tpu.memory_space<vmem>>, vector<1x256x128xbf16>
    %33 = vector.shape_cast %32 : vector<1x256x128xbf16> to vector<256x128xbf16>
    %cst_33 = arith.constant dense<0.000000e+00> : vector<100x128xf32>
    %34 = tpu.matmul %31, %33, %cst_33 {dimension_numbers = #tpu.dot_dimension_numbers<[1], [0], [0], [1], [0, 0, 1, 1], [], []>} : vector<100x256xbf16>, vector<256x128xbf16>, vector<100x128xf32> -> vector<100x128xf32>
    %35 = arith.addf %29, %34 : vector<100x128xf32>
    %c1_34 = arith.constant 1 : index
    %c0_35 = arith.constant 0 : index
    %36 = vector.load %arg8[%c1_34, %c0_35] : memref<204x256xf32, #tpu.memory_space<vmem>>, vector<100x256xf32>
    %37 = arith.truncf %36 : vector<100x256xf32> to vector<100x256xbf16>
    %c1_36 = arith.constant 1 : index
    %c0_37 = arith.constant 0 : index
    %c0_38 = arith.constant 0 : index
    %38 = vector.load %arg2[%c1_36, %c0_37, %c0_38] : memref<3x256x128xbf16, #tpu.memory_space<vmem>>, vector<1x256x128xbf16>
    %39 = vector.shape_cast %38 : vector<1x256x128xbf16> to vector<256x128xbf16>
    %cst_39 = arith.constant dense<0.000000e+00> : vector<100x128xf32>
    %40 = tpu.matmul %37, %39, %cst_39 {dimension_numbers = #tpu.dot_dimension_numbers<[1], [0], [0], [1], [0, 0, 1, 1], [], []>} : vector<100x256xbf16>, vector<256x128xbf16>, vector<100x128xf32> -> vector<100x128xf32>
    %41 = arith.addf %35, %40 : vector<100x128xf32>
    %c2_40 = arith.constant 2 : index
    %c0_41 = arith.constant 0 : index
    %42 = vector.load %arg8[%c2_40, %c0_41] : memref<204x256xf32, #tpu.memory_space<vmem>>, vector<100x256xf32>
    %43 = arith.truncf %42 : vector<100x256xf32> to vector<100x256xbf16>
    %c2_42 = arith.constant 2 : index
    %c0_43 = arith.constant 0 : index
    %c0_44 = arith.constant 0 : index
    %44 = vector.load %arg2[%c2_42, %c0_43, %c0_44] : memref<3x256x128xbf16, #tpu.memory_space<vmem>>, vector<1x256x128xbf16>
    %45 = vector.shape_cast %44 : vector<1x256x128xbf16> to vector<256x128xbf16>
    %cst_45 = arith.constant dense<0.000000e+00> : vector<100x128xf32>
    %46 = tpu.matmul %43, %45, %cst_45 {dimension_numbers = #tpu.dot_dimension_numbers<[1], [0], [0], [1], [0, 0, 1, 1], [], []>} : vector<100x256xbf16>, vector<256x128xbf16>, vector<100x128xf32> -> vector<100x128xf32>
    %47 = arith.addf %41, %46 : vector<100x128xf32>
    %48 = vector.extract_strided_slice %47 {offsets = [0, 0], sizes = [100, 32], strides = [1, 1]} : vector<100x128xf32> to vector<100x32xf32>
    %49 = vector.extract_strided_slice %47 {offsets = [0, 32], sizes = [100, 32], strides = [1, 1]} : vector<100x128xf32> to vector<100x32xf32>
    %50 = arith.maximumf %48, %49 : vector<100x32xf32>
    %51 = vector.extract_strided_slice %47 {offsets = [0, 64], sizes = [100, 32], strides = [1, 1]} : vector<100x128xf32> to vector<100x32xf32>
    %52 = vector.extract_strided_slice %47 {offsets = [0, 96], sizes = [100, 32], strides = [1, 1]} : vector<100x128xf32> to vector<100x32xf32>
    %53 = arith.maximumf %51, %52 : vector<100x32xf32>
    %54 = arith.maximumf %50, %53 : vector<100x32xf32>
    %c0_46 = arith.constant 0 : index
    %c0_47 = arith.constant 0 : index
    %55 = vector.load %arg5[%c0_46, %c0_47] : memref<1x32xf32, #tpu.memory_space<vmem>>, vector<1x32xf32>
    %56 = vector.broadcast %55 : vector<1x32xf32> to vector<100x32xf32>
    %57 = arith.addf %54, %56 : vector<100x32xf32>
    %cst_48 = arith.constant 0.000000e+00 : f32
    %58 = vector.broadcast %cst_48 : f32 to vector<100x32xf32>
    %59 = arith.maximumf %57, %58 : vector<100x32xf32>
    %60 = arith.truncf %59 : vector<100x32xf32> to vector<100x32xbf16>
    %c0_49 = arith.constant 0 : index
    %c0_50 = arith.constant 0 : index
    %c0_51 = arith.constant 0 : index
    %61 = vector.load %arg9[%c0_49, %c0_50, %c0_51] : memref<2x128x32xbf16, #tpu.memory_space<vmem>>, vector<1x100x32xbf16>
    %62 = vector.shape_cast %61 : vector<1x100x32xbf16> to vector<100x32xbf16>
    %63 = vector.shape_cast %60 : vector<100x32xbf16> to vector<1x100x32xbf16>
    tpu.vector_store %arg9[%c0_49, %c0_50, %c0_51], %63 {strides = array<i32>} : memref<2x128x32xbf16, #tpu.memory_space<vmem>>, vector<1x100x32xbf16>,
    %cst_52 = arith.constant 0.000000e+00 : f32
    %64 = vector.broadcast %cst_52 : f32 to vector<100x256xf32>
    %c102 = arith.constant 102 : index
    %c0_53 = arith.constant 0 : index
    %65 = vector.load %arg0[%c102, %c0_53] : memref<204x8xf32, #tpu.memory_space<vmem>>, vector<100x8xf32>
    %66 = arith.truncf %65 : vector<100x8xf32> to vector<100x8xbf16>
    %c0_54 = arith.constant 0 : index
    %c0_55 = arith.constant 0 : index
    %c0_56 = arith.constant 0 : index
    %67 = vector.load %arg1[%c0_54, %c0_55, %c0_56] : memref<3x8x256xbf16, #tpu.memory_space<vmem>>, vector<1x8x256xbf16>
    %68 = vector.shape_cast %67 : vector<1x8x256xbf16> to vector<8x256xbf16>
    %cst_57 = arith.constant dense<0.000000e+00> : vector<100x256xf32>
    %69 = tpu.matmul %66, %68, %cst_57 {dimension_numbers = #tpu.dot_dimension_numbers<[1], [0], [0], [1], [0, 0, 1, 1], [], []>} : vector<100x8xbf16>, vector<8x256xbf16>, vector<100x256xf32> -> vector<100x256xf32>
    %70 = arith.addf %64, %69 : vector<100x256xf32>
    %c103 = arith.constant 103 : index
    %c0_58 = arith.constant 0 : index
    %71 = vector.load %arg0[%c103, %c0_58] : memref<204x8xf32, #tpu.memory_space<vmem>>, vector<100x8xf32>
    %72 = arith.truncf %71 : vector<100x8xf32> to vector<100x8xbf16>
    %c1_59 = arith.constant 1 : index
    %c0_60 = arith.constant 0 : index
    %c0_61 = arith.constant 0 : index
    %73 = vector.load %arg1[%c1_59, %c0_60, %c0_61] : memref<3x8x256xbf16, #tpu.memory_space<vmem>>, vector<1x8x256xbf16>
    %74 = vector.shape_cast %73 : vector<1x8x256xbf16> to vector<8x256xbf16>
    %cst_62 = arith.constant dense<0.000000e+00> : vector<100x256xf32>
    %75 = tpu.matmul %72, %74, %cst_62 {dimension_numbers = #tpu.dot_dimension_numbers<[1], [0], [0], [1], [0, 0, 1, 1], [], []>} : vector<100x8xbf16>, vector<8x256xbf16>, vector<100x256xf32> -> vector<100x256xf32>
    %76 = arith.addf %70, %75 : vector<100x256xf32>
    %c104 = arith.constant 104 : index
    %c0_63 = arith.constant 0 : index
    %77 = vector.load %arg0[%c104, %c0_63] : memref<204x8xf32, #tpu.memory_space<vmem>>, vector<100x8xf32>
    %78 = arith.truncf %77 : vector<100x8xf32> to vector<100x8xbf16>
    %c2_64 = arith.constant 2 : index
    %c0_65 = arith.constant 0 : index
    %c0_66 = arith.constant 0 : index
    %79 = vector.load %arg1[%c2_64, %c0_65, %c0_66] : memref<3x8x256xbf16, #tpu.memory_space<vmem>>, vector<1x8x256xbf16>
    %80 = vector.shape_cast %79 : vector<1x8x256xbf16> to vector<8x256xbf16>
    %cst_67 = arith.constant dense<0.000000e+00> : vector<100x256xf32>
    %81 = tpu.matmul %78, %80, %cst_67 {dimension_numbers = #tpu.dot_dimension_numbers<[1], [0], [0], [1], [0, 0, 1, 1], [], []>} : vector<100x8xbf16>, vector<8x256xbf16>, vector<100x256xf32> -> vector<100x256xf32>
    %82 = arith.addf %76, %81 : vector<100x256xf32>
    %c0_68 = arith.constant 0 : index
    %c0_69 = arith.constant 0 : index
    %83 = vector.load %arg4[%c0_68, %c0_69] : memref<1x256xf32, #tpu.memory_space<vmem>>, vector<1x256xf32>
    %84 = vector.broadcast %83 : vector<1x256xf32> to vector<100x256xf32>
    %85 = arith.addf %82, %84 : vector<100x256xf32>
    %cst_70 = arith.constant 0.000000e+00 : f32
    %86 = vector.broadcast %cst_70 : f32 to vector<100x256xf32>
    %87 = arith.maximumf %85, %86 : vector<100x256xf32>
    %c103_71 = arith.constant 103 : index
    %c0_72 = arith.constant 0 : index
    %88 = vector.load %arg8[%c103_71, %c0_72] : memref<204x256xf32, #tpu.memory_space<vmem>>, vector<100x256xf32>
    tpu.vector_store %arg8[%c103_71, %c0_72], %87 {strides = array<i32>} : memref<204x256xf32, #tpu.memory_space<vmem>>, vector<100x256xf32>,
    %cst_73 = arith.constant 0.000000e+00 : f32
    %89 = vector.broadcast %cst_73 : f32 to vector<100x128xf32>
    %c102_74 = arith.constant 102 : index
    %c0_75 = arith.constant 0 : index
    %90 = vector.load %arg8[%c102_74, %c0_75] : memref<204x256xf32, #tpu.memory_space<vmem>>, vector<100x256xf32>
    %91 = arith.truncf %90 : vector<100x256xf32> to vector<100x256xbf16>
    %c0_76 = arith.constant 0 : index
    %c0_77 = arith.constant 0 : index
    %c0_78 = arith.constant 0 : index
    %92 = vector.load %arg2[%c0_76, %c0_77, %c0_78] : memref<3x256x128xbf16, #tpu.memory_space<vmem>>, vector<1x256x128xbf16>
    %93 = vector.shape_cast %92 : vector<1x256x128xbf16> to vector<256x128xbf16>
    %cst_79 = arith.constant dense<0.000000e+00> : vector<100x128xf32>
    %94 = tpu.matmul %91, %93, %cst_79 {dimension_numbers = #tpu.dot_dimension_numbers<[1], [0], [0], [1], [0, 0, 1, 1], [], []>} : vector<100x256xbf16>, vector<256x128xbf16>, vector<100x128xf32> -> vector<100x128xf32>
    %95 = arith.addf %89, %94 : vector<100x128xf32>
    %c103_80 = arith.constant 103 : index
    %c0_81 = arith.constant 0 : index
    %96 = vector.load %arg8[%c103_80, %c0_81] : memref<204x256xf32, #tpu.memory_space<vmem>>, vector<100x256xf32>
    %97 = arith.truncf %96 : vector<100x256xf32> to vector<100x256xbf16>
    %c1_82 = arith.constant 1 : index
    %c0_83 = arith.constant 0 : index
    %c0_84 = arith.constant 0 : index
    %98 = vector.load %arg2[%c1_82, %c0_83, %c0_84] : memref<3x256x128xbf16, #tpu.memory_space<vmem>>, vector<1x256x128xbf16>
    %99 = vector.shape_cast %98 : vector<1x256x128xbf16> to vector<256x128xbf16>
    %cst_85 = arith.constant dense<0.000000e+00> : vector<100x128xf32>
    %100 = tpu.matmul %97, %99, %cst_85 {dimension_numbers = #tpu.dot_dimension_numbers<[1], [0], [0], [1], [0, 0, 1, 1], [], []>} : vector<100x256xbf16>, vector<256x128xbf16>, vector<100x128xf32> -> vector<100x128xf32>
    %101 = arith.addf %95, %100 : vector<100x128xf32>
    %c104_86 = arith.constant 104 : index
    %c0_87 = arith.constant 0 : index
    %102 = vector.load %arg8[%c104_86, %c0_87] : memref<204x256xf32, #tpu.memory_space<vmem>>, vector<100x256xf32>
    %103 = arith.truncf %102 : vector<100x256xf32> to vector<100x256xbf16>
    %c2_88 = arith.constant 2 : index
    %c0_89 = arith.constant 0 : index
    %c0_90 = arith.constant 0 : index
    %104 = vector.load %arg2[%c2_88, %c0_89, %c0_90] : memref<3x256x128xbf16, #tpu.memory_space<vmem>>, vector<1x256x128xbf16>
    %105 = vector.shape_cast %104 : vector<1x256x128xbf16> to vector<256x128xbf16>
    %cst_91 = arith.constant dense<0.000000e+00> : vector<100x128xf32>
    %106 = tpu.matmul %103, %105, %cst_91 {dimension_numbers = #tpu.dot_dimension_numbers<[1], [0], [0], [1], [0, 0, 1, 1], [], []>} : vector<100x256xbf16>, vector<256x128xbf16>, vector<100x128xf32> -> vector<100x128xf32>
    %107 = arith.addf %101, %106 : vector<100x128xf32>
    %108 = vector.extract_strided_slice %107 {offsets = [0, 0], sizes = [100, 32], strides = [1, 1]} : vector<100x128xf32> to vector<100x32xf32>
    %109 = vector.extract_strided_slice %107 {offsets = [0, 32], sizes = [100, 32], strides = [1, 1]} : vector<100x128xf32> to vector<100x32xf32>
    %110 = arith.maximumf %108, %109 : vector<100x32xf32>
    %111 = vector.extract_strided_slice %107 {offsets = [0, 64], sizes = [100, 32], strides = [1, 1]} : vector<100x128xf32> to vector<100x32xf32>
    %112 = vector.extract_strided_slice %107 {offsets = [0, 96], sizes = [100, 32], strides = [1, 1]} : vector<100x128xf32> to vector<100x32xf32>
    %113 = arith.maximumf %111, %112 : vector<100x32xf32>
    %114 = arith.maximumf %110, %113 : vector<100x32xf32>
    %c0_92 = arith.constant 0 : index
    %c0_93 = arith.constant 0 : index
    %115 = vector.load %arg5[%c0_92, %c0_93] : memref<1x32xf32, #tpu.memory_space<vmem>>, vector<1x32xf32>
    %116 = vector.broadcast %115 : vector<1x32xf32> to vector<100x32xf32>
    %117 = arith.addf %114, %116 : vector<100x32xf32>
    %cst_94 = arith.constant 0.000000e+00 : f32
    %118 = vector.broadcast %cst_94 : f32 to vector<100x32xf32>
    %119 = arith.maximumf %117, %118 : vector<100x32xf32>
    %120 = arith.truncf %119 : vector<100x32xf32> to vector<100x32xbf16>
    %c1_95 = arith.constant 1 : index
    %c0_96 = arith.constant 0 : index
    %c0_97 = arith.constant 0 : index
    %121 = vector.load %arg9[%c1_95, %c0_96, %c0_97] : memref<2x128x32xbf16, #tpu.memory_space<vmem>>, vector<1x100x32xbf16>
    %122 = vector.shape_cast %121 : vector<1x100x32xbf16> to vector<100x32xbf16>
    %123 = vector.shape_cast %120 : vector<100x32xbf16> to vector<1x100x32xbf16>
    tpu.vector_store %arg9[%c1_95, %c0_96, %c0_97], %123 {strides = array<i32>} : memref<2x128x32xbf16, #tpu.memory_space<vmem>>, vector<1x100x32xbf16>,
    tpu.wait_dma2 semaphore(%arg11 : memref<!tpu.dma_semaphore, #tpu.memory_space<semaphore_mem>>) src(%arg3 : memref<128x8192xbf16, #tpu.memory_space<any>>) dst(%arg10 : memref<128x8192xbf16, #tpu.memory_space<vmem>>)
    %c0_98 = arith.constant 0 : index
    %c0_99 = arith.constant 0 : index
    %c0_100 = arith.constant 0 : index
    %124 = vector.load %arg9[%c0_98, %c0_99, %c0_100] : memref<2x128x32xbf16, #tpu.memory_space<vmem>>, vector<1x128x32xbf16>
    %125 = vector.shape_cast %124 : vector<1x128x32xbf16> to vector<128x32xbf16>
    %c1_101 = arith.constant 1 : index
    %c0_102 = arith.constant 0 : index
    %c0_103 = arith.constant 0 : index
    %126 = vector.load %arg9[%c1_101, %c0_102, %c0_103] : memref<2x128x32xbf16, #tpu.memory_space<vmem>>, vector<1x128x32xbf16>
    %127 = vector.shape_cast %126 : vector<1x128x32xbf16> to vector<128x32xbf16>
    %128 = tpu.concatenate %125, %127 in 1 : vector<128x32xbf16>, vector<128x32xbf16> -> vector<128x64xbf16>
    %c0_104 = arith.constant 0 : index
    %c0_105 = arith.constant 0 : index
    %129 = vector.load %arg10[%c0_104, %c0_105] : memref<128x8192xbf16, #tpu.memory_space<vmem>>, vector<128x8192xbf16>
    %cst_106 = arith.constant dense<0.000000e+00> : vector<64x8192xf32>
    %130 = tpu.matmul %128, %129, %cst_106 {dimension_numbers = #tpu.dot_dimension_numbers<[0], [0], [1], [1], [0, 1, 1, 1], [], []>} : vector<128x64xbf16>, vector<128x8192xbf16>, vector<64x8192xf32> -> vector<64x8192xf32>
    %131 = vector.extract_strided_slice %130 {offsets = [0, 0], sizes = [1, 256], strides = [1, 1]} : vector<64x8192xf32> to vector<1x256xf32>
    %132 = vector.extract_strided_slice %130 {offsets = [1, 256], sizes = [1, 256], strides = [1, 1]} : vector<64x8192xf32> to vector<1x256xf32>
    %133 = arith.addf %131, %132 : vector<1x256xf32>
    %134 = vector.extract_strided_slice %130 {offsets = [2, 512], sizes = [1, 256], strides = [1, 1]} : vector<64x8192xf32> to vector<1x256xf32>
    %135 = arith.addf %133, %134 : vector<1x256xf32>
    %136 = vector.extract_strided_slice %130 {offsets = [3, 768], sizes = [1, 256], strides = [1, 1]} : vector<64x8192xf32> to vector<1x256xf32>
    %137 = arith.addf %135, %136 : vector<1x256xf32>
    %138 = vector.extract_strided_slice %130 {offsets = [4, 1024], sizes = [1, 256], strides = [1, 1]} : vector<64x8192xf32> to vector<1x256xf32>
    %139 = arith.addf %137, %138 : vector<1x256xf32>
    %140 = vector.extract_strided_slice %130 {offsets = [5, 1280], sizes = [1, 256], strides = [1, 1]} : vector<64x8192xf32> to vector<1x256xf32>
    %141 = arith.addf %139, %140 : vector<1x256xf32>
    %142 = vector.extract_strided_slice %130 {offsets = [6, 1536], sizes = [1, 256], strides = [1, 1]} : vector<64x8192xf32> to vector<1x256xf32>
    %143 = arith.addf %141, %142 : vector<1x256xf32>
    %144 = vector.extract_strided_slice %130 {offsets = [7, 1792], sizes = [1, 256], strides = [1, 1]} : vector<64x8192xf32> to vector<1x256xf32>
    %145 = arith.addf %143, %144 : vector<1x256xf32>
    %146 = vector.extract_strided_slice %130 {offsets = [8, 2048], sizes = [1, 256], strides = [1, 1]} : vector<64x8192xf32> to vector<1x256xf32>
    %147 = arith.addf %145, %146 : vector<1x256xf32>
    %148 = vector.extract_strided_slice %130 {offsets = [9, 2304], sizes = [1, 256], strides = [1, 1]} : vector<64x8192xf32> to vector<1x256xf32>
    %149 = arith.addf %147, %148 : vector<1x256xf32>
    %150 = vector.extract_strided_slice %130 {offsets = [10, 2560], sizes = [1, 256], strides = [1, 1]} : vector<64x8192xf32> to vector<1x256xf32>
    %151 = arith.addf %149, %150 : vector<1x256xf32>
    %152 = vector.extract_strided_slice %130 {offsets = [11, 2816], sizes = [1, 256], strides = [1, 1]} : vector<64x8192xf32> to vector<1x256xf32>
    %153 = arith.addf %151, %152 : vector<1x256xf32>
    %154 = vector.extract_strided_slice %130 {offsets = [12, 3072], sizes = [1, 256], strides = [1, 1]} : vector<64x8192xf32> to vector<1x256xf32>
    %155 = arith.addf %153, %154 : vector<1x256xf32>
    %156 = vector.extract_strided_slice %130 {offsets = [13, 3328], sizes = [1, 256], strides = [1, 1]} : vector<64x8192xf32> to vector<1x256xf32>
    %157 = arith.addf %155, %156 : vector<1x256xf32>
    %158 = vector.extract_strided_slice %130 {offsets = [14, 3584], sizes = [1, 256], strides = [1, 1]} : vector<64x8192xf32> to vector<1x256xf32>
    %159 = arith.addf %157, %158 : vector<1x256xf32>
    %160 = vector.extract_strided_slice %130 {offsets = [15, 3840], sizes = [1, 256], strides = [1, 1]} : vector<64x8192xf32> to vector<1x256xf32>
    %161 = arith.addf %159, %160 : vector<1x256xf32>
    %162 = vector.extract_strided_slice %130 {offsets = [16, 4096], sizes = [1, 256], strides = [1, 1]} : vector<64x8192xf32> to vector<1x256xf32>
    %163 = arith.addf %161, %162 : vector<1x256xf32>
    %164 = vector.extract_strided_slice %130 {offsets = [17, 4352], sizes = [1, 256], strides = [1, 1]} : vector<64x8192xf32> to vector<1x256xf32>
    %165 = arith.addf %163, %164 : vector<1x256xf32>
    %166 = vector.extract_strided_slice %130 {offsets = [18, 4608], sizes = [1, 256], strides = [1, 1]} : vector<64x8192xf32> to vector<1x256xf32>
    %167 = arith.addf %165, %166 : vector<1x256xf32>
    %168 = vector.extract_strided_slice %130 {offsets = [19, 4864], sizes = [1, 256], strides = [1, 1]} : vector<64x8192xf32> to vector<1x256xf32>
    %169 = arith.addf %167, %168 : vector<1x256xf32>
    %170 = vector.extract_strided_slice %130 {offsets = [20, 5120], sizes = [1, 256], strides = [1, 1]} : vector<64x8192xf32> to vector<1x256xf32>
    %171 = arith.addf %169, %170 : vector<1x256xf32>
    %172 = vector.extract_strided_slice %130 {offsets = [21, 5376], sizes = [1, 256], strides = [1, 1]} : vector<64x8192xf32> to vector<1x256xf32>
    %173 = arith.addf %171, %172 : vector<1x256xf32>
    %174 = vector.extract_strided_slice %130 {offsets = [22, 5632], sizes = [1, 256], strides = [1, 1]} : vector<64x8192xf32> to vector<1x256xf32>
    %175 = arith.addf %173, %174 : vector<1x256xf32>
    %176 = vector.extract_strided_slice %130 {offsets = [23, 5888], sizes = [1, 256], strides = [1, 1]} : vector<64x8192xf32> to vector<1x256xf32>
    %177 = arith.addf %175, %176 : vector<1x256xf32>
    %178 = vector.extract_strided_slice %130 {offsets = [24, 6144], sizes = [1, 256], strides = [1, 1]} : vector<64x8192xf32> to vector<1x256xf32>
    %179 = arith.addf %177, %178 : vector<1x256xf32>
    %180 = vector.extract_strided_slice %130 {offsets = [25, 6400], sizes = [1, 256], strides = [1, 1]} : vector<64x8192xf32> to vector<1x256xf32>
    %181 = arith.addf %179, %180 : vector<1x256xf32>
    %182 = vector.extract_strided_slice %130 {offsets = [26, 6656], sizes = [1, 256], strides = [1, 1]} : vector<64x8192xf32> to vector<1x256xf32>
    %183 = arith.addf %181, %182 : vector<1x256xf32>
    %184 = vector.extract_strided_slice %130 {offsets = [27, 6912], sizes = [1, 256], strides = [1, 1]} : vector<64x8192xf32> to vector<1x256xf32>
    %185 = arith.addf %183, %184 : vector<1x256xf32>
    %186 = vector.extract_strided_slice %130 {offsets = [28, 7168], sizes = [1, 256], strides = [1, 1]} : vector<64x8192xf32> to vector<1x256xf32>
    %187 = arith.addf %185, %186 : vector<1x256xf32>
    %188 = vector.extract_strided_slice %130 {offsets = [29, 7424], sizes = [1, 256], strides = [1, 1]} : vector<64x8192xf32> to vector<1x256xf32>
    %189 = arith.addf %187, %188 : vector<1x256xf32>
    %190 = vector.extract_strided_slice %130 {offsets = [30, 7680], sizes = [1, 256], strides = [1, 1]} : vector<64x8192xf32> to vector<1x256xf32>
    %191 = arith.addf %189, %190 : vector<1x256xf32>
    %192 = vector.extract_strided_slice %130 {offsets = [31, 7936], sizes = [1, 256], strides = [1, 1]} : vector<64x8192xf32> to vector<1x256xf32>
    %193 = arith.addf %191, %192 : vector<1x256xf32>
    %194 = vector.extract_strided_slice %130 {offsets = [32, 0], sizes = [1, 256], strides = [1, 1]} : vector<64x8192xf32> to vector<1x256xf32>
    %195 = vector.extract_strided_slice %130 {offsets = [33, 256], sizes = [1, 256], strides = [1, 1]} : vector<64x8192xf32> to vector<1x256xf32>
    %196 = arith.addf %194, %195 : vector<1x256xf32>
    %197 = vector.extract_strided_slice %130 {offsets = [34, 512], sizes = [1, 256], strides = [1, 1]} : vector<64x8192xf32> to vector<1x256xf32>
    %198 = arith.addf %196, %197 : vector<1x256xf32>
    %199 = vector.extract_strided_slice %130 {offsets = [35, 768], sizes = [1, 256], strides = [1, 1]} : vector<64x8192xf32> to vector<1x256xf32>
    %200 = arith.addf %198, %199 : vector<1x256xf32>
    %201 = vector.extract_strided_slice %130 {offsets = [36, 1024], sizes = [1, 256], strides = [1, 1]} : vector<64x8192xf32> to vector<1x256xf32>
    %202 = arith.addf %200, %201 : vector<1x256xf32>
    %203 = vector.extract_strided_slice %130 {offsets = [37, 1280], sizes = [1, 256], strides = [1, 1]} : vector<64x8192xf32> to vector<1x256xf32>
    %204 = arith.addf %202, %203 : vector<1x256xf32>
    %205 = vector.extract_strided_slice %130 {offsets = [38, 1536], sizes = [1, 256], strides = [1, 1]} : vector<64x8192xf32> to vector<1x256xf32>
    %206 = arith.addf %204, %205 : vector<1x256xf32>
    %207 = vector.extract_strided_slice %130 {offsets = [39, 1792], sizes = [1, 256], strides = [1, 1]} : vector<64x8192xf32> to vector<1x256xf32>
    %208 = arith.addf %206, %207 : vector<1x256xf32>
    %209 = vector.extract_strided_slice %130 {offsets = [40, 2048], sizes = [1, 256], strides = [1, 1]} : vector<64x8192xf32> to vector<1x256xf32>
    %210 = arith.addf %208, %209 : vector<1x256xf32>
    %211 = vector.extract_strided_slice %130 {offsets = [41, 2304], sizes = [1, 256], strides = [1, 1]} : vector<64x8192xf32> to vector<1x256xf32>
    %212 = arith.addf %210, %211 : vector<1x256xf32>
    %213 = vector.extract_strided_slice %130 {offsets = [42, 2560], sizes = [1, 256], strides = [1, 1]} : vector<64x8192xf32> to vector<1x256xf32>
    %214 = arith.addf %212, %213 : vector<1x256xf32>
    %215 = vector.extract_strided_slice %130 {offsets = [43, 2816], sizes = [1, 256], strides = [1, 1]} : vector<64x8192xf32> to vector<1x256xf32>
    %216 = arith.addf %214, %215 : vector<1x256xf32>
    %217 = vector.extract_strided_slice %130 {offsets = [44, 3072], sizes = [1, 256], strides = [1, 1]} : vector<64x8192xf32> to vector<1x256xf32>
    %218 = arith.addf %216, %217 : vector<1x256xf32>
    %219 = vector.extract_strided_slice %130 {offsets = [45, 3328], sizes = [1, 256], strides = [1, 1]} : vector<64x8192xf32> to vector<1x256xf32>
    %220 = arith.addf %218, %219 : vector<1x256xf32>
    %221 = vector.extract_strided_slice %130 {offsets = [46, 3584], sizes = [1, 256], strides = [1, 1]} : vector<64x8192xf32> to vector<1x256xf32>
    %222 = arith.addf %220, %221 : vector<1x256xf32>
    %223 = vector.extract_strided_slice %130 {offsets = [47, 3840], sizes = [1, 256], strides = [1, 1]} : vector<64x8192xf32> to vector<1x256xf32>
    %224 = arith.addf %222, %223 : vector<1x256xf32>
    %225 = vector.extract_strided_slice %130 {offsets = [48, 4096], sizes = [1, 256], strides = [1, 1]} : vector<64x8192xf32> to vector<1x256xf32>
    %226 = arith.addf %224, %225 : vector<1x256xf32>
    %227 = vector.extract_strided_slice %130 {offsets = [49, 4352], sizes = [1, 256], strides = [1, 1]} : vector<64x8192xf32> to vector<1x256xf32>
    %228 = arith.addf %226, %227 : vector<1x256xf32>
    %229 = vector.extract_strided_slice %130 {offsets = [50, 4608], sizes = [1, 256], strides = [1, 1]} : vector<64x8192xf32> to vector<1x256xf32>
    %230 = arith.addf %228, %229 : vector<1x256xf32>
    %231 = vector.extract_strided_slice %130 {offsets = [51, 4864], sizes = [1, 256], strides = [1, 1]} : vector<64x8192xf32> to vector<1x256xf32>
    %232 = arith.addf %230, %231 : vector<1x256xf32>
    %233 = vector.extract_strided_slice %130 {offsets = [52, 5120], sizes = [1, 256], strides = [1, 1]} : vector<64x8192xf32> to vector<1x256xf32>
    %234 = arith.addf %232, %233 : vector<1x256xf32>
    %235 = vector.extract_strided_slice %130 {offsets = [53, 5376], sizes = [1, 256], strides = [1, 1]} : vector<64x8192xf32> to vector<1x256xf32>
    %236 = arith.addf %234, %235 : vector<1x256xf32>
    %237 = vector.extract_strided_slice %130 {offsets = [54, 5632], sizes = [1, 256], strides = [1, 1]} : vector<64x8192xf32> to vector<1x256xf32>
    %238 = arith.addf %236, %237 : vector<1x256xf32>
    %239 = vector.extract_strided_slice %130 {offsets = [55, 5888], sizes = [1, 256], strides = [1, 1]} : vector<64x8192xf32> to vector<1x256xf32>
    %240 = arith.addf %238, %239 : vector<1x256xf32>
    %241 = vector.extract_strided_slice %130 {offsets = [56, 6144], sizes = [1, 256], strides = [1, 1]} : vector<64x8192xf32> to vector<1x256xf32>
    %242 = arith.addf %240, %241 : vector<1x256xf32>
    %243 = vector.extract_strided_slice %130 {offsets = [57, 6400], sizes = [1, 256], strides = [1, 1]} : vector<64x8192xf32> to vector<1x256xf32>
    %244 = arith.addf %242, %243 : vector<1x256xf32>
    %245 = vector.extract_strided_slice %130 {offsets = [58, 6656], sizes = [1, 256], strides = [1, 1]} : vector<64x8192xf32> to vector<1x256xf32>
    %246 = arith.addf %244, %245 : vector<1x256xf32>
    %247 = vector.extract_strided_slice %130 {offsets = [59, 6912], sizes = [1, 256], strides = [1, 1]} : vector<64x8192xf32> to vector<1x256xf32>
    %248 = arith.addf %246, %247 : vector<1x256xf32>
    %249 = vector.extract_strided_slice %130 {offsets = [60, 7168], sizes = [1, 256], strides = [1, 1]} : vector<64x8192xf32> to vector<1x256xf32>
    %250 = arith.addf %248, %249 : vector<1x256xf32>
    %251 = vector.extract_strided_slice %130 {offsets = [61, 7424], sizes = [1, 256], strides = [1, 1]} : vector<64x8192xf32> to vector<1x256xf32>
    %252 = arith.addf %250, %251 : vector<1x256xf32>
    %253 = vector.extract_strided_slice %130 {offsets = [62, 7680], sizes = [1, 256], strides = [1, 1]} : vector<64x8192xf32> to vector<1x256xf32>
    %254 = arith.addf %252, %253 : vector<1x256xf32>
    %255 = vector.extract_strided_slice %130 {offsets = [63, 7936], sizes = [1, 256], strides = [1, 1]} : vector<64x8192xf32> to vector<1x256xf32>
    %256 = arith.addf %254, %255 : vector<1x256xf32>
    %257 = tpu.concatenate %193, %256 in 0 : vector<1x256xf32>, vector<1x256xf32> -> vector<2x256xf32>
    %258 = vector.extract_strided_slice %257 {offsets = [0, 0], sizes = [2, 200], strides = [1, 1]} : vector<2x256xf32> to vector<2x200xf32>
    %c0_107 = arith.constant 0 : index
    %c0_108 = arith.constant 0 : index
    %259 = vector.load %arg6[%c0_107, %c0_108] : memref<1x200xf32, #tpu.memory_space<vmem>>, vector<1x200xf32>
    %260 = vector.broadcast %259 : vector<1x200xf32> to vector<2x200xf32>
    %261 = arith.addf %258, %260 : vector<2x200xf32>
    %c0_109 = arith.constant 0 : index
    %c0_110 = arith.constant 0 : index
    %262 = vector.load %arg7[%c0_109, %c0_110] : memref<2x200xf32, #tpu.memory_space<vmem>>, vector<2x200xf32>
    tpu.vector_store %arg7[%c0_109, %c0_110], %261 {strides = array<i32>} : memref<2x200xf32, #tpu.memory_space<vmem>>, vector<2x200xf32>,
    return
  }
}

</mosaic_0001>

<bundles_post_ra>
// kernel: cnn_forward.1
= control target key start
LH: loop header
LB: loop body
LE: loop exit
PB: predicated region body
PF: predicated region fallthrough
CT: control target
= control target key end

     0   :  { %12 = vsyncpa [#allocation7], 0  ;;  %s9494_s0 = inlined_call_operand.vmem [shape: f32[204,8], index: 0, kind: input, shape index: {}]   ;;  %s9495_s1 = inlined_call_operand.hbm [shape: bf16[3,8,256], index: 1, kind: input, shape index: {}]   ;;  %s9496_s2 = inlined_call_operand.hbm [shape: bf16[3,256,128], index: 2, kind: input, shape index: {}]   ;;  %s9497_s3 = inlined_call_operand.hbm [shape: bf16[128,8192], index: 3, kind: input, shape index: {}]   ;;  %s9498_s4 = inlined_call_operand.hbm [shape: f32[1,256], index: 4, kind: input, shape index: {}]   ;;  %s9499_s5 = inlined_call_operand.hbm [shape: f32[1,32], index: 5, kind: input, shape index: {}]   ;;  %s9500_s6 = inlined_call_operand.hbm [shape: f32[1,200], index: 6, kind: input, shape index: {}]   ;;  %s9501_s7 = inlined_call_operand.hbm [shape: f32[2,200], index: 7, kind: output, shape index: {}]  }
   0x1   :  { %13 = vsyncpa [#allocation10], 0 }
   0x2   :  { %14 = vsyncpa [#allocation13], 0 }
   0x3   :  { %15 = vsyncpa [#allocation8], 0  ;;  %s7702_s24 = smov [#allocation9]   ;;  %s7560_s28 = scalar_lea.hbm %s9496_s2, 6144 }
   0x4   :  { %s35_s25 = sshll.u32 %s7702_s24, 4  ;;  %p7561_p0 = scmp.ne.s32.totalorder %s9496_s2, %s7560_s28  ;;  %s36_s25 = int_to_ptr.vmem [resolvable:$true] %s35_s25 }
   0x5   :  { %p7564_p1 = scmp.lt.u32.totalorder %s7560_s28, %s9496_s2 }
   0x7   :  { %p7566_p2 = pnand %p7564_p1, %p7561_p0 }
   0x9   :  { %7569 = shalt.err (!%p7566_p2)
}
   0xa   :  { %s7570_s10 = scalar_lea.vmem %s36_s25, 6144  ;;  %p7575_p4 = scmp.lt.s32.totalorder %s36_s25, %s36_s25 }
   0xb   :  { %p7571_p3 = scmp.ne.s32.totalorder %s36_s25, %s7570_s10  ;;  %p7576_p5 = scmp.lt.s32.totalorder %s7570_s10, %s7570_s10 }
   0xd   :  { %p7577_p6 = por %p7576_p5, %p7575_p4 }
   0xf   :  { %p7578_p7 = pnand %p7577_p6, %p7571_p3 }
  0x11   :  { %7581 = shalt.err (!%p7578_p7)
}
  0x12   :  { %s7703_s11 = smov 64   ;;  %s7704_s12 = smov 4  }
  0x13   :  { %41 = dma.hbm_to_vmem [thread:$0]  %s9496_s2, 6144, %s36_s25, [#allocation10], %s7703_s11, %s7703_s11, %s7704_s12  }
  0x14   :  { %s7705_s15 = smov [#allocation12]   ;;  %s7706_s17 = smov [#allocation6]  }
  0x15   :  { %s58_s16 = sshll.u32 %s7705_s15, 4  ;;  %s23_s18 = sshll.u32 %s7706_s17, 4  ;;  %s59_s16 = int_to_ptr.vmem [resolvable:$true] %s58_s16  ;;  %s24_s18 = int_to_ptr.vmem [resolvable:$true] %s23_s18 }
  0x16   :  { %s7582_s21 = scalar_lea.hbm %s9499_s5, 16 }
  0x17   :  { %p7583_p8 = scmp.ne.s32.totalorder %s9499_s5, %s7582_s21  ;;  %p7586_p9 = scmp.lt.u32.totalorder %s7582_s21, %s9499_s5 }
  0x19   :  { %p7588_p10 = pnand %p7586_p9, %p7583_p8 }
  0x1b   :  { %7591 = shalt.err (!%p7588_p10)
}
  0x1c   :  { %s7592_s2 = scalar_lea.vmem %s59_s16, 16  ;;  %s7596_s25 = scalar_lea.vmem %s59_s16, 32 }
  0x1d   :  { %p7593_p11 = scmp.ne.s32.totalorder %s59_s16, %s7592_s2  ;;  %p7597_p12 = scmp.lt.s32.totalorder %s59_s16, %s59_s16 }
  0x1e   :  { %p7598_p13 = scmp.lt.s32.totalorder %s7596_s25, %s7592_s2 }
  0x20   :  { %p7599_p0 = por %p7598_p13, %p7597_p12 }
  0x22   :  { %p7600_p1 = pnand %p7599_p0, %p7593_p11 }
  0x24   :  { %7603 = shalt.err (!%p7600_p1)
}
  0x25   :  { %61 = dma.hbm_to_vmem [thread:$0]  %s9499_s5, 16, %s59_s16, [#allocation13]  }
  0x26   :  { %s7604_s8 = scalar_lea.hbm %s9495_s1, 384 }
  0x27   :  { %p7605_p2 = scmp.ne.s32.totalorder %s9495_s1, %s7604_s8  ;;  %p7608_p3 = scmp.lt.u32.totalorder %s7604_s8, %s9495_s1 }
  0x29   :  { %p7610_p4 = pnand %p7608_p3, %p7605_p2 }
  0x2b   :  { %7613 = shalt.err (!%p7610_p4)
}
  0x2c   :  { %s7614_s15 = scalar_lea.vmem %s24_s18, 384  ;;  %p7619_p6 = scmp.lt.s32.totalorder %s24_s18, %s24_s18 }
  0x2d   :  { %p7615_p5 = scmp.ne.s32.totalorder %s24_s18, %s7614_s15  ;;  %p7620_p7 = scmp.lt.s32.totalorder %s7614_s15, %s7614_s15 }
  0x2f   :  { %p7621_p8 = por %p7620_p7, %p7619_p6 }
  0x31   :  { %p7622_p9 = pnand %p7621_p8, %p7615_p5 }
  0x33   :  { %7625 = shalt.err (!%p7622_p9)
}
  0x34   :  { %s7707_s5 = smov 128   ;;  %s7708_s16 = smov 8  }
  0x35   :  { %29 = dma.hbm_to_vmem [thread:$0]  %s9495_s1, 384, %s24_s18, [#allocation7], %s7707_s5, %s7707_s5, %s7708_s16  }
  0x36   :  { %s7709_s20 = smov [#allocation11]   ;;  %s7710_s22 = smov [#allocation14]  }
  0x37   :  { %s48_s21 = sshll.u32 %s7709_s20, 4  ;;  %s68_s23 = sshll.u32 %s7710_s22, 4  ;;  %s49_s21 = int_to_ptr.vmem [resolvable:$true] %s48_s21  ;;  %s69_s23 = int_to_ptr.vmem [resolvable:$true] %s68_s23 }
  0x38   :  { %s7626_s2 = scalar_lea.hbm %s9498_s4, 32 }
  0x39   :  { %p7627_p10 = scmp.ne.s32.totalorder %s9498_s4, %s7626_s2  ;;  %p7630_p11 = scmp.lt.u32.totalorder %s7626_s2, %s9498_s4 }
  0x3b   :  { %p7632_p12 = pnand %p7630_p11, %p7627_p10 }
  0x3d   :  { %7635 = shalt.err (!%p7632_p12)
}
  0x3e   :  { %s7636_s1 = scalar_lea.vmem %s49_s21, 32  ;;  %p7641_p0 = scmp.lt.s32.totalorder %s49_s21, %s49_s21 }
  0x3f   :  { %p7637_p13 = scmp.ne.s32.totalorder %s49_s21, %s7636_s1  ;;  %p7642_p1 = scmp.lt.s32.totalorder %s7636_s1, %s7636_s1 }
  0x41   :  { %p7643_p2 = por %p7642_p1, %p7641_p0 }
  0x43   :  { %p7644_p3 = pnand %p7643_p2, %p7637_p13 }
  0x45   :  { %7647 = shalt.err (!%p7644_p3)
}
  0x46   :  { %51 = dma.hbm_to_vmem [thread:$0]  %s9498_s4, 32, %s49_s21, [#allocation10]  }
  0x47   :  { %s7648_s10 = scalar_lea.hbm %s9500_s6, 32 }
  0x48   :  { %p7649_p4 = scmp.ne.s32.totalorder %s9500_s6, %s7648_s10  ;;  %p7652_p5 = scmp.lt.u32.totalorder %s7648_s10, %s9500_s6 }
  0x4a   :  { %p7654_p6 = pnand %p7652_p5, %p7649_p4 }
  0x4c   :  { %7657 = shalt.err (!%p7654_p6)
}
  0x4d   :  { %s7658_s17 = scalar_lea.vmem %s69_s23, 32  ;;  %p7663_p8 = scmp.lt.s32.totalorder %s69_s23, %s69_s23 }
  0x4e   :  { %p7659_p7 = scmp.ne.s32.totalorder %s69_s23, %s7658_s17  ;;  %p7664_p9 = scmp.lt.s32.totalorder %s7658_s17, %s7658_s17 }
  0x50   :  { %p7665_p10 = por %p7664_p9, %p7663_p8 }
  0x52   :  { %p7666_p11 = pnand %p7665_p10, %p7659_p7 }
  0x54   :  { %7669 = shalt.err (!%p7666_p11)
}
  0x55   :  { %71 = dma.hbm_to_vmem [thread:$0]  %s9500_s6, 32, %s69_s23, [#allocation13]  }
  0x56   :  { %7692 = dma.done.wait [#allocation7], 384  }
  0x57   :  { %7693 = vsyncadd [#allocation7], 4294966912 }
  0x58   :  { %7694 = dma.done.wait [#allocation10], 6176  }
  0x59   :  { %7695 = vsyncadd [#allocation10], 4294961120 }
  0x5a   :  { %7696 = dma.done.wait [#allocation13], 48  }
  0x5b   :  { %7697 = vsyncadd [#allocation13], 4294967248  ;;  %s92_s20 = sld [smem:[#allocation0]]   ;;  %s7711_s21 = smov 8192   ;;  %v9502_v0 = vmov 0   ;;  %vm262_vm0 = vcmask 1043456  }
  0x5c   :  { %104 = sst [smem:[#allocation17]] %s7711_s21  ;;  %301 = vmatprep.mubr.bf16.mxu0 %v9502_v0  ;;  %s7713_s22 = smov [#allocation4]   ;;  %vm240_vm1 = vcmask 64512   ;;  %vm774_vm2 = vcmask 1040384   ;;  %vm990_vm3 = vsmask.f32 7424 }
  0x5d   :  { %106 = sst [smem:[#allocation17 + $0x1]] %s7711_s21  ;;  %s100_s24 = sshll.u32 %s7713_s22, 4  ;;  %vm1538_vm4 = vcmask 1046528   ;;  %vm2753_vm5 = vsmask.f32 4352  ;;  %vm3090_vm6 = vcmask 1044480   ;;  %s101_s24 = int_to_ptr.vmem [resolvable:$true] %s100_s24 }
  0x5e   :  { %108 = sst [smem:[#allocation17 + $0x2]] %s7703_s11  ;;  %s7714_s6 = smov 2   ;;  %vm175_vm7 = vcmask 261120   ;;  %vm1952_vm8 = vcmask 254976  }
  0x5f   :  { %110 = sst [smem:[#allocation17 + $0x3]] %s7703_s11  ;;  %s7715_s26 = smov 4096  }
  0x60   :  { %112 = sst [smem:[#allocation17 + $0x4]] %s7707_s5  ;;  %s7716_s25 = smov [#allocation5]  }
  0x61   :  { %114 = sst [smem:[#allocation17 + $0x5]] %s7714_s6  ;;  %s6814_s23 = sshll.u32 %s92_s20, 26 }
  0x62   :  { %116 = sst [smem:[#allocation17 + $0x6]] %s7715_s26  ;;  %s6815_s2 = sadd.s32 134217728, %s6814_s23 }
  0x63   :  { %118 = sst [smem:[#allocation17 + $0x7]] %s7703_s11  ;;  %s7717_s27 = smov [#allocation16]  }
  0x64   :  { %120 = sst [smem:[#allocation17 + $0x8]] %s7704_s12 }
  0x65   :  { %122 = dma.general %s9497_s3, 65536, %s101_s24, %s7716_s25, %s7717_s27, [#allocation17], %s6815_s2, 0  }
  0x66   :  { %v234_v1 = vld [vmem:[#allocation6 + $0x8] sm:$0xff]  ;;  %v212_v6 = vld [vmem:[#allocation6] sm:$0xff]  ;;  %v524_v12 = vld [vmem:[#allocation6 + $0x10] sm:$0xff] }
  0x67   :  { %v213_v2 = vld [vmem:[%s9494_s0 + $0x1] sm:$0xff]  ;;  %v214_v3 = vld [vmem:[%s9494_s0 + $0x9] sm:$0xff]  ;;  %v7843_v4 = vcombine.high %v234_v1, %v234_v1  ;;  %v6816_v5 = vcombine.low %v234_v1, %v234_v1  ;;  %v7845_v7 = vcombine.high %v212_v6, %v212_v6  ;;  %v6826_v8 = vcombine.low %v212_v6, %v212_v6  ;;  %v215_v14 = vld [vmem:[%s9494_s0 + $0x11] sm:$0xff] }
  0x68   :  { %v226_v10 = vpack.c.bf16 %v214_v3, %v213_v2  ;;  %v6837_v13 = vcombine.high %v524_v12, %v524_v12  ;;  %v216_v15 = vld [vmem:[%s9494_s0 + $0x19] sm:$0xff]  ;;  %v217_v17 = vld [vmem:[%s9494_s0 + $0x21] sm:$0xff]  ;;  %v218_v18 = vld [vmem:[%s9494_s0 + $0x29] sm:$0xff]  ;;  %v6836_v23 = vcombine.low %v524_v12, %v524_v12 }
  0x69   :  { %6818 = vmatprep.subr.msk.bf16.mxu0 %vm262_vm0, %v7843_v4  ;;  %v7850_v9 = vsel %vm262_vm0, %v6816_v5, 0  ;;  %v7856_v11 = vsel %vm262_vm0, %v6826_v8, 0  ;;  %v227_v16 = vpack.c.bf16 %v216_v15, %v215_v14  ;;  %v228_v19 = vpack.c.bf16 %v218_v18, %v217_v17  ;;  %v219_v20 = vld [vmem:[%s9494_s0 + $0x31] sm:$0xff]  ;;  %v220_v21 = vld [vmem:[%s9494_s0 + $0x39] sm:$0xff]  ;;  %v221_v24 = vld [vmem:[%s9494_s0 + $0x41] sm:$0xff] }
  0x6a   :  { %270 = vmatpush1.bf16.msra.mxu0 %v7850_v9  ;;  %v229_v22 = vpack.c.bf16 %v220_v21, %v219_v20  ;;  %v222_v25 = vld [vmem:[%s9494_s0 + $0x49] sm:$0xff]  ;;  %v552_v26 = vsel %vm262_vm0, %v6836_v23, 0  ;;  %v223_v28 = vld [vmem:[%s9494_s0 + $0x51] sm:$0xff]  ;;  %v224_v29 = vld [vmem:[%s9494_s0 + $0x59] sm:$0xff]  ;;  %v7718_v20 = vmov 0.0  }
  0x6b   :  { %6828 = vmatprep.subr.msk.bf16.mxu0 %vm262_vm0, %v7845_v7  ;;  %v230_v27 = vpack.c.bf16 %v222_v25, %v221_v24  ;;  %v231_v30 = vpack.c.bf16 %v224_v29, %v223_v28  ;;  %v225_v31 = vld [vmem:[%s9494_s0 + $0x61] sm:$0xf]  ;;  %v193_v34 = vld [vmem:[%s9494_s0 + $0x8] sm:$0xff]  ;;  %v194_v36 = vld [vmem:[%s9494_s0 + $0x10] sm:$0xff]  ;;  %123 = vst [vmem:[#allocation2] sm:$0xff] %v7718_v20 }
  0x6c   :  { %v232_v32 = vpack.c.bf16 %v225_v31, %v225_v31  ;;  %v192_v33 = vld [vmem:[%s9494_s0] sm:$0xff]  ;;  %v195_v37 = vld [vmem:[%s9494_s0 + $0x18] sm:$0xff]  ;;  %v197_v40 = vld [vmem:[%s9494_s0 + $0x28] sm:$0xff]  ;;  %124 = vst [vmem:[#allocation2 + $0x8] sm:$0xff] %v7718_v20 }
  0x6d   :  { %6819 = vmatmul.mubr.msk.bf16.vlgmr.msra.gmra.mrb[0].mxu0 %vm240_vm1, %v226_v10  ;;  %v205_v35 = vpack.c.bf16 %v193_v34, %v192_v33  ;;  %v206_v38 = vpack.c.bf16 %v195_v37, %v194_v36  ;;  %v196_v39 = vld [vmem:[%s9494_s0 + $0x20] sm:$0xff]  ;;  %v198_v42 = vld [vmem:[%s9494_s0 + $0x30] sm:$0xff]  ;;  %v199_v43 = vld [vmem:[%s9494_s0 + $0x38] sm:$0xff]  ;;  %147 = vst [vmem:[#allocation2 + $0xc0] sm:$0xff] %v7718_v20  ;;  %v686_v36 = vlaneseq }
  0x6e   :  { %403 = vmatpush1.bf16.msra.mxu0 %v7856_v11  ;;  %311 = vmatprep.mubr.bf16.mxu0 %v9502_v0  ;;  %v207_v41 = vpack.c.bf16 %v197_v40, %v196_v39  ;;  %v208_v44 = vpack.c.bf16 %v199_v43, %v198_v42  ;;  %v200_v45 = vld [vmem:[%s9494_s0 + $0x40] sm:$0xff]  ;;  %v201_v46 = vld [vmem:[%s9494_s0 + $0x48] sm:$0xff]  ;;  %v202_v48 = vld [vmem:[%s9494_s0 + $0x50] sm:$0xff]  ;;  %148 = vst [vmem:[#allocation2 + $0xc8] sm:$0xff] %v7718_v20 }
  0x6f   :  { %6838 = vmatprep.subr.msk.bf16.mxu0 %vm262_vm0, %v6837_v13  ;;  %v209_v47 = vpack.c.bf16 %v201_v46, %v200_v45  ;;  %v203_v49 = vld [vmem:[%s9494_s0 + $0x58] sm:$0xff]  ;;  %v204_v51 = vld [vmem:[%s9494_s0 + $0x60] sm:$0xf]  ;;  %v504_v54 = vld [vmem:[%s9494_s0 + $0xa] sm:$0xff]  ;;  %173 = vst [vmem:[#allocation2 + $0x190] sm:$0xf] %v7718_v20 }
  0x70   :  { %v210_v50 = vpack.c.bf16 %v203_v49, %v202_v48  ;;  %v211_v52 = vpack.c.bf16 %v204_v51, %v204_v51  ;;  %v503_v53 = vld [vmem:[%s9494_s0 + $0x2] sm:$0xff]  ;;  %v505_v56 = vld [vmem:[%s9494_s0 + $0x12] sm:$0xff]  ;;  %v506_v57 = vld [vmem:[%s9494_s0 + $0x1a] sm:$0xff]  ;;  %174 = vst [vmem:[#allocation2 + $0x198] sm:$0xf] %v7718_v20  ;;  %v8015_v37 = vshrl.u32 %v686_v36, 7 }
  0x71   :  { %v516_v55 = vpack.c.bf16 %v504_v54, %v503_v53  ;;  %v517_v58 = vpack.c.bf16 %v506_v57, %v505_v56  ;;  %v507_v59 = vld [vmem:[%s9494_s0 + $0x22] sm:$0xff]  ;;  %v508_v60 = vld [vmem:[%s9494_s0 + $0x2a] sm:$0xff]  ;;  %v509_v62 = vld [vmem:[%s9494_s0 + $0x32] sm:$0xff] }
  0x72   :  { %v518_v61 = vpack.c.bf16 %v508_v60, %v507_v59  ;;  %v510_v63 = vld [vmem:[%s9494_s0 + $0x3a] sm:$0xff]  ;;  %v511_v6 = vld [vmem:[%s9494_s0 + $0x42] sm:$0xff]  ;;  %v512_v8 = vld [vmem:[%s9494_s0 + $0x4a] sm:$0xff]  ;;  %9515 = vst [vmem:[#allocation23_spill] sm:$0xff] %v8015_v37 }
  0x73   :  { %v519_v1 = vpack.c.bf16 %v510_v63, %v509_v62  ;;  %v7462_v2 = vld [vmem:[#allocation9 + $0xc0] sm:$0xff]   ;;  %v7464_v5 = vld [vmem:[#allocation9 + $0xc8] sm:$0xff]   ;;  %v520_v12 = vpack.c.bf16 %v512_v8, %v511_v6  ;;  %v7466_v18 = vld [vmem:[#allocation9 + $0xd0] sm:$0xff]  }
  0x74   :  { %v7463_v3 = vld [vmem:[#allocation9 + $0x80] sm:$0xff]   ;;  %v7465_v10 = vld [vmem:[#allocation9 + $0x88] sm:$0xff]   ;;  %7323 = vmatprep.subr.bf16.mxu1 %v7462_v2  ;;  %v7468_v21 = vld [vmem:[#allocation9 + $0xd8] sm:$0xff]  }
  0x75   :  { %6820 = vmatmul.mubr.msk.bf16.gmra.mrb[4].mxu0 %vm240_vm1, %v227_v16  ;;  %7331 = vmatpush3.bf16.msra.mxu1 %v7463_v3  ;;  %v513_v13 = vld [vmem:[%s9494_s0 + $0x52] sm:$0xff]  ;;  %v514_v14 = vld [vmem:[%s9494_s0 + $0x5a] sm:$0xff]  ;;  %v515_v16 = vld [vmem:[%s9494_s0 + $0x62] sm:$0xf] }
  0x76   :  { %321 = vmatprep.mubr.bf16.mxu0 %v9502_v0  ;;  %7324 = vmatprep.subr.bf16.mxu1 %v7464_v5  ;;  %v521_v15 = vpack.c.bf16 %v514_v14, %v513_v13  ;;  %v522_v17 = vpack.c.bf16 %v515_v16, %v515_v16  ;;  %v7470_v23 = vld [vmem:[#allocation9 + $0xe0] sm:$0xff]   ;;  %v7472_v25 = vld [vmem:[#allocation9 + $0xe8] sm:$0xff]   ;;  %v7475_v28 = vld [vmem:[#allocation9 + $0xb0] sm:$0xff]  }
  0x77   :  { %v7471_v24 = vld [vmem:[#allocation9 + $0xa0] sm:$0xff]   ;;  %v7476_v29 = vld [vmem:[#allocation9 + $0xf8] sm:$0xff]  }
  0x78   :  { %v7478_v31 = vld [vmem:[#allocation9 + $0x40] sm:$0xff]  }
  0x79   :  { %7332 = vmatpush3.bf16.msra.mxu1 %v7465_v10 }
  0x7a   :  { %7325 = vmatprep.subr.bf16.mxu1 %v7466_v18 }
  0x7d   :  { %6821 = vmatmul.mubr.msk.bf16.gmra.mrb[8].mxu0 %vm240_vm1, %v228_v19  ;;  %v7467_v19 = vld [vmem:[#allocation9 + $0x90] sm:$0xff]  }
  0x7e   :  { %331 = vmatprep.mubr.bf16.mxu0 %v9502_v0  ;;  %7333 = vmatpush3.bf16.msra.mxu1 %v7467_v19 }
  0x7f   :  { %7326 = vmatprep.subr.bf16.mxu1 %v7468_v21 }
  0x85   :  { %6822 = vmatmul.mubr.msk.bf16.gmra.mrb[12].mxu0 %vm240_vm1, %v229_v22  ;;  %v7469_v22 = vld [vmem:[#allocation9 + $0x98] sm:$0xff]  }
  0x86   :  { %341 = vmatprep.mubr.bf16.mxu0 %v9502_v0  ;;  %7334 = vmatpush3.bf16.msra.mxu1 %v7469_v22 }
  0x87   :  { %7327 = vmatprep.subr.bf16.mxu1 %v7470_v23 }
  0x8a   :  { %7335 = vmatpush3.bf16.msra.mxu1 %v7471_v24 }
  0x8b   :  { %7328 = vmatprep.subr.bf16.mxu1 %v7472_v25 }
  0x8d   :  { %6823 = vmatmul.mubr.msk.bf16.gmra.mrb[16].mxu0 %vm240_vm1, %v230_v27  ;;  %v7474_v27 = vld [vmem:[#allocation9 + $0xf0] sm:$0xff]  }
  0x8e   :  { %351 = vmatprep.mubr.bf16.mxu0 %v9502_v0 }
  0x95   :  { %6824 = vmatmul.mubr.msk.bf16.gmra.mrb[20].mxu0 %vm240_vm1, %v231_v30  ;;  %v7477_v30 = vld [vmem:[#allocation9 + $0xb8] sm:$0xff]  }
  0x96   :  { %361 = vmatprep.mubr.bf16.mxu0 %v9502_v0 }
  0x9d   :  { %6825 = vmatmul.mubr.msk.bf16.gmra.mrb[24].mxu0 %vm240_vm1, %v232_v32 }
  0x9e   :  { %434 = vmatprep.mubr.bf16.mxu0 %v9502_v0 }
  0xa5   :  { %6829 = vmatmul.mubr.msk.bf16.vlgmr.msra.gmra.mrb[0].mxu0 %vm240_vm1, %v205_v35 }
  0xa6   :  { %558 = vmatpush1.bf16.msra.mxu0 %v552_v26  ;;  %444 = vmatprep.mubr.bf16.mxu0 %v9502_v0  ;;  %v7473_v26 = vld [vmem:[#allocation9 + $0xa8] sm:$0xff]  }
  0xa7   :  { %6975 = vmatprep.subr.bf16.mxu0 %v7462_v2  ;;  %7336 = vmatpush3.bf16.msra.mxu1 %v7473_v26 }
  0xa8   :  { %7329 = vmatprep.subr.bf16.mxu1 %v7474_v27 }
  0xab   :  { %7337 = vmatpush3.bf16.msra.mxu1 %v7475_v28 }
  0xac   :  { %7330 = vmatprep.subr.bf16.mxu1 %v7476_v29 }
  0xad   :  { %6830 = vmatmul.mubr.msk.bf16.gmra.mrb[4].mxu0 %vm240_vm1, %v206_v38 }
  0xae   :  { %454 = vmatprep.mubr.bf16.mxu0 %v9502_v0 }
  0xaf   :  { %7338 = vmatpush3.bf16.msra.mxu1 %v7477_v30 }
  0xb0   :  { %7033 = vmatprep.subr.bf16.mxu1 %v7478_v31 }
  0xb5   :  { %6831 = vmatmul.mubr.msk.bf16.gmra.mrb[8].mxu0 %vm240_vm1, %v207_v41  ;;  %v8020_v41 = vsub.s32 0, %v8015_v37 }
  0xb6   :  { %464 = vmatprep.mubr.bf16.mxu0 %v9502_v0 }
  0xb7   :  { %9516 = vst [vmem:[#allocation24_spill] sm:$0xff] %v8020_v41 }
  0xbd   :  { %6832 = vmatmul.mubr.msk.bf16.gmra.mrb[12].mxu0 %vm240_vm1, %v208_v44  ;;  %v8025_v44 = vsub.s32 1, %v8015_v37 }
  0xbe   :  { %474 = vmatprep.mubr.bf16.mxu0 %v9502_v0 }
  0xbf   :  { %9517 = vst [vmem:[#allocation25_spill] sm:$0xff] %v8025_v44 }
  0xc5   :  { %6833 = vmatmul.mubr.msk.bf16.gmra.mrb[16].mxu0 %vm240_vm1, %v209_v47 }
  0xc6   :  { %484 = vmatprep.mubr.bf16.mxu0 %v9502_v0 }
  0xcd   :  { %6834 = vmatmul.mubr.msk.bf16.gmra.mrb[20].mxu0 %vm240_vm1, %v210_v50 }
  0xce   :  { %494 = vmatprep.mubr.bf16.mxu0 %v9502_v0 }
  0xd5   :  { %6835 = vmatmul.mubr.msk.bf16.gmra.mrb[28].mxu0 %vm240_vm1, %v211_v52 }
  0xd6   :  { %589 = vmatprep.mubr.bf16.mxu0 %v9502_v0 }
  0xdd   :  { %6839 = vmatmul.mubr.msk.bf16.vlgmr.msra.gmra.mrb[0].mxu0 %vm240_vm1, %v516_v55 }
  0xde   :  { %599 = vmatprep.mubr.bf16.mxu0 %v9502_v0  ;;  %6976 = vmatpush3.bf16.msra.mxu0 %v7463_v3 }
  0xdf   :  { %6977 = vmatprep.subr.bf16.mxu0 %v7464_v5 }
  0xe2   :  { %6978 = vmatpush3.bf16.msra.mxu0 %v7465_v10 }
  0xe3   :  { %6979 = vmatprep.subr.bf16.mxu0 %v7466_v18 }
  0xe5   :  { %6840 = vmatmul.mubr.msk.bf16.gmra.mrb[4].mxu0 %vm240_vm1, %v517_v58 }
  0xe6   :  { %609 = vmatprep.mubr.bf16.mxu0 %v9502_v0  ;;  %6980 = vmatpush3.bf16.msra.mxu0 %v7467_v19 }
  0xe7   :  { %6981 = vmatprep.subr.bf16.mxu0 %v7468_v21 }
  0xea   :  { %6982 = vmatpush3.bf16.msra.mxu0 %v7469_v22 }
  0xeb   :  { %6983 = vmatprep.subr.bf16.mxu0 %v7470_v23 }
  0xed   :  { %6841 = vmatmul.mubr.msk.bf16.gmra.mrb[8].mxu0 %vm240_vm1, %v518_v61 }
  0xee   :  { %619 = vmatprep.mubr.bf16.mxu0 %v9502_v0  ;;  %6984 = vmatpush3.bf16.msra.mxu0 %v7471_v24 }
  0xef   :  { %6985 = vmatprep.subr.bf16.mxu0 %v7472_v25 }
  0xf2   :  { %6986 = vmatpush3.bf16.msra.mxu0 %v7473_v26 }
  0xf3   :  { %6987 = vmatprep.subr.bf16.mxu0 %v7474_v27 }
  0xf5   :  { %6842 = vmatmul.mubr.msk.bf16.gmra.mrb[12].mxu0 %vm240_vm1, %v519_v1 }
  0xf6   :  { %629 = vmatprep.mubr.bf16.mxu0 %v9502_v0  ;;  %6988 = vmatpush3.bf16.msra.mxu0 %v7475_v28 }
  0xf7   :  { %6989 = vmatprep.subr.bf16.mxu0 %v7476_v29 }
  0xfa   :  { %6990 = vmatpush3.bf16.msra.mxu0 %v7477_v30 }
  0xfb   :  { %6897 = vmatprep.subr.msk.bf16.mxu0 %vm262_vm0, %v7843_v4  ;;  %v684_v4 = vld [vmem:[#allocation11] sm:$0x3] }
  0xfc   :  { %v8028_v46 = vrot.slane %v684_v4, %v8020_v41  ;;  %v8031_v47 = vrot.slane %v684_v4, %v8025_v44 }
  0xfd   :  { %6843 = vmatmul.mubr.msk.bf16.gmra.mrb[16].mxu0 %vm240_vm1, %v520_v12 }
  0xfe   :  { %639 = vmatprep.mubr.bf16.mxu0 %v9502_v0 }
 0x105   :  { %6844 = vmatmul.mubr.msk.bf16.gmra.mrb[20].mxu0 %vm240_vm1, %v521_v15 }
 0x106   :  { %649 = vmatprep.mubr.bf16.mxu0 %v9502_v0 }
 0x10d   :  { %6845 = vmatmul.mubr.msk.bf16.gmra.mrb[32].mxu0 %vm240_vm1, %v522_v17 }
 0x170   :  { %v363_v32 = vpop.f32.mrb[24].mxu0 }
 0x171   :  { %v365_v33 = vpop.f32.mrb[25].mxu0 }
 0x172   :  { %v367_v34 = vpop.f32.mrb[26].mxu0 }
 0x173   :  { %v368_v35 = vpop.f32.mrb[27].mxu0 }
 0x1a8   :  { %v496_v38 = vpop.f32.mrb[28].mxu0 }
 0x1a9   :  { %v8017_v39 = vadd.f32 %v496_v38, %v363_v32  ;;  %v498_v40 = vpop.f32.mrb[29].mxu0 }
 0x1aa   :  { %v8022_v42 = vadd.f32 %v498_v40, %v365_v33  ;;  %v500_v43 = vpop.f32.mrb[30].mxu0 }
 0x1ab   :  { %v501_v45 = vpop.f32.mrb[31].mxu0 }
 0x1b0   :  { %v591_v48 = vpop.f32.mrb[0].mxu0 }
 0x1b1   :  { %v696_v49 = vadd.f32 %v8028_v46, %v591_v48  ;;  %v593_v50 = vpop.f32.mrb[1].mxu0 }
 0x1b2   :  { %v697_v51 = vadd.f32 %v8031_v47, %v593_v50  ;;  %v595_v52 = vpop.f32.mrb[2].mxu0 }
 0x1b3   :  { %v722_v53 = vmax.f32 %v696_v49, 0.0  ;;  %v698_v54 = vadd.f32 %v8028_v46, %v595_v52  ;;  %v597_v55 = vpop.f32.mrb[3].mxu0 }
 0x1b4   :  { %v723_v56 = vmax.f32 %v697_v51, 0.0  ;;  %v699_v57 = vadd.f32 %v8031_v47, %v597_v55 }
 0x1b5   :  { %v775_v58 = vrot.slane %v722_v53, 7  ;;  %v724_v59 = vmax.f32 %v698_v54, 0.0 }
 0x1b6   :  { %v776_v60 = vrot.slane %v723_v56, 7  ;;  %v725_v61 = vmax.f32 %v699_v57, 0.0 }
 0x1b7   :  { %851 = vst [vmem:[#allocation2] sm:$0xfe] %v775_v58  ;;  %v777_v62 = vrot.slane %v724_v59, 7 }
 0x1b8   :  { %852 = vst [vmem:[#allocation2 + $0x8] sm:$0xfe] %v776_v60  ;;  %v779_v63 = vrot.slane %v725_v61, 7  ;;  %v601_v1 = vpop.f32.mrb[4].mxu0 }
 0x1b9   :  { %v8038_v2 = vsel %vm774_vm2, %v775_v58, %v777_v62  ;;  %v700_v3 = vadd.f32 %v8028_v46, %v601_v1  ;;  %v603_v5 = vpop.f32.mrb[5].mxu0 }
 0x1ba   :  { %v8042_v6 = vsel %vm774_vm2, %v776_v60, %v779_v63  ;;  %v701_v8 = vadd.f32 %v8031_v47, %v603_v5  ;;  %v605_v10 = vpop.f32.mrb[6].mxu0 }
 0x1bb   :  { %v726_v12 = vmax.f32 %v700_v3, 0.0  ;;  %v702_v13 = vadd.f32 %v8028_v46, %v605_v10  ;;  %v607_v14 = vpop.f32.mrb[7].mxu0 }
 0x1bc   :  { %v727_v15 = vmax.f32 %v701_v8, 0.0  ;;  %v703_v16 = vadd.f32 %v8031_v47, %v607_v14 }
 0x1bd   :  { %v781_v17 = vrot.slane %v726_v12, 7  ;;  %v728_v18 = vmax.f32 %v702_v13, 0.0 }
 0x1be   :  { %v783_v19 = vrot.slane %v727_v15, 7  ;;  %v729_v20 = vmax.f32 %v703_v16, 0.0  ;;  %v949_v21 = vld [vmem:[#allocation2] sm:$0xfe] }
 0x1bf   :  { %v782_v22 = vsel %vm774_vm2, %v777_v62, %v781_v17  ;;  %v785_v23 = vrot.slane %v728_v18, 7  ;;  %v950_v24 = vld [vmem:[#allocation2 + $0x8] sm:$0xfe]  ;;  %v953_v25 = vpack.c.bf16 %v8038_v2, %v949_v21 }
 0x1c0   :  { %v784_v26 = vsel %vm774_vm2, %v779_v63, %v783_v19  ;;  %v787_v27 = vrot.slane %v729_v20, 7  ;;  %v611_v28 = vpop.f32.mrb[8].mxu0  ;;  %v954_v29 = vpack.c.bf16 %v8042_v6, %v950_v24  ;;  %v1976_v18 = vld [vmem:[%s9494_s0 + $0x6f] sm:$0xff] }
 0x1c1   :  { %v786_v30 = vsel %vm774_vm2, %v781_v17, %v785_v23  ;;  %v704_v31 = vadd.f32 %v8028_v46, %v611_v28  ;;  %v613_v32 = vpop.f32.mrb[9].mxu0  ;;  %v992_v33 = vshrl.u32 %v953_v25, 16  ;;  %v994_v34 = vshll.u32 %v953_v25, 16  ;;  %v1975_v17 = vld [vmem:[%s9494_s0 + $0x67] sm:$0xff] }
 0x1c2   :  { %v788_v35 = vsel %vm774_vm2, %v783_v19, %v787_v27  ;;  %v705_v36 = vadd.f32 %v8031_v47, %v613_v32  ;;  %v615_v38 = vpop.f32.mrb[10].mxu0  ;;  %v1004_v40 = vshrl.u32 %v954_v29, 16  ;;  %v1006_v43 = vshll.u32 %v954_v29, 16 }
 0x1c3   :  { %v730_v4 = vmax.f32 %v704_v31, 0.0  ;;  %v706_v45 = vadd.f32 %v8028_v46, %v615_v38  ;;  %v617_v48 = vpop.f32.mrb[11].mxu0  ;;  %v8056_v49 = vpack.c.bf16 %v788_v35, %v784_v26  ;;  %v8058_v50 = vpack.c.bf16 %v786_v30, %v782_v22 }
 0x1c4   :  { %v731_v51 = vmax.f32 %v705_v36, 0.0  ;;  %v707_v52 = vadd.f32 %v8031_v47, %v617_v48  ;;  %v1008_v53 = vrot.slane %v1006_v43, 1  ;;  %v996_v54 = vrot.slane %v994_v34, 1 }
 0x1c5   :  { %v789_v55 = vrot.slane %v730_v4, 7  ;;  %v732_v56 = vmax.f32 %v706_v45, 0.0  ;;  %v1011_v57 = vshll.u32 %v8056_v49, 16  ;;  %v999_v58 = vshll.u32 %v8058_v50, 16 }
 0x1c6   :  { %v791_v59 = vrot.slane %v731_v51, 7  ;;  %v733_v60 = vmax.f32 %v707_v52, 0.0  ;;  %v1009_v61 = vor.u32 %v1008_v53, %v1004_v40  ;;  %v997_v62 = vor.u32 %v996_v54, %v992_v33 }
 0x1c7   :  { %v790_v63 = vsel %vm774_vm2, %v785_v23, %v789_v55  ;;  %v793_v1 = vrot.slane %v732_v56, 7  ;;  %v1013_v3 = vrot.slane %v1011_v57, 1  ;;  %v1001_v5 = vrot.slane %v999_v58, 1  ;;  %v8103_v56 = vld [vmem:[%s9494_s0 + $0x7f] sm:$0xff] }
 0x1c8   :  { %v792_v8 = vsel %vm774_vm2, %v787_v27, %v791_v59  ;;  %v795_v10 = vrot.slane %v733_v60, 7  ;;  %v621_v12 = vpop.f32.mrb[12].mxu0  ;;  %v1988_v31 = vpack.c.bf16 %v1976_v18, %v1975_v17  ;;  %v1023_v34 = vshrl.u32 %v8056_v49, 16 }
 0x1c9   :  { %v794_v13 = vsel %vm774_vm2, %v789_v55, %v793_v1  ;;  %v708_v14 = vadd.f32 %v8028_v46, %v621_v12  ;;  %v623_v15 = vpop.f32.mrb[13].mxu0  ;;  %v1014_v16 = vsel %vm990_vm3, %v1009_v61, %v1013_v3  ;;  %v1002_v22 = vsel %vm990_vm3, %v997_v62, %v1001_v5  ;;  %v7479_v61 = vld [vmem:[#allocation9] sm:$0xff]  }
 0x1ca   :  { %v796_v19 = vsel %vm774_vm2, %v791_v59, %v795_v10  ;;  %v709_v20 = vadd.f32 %v8031_v47, %v623_v15  ;;  %v625_v21 = vpop.f32.mrb[14].mxu0  ;;  %1243 = vmatprep.mubr.bf16.mxu0 %v1014_v16  ;;  %v8077_v23 = vpack.c.bf16 %v794_v13, %v790_v63  ;;  %v1015_v40 = vshrl.u32 %v8058_v50, 16 }
 0x1cb   :  { %v734_v24 = vmax.f32 %v708_v14, 0.0  ;;  %v710_v25 = vadd.f32 %v8028_v46, %v625_v21  ;;  %v627_v26 = vpop.f32.mrb[15].mxu0  ;;  %1244 = vmatmul.mubr.bf16.vlgmr.msra.gmra.mrb[36].mxu0 %v1002_v22  ;;  %v8080_v27 = vpack.c.bf16 %v796_v19, %v792_v8  ;;  %v1025_v48 = vor.u32 %v1023_v34, %v1013_v3 }
 0x1cc   :  { %v735_v28 = vmax.f32 %v709_v20, 0.0  ;;  %v711_v29 = vadd.f32 %v8031_v47, %v627_v26  ;;  %2029 = vmatpush1.bf16.msra.mxu0 %v7850_v9  ;;  %2060 = vmatprep.mubr.bf16.mxu0 %v9502_v0  ;;  %v1019_v30 = vshll.u32 %v8077_v23, 16  ;;  %v8091_v9 = vld [vmem:[#allocation6 + $0x10] sm:$0xff]  ;;  %v1017_v55 = vor.u32 %v1015_v40, %v1001_v5  ;;  %v7481_v26 = vld [vmem:[#allocation9 + $0x8] sm:$0xff]  }
 0x1cd   :  { %v797_v32 = vrot.slane %v734_v24, 7  ;;  %v736_v33 = vmax.f32 %v710_v25, 0.0  ;;  %v1027_v35 = vshll.u32 %v8080_v27, 16  ;;  %6907 = vmatprep.subr.msk.bf16.mxu0 %vm262_vm0, %v7845_v7  ;;  %v8098_v7 = vld [vmem:[%s9494_s0 + $0x77] sm:$0xff]  ;;  %v6916_v62 = vcombine.high %v8091_v9, %v8091_v9 }
 0x1ce   :  { %v799_v36 = vrot.slane %v735_v28, 7  ;;  %v737_v38 = vmax.f32 %v711_v29, 0.0  ;;  %v1021_v43 = vrot.slane %v1019_v30, 1  ;;  %v1989_v16 = vpack.c.bf16 %v8103_v56, %v8098_v7 }
 0x1cf   :  { %v798_v4 = vsel %vm774_vm2, %v793_v1, %v797_v32  ;;  %v801_v45 = vrot.slane %v736_v33, 7  ;;  %v1029_v51 = vrot.slane %v1027_v35, 1  ;;  %v1031_v19 = vshrl.u32 %v8077_v23, 16 }
 0x1d0   :  { %v800_v52 = vsel %vm774_vm2, %v795_v10, %v799_v36  ;;  %v803_v53 = vrot.slane %v737_v38, 7  ;;  %v631_v54 = vpop.f32.mrb[16].mxu0  ;;  %v1022_v5 = vsel %vm990_vm3, %v1017_v55, %v1021_v43  ;;  %v7480_v10 = vld [vmem:[#allocation9 + $0x48] sm:$0xff]   ;;  %v1039_v24 = vshrl.u32 %v8080_v27, 16 }
 0x1d1   :  { %v802_v57 = vsel %vm774_vm2, %v797_v32, %v801_v45  ;;  %v712_v58 = vadd.f32 %v8028_v46, %v631_v54  ;;  %v633_v59 = vpop.f32.mrb[17].mxu0  ;;  %v1030_v60 = vsel %vm990_vm3, %v1025_v48, %v1029_v51  ;;  %v1033_v30 = vor.u32 %v1031_v19, %v1021_v43  ;;  %v8139_v43 = vld [vmem:[%s9494_s0 + $0x8f] sm:$0xff] }
 0x1d2   :  { %v804_v63 = vsel %vm774_vm2, %v799_v36, %v803_v53  ;;  %v713_v1 = vadd.f32 %v8031_v47, %v633_v59  ;;  %v635_v3 = vpop.f32.mrb[18].mxu0  ;;  %1251 = vmatprep.mubr.bf16.mxu1 %v1030_v60  ;;  %v8113_v8 = vpack.c.bf16 %v802_v57, %v798_v4  ;;  %v1041_v34 = vor.u32 %v1039_v24, %v1029_v51  ;;  %v8134_v4 = vld [vmem:[%s9494_s0 + $0x87] sm:$0xff] }
 0x1d3   :  { %v738_v12 = vmax.f32 %v712_v58, 0.0  ;;  %v714_v13 = vadd.f32 %v8028_v46, %v635_v3  ;;  %v637_v14 = vpop.f32.mrb[19].mxu0  ;;  %1252 = vmatmul.mubr.bf16.vlgmr.msra.gmra.mrb[0].mxu1 %v1022_v5  ;;  %6898 = vmatmul.mubr.msk.bf16.vlgmr.msra.gmra.mrb[40].mxu0 %vm240_vm1, %v1988_v31  ;;  %v8117_v15 = vpack.c.bf16 %v804_v63, %v800_v52  ;;  %v7482_v31 = vld [vmem:[#allocation9 + $0x50] sm:$0xff]   ;;  %v7484_v58 = vld [vmem:[#allocation9 + $0x58] sm:$0xff]   ;;  %v1990_v63 = vpack.c.bf16 %v8139_v43, %v8134_v4  ;;  %v7487_v4 = vld [vmem:[#allocation9 + $0x20] sm:$0xff]  }
 0x1d4   :  { %v739_v17 = vmax.f32 %v713_v1, 0.0  ;;  %v715_v18 = vadd.f32 %v8031_v47, %v637_v14  ;;  %2162 = vmatpush1.bf16.msra.mxu0 %v7856_v11  ;;  %2070 = vmatprep.mubr.bf16.mxu0 %v9502_v0  ;;  %v1035_v20 = vshll.u32 %v8113_v8, 16  ;;  %v7483_v54 = vld [vmem:[#allocation9 + $0x10] sm:$0xff]   ;;  %v1047_v5 = vshrl.u32 %v8113_v8, 16 }
 0x1d5   :  { %v805_v21 = vrot.slane %v738_v12, 7  ;;  %v740_v22 = vmax.f32 %v714_v13, 0.0  ;;  %v1043_v25 = vshll.u32 %v8117_v15, 16  ;;  %7034 = vmatpush3.bf16.msra.mxu1 %v7479_v61  ;;  %6917 = vmatprep.subr.msk.bf16.mxu0 %vm262_vm0, %v6916_v62  ;;  %v1055_v14 = vshrl.u32 %v8117_v15, 16 }
 0x1d6   :  { %v807_v28 = vrot.slane %v739_v17, 7  ;;  %v741_v29 = vmax.f32 %v715_v18, 0.0  ;;  %v1037_v11 = vrot.slane %v1035_v20, 1  ;;  %7035 = vmatprep.subr.bf16.mxu1 %v7480_v10  ;;  %v7485_v17 = vld [vmem:[#allocation9 + $0x18] sm:$0xff]  }
 0x1d7   :  { %v806_v32 = vsel %vm774_vm2, %v801_v45, %v805_v21  ;;  %v809_v33 = vrot.slane %v740_v22, 7  ;;  %v1045_v35 = vrot.slane %v1043_v25, 1  ;;  %v7486_v22 = vld [vmem:[#allocation9 + $0x60] sm:$0xff]  }
 0x1d8   :  { %v808_v36 = vsel %vm774_vm2, %v803_v53, %v807_v28  ;;  %v811_v38 = vrot.slane %v741_v29, 7  ;;  %v641_v40 = vpop.f32.mrb[20].mxu0  ;;  %v1038_v53 = vsel %vm990_vm3, %v1033_v30, %v1037_v11  ;;  %v1049_v20 = vor.u32 %v1047_v5, %v1037_v11 }
 0x1d9   :  { %v810_v48 = vsel %vm774_vm2, %v805_v21, %v809_v33  ;;  %v716_v45 = vadd.f32 %v8028_v46, %v641_v40  ;;  %v643_v51 = vpop.f32.mrb[21].mxu0  ;;  %v1046_v52 = vsel %vm990_vm3, %v1041_v34, %v1045_v35  ;;  %7036 = vmatpush3.bf16.msra.mxu1 %v7481_v26  ;;  %v1057_v26 = vor.u32 %v1055_v14, %v1045_v35  ;;  %v7491_v14 = vld [vmem:[#allocation9 + $0x30] sm:$0xff]  }
 0x1da   :  { %v812_v55 = vsel %vm774_vm2, %v807_v28, %v811_v38  ;;  %v717_v7 = vadd.f32 %v8031_v47, %v643_v51  ;;  %v645_v56 = vpop.f32.mrb[22].mxu0  ;;  %1259 = vmatprep.mubr.bf16.mxu1 %v1046_v52  ;;  %v8147_v57 = vpack.c.bf16 %v810_v48, %v806_v32  ;;  %7037 = vmatprep.subr.bf16.mxu1 %v7482_v31 }
 0x1db   :  { %v742_v59 = vmax.f32 %v716_v45, 0.0  ;;  %v718_v60 = vadd.f32 %v8028_v46, %v645_v56  ;;  %v647_v61 = vpop.f32.mrb[23].mxu0  ;;  %1260 = vmatmul.mubr.bf16.gmra.mrb[4].mxu1 %v1038_v53  ;;  %6899 = vmatmul.mubr.msk.bf16.gmra.mrb[44].mxu0 %vm240_vm1, %v1989_v16  ;;  %v8151_v62 = vpack.c.bf16 %v812_v55, %v808_v36  ;;  %v1981_v53 = vld [vmem:[%s9494_s0 + $0x97] sm:$0xff]  ;;  %v7489_v56 = vld [vmem:[#allocation9 + $0x28] sm:$0xff]  }
 0x1dc   :  { %v743_v1 = vmax.f32 %v717_v7, 0.0  ;;  %v719_v3 = vadd.f32 %v8031_v47, %v647_v61  ;;  %2080 = vmatprep.mubr.bf16.mxu0 %v9502_v0  ;;  %v1051_v10 = vshll.u32 %v8147_v57, 16 }
 0x1dd   :  { %v813_v12 = vrot.slane %v742_v59, 7  ;;  %v744_v13 = vmax.f32 %v718_v60, 0.0  ;;  %v1059_v16 = vshll.u32 %v8151_v62, 16  ;;  %7038 = vmatpush3.bf16.msra.mxu1 %v7483_v54  ;;  %v1071_v55 = vshrl.u32 %v8151_v62, 16  ;;  %v7490_v60 = vld [vmem:[#allocation9 + $0x70] sm:$0xff]  }
 0x1de   :  { %v815_v18 = vrot.slane %v743_v1, 7  ;;  %v745_v19 = vmax.f32 %v719_v3, 0.0  ;;  %v1053_v21 = vrot.slane %v1051_v10, 1  ;;  %7039 = vmatprep.subr.bf16.mxu1 %v7484_v58  ;;  %v1063_v58 = vshrl.u32 %v8147_v57, 16 }
 0x1df   :  { %v814_v24 = vsel %vm774_vm2, %v809_v33, %v813_v12  ;;  %v817_v25 = vrot.slane %v744_v13, 7  ;;  %v1061_v28 = vrot.slane %v1059_v16, 1 }
 0x1e0   :  { %v816_v29 = vsel %vm774_vm2, %v811_v38, %v815_v18  ;;  %v819_v30 = vrot.slane %v745_v19, 7  ;;  %v651_v31 = vpop.f32.mrb[32].mxu0  ;;  %v1054_v11 = vsel %vm990_vm3, %v1049_v20, %v1053_v21  ;;  %v7488_v38 = vld [vmem:[#allocation9 + $0x68] sm:$0xff]   ;;  %v1065_v10 = vor.u32 %v1063_v58, %v1053_v21  ;;  %v1984_v20 = vld [vmem:[%s9494_s0 + $0xaf] sm:$0xff] }
 0x1e1   :  { %v818_v32 = vsel %vm774_vm2, %v813_v12, %v817_v25  ;;  %v682_v34 = vadd.f32 %v651_v31, %v8017_v39  ;;  %v653_v36 = vpop.f32.mrb[33].mxu0  ;;  %v1062_v40 = vsel %vm990_vm3, %v1057_v26, %v1061_v28  ;;  %7040 = vmatpush3.bf16.msra.mxu1 %v7485_v17  ;;  %v1983_v19 = vld [vmem:[%s9494_s0 + $0xa7] sm:$0xff]  ;;  %v7493_v21 = vld [vmem:[#allocation9 + $0x38] sm:$0xff]   ;;  %v6915_v58 = vcombine.low %v8091_v9, %v8091_v9  ;;  %v1957_v9 = vld [vmem:[%s9494_s0 + $0x7e] sm:$0xff] }
 0x1e2   :  { %v820_v33 = vsel %vm774_vm2, %v815_v18, %v819_v30  ;;  %v683_v35 = vadd.f32 %v653_v36, %v8022_v42  ;;  %1267 = vmatprep.mubr.bf16.mxu1 %v1062_v40  ;;  %v8169_v43 = vpack.c.bf16 %v818_v32, %v814_v24  ;;  %7041 = vmatprep.subr.bf16.mxu1 %v7486_v22  ;;  %v655_v48 = vpop.f32.mrb[34].mxu0  ;;  %v7492_v18 = vld [vmem:[#allocation9 + $0x78] sm:$0xff]   ;;  %v7496_v22 = vld [vmem:[#allocation9 + $0x140] sm:$0xff]  }
 0x1e3   :  { %v720_v45 = vadd.f32 %v8028_v46, %v682_v34  ;;  %1268 = vmatmul.mubr.bf16.gmra.mrb[8].mxu1 %v1054_v11  ;;  %6900 = vmatmul.mubr.msk.bf16.gmra.mrb[48].mxu0 %vm240_vm1, %v1990_v63  ;;  %v8173_v39 = vpack.c.bf16 %v820_v33, %v816_v29  ;;  %v656_v51 = vpop.f32.mrb[35].mxu0  ;;  %v1982_v46 = vld [vmem:[%s9494_s0 + $0x9f] sm:$0xff]  ;;  %v1073_v63 = vor.u32 %v1071_v55, %v1061_v28  ;;  %v1985_v31 = vld [vmem:[%s9494_s0 + $0xb7] sm:$0xff] }
 0x1e4   :  { %v721_v52 = vadd.f32 %v8031_v47, %v683_v35  ;;  %2090 = vmatprep.mubr.bf16.mxu0 %v9502_v0  ;;  %v1067_v42 = vshll.u32 %v8169_v43, 16  ;;  %v1991_v3 = vpack.c.bf16 %v1982_v46, %v1981_v53  ;;  %v1992_v24 = vpack.c.bf16 %v1984_v20, %v1983_v19  ;;  %v1986_v32 = vld [vmem:[%s9494_s0 + $0xbf] sm:$0xff]  ;;  %v878_v46 = vld [vmem:[#allocation2 + $0x8] sm:$0xff]  ;;  %v7503_v19 = vld [vmem:[#allocation9 + $0x118] sm:$0xff]  }
 0x1e5   :  { %v746_v54 = vmax.f32 %v720_v45, 0.0  ;;  %v1075_v7 = vshll.u32 %v8173_v39, 16  ;;  %7042 = vmatpush3.bf16.msra.mxu1 %v7487_v4  ;;  %v1087_v34 = vshrl.u32 %v8173_v39, 16  ;;  %v1079_v40 = vshrl.u32 %v8169_v43, 16  ;;  %v7504_v20 = vld [vmem:[#allocation9 + $0x160] sm:$0xff]  }
 0x1e6   :  { %v747_v47 = vmax.f32 %v721_v52, 0.0  ;;  %v1069_v59 = vrot.slane %v1067_v42, 1  ;;  %7043 = vmatprep.subr.bf16.mxu1 %v7488_v38  ;;  %v1993_v38 = vpack.c.bf16 %v1986_v32, %v1985_v31  ;;  %v1987_v42 = vld [vmem:[%s9494_s0 + $0xc7] sm:$0xf]  ;;  %v7510_v32 = vld [vmem:[#allocation9 + $0x178] sm:$0xff]  }
 0x1e7   :  { %v821_v61 = vrot.slane %v746_v54, 7  ;;  %v1077_v1 = vrot.slane %v1075_v7, 1  ;;  %v1994_v54 = vpack.c.bf16 %v1987_v42, %v1987_v42  ;;  %v904_v7 = vpack.c.bf16 %v8042_v6, %v878_v46  ;;  %v7509_v31 = vld [vmem:[#allocation9 + $0x130] sm:$0xff]  }
 0x1e8   :  { %v823_v5 = vrot.slane %v747_v47, 7  ;;  %v1070_v17 = vsel %vm990_vm3, %v1065_v10, %v1069_v59  ;;  %v1081_v48 = vor.u32 %v1079_v40, %v1069_v59  ;;  %v1955_v47 = vld [vmem:[%s9494_s0 + $0x6e] sm:$0xff]  ;;  %v877_v59 = vld [vmem:[#allocation2] sm:$0xff] }
 0x1e9   :  { %v822_v12 = vsel %vm774_vm2, %v817_v25, %v821_v61  ;;  %v1078_v13 = vsel %vm990_vm3, %v1073_v63, %v1077_v1  ;;  %7044 = vmatpush3.bf16.msra.mxu1 %v7489_v56  ;;  %v1089_v4 = vor.u32 %v1087_v34, %v1077_v1  ;;  %v1954_v56 = vld [vmem:[%s9494_s0 + $0x66] sm:$0xff]  ;;  %v903_v61 = vpack.c.bf16 %v8038_v2, %v877_v59  ;;  %v7497_v1 = vld [vmem:[#allocation9 + $0x100] sm:$0xff]   ;;  %v7511_v40 = vld [vmem:[#allocation9 + $0x138] sm:$0xff]  }
 0x1ea   :  { %875 = vst [vmem:[#allocation2 + $0xc0] sm:$0x1f] %v822_v12  ;;  %v824_v16 = vsel %vm774_vm2, %v819_v30, %v823_v5  ;;  %1275 = vmatprep.mubr.bf16.mxu1 %v1078_v13  ;;  %7045 = vmatprep.subr.bf16.mxu1 %v7490_v60  ;;  %v1967_v60 = vpack.c.bf16 %v1955_v47, %v1954_v56  ;;  %v2310_v63 = vsel %vm262_vm0, %v6915_v58, 0  ;;  %v1956_v5 = vld [vmem:[%s9494_s0 + $0x76] sm:$0xff]  ;;  %v7499_v10 = vld [vmem:[#allocation9 + $0x108] sm:$0xff]   ;;  %v7500_v12 = vld [vmem:[#allocation9 + $0x150] sm:$0xff]  }
 0x1eb   :  { %876 = vst [vmem:[#allocation2 + $0xc8] sm:$0x1f] %v824_v16  ;;  %1276 = vmatmul.mubr.bf16.gmra.mrb[12].mxu1 %v1070_v17  ;;  %6901 = vmatmul.mubr.msk.bf16.gmra.mrb[52].mxu0 %vm240_vm1, %v1991_v3  ;;  %v7498_v3 = vld [vmem:[#allocation9 + $0x148] sm:$0xff]   ;;  %v1968_v13 = vpack.c.bf16 %v1957_v9, %v1956_v5  ;;  %v7502_v16 = vld [vmem:[#allocation9 + $0x158] sm:$0xff]   ;;  %v1540_v58 = vrot.slane %v8058_v50, 1  ;;  %v1547_v59 = vrot.slane %v8080_v27, 1 }
 0x1ec   :  { %2100 = vmatprep.mubr.bf16.mxu0 %v9502_v0  ;;  %v1958_v17 = vld [vmem:[%s9494_s0 + $0x86] sm:$0xff] }
 0x1ed   :  { %7046 = vmatpush3.bf16.msra.mxu1 %v7491_v14  ;;  %v7501_v14 = vld [vmem:[#allocation9 + $0x110] sm:$0xff]  }
 0x1ee   :  { %7047 = vmatprep.subr.bf16.mxu1 %v7492_v18  ;;  %v1959_v18 = vld [vmem:[%s9494_s0 + $0x8e] sm:$0xff]  ;;  %v1962_v34 = vld [vmem:[%s9494_s0 + $0xa6] sm:$0xff] }
 0x1f1   :  { %v951_v25 = vld [vmem:[#allocation2 + $0xc0] sm:$0x1f]  ;;  %7048 = vmatpush3.bf16.msra.mxu1 %v7493_v21  ;;  %v1969_v21 = vpack.c.bf16 %v1959_v18, %v1958_v17  ;;  %v2268_v18 = vld [vmem:[%s9494_s0 + $0x98] sm:$0xff] }
 0x1f2   :  { %v952_v26 = vld [vmem:[#allocation2 + $0xc8] sm:$0x1f]  ;;  %v955_v28 = vpack.c.bf16 %v951_v25, %v951_v25  ;;  %7091 = vmatprep.subr.bf16.mxu1 %v7496_v22  ;;  %v7505_v22 = vld [vmem:[#allocation9 + $0x120] sm:$0xff]   ;;  %v901_v42 = vld [vmem:[#allocation2 + $0xc0] sm:$0xf] }
 0x1f3   :  { %v956_v29 = vpack.c.bf16 %v952_v26, %v952_v26  ;;  %6902 = vmatmul.mubr.msk.bf16.gmra.mrb[56].mxu0 %vm240_vm1, %v1992_v24  ;;  %v7506_v24 = vld [vmem:[#allocation9 + $0x168] sm:$0xff]   ;;  %v1960_v25 = vld [vmem:[%s9494_s0 + $0x96] sm:$0xff] }
 0x1f4   :  { %v1083_v30 = vshll.u32 %v955_v28, 16  ;;  %2110 = vmatprep.mubr.bf16.mxu0 %v9502_v0  ;;  %v1095_v53 = vshrl.u32 %v955_v28, 16  ;;  %v1961_v26 = vld [vmem:[%s9494_s0 + $0x9e] sm:$0xff] }
 0x1f5   :  { %v1091_v36 = vshll.u32 %v956_v29, 16  ;;  %v1098_v35 = vshrl.u32 %v956_v29, 16  ;;  %v7507_v28 = vld [vmem:[#allocation9 + $0x128] sm:$0xff]   ;;  %v7508_v29 = vld [vmem:[#allocation9 + $0x170] sm:$0xff]  }
 0x1f6   :  { %v1085_v11 = vrot.slane %v1083_v30, 1  ;;  %v1970_v30 = vpack.c.bf16 %v1961_v26, %v1960_v25  ;;  %v2270_v26 = vld [vmem:[%s9494_s0 + $0xa8] sm:$0xff] }
 0x1f7   :  { %v1093_v33 = vrot.slane %v1091_v36, 1  ;;  %v1963_v36 = vld [vmem:[%s9494_s0 + $0xae] sm:$0xff] }
 0x1f8   :  { %v1086_v52 = vsel %vm990_vm3, %v1081_v48, %v1085_v11  ;;  %v1097_v55 = vor.u32 %v1095_v53, %v1085_v11  ;;  %v1971_v11 = vpack.c.bf16 %v1963_v36, %v1962_v34  ;;  %v1543_v53 = vrot.slane %v8056_v49, 1  ;;  %v2272_v36 = vld [vmem:[%s9494_s0 + $0xb8] sm:$0xff] }
 0x1f9   :  { %v1094_v45 = vsel %vm990_vm3, %v1089_v4, %v1093_v33  ;;  %v1100_v51 = vor.u32 %v1098_v35, %v1093_v33  ;;  %v1964_v4 = vld [vmem:[%s9494_s0 + $0xb6] sm:$0xff]  ;;  %v1965_v33 = vld [vmem:[%s9494_s0 + $0xbe] sm:$0xff]  ;;  %v902_v35 = vld [vmem:[#allocation2 + $0xc8] sm:$0xf] }
 0x1fa   :  { %1283 = vmatprep.mubr.bf16.mxu1 %v1094_v45  ;;  %v916_v48 = vpack.c.bf16 %v902_v35, %v902_v35  ;;  %v1484_v45 = vld [vmem:[#allocation2 + $0x8] sm:$0xfc] }
 0x1fb   :  { %1284 = vmatmul.mubr.bf16.gmra.mrb[16].mxu1 %v1086_v52  ;;  %6903 = vmatmul.mubr.msk.bf16.gmra.mrb[60].mxu0 %vm240_vm1, %v1993_v38  ;;  %v1972_v38 = vpack.c.bf16 %v1965_v33, %v1964_v4  ;;  %v1488_v52 = vpack.c.bf16 %v8042_v6, %v1484_v45  ;;  %v2262_v6 = vld [vmem:[%s9494_s0 + $0x68] sm:$0xff]  ;;  %v7514_v45 = vld [vmem:[#allocation9 + $0xc8] sm:$0xff]  }
 0x1fc   :  { %1291 = vmatprep.mubr.bf16.mxu1 %v1100_v51  ;;  %2120 = vmatprep.mubr.bf16.mxu0 %v9502_v0  ;;  %v1966_v51 = vld [vmem:[%s9494_s0 + $0xc6] sm:$0xf] }
 0x1fd   :  { %v1973_v46 = vpack.c.bf16 %v1966_v51, %v1966_v51  ;;  %v2274_v33 = vld [vmem:[%s9494_s0 + $0xc8] sm:$0xf]  ;;  %v7515_v51 = vld [vmem:[#allocation9 + $0x88] sm:$0xff]  }
 0x1fe   :  { %v2281_v35 = vpack.c.bf16 %v2274_v33, %v2274_v33 }
 0x203   :  { %1292 = vmatmul.mubr.bf16.gmra.mrb[20].mxu1 %v1097_v55  ;;  %6904 = vmatmul.mubr.msk.bf16.gmra.mrb[64].mxu0 %vm240_vm1, %v1994_v54  ;;  %v915_v54 = vpack.c.bf16 %v901_v42, %v901_v42  ;;  %v1542_v55 = vrot.slane %v1488_v52, 1  ;;  %v7516_v52 = vld [vmem:[#allocation9 + $0xd0] sm:$0xff]  }
 0x204   :  { %1427 = vmatprep.mubr.bf16.mxu1 %v904_v7  ;;  %2193 = vmatprep.mubr.bf16.mxu0 %v9502_v0  ;;  %v1483_v7 = vld [vmem:[#allocation2] sm:$0xfc]  ;;  %v7517_v42 = vld [vmem:[#allocation9 + $0x90] sm:$0xff]  }
 0x205   :  { %v1544_v56 = vsel %vm1538_vm4, %v1542_v55, %v1543_v53  ;;  %v1487_v47 = vpack.c.bf16 %v8038_v2, %v1483_v7  ;;  %v1548_v2 = vsel %vm1538_vm4, %v1543_v53, %v1547_v59  ;;  %v7518_v7 = vld [vmem:[#allocation9 + $0xd8] sm:$0xff]  }
 0x20b   :  { %1428 = vmatmul.mubr.bf16.vlgmr.msra.gmra.mrb[24].mxu1 %v903_v61  ;;  %6908 = vmatmul.mubr.msk.bf16.vlgmr.msra.gmra.mrb[40].mxu0 %vm240_vm1, %v1967_v60  ;;  %v1539_v61 = vrot.slane %v1487_v47, 1 }
 0x20c   :  { %1435 = vmatprep.mubr.bf16.mxu1 %v8056_v49  ;;  %2316 = vmatpush1.bf16.msra.mxu0 %v2310_v63  ;;  %v2263_v49 = vld [vmem:[%s9494_s0 + $0x70] sm:$0xff] }
 0x20d   :  { %2203 = vmatprep.mubr.bf16.mxu0 %v9502_v0  ;;  %7092 = vmatpush3.bf16.msra.mxu1 %v7497_v1  ;;  %v2275_v60 = vpack.c.bf16 %v2263_v49, %v2262_v6  ;;  %v1541_v63 = vsel %vm1538_vm4, %v1539_v61, %v1540_v58  ;;  %v2264_v1 = vld [vmem:[%s9494_s0 + $0x78] sm:$0xff]  ;;  %v7519_v6 = vld [vmem:[#allocation9 + $0x98] sm:$0xff]  }
 0x20e   :  { %7093 = vmatprep.subr.bf16.mxu1 %v7498_v3  ;;  %v1551_v3 = vrot.slane %v8117_v15, 1 }
 0x211   :  { %7094 = vmatpush3.bf16.msra.mxu1 %v7499_v10  ;;  %v1552_v10 = vsel %vm1538_vm4, %v1547_v59, %v1551_v3 }
 0x212   :  { %7095 = vmatprep.subr.bf16.mxu1 %v7500_v12  ;;  %v2266_v12 = vld [vmem:[%s9494_s0 + $0x88] sm:$0xff] }
 0x213   :  { %1436 = vmatmul.mubr.bf16.gmra.mrb[28].mxu1 %v8058_v50  ;;  %6909 = vmatmul.mubr.msk.bf16.gmra.mrb[44].mxu0 %vm240_vm1, %v1968_v13  ;;  %v2265_v50 = vld [vmem:[%s9494_s0 + $0x80] sm:$0xff]  ;;  %v1555_v13 = vrot.slane %v8151_v62, 1 }
 0x214   :  { %1443 = vmatprep.mubr.bf16.mxu1 %v8080_v27  ;;  %2213 = vmatprep.mubr.bf16.mxu0 %v9502_v0  ;;  %v1545_v27 = vrot.slane %v8077_v23, 1  ;;  %v2276_v5 = vpack.c.bf16 %v2265_v50, %v2264_v1  ;;  %v7521_v1 = vld [vmem:[#allocation9 + $0xa0] sm:$0xff]  }
 0x215   :  { %7096 = vmatpush3.bf16.msra.mxu1 %v7501_v14  ;;  %v1556_v17 = vsel %vm1538_vm4, %v1551_v3, %v1555_v13 }
 0x216   :  { %7097 = vmatprep.subr.bf16.mxu1 %v7502_v16  ;;  %v1546_v9 = vsel %vm1538_vm4, %v1540_v58, %v1545_v27 }
 0x219   :  { %7098 = vmatpush3.bf16.msra.mxu1 %v7503_v19  ;;  %v1559_v19 = vrot.slane %v8173_v39, 1 }
 0x21a   :  { %7099 = vmatprep.subr.bf16.mxu1 %v7504_v20 }
 0x21b   :  { %1444 = vmatmul.mubr.bf16.gmra.mrb[32].mxu1 %v8077_v23  ;;  %6910 = vmatmul.mubr.msk.bf16.gmra.mrb[48].mxu0 %vm240_vm1, %v1969_v21  ;;  %v2267_v23 = vld [vmem:[%s9494_s0 + $0x90] sm:$0xff]  ;;  %v1486_v21 = vld [vmem:[#allocation2 + $0xc8] sm:$0x3f] }
 0x21c   :  { %1451 = vmatprep.mubr.bf16.mxu1 %v8117_v15  ;;  %2223 = vmatprep.mubr.bf16.mxu0 %v9502_v0  ;;  %v1549_v15 = vrot.slane %v8113_v8, 1  ;;  %v2277_v14 = vpack.c.bf16 %v2267_v23, %v2266_v12  ;;  %v1490_v25 = vpack.c.bf16 %v1486_v21, %v1486_v21  ;;  %v7523_v23 = vld [vmem:[#allocation9 + $0xa8] sm:$0xff]  }
 0x21d   :  { %7100 = vmatpush3.bf16.msra.mxu1 %v7505_v22 }
 0x21e   :  { %7101 = vmatprep.subr.bf16.mxu1 %v7506_v24  ;;  %v1550_v16 = vsel %vm1538_vm4, %v1545_v27, %v1549_v15  ;;  %v1560_v24 = vsel %vm1538_vm4, %v1555_v13, %v1559_v19  ;;  %v7522_v27 = vld [vmem:[#allocation9 + $0xe8] sm:$0xff]  }
 0x221   :  { %7102 = vmatpush3.bf16.msra.mxu1 %v7507_v28  ;;  %v1563_v28 = vrot.slane %v1490_v25, 1 }
 0x222   :  { %7103 = vmatprep.subr.bf16.mxu1 %v7508_v29  ;;  %v1485_v29 = vld [vmem:[#allocation2 + $0xc0] sm:$0x3f] }
 0x223   :  { %1452 = vmatmul.mubr.bf16.gmra.mrb[36].mxu1 %v8113_v8  ;;  %6911 = vmatmul.mubr.msk.bf16.gmra.mrb[52].mxu0 %vm240_vm1, %v1970_v30  ;;  %v2269_v8 = vld [vmem:[%s9494_s0 + $0xa0] sm:$0xff]  ;;  %v1564_v34 = vsel %vm1538_vm4, %v1559_v19, %v1563_v28  ;;  %v7526_v19 = vld [vmem:[#allocation9 + $0xf8] sm:$0xff]  }
 0x224   :  { %1459 = vmatprep.mubr.bf16.mxu1 %v8151_v62  ;;  %2233 = vmatprep.mubr.bf16.mxu0 %v9502_v0  ;;  %v1553_v62 = vrot.slane %v8147_v57, 1  ;;  %v2278_v20 = vpack.c.bf16 %v2269_v8, %v2268_v18 }
 0x225   :  { %7104 = vmatpush3.bf16.msra.mxu1 %v7509_v31 }
 0x226   :  { %7105 = vmatprep.subr.bf16.mxu1 %v7510_v32  ;;  %v1554_v22 = vsel %vm1538_vm4, %v1549_v15, %v1553_v62  ;;  %v1489_v32 = vpack.c.bf16 %v1485_v29, %v1485_v29  ;;  %v7524_v15 = vld [vmem:[#allocation9 + $0xf0] sm:$0xff]  }
 0x229   :  { %7106 = vmatpush3.bf16.msra.mxu1 %v7511_v40  ;;  %v1561_v40 = vrot.slane %v1489_v32, 1 }
 0x22b   :  { %1460 = vmatmul.mubr.bf16.gmra.mrb[40].mxu1 %v8147_v57  ;;  %6912 = vmatmul.mubr.msk.bf16.gmra.mrb[56].mxu0 %vm240_vm1, %v1971_v11  ;;  %v2271_v57 = vld [vmem:[%s9494_s0 + $0xb0] sm:$0xff] }
 0x22c   :  { %1467 = vmatprep.mubr.bf16.mxu1 %v8173_v39  ;;  %2243 = vmatprep.mubr.bf16.mxu0 %v9502_v0  ;;  %v1557_v39 = vrot.slane %v8169_v43, 1  ;;  %v2279_v30 = vpack.c.bf16 %v2271_v57, %v2270_v26 }
 0x22e   :  { %v1558_v31 = vsel %vm1538_vm4, %v1553_v62, %v1557_v39  ;;  %v1562_v4 = vsel %vm1538_vm4, %v1557_v39, %v1561_v40  ;;  %v7528_v39 = vld [vmem:[#allocation9 + $0x40] sm:$0xff]  }
 0x233   :  { %1468 = vmatmul.mubr.bf16.gmra.mrb[44].mxu1 %v8169_v43  ;;  %6913 = vmatmul.mubr.msk.bf16.gmra.mrb[60].mxu0 %vm240_vm1, %v1972_v38  ;;  %v2273_v43 = vld [vmem:[%s9494_s0 + $0xc0] sm:$0xff]  ;;  %v7512_v38 = vld [vmem:[#allocation9 + $0xc0] sm:$0xff]   ;;  %s7719_s0 = smov 96  }
 0x234   :  { %1475 = vmatprep.mubr.bf16.mxu1 %v916_v48  ;;  %2253 = vmatprep.mubr.bf16.mxu0 %v9502_v0  ;;  %v2280_v11 = vpack.c.bf16 %v2273_v43, %v2272_v36  ;;  %v7513_v48 = vld [vmem:[#allocation9 + $0x80] sm:$0xff]  }
 0x235   :  { %7149 = vmatprep.subr.bf16.mxu1 %v7512_v38 }
 0x23b   :  { %1476 = vmatmul.mubr.bf16.gmra.mrb[48].mxu1 %v915_v54  ;;  %6914 = vmatmul.mubr.msk.bf16.gmra.mrb[68].mxu0 %vm240_vm1, %v1973_v46 }
 0x23c   :  { %1707 = vmatprep.mubr.bf16.mxu1 %v1544_v56  ;;  %2347 = vmatprep.mubr.bf16.mxu0 %v9502_v0 }
 0x243   :  { %1708 = vmatmul.mubr.bf16.vlgmr.msra.gmra.mrb[52].mxu1 %v1541_v63  ;;  %6918 = vmatmul.mubr.msk.bf16.vlgmr.msra.gmra.mrb[40].mxu0 %vm240_vm1, %v2275_v60 }
 0x244   :  { %1715 = vmatprep.mubr.bf16.mxu1 %v1548_v2  ;;  %2357 = vmatprep.mubr.bf16.mxu0 %v9502_v0  ;;  %v7520_v2 = vld [vmem:[#allocation9 + $0xe0] sm:$0xff]  }
 0x245   :  { %7150 = vmatpush3.bf16.msra.mxu1 %v7513_v48 }
 0x246   :  { %7151 = vmatprep.subr.bf16.mxu1 %v7514_v45 }
 0x249   :  { %7152 = vmatpush3.bf16.msra.mxu1 %v7515_v51 }
 0x24a   :  { %7153 = vmatprep.subr.bf16.mxu1 %v7516_v52 }
 0x24b   :  { %1716 = vmatmul.mubr.bf16.gmra.mrb[56].mxu1 %v1546_v9  ;;  %6919 = vmatmul.mubr.msk.bf16.gmra.mrb[44].mxu0 %vm240_vm1, %v2276_v5 }
 0x24c   :  { %1723 = vmatprep.mubr.bf16.mxu1 %v1552_v10  ;;  %2367 = vmatprep.mubr.bf16.mxu0 %v9502_v0 }
 0x24d   :  { %7154 = vmatpush3.bf16.msra.mxu1 %v7517_v42 }
 0x24e   :  { %7155 = vmatprep.subr.bf16.mxu1 %v7518_v7 }
 0x251   :  { %7156 = vmatpush3.bf16.msra.mxu1 %v7519_v6 }
 0x252   :  { %7157 = vmatprep.subr.bf16.mxu1 %v7520_v2 }
 0x253   :  { %1724 = vmatmul.mubr.bf16.gmra.mrb[60].mxu1 %v1550_v16  ;;  %6920 = vmatmul.mubr.msk.bf16.gmra.mrb[48].mxu0 %vm240_vm1, %v2277_v14  ;;  %v7525_v14 = vld [vmem:[#allocation9 + $0xb0] sm:$0xff]  }
 0x254   :  { %1731 = vmatprep.mubr.bf16.mxu1 %v1556_v17  ;;  %2377 = vmatprep.mubr.bf16.mxu0 %v9502_v0 }
 0x255   :  { %7158 = vmatpush3.bf16.msra.mxu1 %v7521_v1 }
 0x256   :  { %7159 = vmatprep.subr.bf16.mxu1 %v7522_v27 }
 0x259   :  { %7160 = vmatpush3.bf16.msra.mxu1 %v7523_v23 }
 0x25a   :  { %7161 = vmatprep.subr.bf16.mxu1 %v7524_v15 }
 0x25b   :  { %1732 = vmatmul.mubr.bf16.gmra.mrb[64].mxu1 %v1554_v22  ;;  %6921 = vmatmul.mubr.msk.bf16.gmra.mrb[52].mxu0 %vm240_vm1, %v2278_v20  ;;  %v7527_v20 = vld [vmem:[#allocation9 + $0xb8] sm:$0xff]  }
 0x25c   :  { %1739 = vmatprep.mubr.bf16.mxu1 %v1560_v24  ;;  %2387 = vmatprep.mubr.bf16.mxu0 %v9502_v0 }
 0x25d   :  { %7162 = vmatpush3.bf16.msra.mxu1 %v7525_v14 }
 0x25e   :  { %7163 = vmatprep.subr.bf16.mxu1 %v7526_v19 }
 0x261   :  { %7164 = vmatpush3.bf16.msra.mxu1 %v7527_v20 }
 0x262   :  { %7207 = vmatprep.subr.bf16.mxu1 %v7528_v39 }
 0x263   :  { %1740 = vmatmul.mubr.bf16.gmra.mrb[68].mxu1 %v1558_v31  ;;  %6922 = vmatmul.mubr.msk.bf16.gmra.mrb[56].mxu0 %vm240_vm1, %v2279_v30 }
 0x264   :  { %1747 = vmatprep.mubr.bf16.mxu1 %v1564_v34  ;;  %2397 = vmatprep.mubr.bf16.mxu0 %v9502_v0 }
 0x26b   :  { %1748 = vmatmul.mubr.bf16.gmra.mrb[72].mxu1 %v1562_v4  ;;  %6923 = vmatmul.mubr.msk.bf16.gmra.mrb[60].mxu0 %vm240_vm1, %v2280_v11 }
 0x26c   :  { %1755 = vmatprep.mubr.bf16.mxu1 %v1563_v28  ;;  %2407 = vmatprep.mubr.bf16.mxu0 %v9502_v0 }
 0x273   :  { %1756 = vmatmul.mubr.bf16.gmra.mrb[76].mxu1 %v1561_v40  ;;  %6924 = vmatmul.mubr.msk.bf16.gmra.mrb[72].mxu0 %vm240_vm1, %v2281_v35 }
 0x29e   :  { %v6991_v53 = vpop.f32.mrb[36].mxu0 }
 0x29f   :  { %v6992_v46 = vpop.f32.mrb[37].mxu0 }
 0x2a0   :  { %v8362_v54 = vadd.f32 %v6992_v46, %v6991_v53  ;;  %v6994_v55 = vpop.f32.mrb[38].mxu0 }
 0x2a1   :  { %v6995_v56 = vpop.f32.mrb[39].mxu0 }
 0x2a2   :  { %v8364_v47 = vadd.f32 %v6995_v56, %v6994_v55 }
 0x2a6   :  { %v6997_v49 = vpop.f32.mrb[0].mxu1 }
 0x2a7   :  { %v6998_v58 = vpop.f32.mrb[1].mxu1 }
 0x2a8   :  { %v8366_v59 = vadd.f32 %v6998_v58, %v6997_v49  ;;  %v7000_v60 = vpop.f32.mrb[2].mxu1 }
 0x2a9   :  { %v7001_v61 = vpop.f32.mrb[3].mxu1 }
 0x2aa   :  { %v8368_v63 = vadd.f32 %v7001_v61, %v7000_v60 }
 0x2ae   :  { %v7003_v50 = vpop.f32.mrb[4].mxu1 }
 0x2af   :  { %v7004_v3 = vpop.f32.mrb[5].mxu1 }
 0x2b0   :  { %v8370_v5 = vadd.f32 %v7004_v3, %v7003_v50  ;;  %v7006_v9 = vpop.f32.mrb[6].mxu1 }
 0x2b1   :  { %v7007_v10 = vpop.f32.mrb[7].mxu1 }
 0x2b2   :  { %v8372_v12 = vadd.f32 %v7007_v10, %v7006_v9 }
 0x2b6   :  { %v7009_v13 = vpop.f32.mrb[8].mxu1 }
 0x2b7   :  { %v7010_v16 = vpop.f32.mrb[9].mxu1 }
 0x2b8   :  { %v7011_v17 = vadd.f32 %v7010_v16, %v7009_v13  ;;  %v7012_v18 = vpop.f32.mrb[10].mxu1 }
 0x2b9   :  { %v7013_v8 = vpop.f32.mrb[11].mxu1 }
 0x2ba   :  { %v7014_v62 = vadd.f32 %v7013_v8, %v7012_v18 }
 0x2be   :  { %v7015_v21 = vpop.f32.mrb[12].mxu1 }
 0x2bf   :  { %v7016_v22 = vpop.f32.mrb[13].mxu1 }
 0x2c0   :  { %v7017_v24 = vadd.f32 %v7016_v22, %v7015_v21  ;;  %v7018_v25 = vpop.f32.mrb[14].mxu1 }
 0x2c1   :  { %v7019_v26 = vpop.f32.mrb[15].mxu1 }
 0x2c2   :  { %v7020_v57 = vadd.f32 %v7019_v26, %v7018_v25 }
 0x2ce   :  { %v7021_v28 = vpop.f32.mrb[16].mxu1 }
 0x2cf   :  { %v7022_v29 = vpop.f32.mrb[17].mxu1 }
 0x2d0   :  { %v7023_v30 = vadd.f32 %v7022_v29, %v7021_v28  ;;  %v7024_v31 = vpop.f32.mrb[18].mxu1 }
 0x2d1   :  { %v7025_v32 = vpop.f32.mrb[19].mxu1 }
 0x2d2   :  { %v7026_v34 = vadd.f32 %v7025_v32, %v7024_v31 }
 0x2d6   :  { %v7027_v36 = vpop.f32.mrb[20].mxu1  ;;  %v2122_v43 = vpop.f32.mrb[64].mxu0 }
 0x2d7   :  { %v7028_v40 = vpop.f32.mrb[21].mxu1  ;;  %v2124_v11 = vpop.f32.mrb[65].mxu0 }
 0x2d8   :  { %v8374_v4 = vadd.f32 %v7028_v40, %v7027_v36  ;;  %v7030_v33 = vpop.f32.mrb[22].mxu1  ;;  %v2126_v35 = vpop.f32.mrb[66].mxu0 }
 0x2d9   :  { %v7031_v38 = vpop.f32.mrb[23].mxu1  ;;  %v2127_v48 = vpop.f32.mrb[67].mxu0 }
 0x2de   :  { %v7049_v45 = vpop.f32.mrb[24].mxu1 }
 0x2df   :  { %v7050_v51 = vpop.f32.mrb[25].mxu1 }
 0x2e0   :  { %v7051_v52 = vadd.f32 %v7050_v51, %v7049_v45  ;;  %v7052_v42 = vpop.f32.mrb[26].mxu1 }
 0x2e1   :  { %v7053_v53 = vpop.f32.mrb[27].mxu1 }
 0x2e2   :  { %v8377_v46 = vadd.f32 %v7051_v52, %v8362_v54  ;;  %v7054_v55 = vadd.f32 %v7053_v53, %v7052_v42  ;;  %v2442_v52 = vld [vmem:[#allocation11] sm:$0x3] }
 0x2e4   :  { %v8380_v7 = vadd.f32 %v7054_v55, %v8364_v47  ;;  %v8417_v55 = vrot.slane %v2442_v52, %v8025_v44 }
 0x2e6   :  { %v7055_v56 = vpop.f32.mrb[28].mxu1 }
 0x2e7   :  { %v7056_v6 = vpop.f32.mrb[29].mxu1 }
 0x2e8   :  { %v7057_v49 = vadd.f32 %v7056_v6, %v7055_v56  ;;  %v7058_v58 = vpop.f32.mrb[30].mxu1 }
 0x2e9   :  { %v7059_v60 = vpop.f32.mrb[31].mxu1 }
 0x2ea   :  { %v8383_v61 = vadd.f32 %v7057_v49, %v8366_v59  ;;  %v7060_v2 = vadd.f32 %v7059_v60, %v7058_v58 }
 0x2ec   :  { %v8386_v1 = vadd.f32 %v7060_v2, %v8368_v63 }
 0x2ee   :  { %v7061_v50 = vpop.f32.mrb[32].mxu1 }
 0x2ef   :  { %v7062_v27 = vpop.f32.mrb[33].mxu1 }
 0x2f0   :  { %v7063_v54 = vadd.f32 %v7062_v27, %v7061_v50  ;;  %v7064_v3 = vpop.f32.mrb[34].mxu1 }
 0x2f1   :  { %v7065_v9 = vpop.f32.mrb[35].mxu1 }
 0x2f2   :  { %v8389_v47 = vadd.f32 %v7063_v54, %v8370_v5  ;;  %v7066_v10 = vadd.f32 %v7065_v9, %v7064_v3 }
 0x2f4   :  { %v8392_v23 = vadd.f32 %v7066_v10, %v8372_v12 }
 0x2f6   :  { %v7067_v15 = vpop.f32.mrb[36].mxu1 }
 0x2f7   :  { %v7068_v13 = vpop.f32.mrb[37].mxu1 }
 0x2f8   :  { %v7069_v59 = vadd.f32 %v7068_v13, %v7067_v15  ;;  %v7070_v14 = vpop.f32.mrb[38].mxu1 }
 0x2f9   :  { %v7071_v16 = vpop.f32.mrb[39].mxu1 }
 0x2fa   :  { %v8394_v18 = vadd.f32 %v7069_v59, %v7011_v17  ;;  %v7072_v63 = vadd.f32 %v7071_v16, %v7070_v14 }
 0x2fc   :  { %v8396_v8 = vadd.f32 %v7072_v63, %v7014_v62 }
 0x2fe   :  { %v7073_v19 = vpop.f32.mrb[40].mxu1 }
 0x2ff   :  { %v7074_v20 = vpop.f32.mrb[41].mxu1 }
 0x300   :  { %v7075_v21 = vadd.f32 %v7074_v20, %v7073_v19  ;;  %v7076_v22 = vpop.f32.mrb[42].mxu1 }
 0x301   :  { %v7077_v5 = vpop.f32.mrb[43].mxu1 }
 0x302   :  { %v8398_v25 = vadd.f32 %v7075_v21, %v7017_v24  ;;  %v7078_v26 = vadd.f32 %v7077_v5, %v7076_v22 }
 0x304   :  { %v8400_v12 = vadd.f32 %v7078_v26, %v7020_v57 }
 0x306   :  { %v7079_v39 = vpop.f32.mrb[44].mxu1 }
 0x307   :  { %v7080_v28 = vpop.f32.mrb[45].mxu1 }
 0x308   :  { %v7081_v29 = vadd.f32 %v7080_v28, %v7079_v39  ;;  %v7082_v31 = vpop.f32.mrb[46].mxu1 }
 0x309   :  { %v7083_v32 = vpop.f32.mrb[47].mxu1 }
 0x30a   :  { %v8402_v17 = vadd.f32 %v7081_v29, %v7023_v30  ;;  %v7084_v36 = vadd.f32 %v7083_v32, %v7082_v31 }
 0x30c   :  { %v8404_v62 = vadd.f32 %v7084_v36, %v7026_v34  ;;  %v8414_v34 = vrot.slane %v2442_v52, %v8020_v41 }
 0x30e   :  { %v7085_v40 = vpop.f32.mrb[48].mxu1  ;;  %v2255_v33 = vpop.f32.mrb[68].mxu0 }
 0x30f   :  { %v7086_v35 = vpop.f32.mrb[49].mxu1  ;;  %v8406_v38 = vadd.f32 %v2255_v33, %v2122_v43  ;;  %v2257_v24 = vpop.f32.mrb[69].mxu0 }
 0x310   :  { %v7087_v48 = vadd.f32 %v7086_v35, %v7085_v40  ;;  %v7088_v45 = vpop.f32.mrb[50].mxu1  ;;  %v8408_v57 = vadd.f32 %v2257_v24, %v2124_v11  ;;  %v2259_v51 = vpop.f32.mrb[70].mxu0 }
 0x311   :  { %v7089_v42 = vpop.f32.mrb[51].mxu1  ;;  %v2260_v53 = vpop.f32.mrb[71].mxu0 }
 0x312   :  { %v8411_v30 = vadd.f32 %v7087_v48, %v8374_v4 }
 0x316   :  { %v7107_v43 = vpop.f32.mrb[52].mxu1  ;;  %v2349_v56 = vpop.f32.mrb[40].mxu0 }
 0x317   :  { %v7108_v6 = vpop.f32.mrb[53].mxu1  ;;  %v2454_v49 = vadd.f32 %v8414_v34, %v2349_v56  ;;  %v2351_v11 = vpop.f32.mrb[41].mxu0 }
 0x318   :  { %v7109_v58 = vadd.f32 %v7108_v6, %v7107_v43  ;;  %v7110_v60 = vpop.f32.mrb[54].mxu1  ;;  %v2455_v2 = vadd.f32 %v8417_v55, %v2351_v11  ;;  %v2353_v50 = vpop.f32.mrb[42].mxu0 }
 0x319   :  { %v7111_v27 = vpop.f32.mrb[55].mxu1  ;;  %v2480_v4 = vmax.f32 %v2454_v49, 0.0  ;;  %v2456_v54 = vadd.f32 %v8414_v34, %v2353_v50  ;;  %v2355_v3 = vpop.f32.mrb[43].mxu0 }
 0x31a   :  { %v7112_v9 = vadd.f32 %v7111_v27, %v7110_v60  ;;  %v8423_v10 = vadd.f32 %v7109_v58, %v8377_v46  ;;  %v2481_v15 = vmax.f32 %v2455_v2, 0.0  ;;  %v2457_v13 = vadd.f32 %v8417_v55, %v2355_v3 }
 0x31b   :  { %v2533_v59 = vrot.slane %v2480_v4, 1  ;;  %v2482_v14 = vmax.f32 %v2456_v54, 0.0 }
 0x31c   :  { %v8427_v16 = vadd.f32 %v7112_v9, %v8380_v7  ;;  %1789 = vrot.lane.b32.xlu0 %v8423_v10, %s7719_s0  ;;  %v2534_v63 = vrot.slane %v2481_v15, 1  ;;  %v2483_v19 = vmax.f32 %v2457_v13, 0.0 }
 0x31d   :  { %2611 = vst [vmem:[#allocation2 + $0xc0] sm:$0x80] %v2533_v59  ;;  %v2535_v20 = vrot.slane %v2482_v14, 1 }
 0x31e   :  { %v7113_v21 = vpop.f32.mrb[56].mxu1  ;;  %2612 = vst [vmem:[#allocation2 + $0xc8] sm:$0x80] %v2534_v63  ;;  %v2537_v46 = vrot.slane %v2483_v19, 1  ;;  %v2359_v22 = vpop.f32.mrb[44].mxu0 }
 0x31f   :  { %v7114_v5 = vpop.f32.mrb[57].mxu1  ;;  %v8432_v26 = vsel %vm1538_vm4, %v2533_v59, %v2535_v20  ;;  %v2458_v39 = vadd.f32 %v8414_v34, %v2359_v22  ;;  %v2361_v7 = vpop.f32.mrb[45].mxu0 }
 0x320   :  { %v7115_v28 = vadd.f32 %v7114_v5, %v7113_v21  ;;  %v7116_v29 = vpop.f32.mrb[58].mxu1  ;;  %1791 = vrot.lane.b32.xlu0 %v8427_v16, %s7719_s0  ;;  %v8438_v31 = vsel %vm1538_vm4, %v2534_v63, %v2537_v46  ;;  %v2459_v32 = vadd.f32 %v8417_v55, %v2361_v7  ;;  %v2363_v36 = vpop.f32.mrb[46].mxu0 }
 0x321   :  { %v7117_v40 = vpop.f32.mrb[59].mxu1  ;;  %v2484_v33 = vmax.f32 %v2458_v39, 0.0  ;;  %v2460_v35 = vadd.f32 %v8414_v34, %v2363_v36  ;;  %v2365_v24 = vpop.f32.mrb[47].mxu0 }
 0x322   :  { %v7118_v48 = vadd.f32 %v7117_v40, %v7116_v29  ;;  %v8443_v45 = vadd.f32 %v7115_v28, %v8383_v61  ;;  %v2485_v51 = vmax.f32 %v2459_v32, 0.0  ;;  %v2461_v52 = vadd.f32 %v8417_v55, %v2365_v24 }
 0x323   :  { %v2539_v42 = vrot.slane %v2484_v33, 1  ;;  %v2486_v53 = vmax.f32 %v2460_v35, 0.0 }
 0x324   :  { %v8447_v43 = vadd.f32 %v7118_v48, %v8386_v1  ;;  %1793 = vrot.lane.b32.xlu1 %v8443_v45, %s7719_s0  ;;  %v2541_v56 = vrot.slane %v2485_v51, 1  ;;  %v2487_v6 = vmax.f32 %v2461_v52, 0.0  ;;  %v2713_v49 = vld [vmem:[#allocation2 + $0xc0] sm:$0x80] }
 0x325   :  { %v8451_v11 = vld [vmem:[#allocation2 + $0xc0] sm:$0xc0]  ;;  %v8454_v58 = vsel %vm1538_vm4, %v2535_v20, %v2539_v42  ;;  %v2543_v61 = vrot.slane %v2486_v53, 1  ;;  %v2714_v60 = vld [vmem:[#allocation2 + $0xc8] sm:$0x80]  ;;  %v8457_v2 = vpack.c.bf16 %v8432_v26, %v2713_v49 }
 0x326   :  { %9518 = vst [vmem:[#allocation26_spill] sm:$0xff] %v8447_v43  ;;  %v8459_v50 = vld [vmem:[#allocation2 + $0xc8] sm:$0xc0]  ;;  %v7119_v27 = vpop.f32.mrb[60].mxu1  ;;  %v8464_v4 = vsel %vm1538_vm4, %v2537_v46, %v2541_v56  ;;  %v2545_v54 = vrot.slane %v2487_v6, 1  ;;  %v2369_v3 = vpop.f32.mrb[48].mxu0  ;;  %v2718_v9 = vpack.c.bf16 %v8438_v31, %v2714_v60 }
 0x327   :  { %v2668_v15 = vpack.c.bf16 %v8438_v31, %v8459_v50  ;;  %v7120_v13 = vpop.f32.mrb[61].mxu1  ;;  %v8470_v59 = vsel %vm1538_vm4, %v2539_v42, %v2543_v61  ;;  %v2462_v14 = vadd.f32 %v8414_v34, %v2369_v3  ;;  %v2371_v63 = vpop.f32.mrb[49].mxu0  ;;  %v2755_v19 = vshrl.u32 %v8457_v2, 16 }
 0x328   :  { %v2758_v20 = vshll.u32 %v8457_v2, 16  ;;  %v7121_v21 = vadd.f32 %v7120_v13, %v7119_v27  ;;  %v7122_v46 = vpop.f32.mrb[62].mxu1  ;;  %1795 = vrot.lane.b32.xlu1 %v8447_v43, %s7719_s0  ;;  %v8478_v22 = vsel %vm1538_vm4, %v2541_v56, %v2545_v54  ;;  %v2463_v5 = vadd.f32 %v8417_v55, %v2371_v63  ;;  %v2373_v39 = vpop.f32.mrb[50].mxu0 }
 0x329   :  { %v2772_v7 = vshrl.u32 %v2718_v9, 16  ;;  %v7123_v28 = vpop.f32.mrb[63].mxu1  ;;  %v2488_v29 = vmax.f32 %v2462_v14, 0.0  ;;  %v2464_v32 = vadd.f32 %v8414_v34, %v2373_v39  ;;  %v2375_v36 = vpop.f32.mrb[51].mxu0  ;;  %v8484_v40 = vpack.c.bf16 %v8478_v22, %v8464_v4 }
 0x32a   :  { %v2775_v33 = vshll.u32 %v2718_v9, 16  ;;  %v8487_v35 = vadd.f32 %v7121_v21, %v8389_v47  ;;  %v7124_v24 = vadd.f32 %v7123_v28, %v7122_v46  ;;  %v2489_v48 = vmax.f32 %v2463_v5, 0.0 }
 0x32b   :  { %v2465_v51 = vadd.f32 %v8417_v55, %v2375_v36  ;;  %v2547_v52 = vrot.slane %v2488_v29, 1  ;;  %v2490_v42 = vmax.f32 %v2464_v32, 0.0  ;;  %v2774_v53 = vrot.slane %v2772_v7, 3 }
 0x32c   :  { %v2777_v56 = vrot.slane %v2775_v33, 4  ;;  %v8491_v6 = vadd.f32 %v7124_v24, %v8392_v23  ;;  %1797 = vrot.lane.b32.xlu0 %v8487_v35, %s7719_s0  ;;  %v2549_v49 = vrot.slane %v2489_v48, 1  ;;  %v2780_v2 = vshrl.u32 %v8484_v40, 16 }
 0x32d   :  { %v2491_v60 = vmax.f32 %v2465_v51, 0.0  ;;  %v8497_v47 = vsel %vm1538_vm4, %v2543_v61, %v2547_v52  ;;  %v2551_v27 = vrot.slane %v2490_v42, 1  ;;  %v2783_v9 = vshll.u32 %v8484_v40, 16 }
 0x32e   :  { %9519 = vst [vmem:[#allocation27_spill] sm:$0xff] %v8491_v6  ;;  %v2778_v3 = vor.u32 %v2777_v56, %v2774_v53  ;;  %v7125_v13 = vpop.f32.mrb[64].mxu1  ;;  %1799 = vrot.lane.b32.xlu1 %v8491_v6, %s7719_s0  ;;  %v8503_v23 = vsel %vm1538_vm4, %v2545_v54, %v2549_v49  ;;  %v2379_v63 = vpop.f32.mrb[52].mxu0  ;;  %v2782_v21 = vrot.slane %v2780_v2, 3  ;;  %v8507_v46 = vpack.c.bf16 %v8470_v59, %v8454_v58 }
 0x32f   :  { %v2553_v14 = vrot.slane %v2491_v60, 1  ;;  %v7126_v61 = vpop.f32.mrb[65].mxu1  ;;  %v8510_v5 = vsel %vm1538_vm4, %v2547_v52, %v2551_v27  ;;  %v2466_v39 = vadd.f32 %v8414_v34, %v2379_v63  ;;  %v2381_v7 = vpop.f32.mrb[53].mxu0  ;;  %v2785_v28 = vrot.slane %v2783_v9, 4 }
 0x330   :  { %v8513_v29 = vrot.slane %v2755_v19, 3  ;;  %v7127_v32 = vadd.f32 %v7126_v61, %v7125_v13  ;;  %v7128_v54 = vpop.f32.mrb[66].mxu1  ;;  %v2467_v33 = vadd.f32 %v8417_v55, %v2381_v7  ;;  %v2383_v24 = vpop.f32.mrb[54].mxu0  ;;  %v2760_v48 = vrot.slane %v2758_v20, 4 }
 0x331   :  { %v8516_v36 = vsel %vm1538_vm4, %v2549_v49, %v2553_v14  ;;  %v7129_v51 = vpop.f32.mrb[67].mxu1  ;;  %v2492_v42 = vmax.f32 %v2466_v39, 0.0  ;;  %v2468_v52 = vadd.f32 %v8414_v34, %v2383_v24  ;;  %v2385_v53 = vpop.f32.mrb[55].mxu0  ;;  %v8520_v56 = vor.u32 %v2785_v28, %v2782_v21 }
 0x332   :  { %v2763_v60 = vshrl.u32 %v8507_v46, 16  ;;  %v8524_v19 = vadd.f32 %v7127_v32, %v8394_v18  ;;  %v7130_v2 = vadd.f32 %v7129_v51, %v7128_v54  ;;  %v2493_v9 = vmax.f32 %v2467_v33, 0.0 }
 0x333   :  { %v2469_v49 = vadd.f32 %v8417_v55, %v2385_v53  ;;  %v2555_v13 = vrot.slane %v2492_v42, 1  ;;  %v2494_v63 = vmax.f32 %v2468_v52, 0.0  ;;  %v2787_v20 = vsel %vm2753_vm5, %v2778_v3, %v8520_v56 }
 0x334   :  { %9520 = vst [vmem:[#allocation28_spill] sm:$0xff] %v8524_v19  ;;  %v2761_v61 = vor.u32 %v2760_v48, %v8513_v29  ;;  %v8531_v39 = vadd.f32 %v7130_v2, %v8396_v8  ;;  %1801 = vrot.lane.b32.xlu0 %v8524_v19, %s7719_s0  ;;  %v2557_v21 = vrot.slane %v2493_v9, 1  ;;  %3020 = vmatprep.mubr.bf16.mxu1 %v2787_v20  ;;  %v2765_v7 = vrot.slane %v2763_v60, 3 }
 0x335   :  { %v2495_v18 = vmax.f32 %v2469_v49, 0.0  ;;  %v8536_v28 = vsel %vm1538_vm4, %v2551_v27, %v2555_v13  ;;  %v2559_v32 = vrot.slane %v2494_v63, 1  ;;  %v2766_v54 = vshll.u32 %v8507_v46, 16 }
 0x336   :  { %9521 = vst [vmem:[#allocation29_spill] sm:$0xff] %v8531_v39  ;;  %v8541_v3 = vpack.c.bf16 %v8516_v36, %v8503_v23  ;;  %v7131_v29 = vpop.f32.mrb[68].mxu1  ;;  %1803 = vrot.lane.b32.xlu1 %v8531_v39, %s7719_s0  ;;  %v8546_v8 = vsel %vm1538_vm4, %v2553_v14, %v2557_v21  ;;  %v2389_v24 = vpop.f32.mrb[56].mxu0  ;;  %v8550_v27 = vpack.c.bf16 %v8510_v5, %v8497_v47  ;;  %v8555_v48 = vrot.slane %v2668_v15, 3 }
 0x337   :  { %v2561_v33 = vrot.slane %v2495_v18, 1  ;;  %v7132_v51 = vpop.f32.mrb[69].mxu1  ;;  %v8558_v42 = vsel %vm1538_vm4, %v2555_v13, %v2559_v32  ;;  %v2470_v52 = vadd.f32 %v8414_v34, %v2389_v24  ;;  %v2391_v53 = vpop.f32.mrb[57].mxu0  ;;  %v2768_v14 = vrot.slane %v2766_v54, 4  ;;  %v7529_v54 = vld [vmem:[#allocation9] sm:$0xff]  }
 0x338   :  { %v2798_v60 = vshrl.u32 %v8541_v3, 16  ;;  %v7133_v2 = vadd.f32 %v7132_v51, %v7131_v29  ;;  %v7134_v9 = vpop.f32.mrb[70].mxu1  ;;  %v2471_v63 = vadd.f32 %v8417_v55, %v2391_v53  ;;  %v2393_v50 = vpop.f32.mrb[58].mxu0  ;;  %v2801_v15 = vshll.u32 %v8541_v3, 16  ;;  %v7530_v53 = vld [vmem:[#allocation9 + $0x48] sm:$0xff]  }
 0x339   :  { %v8563_v49 = vsel %vm1538_vm4, %v2557_v21, %v2561_v33  ;;  %v7135_v20 = vpop.f32.mrb[71].mxu1  ;;  %v2496_v18 = vmax.f32 %v2470_v52, 0.0  ;;  %v2472_v13 = vadd.f32 %v8414_v34, %v2393_v50  ;;  %v2395_v0 = vpop.f32.mrb[59].mxu0  ;;  %v8568_v24 = vor.u32 %v2768_v14, %v2765_v7 }
 0x33a   :  { %v2800_v1 = vrot.slane %v2798_v60, 3  ;;  %v8571_v29 = vadd.f32 %v7133_v2, %v8398_v25  ;;  %v7136_v51 = vadd.f32 %v7135_v20, %v7134_v9  ;;  %v2497_v21 = vmax.f32 %v2471_v63, 0.0  ;;  %v7531_v9 = vld [vmem:[#allocation9 + $0x8] sm:$0xff]  }
 0x33b   :  { %v2473_v37 = vadd.f32 %v8417_v55, %v2395_v0  ;;  %v2563_v44 = vrot.slane %v2496_v18, 1  ;;  %v2498_v41 = vmax.f32 %v2472_v13, 0.0  ;;  %v2770_v52 = vsel %vm2753_vm5, %v2761_v61, %v8568_v24 }
 0x33c   :  { %9522 = vst [vmem:[#allocation30_spill] sm:$0xff] %v8571_v29  ;;  %v2803_v39 = vrot.slane %v2801_v15, 4  ;;  %v8577_v50 = vadd.f32 %v7136_v51, %v8400_v12  ;;  %1805 = vrot.lane.b32.xlu0 %v8571_v29, %s7719_s0  ;;  %v2565_v7 = vrot.slane %v2497_v21, 1  ;;  %3021 = vmatmul.mubr.bf16.vlgmr.msra.gmra.mrb[80].mxu1 %v2770_v52  ;;  %v2789_v14 = vshrl.u32 %v8550_v27, 16 }
 0x33d   :  { %v2499_v25 = vmax.f32 %v2473_v37, 0.0  ;;  %v8583_v0 = vsel %vm1538_vm4, %v2559_v32, %v2563_v44  ;;  %v2567_v60 = vrot.slane %v2498_v41, 1  ;;  %7208 = vmatpush3.bf16.msra.mxu1 %v7529_v54  ;;  %v2792_v61 = vshll.u32 %v8550_v27, 16  ;;  %v7532_v32 = vld [vmem:[#allocation9 + $0x50] sm:$0xff]  }
 0x33e   :  { %9523 = vst [vmem:[#allocation31_spill] sm:$0xff] %v8577_v50  ;;  %v8585_v2 = vor.u32 %v2803_v39, %v2800_v1  ;;  %v7137_v12 = vpop.f32.mrb[72].mxu1  ;;  %1807 = vrot.lane.b32.xlu1 %v8577_v50, %s7719_s0  ;;  %v8591_v63 = vsel %vm1538_vm4, %v2561_v33, %v2565_v7  ;;  %v2399_v15 = vpop.f32.mrb[60].mxu0  ;;  %7209 = vmatprep.subr.bf16.mxu1 %v7530_v53  ;;  %v2791_v20 = vrot.slane %v2789_v14, 3 }
 0x33f   :  { %v2569_v37 = vrot.slane %v2499_v25, 1  ;;  %v8595_v41 = vpack.c.bf16 %v8563_v49, %v8546_v8  ;;  %v7138_v1 = vpop.f32.mrb[73].mxu1  ;;  %v8598_v39 = vsel %vm1538_vm4, %v2563_v44, %v2567_v60  ;;  %v2474_v18 = vadd.f32 %v8414_v34, %v2399_v15  ;;  %v2401_v13 = vpop.f32.mrb[61].mxu0 }
 0x340   :  { %v2805_v33 = vsel %vm2753_vm5, %v8520_v56, %v8585_v2  ;;  %v2794_v54 = vrot.slane %v2792_v61, 4  ;;  %v7139_v51 = vadd.f32 %v7138_v1, %v7137_v12  ;;  %v7140_v21 = vpop.f32.mrb[74].mxu1  ;;  %v2475_v52 = vadd.f32 %v8417_v55, %v2401_v13  ;;  %v2403_v25 = vpop.f32.mrb[62].mxu0  ;;  %v7533_v61 = vld [vmem:[#allocation9 + $0x10] sm:$0xff]  }
 0x341   :  { %v8605_v53 = vsel %vm1538_vm4, %v2565_v7, %v2569_v37  ;;  %3028 = vmatprep.mubr.bf16.mxu1 %v2805_v33  ;;  %v2816_v44 = vshrl.u32 %v8595_v41, 16  ;;  %v7141_v14 = vpop.f32.mrb[75].mxu1  ;;  %v2500_v50 = vmax.f32 %v2474_v18, 0.0  ;;  %v2476_v15 = vadd.f32 %v8414_v34, %v2403_v25  ;;  %v2405_v29 = vpop.f32.mrb[63].mxu0  ;;  %7210 = vmatpush3.bf16.msra.mxu1 %v7531_v9  ;;  %v7534_v33 = vld [vmem:[#allocation9 + $0x58] sm:$0xff]  }
 0x342   :  { %v8610_v6 = vor.u32 %v2794_v54, %v2791_v20  ;;  %v2819_v56 = vshll.u32 %v8595_v41, 16  ;;  %v8614_v7 = vadd.f32 %v7139_v51, %v8402_v17  ;;  %v7142_v12 = vadd.f32 %v7141_v14, %v7140_v21  ;;  %7211 = vmatprep.subr.bf16.mxu1 %v7532_v32  ;;  %v7535_v32 = vld [vmem:[#allocation9 + $0x18] sm:$0xff]  }
 0x343   :  { %v2501_v1 = vmax.f32 %v2475_v52, 0.0  ;;  %v2477_v13 = vadd.f32 %v8417_v55, %v2405_v29  ;;  %v2571_v19 = vrot.slane %v2500_v50, 1  ;;  %v2502_v18 = vmax.f32 %v2476_v15, 0.0 }
 0x344   :  { %9524 = vst [vmem:[#allocation32_spill] sm:$0xff] %v8614_v7  ;;  %v2796_v20 = vsel %vm2753_vm5, %v8568_v24, %v8610_v6  ;;  %v2818_v54 = vrot.slane %v2816_v44, 3  ;;  %v8621_v9 = vadd.f32 %v7142_v12, %v8404_v62  ;;  %1809 = vrot.lane.b32.xlu0 %v8614_v7, %s7719_s0  ;;  %v2821_v21 = vrot.slane %v2819_v56, 4  ;;  %v7536_v56 = vld [vmem:[#allocation9 + $0x60] sm:$0xff]  }
 0x345   :  { %v2573_v17 = vrot.slane %v2501_v1, 1  ;;  %v2503_v51 = vmax.f32 %v2477_v13, 0.0  ;;  %3029 = vmatmul.mubr.bf16.gmra.mrb[84].mxu1 %v2796_v20  ;;  %v8626_v29 = vsel %vm1538_vm4, %v2567_v60, %v2571_v19  ;;  %v8628_v50 = vrot.slane %v2502_v18, 1 }
 0x346   :  { %9525 = vst [vmem:[#allocation33_spill] sm:$0xff] %v8621_v9  ;;  %7212 = vmatpush3.bf16.msra.mxu1 %v7533_v61  ;;  %v8632_v24 = vpack.c.bf16 %v8558_v42, %v8536_v28  ;;  %v8636_v62 = vpack.c.bf16 %v8605_v53, %v8591_v63  ;;  %v7143_v52 = vpop.f32.mrb[76].mxu1  ;;  %1811 = vrot.lane.b32.xlu1 %v8621_v9, %s7719_s0  ;;  %v2409_v44 = vpop.f32.mrb[72].mxu0 }
 0x347   :  { %v8641_v25 = vsel %vm1538_vm4, %v2569_v37, %v2573_v17  ;;  %v2577_v60 = vrot.slane %v2503_v51, 1  ;;  %v2822_v14 = vor.u32 %v2821_v21, %v2818_v54  ;;  %7213 = vmatprep.subr.bf16.mxu1 %v7534_v33  ;;  %v8645_v15 = vpack.c.bf16 %v8598_v39, %v8583_v0  ;;  %v7144_v61 = vpop.f32.mrb[77].mxu1  ;;  %v2411_v13 = vpop.f32.mrb[73].mxu0 }
 0x348   :  { %v8649_v12 = vsel %vm1538_vm4, %v2571_v19, %v8628_v50  ;;  %v2440_v1 = vadd.f32 %v2409_v44, %v8406_v38  ;;  %v2807_v37 = vshrl.u32 %v8632_v24, 16  ;;  %v2810_v18 = vshll.u32 %v8632_v24, 16  ;;  %v7146_v54 = vpop.f32.mrb[78].mxu1  ;;  %v2413_v21 = vpop.f32.mrb[74].mxu0 }
 0x349   :  { %v7145_v20 = vadd.f32 %v7144_v61, %v7143_v52  ;;  %v8655_v33 = vsel %vm1538_vm4, %v2573_v17, %v2577_v60  ;;  %v2441_v51 = vadd.f32 %v2411_v13, %v8408_v57  ;;  %v2823_v9 = vsel %vm2753_vm5, %v8585_v2, %v2822_v14  ;;  %v7147_v19 = vpop.f32.mrb[79].mxu1  ;;  %v2414_v44 = vpop.f32.mrb[75].mxu0  ;;  %v7537_v61 = vld [vmem:[#allocation9 + $0x20] sm:$0xff]   ;;  %v7538_v54 = vld [vmem:[#allocation9 + $0x68] sm:$0xff]  }
 0x34a   :  { %v2478_v38 = vadd.f32 %v8414_v34, %v2440_v1  ;;  %3036 = vmatprep.mubr.bf16.mxu1 %v2823_v9  ;;  %v2809_v7 = vrot.slane %v2807_v37, 3  ;;  %v2812_v43 = vrot.slane %v2810_v18, 4  ;;  %7214 = vmatpush3.bf16.msra.mxu1 %v7535_v32  ;;  %v2834_v52 = vshrl.u32 %v8636_v62, 16 }
 0x34b   :  { %v8663_v17 = vadd.f32 %v7145_v20, %v8411_v30  ;;  %v2479_v57 = vadd.f32 %v8417_v55, %v2441_v51  ;;  %v2837_v13 = vshll.u32 %v8636_v62, 16  ;;  %v2825_v2 = vshrl.u32 %v8645_v15, 16  ;;  %7215 = vmatprep.subr.bf16.mxu1 %v7536_v56 }
 0x34c   :  { %v2504_v34 = vmax.f32 %v2478_v38, 0.0  ;;  %v2813_v1 = vor.u32 %v2812_v43, %v2809_v7  ;;  %v2836_v9 = vrot.slane %v2834_v52, 3  ;;  %v2828_v37 = vshll.u32 %v8645_v15, 16  ;;  %v7539_v7 = vld [vmem:[#allocation9 + $0x28] sm:$0xff]   ;;  %v7540_v52 = vld [vmem:[#allocation9 + $0x70] sm:$0xff]  }
 0x34d   :  { %1813 = vrot.lane.b32.xlu0 %v8663_v17, %s7719_s0  ;;  %v2505_v32 = vmax.f32 %v2479_v57, 0.0  ;;  %v2839_v18 = vrot.slane %v2837_v13, 4  ;;  %v2827_v30 = vrot.slane %v2825_v2, 3  ;;  %v8673_v55 = vpack.c.bf16 %v8655_v33, %v8641_v25 }
 0x34e   :  { %v2579_v20 = vrot.slane %v2504_v34, 1  ;;  %v2814_v56 = vsel %vm2753_vm5, %v8610_v6, %v2813_v1  ;;  %v2830_v51 = vrot.slane %v2828_v37, 4  ;;  %7216 = vmatpush3.bf16.msra.mxu1 %v7537_v61  ;;  %v8679_v43 = vpack.c.bf16 %v8649_v12, %v8626_v29 }
 0x34f   :  { %v2581_v21 = vrot.slane %v2505_v32, 1  ;;  %3037 = vmatmul.mubr.bf16.gmra.mrb[88].mxu1 %v2814_v56  ;;  %v2840_v19 = vor.u32 %v2839_v18, %v2836_v9  ;;  %v2852_v38 = vshrl.u32 %v8673_v55, 16  ;;  %v2855_v44 = vshll.u32 %v8673_v55, 16  ;;  %7217 = vmatprep.subr.bf16.mxu1 %v7538_v54  ;;  %v7541_v18 = vld [vmem:[#allocation9 + $0x30] sm:$0xff]   ;;  %v7542_v56 = vld [vmem:[#allocation9 + $0x78] sm:$0xff]  }
 0x350   :  { %v8685_v57 = vsel %vm1538_vm4, %v8628_v50, %v2579_v20  ;;  %2637 = vst [vmem:[#allocation2 + $0x190] sm:$0x7] %v2579_v20  ;;  %v2831_v6 = vor.u32 %v2830_v51, %v2827_v30  ;;  %v2843_v61 = vshrl.u32 %v8679_v43, 16  ;;  %v2846_v13 = vshll.u32 %v8679_v43, 16 }
 0x351   :  { %v8690_v2 = vsel %vm1538_vm4, %v2577_v60, %v2581_v21  ;;  %2638 = vst [vmem:[#allocation2 + $0x198] sm:$0x7] %v2581_v21  ;;  %v2841_v34 = vsel %vm2753_vm5, %v2822_v14, %v2840_v19  ;;  %v2854_v9 = vrot.slane %v2852_v38, 3  ;;  %v2857_v37 = vrot.slane %v2855_v44, 4 }
 0x352   :  { %3044 = vmatprep.mubr.bf16.mxu1 %v2841_v34  ;;  %v2832_v54 = vsel %vm2753_vm5, %v2813_v1, %v2831_v6  ;;  %v2845_v32 = vrot.slane %v2843_v61, 3  ;;  %v2848_v50 = vrot.slane %v2846_v13, 4  ;;  %7218 = vmatpush3.bf16.msra.mxu1 %v7539_v7  ;;  %v3095_v30 = vrot.slane %v8484_v40, 3  ;;  %v7544_v13 = vld [vmem:[#allocation9 + $0x140] sm:$0xff]  }
 0x353   :  { %v8695_v20 = vor.u32 %v2857_v37, %v2854_v9  ;;  %7219 = vmatprep.subr.bf16.mxu1 %v7540_v52  ;;  %v9526_v60 = vpack.c.bf16 %v8432_v26, %v8451_v11  ;;  %v3092_v14 = vrot.slane %v8507_v46, 3  ;;  %v3099_v21 = vrot.slane %v8541_v3, 3 }
 0x354   :  { %v2849_v38 = vor.u32 %v2848_v50, %v2845_v32  ;;  %v8704_v1 = vsel %vm3090_vm6, %v8555_v48, %v3095_v30  ;;  %v3097_v7 = vrot.slane %v8550_v27, 3  ;;  %v3103_v40 = vrot.slane %v8595_v41, 3  ;;  %v7543_v48 = vld [vmem:[#allocation9 + $0x38] sm:$0xff]  }
 0x355   :  { %v3091_v51 = vrot.slane %v9526_v60, 3  ;;  %v2859_v44 = vsel %vm2753_vm5, %v2840_v19, %v8695_v20  ;;  %v8714_v11 = vsel %vm3090_vm6, %v3095_v30, %v3099_v21  ;;  %v3101_v46 = vrot.slane %v8632_v24, 3 }
 0x356   :  { %v2850_v3 = vsel %vm2753_vm5, %v2831_v6, %v2849_v38  ;;  %7220 = vmatpush3.bf16.msra.mxu1 %v7541_v18  ;;  %v8719_v61 = vsel %vm3090_vm6, %v3092_v14, %v3097_v7  ;;  %v8722_v27 = vsel %vm3090_vm6, %v3099_v21, %v3103_v40  ;;  %v3107_v41 = vrot.slane %v8636_v62, 3 }
 0x357   :  { %v8711_v52 = vsel %vm3090_vm6, %v3091_v51, %v3092_v14  ;;  %3045 = vmatmul.mubr.bf16.gmra.mrb[92].mxu1 %v2832_v54  ;;  %v2715_v19 = vld [vmem:[#allocation2 + $0x190] sm:$0x7]  ;;  %7221 = vmatprep.subr.bf16.mxu1 %v7542_v56  ;;  %v8726_v34 = vsel %vm3090_vm6, %v3097_v7, %v3101_v46  ;;  %v3105_v24 = vrot.slane %v8645_v15, 3  ;;  %v3111_v6 = vrot.slane %v8673_v55, 3 }
 0x358   :  { %v3109_v9 = vrot.slane %v8679_v43, 3  ;;  %3052 = vmatprep.mubr.bf16.mxu1 %v2859_v44  ;;  %v2716_v37 = vld [vmem:[#allocation2 + $0x198] sm:$0x7]  ;;  %v2719_v32 = vpack.c.bf16 %v2715_v19, %v8685_v57  ;;  %v8733_v50 = vsel %vm3090_vm6, %v3103_v40, %v3107_v41  ;;  %v2665_v54 = vld [vmem:[#allocation2 + $0x190] sm:$0x3]  ;;  %v3318_v18 = vpack.c.bf16 %v8464_v4, %v8438_v31 }
 0x359   :  { %v2666_v62 = vld [vmem:[#allocation2 + $0x198] sm:$0x3]  ;;  %v3317_v30 = vpack.c.bf16 %v8454_v58, %v8432_v26  ;;  %v2720_v15 = vpack.c.bf16 %v2716_v37, %v8690_v2  ;;  %v8741_v55 = vsel %vm3090_vm6, %v3101_v46, %v3105_v24  ;;  %v8744_v43 = vsel %vm3090_vm6, %v3107_v41, %v3111_v6  ;;  %v3315_v58 = vld [vmem:[#allocation2 + $0x190] sm:$0xf] }
 0x35a   :  { %v8747_v56 = vsel %vm3090_vm6, %v3105_v24, %v3109_v9  ;;  %v2861_v60 = vshrl.u32 %v2719_v32, 16  ;;  %v2864_v51 = vshll.u32 %v2719_v32, 16  ;;  %7222 = vmatpush3.bf16.msra.mxu1 %v7543_v48  ;;  %v2680_v14 = vpack.c.bf16 %v2666_v62, %v8690_v2  ;;  %v3316_v26 = vld [vmem:[#allocation2 + $0x198] sm:$0xf] }
 0x35b   :  { %v2679_v21 = vpack.c.bf16 %v2665_v54, %v8685_v57  ;;  %v2870_v7 = vshrl.u32 %v2720_v15, 16  ;;  %v2873_v40 = vshll.u32 %v2720_v15, 16  ;;  %7265 = vmatprep.subr.bf16.mxu1 %v7544_v13  ;;  %v3320_v44 = vpack.c.bf16 %v8503_v23, %v8478_v22 }
 0x35c   :  { %v3319_v46 = vpack.c.bf16 %v8497_v47, %v8470_v59  ;;  %v2863_v41 = vrot.slane %v2861_v60, 3  ;;  %v2866_v19 = vrot.slane %v2864_v51, 4  ;;  %v8755_v24 = vrot.slane %v2680_v14, 3 }
 0x35d   :  { %v8757_v37 = vrot.slane %v2679_v21, 3  ;;  %v2872_v48 = vrot.slane %v2870_v7, 3  ;;  %v2875_v32 = vrot.slane %v2873_v40, 4  ;;  %v3322_v62 = vpack.c.bf16 %v8546_v8, %v8516_v36 }
 0x35e   :  { %v3321_v13 = vpack.c.bf16 %v8536_v28, %v8510_v5  ;;  %v2867_v54 = vor.u32 %v2866_v19, %v2863_v41  ;;  %v3116_v15 = vsel %vm3090_vm6, %v3111_v6, %v8755_v24  ;;  %v3324_v51 = vpack.c.bf16 %v8591_v63, %v8563_v49 }
 0x35f   :  { %v3114_v60 = vsel %vm3090_vm6, %v3109_v9, %v8757_v37  ;;  %3053 = vmatmul.mubr.bf16.gmra.mrb[96].mxu1 %v2850_v3  ;;  %v2876_v14 = vor.u32 %v2875_v32, %v2872_v48  ;;  %v3323_v21 = vpack.c.bf16 %v8583_v0, %v8558_v42  ;;  %v3326_v7 = vpack.c.bf16 %v8641_v25, %v8605_v53  ;;  %v7545_v42 = vld [vmem:[#allocation9 + $0x100] sm:$0xff]   ;;  %v7546_v0 = vld [vmem:[#allocation9 + $0x148] sm:$0xff]   ;;  %v7548_v53 = vld [vmem:[#allocation9 + $0x150] sm:$0xff]  }
 0x360   :  { %v3325_v40 = vpack.c.bf16 %v8626_v29, %v8598_v39  ;;  %v2868_v41 = vsel %vm2753_vm5, %v2849_v38, %v2867_v54  ;;  %v3328_v6 = vpack.c.bf16 %v8690_v2, %v8655_v33  ;;  %v3327_v9 = vpack.c.bf16 %v8685_v57, %v8649_v12  ;;  %v7547_v39 = vld [vmem:[#allocation9 + $0x108] sm:$0xff]   ;;  %v7549_v29 = vld [vmem:[#allocation9 + $0x110] sm:$0xff]   ;;  %v7550_v25 = vld [vmem:[#allocation9 + $0x158] sm:$0xff]  }
 0x361   :  { %v2877_v3 = vsel %vm2753_vm5, %v8695_v20, %v2876_v14  ;;  %v7551_v33 = vld [vmem:[#allocation9 + $0x118] sm:$0xff]   ;;  %v7552_v2 = vld [vmem:[#allocation9 + $0x160] sm:$0xff]   ;;  %v7554_v38 = vld [vmem:[#allocation9 + $0x168] sm:$0xff]   ;;  %v3330_v31 = vpack.c.bf16 %v3316_v26, %v3316_v26  ;;  %v3329_v4 = vpack.c.bf16 %v3315_v58, %v3315_v58 }
 0x362   :  { %3060 = vmatprep.mubr.bf16.mxu1 %v2877_v3  ;;  %v7553_v20 = vld [vmem:[#allocation9 + $0x120] sm:$0xff]  }
 0x367   :  { %3061 = vmatmul.mubr.bf16.gmra.mrb[100].mxu1 %v2868_v41 }
 0x368   :  { %3068 = vmatprep.mubr.bf16.mxu1 %v2876_v14 }
 0x36f   :  { %3069 = vmatmul.mubr.bf16.gmra.mrb[104].mxu1 %v2867_v54 }
 0x370   :  { %3259 = vmatprep.mubr.bf16.mxu1 %v8704_v1  ;;  %v7555_v1 = vld [vmem:[#allocation9 + $0x128] sm:$0xff]  }
 0x377   :  { %3260 = vmatmul.mubr.bf16.vlgmr.msra.gmra.mrb[108].mxu1 %v8711_v52  ;;  %v7556_v52 = vld [vmem:[#allocation9 + $0x170] sm:$0xff]  }
 0x378   :  { %3267 = vmatprep.mubr.bf16.mxu1 %v8714_v11  ;;  %7266 = vmatpush3.bf16.msra.mxu1 %v7545_v42  ;;  %v7557_v11 = vld [vmem:[#allocation9 + $0x130] sm:$0xff]  }
 0x379   :  { %7267 = vmatprep.subr.bf16.mxu1 %v7546_v0 }
 0x37c   :  { %7268 = vmatpush3.bf16.msra.mxu1 %v7547_v39 }
 0x37d   :  { %7269 = vmatprep.subr.bf16.mxu1 %v7548_v53 }
 0x37f   :  { %3268 = vmatmul.mubr.bf16.gmra.mrb[112].mxu1 %v8719_v61  ;;  %v7558_v61 = vld [vmem:[#allocation9 + $0x178] sm:$0xff]  }
 0x380   :  { %3275 = vmatprep.mubr.bf16.mxu1 %v8722_v27  ;;  %7270 = vmatpush3.bf16.msra.mxu1 %v7549_v29  ;;  %v7559_v27 = vld [vmem:[#allocation9 + $0x138] sm:$0xff]  }
 0x381   :  { %7271 = vmatprep.subr.bf16.mxu1 %v7550_v25 }
 0x384   :  { %7272 = vmatpush3.bf16.msra.mxu1 %v7551_v33 }
 0x385   :  { %7273 = vmatprep.subr.bf16.mxu1 %v7552_v2 }
 0x387   :  { %3276 = vmatmul.mubr.bf16.gmra.mrb[116].mxu1 %v8726_v34 }
 0x388   :  { %3283 = vmatprep.mubr.bf16.mxu1 %v8733_v50  ;;  %7274 = vmatpush3.bf16.msra.mxu1 %v7553_v20 }
 0x389   :  { %7275 = vmatprep.subr.bf16.mxu1 %v7554_v38 }
 0x38c   :  { %7276 = vmatpush3.bf16.msra.mxu1 %v7555_v1 }
 0x38d   :  { %7277 = vmatprep.subr.bf16.mxu1 %v7556_v52 }
 0x38f   :  { %3284 = vmatmul.mubr.bf16.gmra.mrb[120].mxu1 %v8741_v55 }
 0x390   :  { %3291 = vmatprep.mubr.bf16.mxu1 %v8744_v43  ;;  %7278 = vmatpush3.bf16.msra.mxu1 %v7557_v11 }
 0x391   :  { %7279 = vmatprep.subr.bf16.mxu1 %v7558_v61 }
 0x394   :  { %7280 = vmatpush3.bf16.msra.mxu1 %v7559_v27 }
 0x397   :  { %3292 = vmatmul.mubr.bf16.gmra.mrb[124].mxu1 %v8747_v56 }
 0x398   :  { %3299 = vmatprep.mubr.bf16.mxu1 %v3116_v15 }
 0x39f   :  { %3300 = vmatmul.mubr.bf16.gmra.mrb[128].mxu1 %v3114_v60 }
 0x3a0   :  { %3307 = vmatprep.mubr.bf16.mxu1 %v8755_v24 }
 0x3a7   :  { %3308 = vmatmul.mubr.bf16.gmra.mrb[132].mxu1 %v8757_v37 }
 0x3a8   :  { %3491 = vmatprep.mubr.bf16.mxu1 %v3318_v18 }
 0x3af   :  { %3492 = vmatmul.mubr.bf16.vlgmr.msra.gmra.mrb[136].mxu1 %v3317_v30 }
 0x3b0   :  { %3499 = vmatprep.mubr.bf16.mxu1 %v3320_v44 }
 0x3b7   :  { %3500 = vmatmul.mubr.bf16.gmra.mrb[140].mxu1 %v3319_v46 }
 0x3b8   :  { %3507 = vmatprep.mubr.bf16.mxu1 %v3322_v62 }
 0x3bf   :  { %3508 = vmatmul.mubr.bf16.gmra.mrb[144].mxu1 %v3321_v13 }
 0x3c0   :  { %3515 = vmatprep.mubr.bf16.mxu1 %v3324_v51 }
 0x3c7   :  { %3516 = vmatmul.mubr.bf16.gmra.mrb[148].mxu1 %v3323_v21 }
 0x3c8   :  { %3523 = vmatprep.mubr.bf16.mxu1 %v3326_v7 }
 0x3cf   :  { %3524 = vmatmul.mubr.bf16.gmra.mrb[152].mxu1 %v3325_v40 }
 0x3d0   :  { %3531 = vmatprep.mubr.bf16.mxu1 %v3328_v6 }
 0x3d7   :  { %3532 = vmatmul.mubr.bf16.gmra.mrb[156].mxu1 %v3327_v9 }
 0x3d8   :  { %3539 = vmatprep.mubr.bf16.mxu1 %v3330_v31 }
 0x3df   :  { %3540 = vmatmul.mubr.bf16.gmra.mrb[160].mxu1 %v3329_v4 }
 0x40f   :  { %v7165_v59 = vpop.f32.mrb[80].mxu1 }
 0x410   :  { %v7166_v22 = vpop.f32.mrb[81].mxu1 }
 0x411   :  { %v7167_v47 = vadd.f32 %v7166_v22, %v7165_v59  ;;  %v7168_v23 = vpop.f32.mrb[82].mxu1 }
 0x412   :  { %v7169_v5 = vpop.f32.mrb[83].mxu1 }
 0x413   :  { %v7170_v36 = vadd.f32 %v7169_v5, %v7168_v23 }
 0x418   :  { %v7171_v28 = vpop.f32.mrb[84].mxu1 }
 0x419   :  { %v7172_v8 = vpop.f32.mrb[85].mxu1 }
 0x41a   :  { %v7173_v49 = vadd.f32 %v7172_v8, %v7171_v28  ;;  %v7174_v63 = vpop.f32.mrb[86].mxu1 }
 0x41b   :  { %v7175_v34 = vpop.f32.mrb[87].mxu1 }
 0x41c   :  { %v7176_v50 = vadd.f32 %v7175_v34, %v7174_v63 }
 0x422   :  { %v7177_v18 = vpop.f32.mrb[88].mxu1 }
 0x423   :  { %v7178_v30 = vpop.f32.mrb[89].mxu1 }
 0x424   :  { %v7179_v12 = vadd.f32 %v7178_v30, %v7177_v18  ;;  %v7180_v57 = vpop.f32.mrb[90].mxu1 }
 0x425   :  { %v7181_v55 = vpop.f32.mrb[91].mxu1 }
 0x426   :  { %v7182_v43 = vadd.f32 %v7181_v55, %v7180_v57 }
 0x42a   :  { %v7183_v56 = vpop.f32.mrb[92].mxu1 }
 0x42b   :  { %v7184_v44 = vpop.f32.mrb[93].mxu1 }
 0x42c   :  { %v7185_v46 = vadd.f32 %v7184_v44, %v7183_v56  ;;  %v7186_v19 = vpop.f32.mrb[94].mxu1 }
 0x42d   :  { %v7187_v24 = vpop.f32.mrb[95].mxu1 }
 0x42e   :  { %v7188_v37 = vadd.f32 %v7187_v24, %v7186_v19 }
 0x432   :  { %v7189_v48 = vpop.f32.mrb[96].mxu1 }
 0x433   :  { %v7190_v32 = vpop.f32.mrb[97].mxu1 }
 0x434   :  { %v7191_v62 = vadd.f32 %v7190_v32, %v7189_v48  ;;  %v7192_v13 = vpop.f32.mrb[98].mxu1 }
 0x435   :  { %v7193_v54 = vpop.f32.mrb[99].mxu1 }
 0x436   :  { %v7194_v15 = vadd.f32 %v7193_v54, %v7192_v13 }
 0x43a   :  { %v7195_v60 = vpop.f32.mrb[100].mxu1 }
 0x43b   :  { %v7196_v51 = vpop.f32.mrb[101].mxu1 }
 0x43c   :  { %v7197_v14 = vadd.f32 %v7196_v51, %v7195_v60  ;;  %v7198_v21 = vpop.f32.mrb[102].mxu1 }
 0x43d   :  { %v7199_v7 = vpop.f32.mrb[103].mxu1 }
 0x43e   :  { %v7200_v40 = vadd.f32 %v7199_v7, %v7198_v21 }
 0x442   :  { %v7201_v41 = vpop.f32.mrb[104].mxu1 }
 0x443   :  { %v7202_v6 = vpop.f32.mrb[105].mxu1 }
 0x444   :  { %v7203_v9 = vadd.f32 %v7202_v6, %v7201_v41  ;;  %v7204_v3 = vpop.f32.mrb[106].mxu1 }
 0x445   :  { %v7205_v42 = vpop.f32.mrb[107].mxu1 }
 0x44a   :  { %v7223_v0 = vpop.f32.mrb[108].mxu1 }
 0x44b   :  { %v7224_v39 = vpop.f32.mrb[109].mxu1 }
 0x44c   :  { %v7225_v53 = vadd.f32 %v7224_v39, %v7223_v0  ;;  %v7226_v29 = vpop.f32.mrb[110].mxu1 }
 0x44d   :  { %v7227_v25 = vpop.f32.mrb[111].mxu1 }
 0x44e   :  { %v3262_v33 = vadd.f32 %v7225_v53, %v7167_v47  ;;  %v7228_v2 = vadd.f32 %v7227_v25, %v7226_v29 }
 0x450   :  { %v3265_v20 = vadd.f32 %v7228_v2, %v7170_v36 }
 0x452   :  { %v7229_v38 = vpop.f32.mrb[112].mxu1 }
 0x453   :  { %v7230_v1 = vpop.f32.mrb[113].mxu1 }
 0x454   :  { %v7231_v52 = vadd.f32 %v7230_v1, %v7229_v38  ;;  %v7232_v11 = vpop.f32.mrb[114].mxu1 }
 0x455   :  { %v7233_v61 = vpop.f32.mrb[115].mxu1 }
 0x456   :  { %v3270_v27 = vadd.f32 %v7231_v52, %v7173_v49  ;;  %v7234_v26 = vadd.f32 %v7233_v61, %v7232_v11 }
 0x458   :  { %v3273_v31 = vadd.f32 %v7234_v26, %v7176_v50 }
 0x45a   :  { %v7235_v58 = vpop.f32.mrb[116].mxu1 }
 0x45b   :  { %v7236_v4 = vpop.f32.mrb[117].mxu1 }
 0x45c   :  { %v7237_v59 = vadd.f32 %v7236_v4, %v7235_v58  ;;  %v7238_v22 = vpop.f32.mrb[118].mxu1 }
 0x45d   :  { %v7239_v23 = vpop.f32.mrb[119].mxu1 }
 0x45e   :  { %v3278_v5 = vadd.f32 %v7237_v59, %v7179_v12  ;;  %v7240_v28 = vadd.f32 %v7239_v23, %v7238_v22 }
 0x460   :  { %v3281_v8 = vadd.f32 %v7240_v28, %v7182_v43 }
 0x462   :  { %v7241_v63 = vpop.f32.mrb[120].mxu1 }
 0x463   :  { %v7242_v47 = vpop.f32.mrb[121].mxu1 }
 0x464   :  { %v7243_v34 = vadd.f32 %v7242_v47, %v7241_v63  ;;  %v7244_v36 = vpop.f32.mrb[122].mxu1 }
 0x465   :  { %v7245_v18 = vpop.f32.mrb[123].mxu1 }
 0x466   :  { %v3286_v30 = vadd.f32 %v7243_v34, %v7185_v46  ;;  %v7246_v57 = vadd.f32 %v7245_v18, %v7244_v36 }
 0x468   :  { %v3289_v55 = vadd.f32 %v7246_v57, %v7188_v37 }
 0x46a   :  { %v7247_v56 = vpop.f32.mrb[124].mxu1 }
 0x46b   :  { %v7248_v49 = vpop.f32.mrb[125].mxu1 }
 0x46c   :  { %v7249_v44 = vadd.f32 %v7248_v49, %v7247_v56  ;;  %v7250_v50 = vpop.f32.mrb[126].mxu1 }
 0x46d   :  { %v7251_v19 = vpop.f32.mrb[127].mxu1 }
 0x46e   :  { %v3294_v24 = vadd.f32 %v7249_v44, %v7191_v62  ;;  %v7252_v48 = vadd.f32 %v7251_v19, %v7250_v50 }
 0x470   :  { %v3297_v32 = vadd.f32 %v7252_v48, %v7194_v15 }
 0x472   :  { %v7253_v13 = vpop.f32.mrb[128].mxu1 }
 0x473   :  { %v7254_v12 = vpop.f32.mrb[129].mxu1 }
 0x474   :  { %v7255_v54 = vadd.f32 %v7254_v12, %v7253_v13  ;;  %v7256_v43 = vpop.f32.mrb[130].mxu1 }
 0x475   :  { %v7257_v60 = vpop.f32.mrb[131].mxu1 }
 0x476   :  { %v8818_v51 = vadd.f32 %v7255_v54, %v7197_v14  ;;  %v7258_v21 = vadd.f32 %v7257_v60, %v7256_v43  ;;  %v1790_v54 = vpop.permute.xlu0 %1789 }
 0x478   :  { %v8820_v7 = vadd.f32 %v7258_v21, %v7200_v40  ;;  %v9527_v21 = vmov 0  }
 0x479   :  { %176 = vst.msk [vmem:[#allocation3] sm:$0xff] %vm175_vm7, %v9527_v21  ;;  %183 = vst.msk [vmem:[#allocation3 + $0x38] sm:$0xff] %vm175_vm7, %v9527_v21 }
 0x47a   :  { %v7259_v46 = vpop.f32.mrb[132].mxu1  ;;  %191 = vst.msk [vmem:[#allocation3 + $0x78] sm:$0xff] %vm175_vm7, %v9527_v21  ;;  %177 = vst.msk [vmem:[#allocation3 + $0x8] sm:$0xff] %vm175_vm7, %v9527_v21 }
 0x47b   :  { %v7260_v37 = vpop.f32.mrb[133].mxu1  ;;  %178 = vst.msk [vmem:[#allocation3 + $0x10] sm:$0xff] %vm175_vm7, %v9527_v21  ;;  %179 = vst.msk [vmem:[#allocation3 + $0x18] sm:$0xff] %vm175_vm7, %v9527_v21 }
 0x47c   :  { %v7261_v41 = vadd.f32 %v7260_v37, %v7259_v46  ;;  %v7262_v6 = vpop.f32.mrb[134].mxu1  ;;  %180 = vst.msk [vmem:[#allocation3 + $0x20] sm:$0xff] %vm175_vm7, %v9527_v21  ;;  %181 = vst.msk [vmem:[#allocation3 + $0x28] sm:$0xff] %vm175_vm7, %v9527_v21  ;;  %v1792_v46 = vpop.permute.xlu0 %1791 }
 0x47d   :  { %v7263_v3 = vpop.f32.mrb[135].mxu1  ;;  %182 = vst.msk [vmem:[#allocation3 + $0x30] sm:$0xff] %vm175_vm7, %v9527_v21  ;;  %184 = vst.msk [vmem:[#allocation3 + $0x40] sm:$0xff] %vm175_vm7, %v9527_v21  ;;  %v1794_v6 = vpop.permute.xlu1 %1793 }
 0x47e   :  { %v8822_v42 = vadd.f32 %v7261_v41, %v7203_v9  ;;  %185 = vst.msk [vmem:[#allocation3 + $0x48] sm:$0xff] %vm175_vm7, %v9527_v21  ;;  %186 = vst.msk [vmem:[#allocation3 + $0x50] sm:$0xff] %vm175_vm7, %v9527_v21 }
 0x47f   :  { %187 = vst.msk [vmem:[#allocation3 + $0x58] sm:$0xff] %vm175_vm7, %v9527_v21  ;;  %188 = vst.msk [vmem:[#allocation3 + $0x60] sm:$0xff] %vm175_vm7, %v9527_v21 }
 0x480   :  { %189 = vst.msk [vmem:[#allocation3 + $0x68] sm:$0xff] %vm175_vm7, %v9527_v21  ;;  %190 = vst.msk [vmem:[#allocation3 + $0x70] sm:$0xff] %vm175_vm7, %v9527_v21 }
 0x482   :  { %v7281_v62 = vpop.f32.mrb[136].mxu1 }
 0x483   :  { %v7282_v0 = vpop.f32.mrb[137].mxu1 }
 0x484   :  { %v7283_v15 = vadd.f32 %v7282_v0, %v7281_v62  ;;  %v7284_v39 = vpop.f32.mrb[138].mxu1  ;;  %v8915_v0 = vmax.f32 %v8443_v45, %v1794_v6  ;;  %v9528_v45 = vld [vmem:[#allocation26_spill] sm:$0xff] }
 0x485   :  { %v7285_v53 = vpop.f32.mrb[139].mxu1 }
 0x486   :  { %v8824_v29 = vadd.f32 %v7283_v15, %v3262_v33  ;;  %v7286_v25 = vadd.f32 %v7285_v53, %v7284_v39  ;;  %v1798_v15 = vpop.permute.xlu0 %1797  ;;  %v1796_v39 = vpop.permute.xlu1 %1795 }
 0x488   :  { %v8826_v14 = vadd.f32 %v7286_v25, %v3265_v20  ;;  %3573 = vrot.lane.b32.xlu1 %v8824_v29, %s7719_s0  ;;  %v8930_v25 = vmax.f32 %v9528_v45, %v1796_v39 }
 0x48a   :  { %v7287_v40 = vpop.f32.mrb[140].mxu1  ;;  %3575 = vrot.lane.b32.xlu0 %v8826_v14, %s7719_s0  ;;  %v1802_v53 = vpop.permute.xlu0 %1801 }
 0x48b   :  { %v7288_v2 = vpop.f32.mrb[141].mxu1 }
 0x48c   :  { %v7289_v9 = vadd.f32 %v7288_v2, %v7287_v40  ;;  %v7290_v38 = vpop.f32.mrb[142].mxu1  ;;  %v1800_v40 = vpop.permute.xlu1 %1799 }
 0x48d   :  { %v7291_v1 = vpop.f32.mrb[143].mxu1 }
 0x48e   :  { %v8832_v52 = vadd.f32 %v7289_v9, %v3270_v27  ;;  %v7292_v11 = vadd.f32 %v7291_v1, %v7290_v38  ;;  %v1806_v9 = vpop.permute.xlu0 %1805 }
 0x490   :  { %v8834_v61 = vadd.f32 %v7292_v11, %v3273_v31  ;;  %3577 = vrot.lane.b32.xlu1 %v8832_v52, %s7719_s0  ;;  %v1804_v1 = vpop.permute.xlu1 %1803  ;;  %v9531_v11 = vld [vmem:[#allocation30_spill] sm:$0xff] }
 0x492   :  { %v7293_v33 = vpop.f32.mrb[144].mxu1  ;;  %3579 = vrot.lane.b32.xlu0 %v8834_v61, %s7719_s0 }
 0x493   :  { %v7294_v20 = vpop.f32.mrb[145].mxu1 }
 0x494   :  { %v7295_v26 = vadd.f32 %v7294_v20, %v7293_v33  ;;  %v7296_v58 = vpop.f32.mrb[146].mxu1  ;;  %v8945_v33 = vmax.f32 %v9531_v11, %v1806_v9  ;;  %v1810_v20 = vpop.permute.xlu0 %1809 }
 0x495   :  { %v7297_v4 = vpop.f32.mrb[147].mxu1 }
 0x496   :  { %v8840_v59 = vadd.f32 %v7295_v26, %v3278_v5  ;;  %v7298_v22 = vadd.f32 %v7297_v4, %v7296_v58  ;;  %v9532_v26 = vld [vmem:[#allocation29_spill] sm:$0xff]  ;;  %v1808_v4 = vpop.permute.xlu1 %1807 }
 0x497   :  { %v8950_v58 = vmax.f32 %v9532_v26, %v1804_v1 }
 0x498   :  { %v8842_v23 = vadd.f32 %v7298_v22, %v3281_v8  ;;  %3581 = vrot.lane.b32.xlu1 %v8840_v59, %s7719_s0  ;;  %v9533_v22 = vld [vmem:[#allocation32_spill] sm:$0xff] }
 0x49a   :  { %v7299_v27 = vpop.f32.mrb[148].mxu1  ;;  %3583 = vrot.lane.b32.xlu0 %v8842_v23, %s7719_s0 }
 0x49b   :  { %v7300_v31 = vpop.f32.mrb[149].mxu1 }
 0x49c   :  { %v7301_v28 = vadd.f32 %v7300_v31, %v7299_v27  ;;  %v7302_v63 = vpop.f32.mrb[150].mxu1  ;;  %v8955_v27 = vmax.f32 %v9533_v22, %v1810_v20  ;;  %v1814_v31 = vpop.permute.xlu0 %1813 }
 0x49d   :  { %v7303_v47 = vpop.f32.mrb[151].mxu1 }
 0x49e   :  { %v8848_v34 = vadd.f32 %v7301_v28, %v3286_v30  ;;  %v7304_v36 = vadd.f32 %v7303_v47, %v7302_v63  ;;  %v9534_v28 = vld [vmem:[#allocation31_spill] sm:$0xff]  ;;  %v1812_v47 = vpop.permute.xlu1 %1811 }
 0x49f   :  { %v8960_v63 = vmax.f32 %v9534_v28, %v1808_v4 }
 0x4a0   :  { %v8850_v18 = vadd.f32 %v7304_v36, %v3289_v55  ;;  %3585 = vrot.lane.b32.xlu1 %v8848_v34, %s7719_s0  ;;  %v8965_v36 = vmax.f32 %v8663_v17, %v1814_v31 }
 0x4a2   :  { %v7305_v5 = vpop.f32.mrb[152].mxu1  ;;  %3587 = vrot.lane.b32.xlu0 %v8850_v18, %s7719_s0 }
 0x4a3   :  { %v7306_v8 = vpop.f32.mrb[153].mxu1 }
 0x4a4   :  { %v7307_v57 = vadd.f32 %v7306_v8, %v7305_v5  ;;  %v7308_v56 = vpop.f32.mrb[154].mxu1  ;;  %v9535_v5 = vld [vmem:[#allocation33_spill] sm:$0xff] }
 0x4a5   :  { %v7309_v49 = vpop.f32.mrb[155].mxu1  ;;  %v8970_v8 = vmax.f32 %v9535_v5, %v1812_v47 }
 0x4a6   :  { %v8856_v44 = vadd.f32 %v7307_v57, %v3294_v24  ;;  %v7310_v50 = vadd.f32 %v7309_v49, %v7308_v56 }
 0x4a8   :  { %v8858_v19 = vadd.f32 %v7310_v50, %v3297_v32  ;;  %3589 = vrot.lane.b32.xlu1 %v8856_v44, %s7719_s0 }
 0x4aa   :  { %v7311_v30 = vpop.f32.mrb[156].mxu1  ;;  %3591 = vrot.lane.b32.xlu0 %v8858_v19, %s7719_s0 }
 0x4ab   :  { %v7312_v55 = vpop.f32.mrb[157].mxu1 }
 0x4ac   :  { %v7313_v48 = vadd.f32 %v7312_v55, %v7311_v30  ;;  %v7314_v13 = vpop.f32.mrb[158].mxu1 }
 0x4ad   :  { %v7315_v12 = vpop.f32.mrb[159].mxu1 }
 0x4ae   :  { %v8865_v43 = vadd.f32 %v7313_v48, %v8818_v51  ;;  %v7316_v24 = vadd.f32 %v7315_v12, %v7314_v13 }
 0x4b0   :  { %v8868_v60 = vadd.f32 %v7316_v24, %v8820_v7  ;;  %3593 = vrot.lane.b32.xlu1 %v8865_v43, %s7719_s0  ;;  %v8907_v7 = vmax.f32 %v8423_v10, %v1790_v54  ;;  %v8920_v10 = vmax.f32 %v8427_v16, %v1792_v46  ;;  %v9529_v16 = vld [vmem:[#allocation28_spill] sm:$0xff] }
 0x4b1   :  { %v8935_v2 = vmax.f32 %v9529_v16, %v1802_v53 }
 0x4b2   :  { %v7317_v32 = vpop.f32.mrb[160].mxu1  ;;  %3595 = vrot.lane.b32.xlu0 %v8868_v60, %s7719_s0 }
 0x4b3   :  { %v7318_v51 = vpop.f32.mrb[161].mxu1 }
 0x4b4   :  { %v7319_v37 = vadd.f32 %v7318_v51, %v7317_v32  ;;  %v7320_v41 = vpop.f32.mrb[162].mxu1 }
 0x4b5   :  { %v7321_v3 = vpop.f32.mrb[163].mxu1 }
 0x4b6   :  { %v8910_v62 = vadd.f32 %v7319_v37, %v8822_v42  ;;  %1854 = vrot.lane.b32.xlu0 %v8907_v7, %s7703_s11  ;;  %v8925_v42 = vmax.f32 %v8487_v35, %v1798_v15  ;;  %v9530_v35 = vld [vmem:[#allocation27_spill] sm:$0xff]  ;;  %v9040_v3 = vld [vmem:[#allocation12] ss:$0 sm:$0xff] }
 0x4b7   :  { %v8940_v38 = vmax.f32 %v9530_v35, %v1800_v40 }
 0x4b8   :  { %3597 = vrot.lane.b32.xlu1 %v8910_v62, %s7719_s0 }
 0x4ba   :  { %1858 = vrot.lane.b32.xlu0 %v8915_v0, %s7703_s11 }
 0x4bc   :  { %1856 = vrot.lane.b32.xlu1 %v8920_v10, %s7703_s11 }
 0x4be   :  { %1862 = vrot.lane.b32.xlu0 %v8925_v42, %s7703_s11 }
 0x4c0   :  { %1860 = vrot.lane.b32.xlu1 %v8930_v25, %s7703_s11 }
 0x4c2   :  { %1866 = vrot.lane.b32.xlu0 %v8935_v2, %s7703_s11 }
 0x4c4   :  { %1864 = vrot.lane.b32.xlu1 %v8940_v38, %s7703_s11 }
 0x4c6   :  { %1870 = vrot.lane.b32.xlu0 %v8945_v33, %s7703_s11 }
 0x4c8   :  { %1868 = vrot.lane.b32.xlu1 %v8950_v58, %s7703_s11 }
 0x4ca   :  { %1874 = vrot.lane.b32.xlu0 %v8955_v27, %s7703_s11 }
 0x4cc   :  { %1872 = vrot.lane.b32.xlu1 %v8960_v63, %s7703_s11 }
 0x4ce   :  { %1878 = vrot.lane.b32.xlu0 %v8965_v36, %s7703_s11 }
 0x4d0   :  { %1876 = vrot.lane.b32.xlu1 %v8970_v8, %s7703_s11 }
 0x4fa   :  { %v3574_v57 = vpop.permute.xlu1 %3573 }
 0x4fb   :  { %v8977_v56 = vmax.f32 %v8824_v29, %v3574_v57 }
 0x4fc   :  { %v3576_v49 = vpop.permute.xlu0 %3575 }
 0x4fd   :  { %v8980_v17 = vmax.f32 %v8826_v14, %v3576_v49  ;;  %3638 = vrot.lane.b32.xlu1 %v8977_v56, %s7703_s11 }
 0x4ff   :  { %3640 = vrot.lane.b32.xlu0 %v8980_v17, %s7703_s11 }
 0x502   :  { %v3578_v50 = vpop.permute.xlu1 %3577 }
 0x503   :  { %v8987_v30 = vmax.f32 %v8832_v52, %v3578_v50 }
 0x504   :  { %v3580_v55 = vpop.permute.xlu0 %3579 }
 0x505   :  { %v8990_v48 = vmax.f32 %v8834_v61, %v3580_v55  ;;  %3642 = vrot.lane.b32.xlu1 %v8987_v30, %s7703_s11 }
 0x507   :  { %3644 = vrot.lane.b32.xlu0 %v8990_v48, %s7703_s11 }
 0x50a   :  { %v3582_v29 = vpop.permute.xlu1 %3581 }
 0x50b   :  { %v8997_v14 = vmax.f32 %v8840_v59, %v3582_v29 }
 0x50c   :  { %v3584_v13 = vpop.permute.xlu0 %3583 }
 0x50d   :  { %v9000_v12 = vmax.f32 %v8842_v23, %v3584_v13  ;;  %3646 = vrot.lane.b32.xlu1 %v8997_v14, %s7703_s11 }
 0x50f   :  { %3648 = vrot.lane.b32.xlu0 %v9000_v12, %s7703_s11 }
 0x512   :  { %v3586_v52 = vpop.permute.xlu1 %3585 }
 0x513   :  { %v9007_v61 = vmax.f32 %v8848_v34, %v3586_v52 }
 0x514   :  { %v3588_v54 = vpop.permute.xlu0 %3587 }
 0x515   :  { %v9010_v24 = vmax.f32 %v8850_v18, %v3588_v54  ;;  %3650 = vrot.lane.b32.xlu1 %v9007_v61, %s7703_s11 }
 0x517   :  { %3652 = vrot.lane.b32.xlu0 %v9010_v24, %s7703_s11 }
 0x51a   :  { %v3590_v59 = vpop.permute.xlu1 %3589 }
 0x51b   :  { %v9017_v23 = vmax.f32 %v8856_v44, %v3590_v59 }
 0x51c   :  { %v3592_v32 = vpop.permute.xlu0 %3591 }
 0x51d   :  { %v9020_v51 = vmax.f32 %v8858_v19, %v3592_v32  ;;  %3654 = vrot.lane.b32.xlu1 %v9017_v23, %s7703_s11 }
 0x51f   :  { %3656 = vrot.lane.b32.xlu0 %v9020_v51, %s7703_s11 }
 0x522   :  { %v3594_v34 = vpop.permute.xlu1 %3593 }
 0x523   :  { %v9027_v18 = vmax.f32 %v8865_v43, %v3594_v34 }
 0x524   :  { %v3596_v46 = vpop.permute.xlu0 %3595 }
 0x525   :  { %v9030_v37 = vmax.f32 %v8868_v60, %v3596_v46  ;;  %3658 = vrot.lane.b32.xlu1 %v9027_v18, %s7703_s11 }
 0x527   :  { %3660 = vrot.lane.b32.xlu0 %v9030_v37, %s7703_s11 }
 0x528   :  { %v1855_v44 = vpop.permute.xlu0 %1854 }
 0x529   :  { %v1893_v41 = vmax.f32 %v8907_v7, %v1855_v44 }
 0x52a   :  { %v3598_v19 = vpop.permute.xlu1 %3597 }
 0x52b   :  { %v9038_v6 = vmax.f32 %v8910_v62, %v3598_v19  ;;  %v1913_v39 = vadd.f32 %v9040_v3, %v1893_v41 }
 0x52c   :  { %v1859_v43 = vpop.permute.xlu0 %1858 }
 0x52d   :  { %3662 = vrot.lane.b32.xlu1 %v9038_v6, %s7703_s11  ;;  %v1895_v60 = vmax.f32 %v8915_v0, %v1859_v43  ;;  %v1926_v16 = vmax.f32 %v1913_v39, 0.0 }
 0x52e   :  { %v1857_v15 = vpop.permute.xlu1 %1856 }
 0x52f   :  { %v1894_v53 = vmax.f32 %v8920_v10, %v1857_v15  ;;  %v1915_v7 = vadd.f32 %v9040_v3, %v1895_v60 }
 0x530   :  { %v1863_v45 = vpop.permute.xlu0 %1862 }
 0x531   :  { %v1914_v40 = vadd.f32 %v9040_v3, %v1894_v53  ;;  %v1897_v35 = vmax.f32 %v8925_v42, %v1863_v45  ;;  %v1928_v26 = vmax.f32 %v1915_v7, 0.0 }
 0x532   :  { %v1861_v62 = vpop.permute.xlu1 %1860 }
 0x533   :  { %v1927_v9 = vmax.f32 %v1914_v40, 0.0  ;;  %v1896_v1 = vmax.f32 %v8930_v25, %v1861_v62  ;;  %v1917_v10 = vadd.f32 %v9040_v3, %v1897_v35 }
 0x534   :  { %v1867_v11 = vpop.permute.xlu0 %1866 }
 0x535   :  { %v1939_v20 = vpack.c.bf16 %v1927_v9, %v1926_v16  ;;  %v1916_v0 = vadd.f32 %v9040_v3, %v1896_v1  ;;  %v1899_v31 = vmax.f32 %v8935_v2, %v1867_v11  ;;  %v1930_v49 = vmax.f32 %v1917_v10, 0.0 }
 0x536   :  { %v1865_v4 = vpop.permute.xlu1 %1864 }
 0x537   :  { %1946 = vst.msk [vmem:[#allocation3] sm:$0xff] %vm175_vm7, %v1939_v20  ;;  %v1929_v22 = vmax.f32 %v1916_v0, 0.0  ;;  %v1898_v28 = vmax.f32 %v8940_v38, %v1865_v4  ;;  %v1919_v50 = vadd.f32 %v9040_v3, %v1899_v31 }
 0x538   :  { %v1871_v47 = vpop.permute.xlu0 %1870 }
 0x539   :  { %v1940_v5 = vpack.c.bf16 %v1929_v22, %v1928_v26  ;;  %v1918_v42 = vadd.f32 %v9040_v3, %v1898_v28  ;;  %v1901_v25 = vmax.f32 %v8945_v33, %v1871_v47  ;;  %v1932_v59 = vmax.f32 %v1919_v50, 0.0 }
 0x53a   :  { %v1869_v57 = vpop.permute.xlu1 %1868 }
 0x53b   :  { %1947 = vst.msk [vmem:[#allocation3 + $0x8] sm:$0xff] %vm175_vm7, %v1940_v5  ;;  %v1931_v55 = vmax.f32 %v1918_v42, 0.0  ;;  %v1900_v29 = vmax.f32 %v8950_v58, %v1869_v57  ;;  %v1921_v38 = vadd.f32 %v9040_v3, %v1901_v25 }
 0x53c   :  { %v1875_v13 = vpop.permute.xlu0 %1874 }
 0x53d   :  { %v1941_v52 = vpack.c.bf16 %v1931_v55, %v1930_v49  ;;  %v1920_v2 = vadd.f32 %v9040_v3, %v1900_v29  ;;  %v1903_v32 = vmax.f32 %v8955_v27, %v1875_v13  ;;  %v1934_v41 = vmax.f32 %v1921_v38, 0.0 }
 0x53e   :  { %v1873_v54 = vpop.permute.xlu1 %1872 }
 0x53f   :  { %1948 = vst.msk [vmem:[#allocation3 + $0x10] sm:$0xff] %vm175_vm7, %v1941_v52  ;;  %v1933_v33 = vmax.f32 %v1920_v2, 0.0  ;;  %v1902_v34 = vmax.f32 %v8960_v63, %v1873_v54  ;;  %v1923_v60 = vadd.f32 %v9040_v3, %v1903_v32 }
 0x540   :  { %v1879_v46 = vpop.permute.xlu0 %1878 }
 0x541   :  { %v1942_v44 = vpack.c.bf16 %v1933_v33, %v1932_v59  ;;  %v1922_v19 = vadd.f32 %v9040_v3, %v1902_v34  ;;  %v1905_v58 = vmax.f32 %v8965_v36, %v1879_v46  ;;  %v1936_v40 = vmax.f32 %v1923_v60, 0.0 }
 0x542   :  { %v1877_v43 = vpop.permute.xlu1 %1876 }
 0x543   :  { %1949 = vst.msk [vmem:[#allocation3 + $0x18] sm:$0xff] %vm175_vm7, %v1942_v44  ;;  %v1935_v15 = vmax.f32 %v1922_v19, 0.0  ;;  %v1925_v39 = vadd.f32 %v9040_v3, %v1905_v58  ;;  %v1904_v53 = vmax.f32 %v8970_v8, %v1877_v43 }
 0x545   :  { %v1943_v27 = vpack.c.bf16 %v1935_v15, %v1934_v41  ;;  %v1938_v45 = vmax.f32 %v1925_v39, 0.0  ;;  %v1924_v63 = vadd.f32 %v9040_v3, %v1904_v53 }
 0x547   :  { %1950 = vst.msk [vmem:[#allocation3 + $0x20] sm:$0xff] %vm175_vm7, %v1943_v27  ;;  %v1945_v36 = vpack.c.bf16 %v1938_v45, %v1938_v45  ;;  %v1937_v7 = vmax.f32 %v1924_v63, 0.0 }
 0x549   :  { %1953 = vst.msk [vmem:[#allocation3 + $0x30] sm:$0x3] %vm1952_vm8, %v1945_v36  ;;  %v1944_v62 = vpack.c.bf16 %v1937_v7, %v1936_v40 }
 0x54b   :  { %1951 = vst.msk [vmem:[#allocation3 + $0x28] sm:$0xff] %vm175_vm7, %v1944_v62 }
 0x56f   :  { %v3639_v16 = vpop.permute.xlu1 %3638 }
 0x570   :  { %v3677_v9 = vmax.f32 %v8977_v56, %v3639_v16 }
 0x571   :  { %v3641_v35 = vpop.permute.xlu0 %3640 }
 0x572   :  { %v3697_v8 = vadd.f32 %v9040_v3, %v3677_v9  ;;  %v3678_v1 = vmax.f32 %v8980_v17, %v3641_v35 }
 0x574   :  { %v3698_v11 = vadd.f32 %v9040_v3, %v3678_v1  ;;  %v3710_v20 = vmax.f32 %v3697_v8, 0.0 }
 0x576   :  { %v3711_v0 = vmax.f32 %v3698_v11, 0.0 }
 0x577   :  { %v3643_v26 = vpop.permute.xlu1 %3642 }
 0x578   :  { %v3723_v4 = vpack.c.bf16 %v3711_v0, %v3710_v20  ;;  %v3679_v10 = vmax.f32 %v8987_v30, %v3643_v26 }
 0x579   :  { %v3645_v22 = vpop.permute.xlu0 %3644 }
 0x57a   :  { %3731 = vst.msk [vmem:[#allocation3 + $0x40] sm:$0xff] %vm175_vm7, %v3723_v4  ;;  %v3699_v31 = vadd.f32 %v9040_v3, %v3679_v10  ;;  %v3680_v56 = vmax.f32 %v8990_v48, %v3645_v22 }
 0x57c   :  { %v3700_v28 = vadd.f32 %v9040_v3, %v3680_v56  ;;  %v3712_v47 = vmax.f32 %v3699_v31, 0.0 }
 0x57e   :  { %v3713_v5 = vmax.f32 %v3700_v28, 0.0 }
 0x57f   :  { %v3647_v17 = vpop.permute.xlu1 %3646 }
 0x580   :  { %v3724_v42 = vpack.c.bf16 %v3713_v5, %v3712_v47  ;;  %v3681_v25 = vmax.f32 %v8997_v14, %v3647_v17 }
 0x581   :  { %v3649_v57 = vpop.permute.xlu0 %3648 }
 0x582   :  { %3732 = vst.msk [vmem:[#allocation3 + $0x48] sm:$0xff] %vm175_vm7, %v3724_v42  ;;  %v3701_v30 = vadd.f32 %v9040_v3, %v3681_v25  ;;  %v3682_v49 = vmax.f32 %v9000_v12, %v3649_v57 }
 0x584   :  { %v3702_v50 = vadd.f32 %v9040_v3, %v3682_v49  ;;  %v3714_v55 = vmax.f32 %v3701_v30, 0.0 }
 0x586   :  { %v3715_v29 = vmax.f32 %v3702_v50, 0.0 }
 0x587   :  { %v3651_v48 = vpop.permute.xlu1 %3650 }
 0x588   :  { %v3725_v13 = vpack.c.bf16 %v3715_v29, %v3714_v55  ;;  %v3683_v52 = vmax.f32 %v9007_v61, %v3651_v48 }
 0x589   :  { %v3653_v2 = vpop.permute.xlu0 %3652 }
 0x58a   :  { %3733 = vst.msk [vmem:[#allocation3 + $0x50] sm:$0xff] %vm175_vm7, %v3725_v13  ;;  %v3703_v14 = vadd.f32 %v9040_v3, %v3683_v52  ;;  %v3684_v38 = vmax.f32 %v9010_v24, %v3653_v2 }
 0x58c   :  { %v3704_v54 = vadd.f32 %v9040_v3, %v3684_v38  ;;  %v3716_v59 = vmax.f32 %v3703_v14, 0.0 }
 0x58e   :  { %v3717_v33 = vmax.f32 %v3704_v54, 0.0 }
 0x58f   :  { %v3655_v12 = vpop.permute.xlu1 %3654 }
 0x590   :  { %v3726_v32 = vpack.c.bf16 %v3717_v33, %v3716_v59  ;;  %v3685_v34 = vmax.f32 %v9017_v23, %v3655_v12 }
 0x591   :  { %v3657_v46 = vpop.permute.xlu0 %3656 }
 0x592   :  { %3734 = vst.msk [vmem:[#allocation3 + $0x58] sm:$0xff] %vm175_vm7, %v3726_v32  ;;  %v3705_v61 = vadd.f32 %v9040_v3, %v3685_v34  ;;  %v3686_v44 = vmax.f32 %v9020_v51, %v3657_v46 }
 0x594   :  { %v3706_v19 = vadd.f32 %v9040_v3, %v3686_v44  ;;  %v3718_v58 = vmax.f32 %v3705_v61, 0.0 }
 0x596   :  { %v3719_v41 = vmax.f32 %v3706_v19, 0.0 }
 0x597   :  { %v3659_v24 = vpop.permute.xlu1 %3658 }
 0x598   :  { %v3727_v43 = vpack.c.bf16 %v3719_v41, %v3718_v58  ;;  %v3687_v60 = vmax.f32 %v9027_v18, %v3659_v24 }
 0x599   :  { %v3661_v15 = vpop.permute.xlu0 %3660 }
 0x59a   :  { %3735 = vst.msk [vmem:[#allocation3 + $0x60] sm:$0xff] %vm175_vm7, %v3727_v43  ;;  %v3707_v23 = vadd.f32 %v9040_v3, %v3687_v60  ;;  %v3688_v39 = vmax.f32 %v9030_v37, %v3661_v15 }
 0x59c   :  { %v3708_v53 = vadd.f32 %v9040_v3, %v3688_v39  ;;  %v3720_v27 = vmax.f32 %v3707_v23, 0.0 }
 0x59e   :  { %v3721_v45 = vmax.f32 %v3708_v53, 0.0 }
 0x59f   :  { %v3663_v51 = vpop.permute.xlu1 %3662 }
 0x5a0   :  { %v3728_v63 = vpack.c.bf16 %v3721_v45, %v3720_v27  ;;  %v3689_v40 = vmax.f32 %v9038_v6, %v3663_v51 }
 0x5a2   :  { %3736 = vst.msk [vmem:[#allocation3 + $0x68] sm:$0xff] %vm175_vm7, %v3728_v63  ;;  %v3709_v36 = vadd.f32 %v9040_v3, %v3689_v40 }
 0x5a4   :  { %v3722_v18 = vmax.f32 %v3709_v36, 0.0 }
 0x5a6   :  { %v3729_v7 = vpack.c.bf16 %v3722_v18, %v3722_v18 }
 0x5a8   :  { %3737 = vst.msk [vmem:[#allocation3 + $0x70] sm:$0x3] %vm1952_vm8, %v3729_v7 }
 0x5a9   :  { %7698 = dma.done.wait [#allocation5], 65536 }
 0x5aa   :  { %7699 = vsyncadd [#allocation5], 4294901760  ;;  %4374 = vmatprep.mubr.bf16.mxu0 %v9527_v21  ;;  %4435 = vmatprep.mubr.bf16.mxu1 %v9527_v21  ;;  %v3750_v37 = vld [vmem:[#allocation3 + $0x40] sm:$0xff]  ;;  %v3752_v62 = vld [vmem:[#allocation3 + $0x50] sm:$0xff]  ;;  %s7720_s11 = smov 32   ;;  %vm6787_vm9 = vcmask 1041408  }
 0x5ab   :  { %3766 = vrot.lane.b32.xlu0 %v3750_v37, %s7720_s11  ;;  %3770 = vrot.lane.b32.xlu1 %v3752_v62, %s7720_s11  ;;  %v3751_v6 = vld [vmem:[#allocation3 + $0x48] sm:$0xff]  ;;  %v3753_v16 = vld [vmem:[#allocation3 + $0x58] sm:$0xff]  ;;  %v3754_v3 = vld [vmem:[#allocation3 + $0x60] sm:$0xff]  ;;  %vm6788_vm10 = vcmask 584706   ;;  %s7722_s20 = smov [#allocation15]  }
 0x5ac   :  { %v3755_v9 = vld [vmem:[#allocation3 + $0x68] sm:$0xff]  ;;  %v3757_v8 = vld [vmem:[#allocation3 + $0x78] sm:$0xff]  ;;  %v3814_v11 = vld [vmem:[#allocation4] sm:$0xff]  ;;  %s6797_s21 = sshll.u32 %s7722_s20, 4  ;;  %s6798_s21 = int_to_ptr.vmem [resolvable:$true] %s6797_s21 }
 0x5ad   :  { %v3815_v1 = vld [vmem:[#allocation4 + $0x8] sm:$0xff]  ;;  %v3817_v20 = vld [vmem:[#allocation4 + $0x18] sm:$0xff]  ;;  %v3816_v0 = vld [vmem:[#allocation4 + $0x10] sm:$0xff]  ;;  %s7670_s22 = scalar_lea.vmem %s6798_s21, 64  ;;  %p7675_p13 = scmp.lt.s32.totalorder %s6798_s21, %s6798_s21 }
 0x5ae   :  { %4342 = vmatprep.subr.bf16.mxu0 %v3815_v1  ;;  %4403 = vmatprep.subr.bf16.mxu1 %v3817_v20  ;;  %v3879_v26 = vld [vmem:[#allocation4 + $0x208] sm:$0xff]  ;;  %v3881_v4 = vld [vmem:[#allocation4 + $0x218] sm:$0xff]  ;;  %v3878_v10 = vld [vmem:[#allocation4 + $0x200] sm:$0xff]  ;;  %p7671_p12 = scmp.ne.s32.totalorder %s6798_s21, %s7670_s22  ;;  %p7676_p0 = scmp.lt.s32.totalorder %s7670_s22, %s7670_s22 }
 0x5af   :  { %3768 = vrot.lane.b32.xlu0 %v3751_v6, %s7720_s11  ;;  %3772 = vrot.lane.b32.xlu1 %v3753_v16, %s7720_s11  ;;  %v3756_v35 = vld [vmem:[#allocation3 + $0x70] sm:$0xff]  ;;  %v3943_v31 = vld [vmem:[#allocation4 + $0x408] sm:$0xff]  ;;  %v3945_v56 = vld [vmem:[#allocation4 + $0x418] sm:$0xff] }
 0x5b0   :  { %4343 = vmatpush1.bf16.msra.mxu0 %v3814_v11  ;;  %4404 = vmatpush1.bf16.msra.mxu1 %v3816_v0  ;;  %v3880_v22 = vld [vmem:[#allocation4 + $0x210] sm:$0xff]  ;;  %v3942_v28 = vld [vmem:[#allocation4 + $0x400] sm:$0xff]  ;;  %v4007_v5 = vld [vmem:[#allocation4 + $0x608] sm:$0xff]  ;;  %p7677_p1 = por %p7676_p0, %p7675_p13 }
 0x5b1   :  { %4344 = vmatprep.subr.bf16.mxu0 %v3879_v26  ;;  %4405 = vmatprep.subr.bf16.mxu1 %v3881_v4  ;;  %v3944_v47 = vld [vmem:[#allocation4 + $0x410] sm:$0xff]  ;;  %v4009_v17 = vld [vmem:[#allocation4 + $0x618] sm:$0xff]  ;;  %v4006_v42 = vld [vmem:[#allocation4 + $0x600] sm:$0xff] }
 0x5b2   :  { %v4008_v25 = vld [vmem:[#allocation4 + $0x610] sm:$0xff]  ;;  %v4071_v57 = vld [vmem:[#allocation4 + $0x808] sm:$0xff]  ;;  %v4073_v30 = vld [vmem:[#allocation4 + $0x818] sm:$0xff]  ;;  %p7678_p2 = pnand %p7677_p1, %p7671_p12 }
 0x5b3   :  { %3774 = vrot.lane.b32.xlu0 %v3754_v3, %s7720_s11  ;;  %3776 = vrot.lane.b32.xlu1 %v3755_v9, %s7720_s11  ;;  %v4070_v49 = vld [vmem:[#allocation4 + $0x800] sm:$0xff]  ;;  %v4072_v50 = vld [vmem:[#allocation4 + $0x810] sm:$0xff]  ;;  %v4135_v55 = vld [vmem:[#allocation4 + $0xa08] sm:$0xff] }
 0x5b4   :  { %4345 = vmatpush1.bf16.msra.mxu0 %v3878_v10  ;;  %4406 = vmatpush1.bf16.msra.mxu1 %v3880_v22  ;;  %v4137_v29 = vld [vmem:[#allocation4 + $0xa18] sm:$0xff]  ;;  %v4134_v48 = vld [vmem:[#allocation4 + $0xa00] sm:$0xff]  ;;  %v4136_v13 = vld [vmem:[#allocation4 + $0xa10] sm:$0xff] }
 0x5b5   :  { %4346 = vmatprep.subr.bf16.mxu0 %v3943_v31  ;;  %4407 = vmatprep.subr.bf16.mxu1 %v3945_v56  ;;  %v4199_v52 = vld [vmem:[#allocation4 + $0xc08] sm:$0xff]  ;;  %v4201_v2 = vld [vmem:[#allocation4 + $0xc18] sm:$0xff]  ;;  %v4198_v14 = vld [vmem:[#allocation4 + $0xc00] sm:$0xff] }
 0x5b6   :  { %v4200_v38 = vld [vmem:[#allocation4 + $0xc10] sm:$0xff]  ;;  %v4263_v54 = vld [vmem:[#allocation4 + $0xe08] sm:$0xff]  ;;  %v4265_v59 = vld [vmem:[#allocation4 + $0xe18] sm:$0xff] }
 0x5b7   :  { %3778 = vrot.lane.b32.xlu0 %v3756_v35, %s7720_s11  ;;  %3780 = vrot.lane.b32.xlu1 %v3757_v8, %s7720_s11  ;;  %v4262_v33 = vld [vmem:[#allocation4 + $0xe00] sm:$0xff]  ;;  %v4264_v12 = vld [vmem:[#allocation4 + $0xe10] sm:$0xff]  ;;  %v3819_v32 = vld [vmem:[#allocation4 + $0x28] sm:$0xff] }
 0x5b8   :  { %4347 = vmatpush1.bf16.msra.mxu0 %v3942_v28  ;;  %4408 = vmatpush1.bf16.msra.mxu1 %v3944_v47  ;;  %v3821_v34 = vld [vmem:[#allocation4 + $0x38] sm:$0xff]  ;;  %v3742_v46 = vld [vmem:[#allocation3] sm:$0xff]  ;;  %v3743_v19 = vld [vmem:[#allocation3 + $0x8] sm:$0xff] }
 0x5b9   :  { %4348 = vmatprep.subr.bf16.mxu0 %v4007_v5  ;;  %4409 = vmatprep.subr.bf16.mxu1 %v4009_v17  ;;  %v3744_v24 = vld [vmem:[#allocation3 + $0x10] sm:$0xff]  ;;  %v3745_v23 = vld [vmem:[#allocation3 + $0x18] sm:$0xff]  ;;  %v3746_v27 = vld [vmem:[#allocation3 + $0x20] sm:$0xff] }
 0x5ba   :  { %v3747_v63 = vld [vmem:[#allocation3 + $0x28] sm:$0xff]  ;;  %v3748_v18 = vld [vmem:[#allocation3 + $0x30] sm:$0xff]  ;;  %v3749_v62 = vld [vmem:[#allocation3 + $0x38] sm:$0xff] }
 0x5bb   :  { %v3818_v16 = vld [vmem:[#allocation4 + $0x20] sm:$0xff]  ;;  %v3820_v3 = vld [vmem:[#allocation4 + $0x30] sm:$0xff]  ;;  %v3883_v35 = vld [vmem:[#allocation4 + $0x228] sm:$0xff] }
 0x5bc   :  { %4349 = vmatpush1.bf16.msra.mxu0 %v4006_v42  ;;  %4410 = vmatpush1.bf16.msra.mxu1 %v4008_v25  ;;  %v3885_v8 = vld [vmem:[#allocation4 + $0x238] sm:$0xff]  ;;  %v3882_v1 = vld [vmem:[#allocation4 + $0x220] sm:$0xff]  ;;  %v3884_v11 = vld [vmem:[#allocation4 + $0x230] sm:$0xff] }
 0x5bd   :  { %4350 = vmatprep.subr.bf16.mxu0 %v4071_v57  ;;  %4411 = vmatprep.subr.bf16.mxu1 %v4073_v30  ;;  %v3947_v20 = vld [vmem:[#allocation4 + $0x428] sm:$0xff]  ;;  %v3949_v0 = vld [vmem:[#allocation4 + $0x438] sm:$0xff]  ;;  %v3946_v4 = vld [vmem:[#allocation4 + $0x420] sm:$0xff] }
 0x5be   :  { %v3948_v10 = vld [vmem:[#allocation4 + $0x430] sm:$0xff]  ;;  %v4011_v22 = vld [vmem:[#allocation4 + $0x628] sm:$0xff]  ;;  %v4013_v31 = vld [vmem:[#allocation4 + $0x638] sm:$0xff] }
 0x5bf   :  { %v4010_v56 = vld [vmem:[#allocation4 + $0x620] sm:$0xff]  ;;  %v4012_v28 = vld [vmem:[#allocation4 + $0x630] sm:$0xff]  ;;  %v4075_v47 = vld [vmem:[#allocation4 + $0x828] sm:$0xff] }
 0x5c0   :  { %4351 = vmatpush1.bf16.msra.mxu0 %v4070_v49  ;;  %4412 = vmatpush1.bf16.msra.mxu1 %v4072_v50  ;;  %v4077_v5 = vld [vmem:[#allocation4 + $0x838] sm:$0xff]  ;;  %v4074_v42 = vld [vmem:[#allocation4 + $0x820] sm:$0xff]  ;;  %v4076_v25 = vld [vmem:[#allocation4 + $0x830] sm:$0xff] }
 0x5c1   :  { %4352 = vmatprep.subr.bf16.mxu0 %v4135_v55  ;;  %4413 = vmatprep.subr.bf16.mxu1 %v4137_v29  ;;  %v4139_v57 = vld [vmem:[#allocation4 + $0xa28] sm:$0xff]  ;;  %v4141_v30 = vld [vmem:[#allocation4 + $0xa38] sm:$0xff]  ;;  %v4138_v49 = vld [vmem:[#allocation4 + $0xa20] sm:$0xff] }
 0x5c2   :  { %v4140_v50 = vld [vmem:[#allocation4 + $0xa30] sm:$0xff]  ;;  %v4203_v55 = vld [vmem:[#allocation4 + $0xc28] sm:$0xff]  ;;  %v4205_v29 = vld [vmem:[#allocation4 + $0xc38] sm:$0xff] }
 0x5c3   :  { %vm6789_vm11 = vmor %vm6788_vm10, %vm6787_vm9 }
 0x5c4   :  { %4353 = vmatpush1.bf16.msra.mxu0 %v4134_v48  ;;  %4414 = vmatpush1.bf16.msra.mxu1 %v4136_v13  ;;  %v4202_v13 = vld [vmem:[#allocation4 + $0xc20] sm:$0xff] }
 0x5c5   :  { %4354 = vmatprep.subr.bf16.mxu0 %v4199_v52  ;;  %4415 = vmatprep.subr.bf16.mxu1 %v4201_v2  ;;  %v4204_v52 = vld [vmem:[#allocation4 + $0xc30] sm:$0xff]  ;;  %v4267_v2 = vld [vmem:[#allocation4 + $0xe28] sm:$0xff] }
 0x5c8   :  { %4355 = vmatpush1.bf16.msra.mxu0 %v4198_v14  ;;  %4416 = vmatpush1.bf16.msra.mxu1 %v4200_v38  ;;  %v4269_v14 = vld [vmem:[#allocation4 + $0xe38] sm:$0xff]  ;;  %v4266_v38 = vld [vmem:[#allocation4 + $0xe20] sm:$0xff] }
 0x5c9   :  { %4356 = vmatprep.subr.bf16.mxu0 %v4263_v54  ;;  %4417 = vmatprep.subr.bf16.mxu1 %v4265_v59  ;;  %v4268_v54 = vld [vmem:[#allocation4 + $0xe30] sm:$0xff]  ;;  %v3823_v59 = vld [vmem:[#allocation4 + $0x48] sm:$0xff] }
 0x5cc   :  { %4357 = vmatpush1.bf16.msra.mxu0 %v4262_v33  ;;  %4418 = vmatpush1.bf16.msra.mxu1 %v4264_v12  ;;  %v3825_v33 = vld [vmem:[#allocation4 + $0x58] sm:$0xff]  ;;  %v3822_v12 = vld [vmem:[#allocation4 + $0x40] sm:$0xff] }
 0x5cd   :  { %4464 = vmatprep.subr.bf16.mxu0 %v3819_v32  ;;  %4525 = vmatprep.subr.bf16.mxu1 %v3821_v34  ;;  %v3824_v32 = vld [vmem:[#allocation4 + $0x50] sm:$0xff]  ;;  %v3887_v34 = vld [vmem:[#allocation4 + $0x248] sm:$0xff] }
 0x61d   :  { %v3767_v61 = vpop.permute.xlu0 %3766  ;;  %v3771_v58 = vpop.permute.xlu1 %3770 }
 0x61e   :  { %v3784_v44 = vsel %vm175_vm7, %v3742_v46, %v3767_v61  ;;  %v3792_v60 = vsel %vm175_vm7, %v3744_v24, %v3771_v58  ;;  %v3889_v46 = vld [vmem:[#allocation4 + $0x258] sm:$0xff]  ;;  %v3886_v61 = vld [vmem:[#allocation4 + $0x240] sm:$0xff]  ;;  %v3952_v24 = vld [vmem:[#allocation4 + $0x450] sm:$0xff] }
 0x61f   :  { %4326 = vxpose.xlu0.c.b16.start [1/8] (narrow) %v3784_v44, 64  ;;  %v3888_v44 = vld [vmem:[#allocation4 + $0x250] sm:$0xff]  ;;  %v3953_v58 = vld [vmem:[#allocation4 + $0x458] sm:$0xff] }
 0x621   :  { %v3769_v41 = vpop.permute.xlu0 %3768  ;;  %v3773_v15 = vpop.permute.xlu1 %3772 }
 0x622   :  { %v3788_v43 = vsel %vm175_vm7, %v3743_v19, %v3769_v41  ;;  %v3796_v39 = vsel %vm175_vm7, %v3745_v23, %v3773_v15  ;;  %v3951_v19 = vld [vmem:[#allocation4 + $0x448] sm:$0xff]  ;;  %v3950_v41 = vld [vmem:[#allocation4 + $0x440] sm:$0xff]  ;;  %v4016_v23 = vld [vmem:[#allocation4 + $0x650] sm:$0xff] }
 0x623   :  { %4327 = vxpose.xlu0.c.b16.cont [2/8] (narrow) %v3788_v43, 64  ;;  %v4015_v43 = vld [vmem:[#allocation4 + $0x648] sm:$0xff]  ;;  %v4014_v15 = vld [vmem:[#allocation4 + $0x640] sm:$0xff] }
 0x625   :  { %v3775_v53 = vpop.permute.xlu0 %3774  ;;  %v3777_v51 = vpop.permute.xlu1 %3776 }
 0x626   :  { %v3800_v45 = vsel %vm175_vm7, %v3746_v27, %v3775_v53  ;;  %v3804_v40 = vsel %vm175_vm7, %v3747_v63, %v3777_v51  ;;  %v4081_v53 = vld [vmem:[#allocation4 + $0x858] sm:$0xff]  ;;  %v4078_v27 = vld [vmem:[#allocation4 + $0x840] sm:$0xff]  ;;  %v4143_v51 = vld [vmem:[#allocation4 + $0xa48] sm:$0xff] }
 0x627   :  { %4328 = vxpose.xlu0.c.b16.cont [3/8] (narrow) %v3792_v60, 64  ;;  %v4017_v60 = vld [vmem:[#allocation4 + $0x658] sm:$0xff] }
 0x628   :  { %v4145_v63 = vld [vmem:[#allocation4 + $0xa58] sm:$0xff] }
 0x629   :  { %v3779_v36 = vpop.permute.xlu0 %3778  ;;  %v3781_v37 = vpop.permute.xlu1 %3780 }
 0x62a   :  { %v3808_v7 = vsel %vm175_vm7, %v3748_v18, %v3779_v36  ;;  %v3812_v6 = vsel %vm175_vm7, %v3749_v62, %v3781_v37  ;;  %v4144_v36 = vld [vmem:[#allocation4 + $0xa50] sm:$0xff]  ;;  %v4207_v18 = vld [vmem:[#allocation4 + $0xc48] sm:$0xff]  ;;  %v4206_v37 = vld [vmem:[#allocation4 + $0xc40] sm:$0xff] }
 0x62b   :  { %4329 = vxpose.xlu0.c.b16.cont [4/8] (narrow) %v3796_v39, 64  ;;  %v4079_v39 = vld [vmem:[#allocation4 + $0x848] sm:$0xff]  ;;  %v4208_v62 = vld [vmem:[#allocation4 + $0xc50] sm:$0xff] }
 0x62f   :  { %4330 = vxpose.xlu0.c.b16.cont [5/8] (narrow) %v3800_v45, 64  ;;  %v4080_v45 = vld [vmem:[#allocation4 + $0x850] sm:$0xff] }
 0x633   :  { %4331 = vxpose.xlu0.c.b16.cont [6/8] (narrow) %v3804_v40, 64  ;;  %v4142_v40 = vld [vmem:[#allocation4 + $0xa40] sm:$0xff] }
 0x637   :  { %4332 = vxpose.xlu0.c.b16.cont [7/8] (narrow) %v3808_v7, 64  ;;  %v4209_v7 = vld [vmem:[#allocation4 + $0xc58] sm:$0xff] }
 0x63b   :  { %4333 = vxpose.xlu0.c.b16.end [8/8] (narrow) %v3812_v6, 64  ;;  %v4271_v6 = vld [vmem:[#allocation4 + $0xe48] sm:$0xff] }
 0x685   :  { %v9119_v9 = vpop.trf.xlu0 }
 0x686   :  { %4375 = vmatmul.mubr.bf16.vlgmr.msra.gmra.mrb[76].mxu0 %v9119_v9  ;;  %4436 = vmatmul.mubr.bf16.vlgmr.msra.gmra.mrb[164].mxu1 %v9119_v9 }
 0x687   :  { %4465 = vmatpush1.bf16.msra.mxu0 %v3818_v16  ;;  %4526 = vmatpush1.bf16.msra.mxu1 %v3820_v3  ;;  %v4273_v16 = vld [vmem:[#allocation4 + $0xe58] sm:$0xff]  ;;  %v4270_v3 = vld [vmem:[#allocation4 + $0xe40] sm:$0xff] }
 0x688   :  { %4466 = vmatprep.subr.bf16.mxu0 %v3883_v35  ;;  %4527 = vmatprep.subr.bf16.mxu1 %v3885_v8  ;;  %v4272_v35 = vld [vmem:[#allocation4 + $0xe50] sm:$0xff]  ;;  %v3827_v8 = vld [vmem:[#allocation4 + $0x68] sm:$0xff] }
 0x689   :  { %4382 = vmatprep.mubr.bf16.mxu0 %v9527_v21  ;;  %4443 = vmatprep.mubr.bf16.mxu1 %v9527_v21  ;;  %v9125_v26 = vpop.trf.xlu0 }
 0x68b   :  { %4467 = vmatpush1.bf16.msra.mxu0 %v3882_v1  ;;  %4528 = vmatpush1.bf16.msra.mxu1 %v3884_v11  ;;  %v3829_v1 = vld [vmem:[#allocation4 + $0x78] sm:$0xff]  ;;  %v3826_v11 = vld [vmem:[#allocation4 + $0x60] sm:$0xff] }
 0x68c   :  { %4468 = vmatprep.subr.bf16.mxu0 %v3947_v20  ;;  %4529 = vmatprep.subr.bf16.mxu1 %v3949_v0  ;;  %v3828_v20 = vld [vmem:[#allocation4 + $0x70] sm:$0xff]  ;;  %v3891_v0 = vld [vmem:[#allocation4 + $0x268] sm:$0xff] }
 0x68d   :  { %v9131_v17 = vpop.trf.xlu0 }
 0x68e   :  { %4383 = vmatmul.mubr.bf16.gmra.mrb[80].mxu0 %v9125_v26  ;;  %4444 = vmatmul.mubr.bf16.gmra.mrb[168].mxu1 %v9125_v26 }
 0x68f   :  { %4469 = vmatpush1.bf16.msra.mxu0 %v3946_v4  ;;  %4530 = vmatpush1.bf16.msra.mxu1 %v3948_v10  ;;  %v3893_v4 = vld [vmem:[#allocation4 + $0x278] sm:$0xff]  ;;  %v3890_v10 = vld [vmem:[#allocation4 + $0x260] sm:$0xff] }
 0x690   :  { %4470 = vmatprep.subr.bf16.mxu0 %v4011_v22  ;;  %4531 = vmatprep.subr.bf16.mxu1 %v4013_v31  ;;  %v3892_v22 = vld [vmem:[#allocation4 + $0x270] sm:$0xff]  ;;  %v3955_v31 = vld [vmem:[#allocation4 + $0x468] sm:$0xff] }
 0x691   :  { %4388 = vmatprep.mubr.bf16.mxu0 %v9527_v21  ;;  %4449 = vmatprep.mubr.bf16.mxu1 %v9527_v21  ;;  %v9137_v48 = vpop.trf.xlu0 }
 0x693   :  { %4471 = vmatpush1.bf16.msra.mxu0 %v4010_v56  ;;  %4532 = vmatpush1.bf16.msra.mxu1 %v4012_v28  ;;  %v3957_v56 = vld [vmem:[#allocation4 + $0x478] sm:$0xff]  ;;  %v3954_v28 = vld [vmem:[#allocation4 + $0x460] sm:$0xff] }
 0x694   :  { %4472 = vmatprep.subr.bf16.mxu0 %v4075_v47  ;;  %4533 = vmatprep.subr.bf16.mxu1 %v4077_v5  ;;  %v3956_v47 = vld [vmem:[#allocation4 + $0x470] sm:$0xff]  ;;  %v4019_v5 = vld [vmem:[#allocation4 + $0x668] sm:$0xff] }
 0x696   :  { %4389 = vmatmul.mubr.bf16.gmra.mrb[84].mxu0 %v9131_v17  ;;  %4450 = vmatmul.mubr.bf16.gmra.mrb[172].mxu1 %v9131_v17 }
 0x697   :  { %4473 = vmatpush1.bf16.msra.mxu0 %v4074_v42  ;;  %4534 = vmatpush1.bf16.msra.mxu1 %v4076_v25  ;;  %v4021_v42 = vld [vmem:[#allocation4 + $0x678] sm:$0xff]  ;;  %v4018_v25 = vld [vmem:[#allocation4 + $0x660] sm:$0xff] }
 0x698   :  { %4474 = vmatprep.subr.bf16.mxu0 %v4139_v57  ;;  %4535 = vmatprep.subr.bf16.mxu1 %v4141_v30  ;;  %v4020_v57 = vld [vmem:[#allocation4 + $0x670] sm:$0xff]  ;;  %v4083_v30 = vld [vmem:[#allocation4 + $0x868] sm:$0xff] }
 0x699   :  { %4396 = vmatprep.mubr.bf16.mxu0 %v9527_v21  ;;  %4457 = vmatprep.mubr.bf16.mxu1 %v9527_v21 }
 0x69b   :  { %4475 = vmatpush1.bf16.msra.mxu0 %v4138_v49  ;;  %4536 = vmatpush1.bf16.msra.mxu1 %v4140_v50  ;;  %v4085_v49 = vld [vmem:[#allocation4 + $0x878] sm:$0xff]  ;;  %v4082_v50 = vld [vmem:[#allocation4 + $0x860] sm:$0xff] }
 0x69c   :  { %4476 = vmatprep.subr.bf16.mxu0 %v4203_v55  ;;  %4537 = vmatprep.subr.bf16.mxu1 %v4205_v29  ;;  %v4084_v55 = vld [vmem:[#allocation4 + $0x870] sm:$0xff]  ;;  %v4147_v29 = vld [vmem:[#allocation4 + $0xa68] sm:$0xff] }
 0x69e   :  { %4397 = vmatmul.mubr.bf16.gmra.mrb[88].mxu0 %v9137_v48  ;;  %4458 = vmatmul.mubr.bf16.gmra.mrb[176].mxu1 %v9137_v48 }
 0x69f   :  { %4477 = vmatpush1.bf16.msra.mxu0 %v4202_v13  ;;  %4538 = vmatpush1.bf16.msra.mxu1 %v4204_v52  ;;  %v4149_v13 = vld [vmem:[#allocation4 + $0xa78] sm:$0xff]  ;;  %v4146_v52 = vld [vmem:[#allocation4 + $0xa60] sm:$0xff] }
 0x6a0   :  { %4478 = vmatprep.subr.bf16.mxu0 %v4267_v2  ;;  %4539 = vmatprep.subr.bf16.mxu1 %v4269_v14  ;;  %v4148_v2 = vld [vmem:[#allocation4 + $0xa70] sm:$0xff]  ;;  %v4211_v14 = vld [vmem:[#allocation4 + $0xc68] sm:$0xff] }
 0x6a1   :  { %4496 = vmatprep.mubr.bf16.mxu0 %v9527_v21  ;;  %4557 = vmatprep.mubr.bf16.mxu1 %v9527_v21 }
 0x6a3   :  { %4479 = vmatpush1.bf16.msra.mxu0 %v4266_v38  ;;  %4540 = vmatpush1.bf16.msra.mxu1 %v4268_v54  ;;  %v4213_v38 = vld [vmem:[#allocation4 + $0xc78] sm:$0xff]  ;;  %v4210_v54 = vld [vmem:[#allocation4 + $0xc60] sm:$0xff] }
 0x6a4   :  { %4586 = vmatprep.subr.bf16.mxu0 %v3823_v59  ;;  %4647 = vmatprep.subr.bf16.mxu1 %v3825_v33  ;;  %v4212_v59 = vld [vmem:[#allocation4 + $0xc70] sm:$0xff]  ;;  %v4275_v33 = vld [vmem:[#allocation4 + $0xe68] sm:$0xff] }
 0x6a6   :  { %4497 = vmatmul.mubr.bf16.vlgmr.msra.gmra.mrb[92].mxu0 %v9119_v9  ;;  %4558 = vmatmul.mubr.bf16.vlgmr.msra.gmra.mrb[180].mxu1 %v9119_v9 }
 0x6a7   :  { %4587 = vmatpush1.bf16.msra.mxu0 %v3822_v12  ;;  %4648 = vmatpush1.bf16.msra.mxu1 %v3824_v32  ;;  %v4277_v12 = vld [vmem:[#allocation4 + $0xe78] sm:$0xff]  ;;  %v4274_v32 = vld [vmem:[#allocation4 + $0xe60] sm:$0xff] }
 0x6a8   :  { %4588 = vmatprep.subr.bf16.mxu0 %v3887_v34  ;;  %4649 = vmatprep.subr.bf16.mxu1 %v3889_v46  ;;  %v4276_v34 = vld [vmem:[#allocation4 + $0xe70] sm:$0xff]  ;;  %v3831_v46 = vld [vmem:[#allocation4 + $0x88] sm:$0xff] }
 0x6a9   :  { %4504 = vmatprep.mubr.bf16.mxu0 %v9527_v21  ;;  %4565 = vmatprep.mubr.bf16.mxu1 %v9527_v21 }
 0x6ab   :  { %4589 = vmatpush1.bf16.msra.mxu0 %v3886_v61  ;;  %4650 = vmatpush1.bf16.msra.mxu1 %v3888_v44  ;;  %v3833_v61 = vld [vmem:[#allocation4 + $0x98] sm:$0xff]  ;;  %v3830_v44 = vld [vmem:[#allocation4 + $0x80] sm:$0xff] }
 0x6ac   :  { %4590 = vmatprep.subr.bf16.mxu0 %v3951_v19  ;;  %4651 = vmatprep.subr.bf16.mxu1 %v3953_v58  ;;  %v3832_v19 = vld [vmem:[#allocation4 + $0x90] sm:$0xff]  ;;  %v3895_v58 = vld [vmem:[#allocation4 + $0x288] sm:$0xff] }
 0x6ae   :  { %4505 = vmatmul.mubr.bf16.gmra.mrb[96].mxu0 %v9125_v26  ;;  %4566 = vmatmul.mubr.bf16.gmra.mrb[184].mxu1 %v9125_v26 }
 0x6af   :  { %4591 = vmatpush1.bf16.msra.mxu0 %v3950_v41  ;;  %4652 = vmatpush1.bf16.msra.mxu1 %v3952_v24  ;;  %v3897_v41 = vld [vmem:[#allocation4 + $0x298] sm:$0xff]  ;;  %v3894_v24 = vld [vmem:[#allocation4 + $0x280] sm:$0xff] }
 0x6b0   :  { %4592 = vmatprep.subr.bf16.mxu0 %v4015_v43  ;;  %4653 = vmatprep.subr.bf16.mxu1 %v4017_v60  ;;  %v3896_v43 = vld [vmem:[#allocation4 + $0x290] sm:$0xff]  ;;  %v3959_v60 = vld [vmem:[#allocation4 + $0x488] sm:$0xff] }
 0x6b1   :  { %4510 = vmatprep.mubr.bf16.mxu0 %v9527_v21  ;;  %4571 = vmatprep.mubr.bf16.mxu1 %v9527_v21 }
 0x6b3   :  { %4593 = vmatpush1.bf16.msra.mxu0 %v4014_v15  ;;  %4654 = vmatpush1.bf16.msra.mxu1 %v4016_v23  ;;  %v3961_v15 = vld [vmem:[#allocation4 + $0x498] sm:$0xff]  ;;  %v3958_v23 = vld [vmem:[#allocation4 + $0x480] sm:$0xff] }
 0x6b4   :  { %4594 = vmatprep.subr.bf16.mxu0 %v4079_v39  ;;  %4655 = vmatprep.subr.bf16.mxu1 %v4081_v53  ;;  %v3960_v39 = vld [vmem:[#allocation4 + $0x490] sm:$0xff]  ;;  %v4023_v53 = vld [vmem:[#allocation4 + $0x688] sm:$0xff] }
 0x6b6   :  { %4511 = vmatmul.mubr.bf16.gmra.mrb[100].mxu0 %v9131_v17  ;;  %4572 = vmatmul.mubr.bf16.gmra.mrb[188].mxu1 %v9131_v17 }
 0x6b7   :  { %4595 = vmatpush1.bf16.msra.mxu0 %v4078_v27  ;;  %4656 = vmatpush1.bf16.msra.mxu1 %v4080_v45  ;;  %v4025_v27 = vld [vmem:[#allocation4 + $0x698] sm:$0xff]  ;;  %v4022_v45 = vld [vmem:[#allocation4 + $0x680] sm:$0xff] }
 0x6b8   :  { %4596 = vmatprep.subr.bf16.mxu0 %v4143_v51  ;;  %4657 = vmatprep.subr.bf16.mxu1 %v4145_v63  ;;  %v4024_v51 = vld [vmem:[#allocation4 + $0x690] sm:$0xff]  ;;  %v4087_v63 = vld [vmem:[#allocation4 + $0x888] sm:$0xff] }
 0x6b9   :  { %4518 = vmatprep.mubr.bf16.mxu0 %v9527_v21  ;;  %4579 = vmatprep.mubr.bf16.mxu1 %v9527_v21 }
 0x6bb   :  { %4597 = vmatpush1.bf16.msra.mxu0 %v4142_v40  ;;  %4658 = vmatpush1.bf16.msra.mxu1 %v4144_v36  ;;  %v4089_v40 = vld [vmem:[#allocation4 + $0x898] sm:$0xff]  ;;  %v4086_v36 = vld [vmem:[#allocation4 + $0x880] sm:$0xff] }
 0x6bc   :  { %4598 = vmatprep.subr.bf16.mxu0 %v4207_v18  ;;  %4659 = vmatprep.subr.bf16.mxu1 %v4209_v7  ;;  %v4088_v18 = vld [vmem:[#allocation4 + $0x890] sm:$0xff]  ;;  %v4151_v7 = vld [vmem:[#allocation4 + $0xa88] sm:$0xff] }
 0x6be   :  { %4519 = vmatmul.mubr.bf16.gmra.mrb[104].mxu0 %v9137_v48  ;;  %4580 = vmatmul.mubr.bf16.gmra.mrb[192].mxu1 %v9137_v48 }
 0x6bf   :  { %4599 = vmatpush1.bf16.msra.mxu0 %v4206_v37  ;;  %4660 = vmatpush1.bf16.msra.mxu1 %v4208_v62  ;;  %v4153_v37 = vld [vmem:[#allocation4 + $0xa98] sm:$0xff]  ;;  %v4150_v62 = vld [vmem:[#allocation4 + $0xa80] sm:$0xff] }
 0x6c0   :  { %4600 = vmatprep.subr.bf16.mxu0 %v4271_v6  ;;  %4661 = vmatprep.subr.bf16.mxu1 %v4273_v16  ;;  %v4152_v6 = vld [vmem:[#allocation4 + $0xa90] sm:$0xff]  ;;  %v4215_v16 = vld [vmem:[#allocation4 + $0xc88] sm:$0xff] }
 0x6c1   :  { %4618 = vmatprep.mubr.bf16.mxu0 %v9527_v21  ;;  %4679 = vmatprep.mubr.bf16.mxu1 %v9527_v21 }
 0x6c3   :  { %4601 = vmatpush1.bf16.msra.mxu0 %v4270_v3  ;;  %4662 = vmatpush1.bf16.msra.mxu1 %v4272_v35  ;;  %v4217_v3 = vld [vmem:[#allocation4 + $0xc98] sm:$0xff]  ;;  %v4214_v35 = vld [vmem:[#allocation4 + $0xc80] sm:$0xff] }
 0x6c4   :  { %4708 = vmatprep.subr.bf16.mxu0 %v3827_v8  ;;  %4769 = vmatprep.subr.bf16.mxu1 %v3829_v1  ;;  %v4216_v8 = vld [vmem:[#allocation4 + $0xc90] sm:$0xff]  ;;  %v4279_v1 = vld [vmem:[#allocation4 + $0xe88] sm:$0xff] }
 0x6c6   :  { %4619 = vmatmul.mubr.bf16.vlgmr.msra.gmra.mrb[108].mxu0 %v9119_v9  ;;  %4680 = vmatmul.mubr.bf16.vlgmr.msra.gmra.mrb[196].mxu1 %v9119_v9 }
 0x6c7   :  { %4709 = vmatpush1.bf16.msra.mxu0 %v3826_v11  ;;  %4770 = vmatpush1.bf16.msra.mxu1 %v3828_v20  ;;  %v4281_v11 = vld [vmem:[#allocation4 + $0xe98] sm:$0xff]  ;;  %v4278_v20 = vld [vmem:[#allocation4 + $0xe80] sm:$0xff] }
 0x6c8   :  { %4710 = vmatprep.subr.bf16.mxu0 %v3891_v0  ;;  %4771 = vmatprep.subr.bf16.mxu1 %v3893_v4  ;;  %v4280_v0 = vld [vmem:[#allocation4 + $0xe90] sm:$0xff]  ;;  %v3835_v4 = vld [vmem:[#allocation4 + $0xa8] sm:$0xff] }
 0x6c9   :  { %4626 = vmatprep.mubr.bf16.mxu0 %v9527_v21  ;;  %4687 = vmatprep.mubr.bf16.mxu1 %v9527_v21 }
 0x6cb   :  { %4711 = vmatpush1.bf16.msra.mxu0 %v3890_v10  ;;  %4772 = vmatpush1.bf16.msra.mxu1 %v3892_v22  ;;  %v3837_v10 = vld [vmem:[#allocation4 + $0xb8] sm:$0xff]  ;;  %v3834_v22 = vld [vmem:[#allocation4 + $0xa0] sm:$0xff] }
 0x6cc   :  { %4712 = vmatprep.subr.bf16.mxu0 %v3955_v31  ;;  %4773 = vmatprep.subr.bf16.mxu1 %v3957_v56  ;;  %v3836_v31 = vld [vmem:[#allocation4 + $0xb0] sm:$0xff]  ;;  %v3899_v56 = vld [vmem:[#allocation4 + $0x2a8] sm:$0xff] }
 0x6ce   :  { %4627 = vmatmul.mubr.bf16.gmra.mrb[112].mxu0 %v9125_v26  ;;  %4688 = vmatmul.mubr.bf16.gmra.mrb[200].mxu1 %v9125_v26 }
 0x6cf   :  { %4713 = vmatpush1.bf16.msra.mxu0 %v3954_v28  ;;  %4774 = vmatpush1.bf16.msra.mxu1 %v3956_v47  ;;  %v3901_v28 = vld [vmem:[#allocation4 + $0x2b8] sm:$0xff]  ;;  %v3898_v47 = vld [vmem:[#allocation4 + $0x2a0] sm:$0xff] }
 0x6d0   :  { %4714 = vmatprep.subr.bf16.mxu0 %v4019_v5  ;;  %4775 = vmatprep.subr.bf16.mxu1 %v4021_v42  ;;  %v3900_v5 = vld [vmem:[#allocation4 + $0x2b0] sm:$0xff]  ;;  %v3963_v42 = vld [vmem:[#allocation4 + $0x4a8] sm:$0xff] }
 0x6d1   :  { %4632 = vmatprep.mubr.bf16.mxu0 %v9527_v21  ;;  %4693 = vmatprep.mubr.bf16.mxu1 %v9527_v21 }
 0x6d3   :  { %4715 = vmatpush1.bf16.msra.mxu0 %v4018_v25  ;;  %4776 = vmatpush1.bf16.msra.mxu1 %v4020_v57  ;;  %v3965_v25 = vld [vmem:[#allocation4 + $0x4b8] sm:$0xff]  ;;  %v3962_v57 = vld [vmem:[#allocation4 + $0x4a0] sm:$0xff] }
 0x6d4   :  { %4716 = vmatprep.subr.bf16.mxu0 %v4083_v30  ;;  %4777 = vmatprep.subr.bf16.mxu1 %v4085_v49  ;;  %v3964_v30 = vld [vmem:[#allocation4 + $0x4b0] sm:$0xff]  ;;  %v4027_v49 = vld [vmem:[#allocation4 + $0x6a8] sm:$0xff] }
 0x6d6   :  { %4633 = vmatmul.mubr.bf16.gmra.mrb[116].mxu0 %v9131_v17  ;;  %4694 = vmatmul.mubr.bf16.gmra.mrb[204].mxu1 %v9131_v17 }
 0x6d7   :  { %4717 = vmatpush1.bf16.msra.mxu0 %v4082_v50  ;;  %4778 = vmatpush1.bf16.msra.mxu1 %v4084_v55  ;;  %v4029_v50 = vld [vmem:[#allocation4 + $0x6b8] sm:$0xff]  ;;  %v4026_v55 = vld [vmem:[#allocation4 + $0x6a0] sm:$0xff] }
 0x6d8   :  { %4718 = vmatprep.subr.bf16.mxu0 %v4147_v29  ;;  %4779 = vmatprep.subr.bf16.mxu1 %v4149_v13  ;;  %v4028_v29 = vld [vmem:[#allocation4 + $0x6b0] sm:$0xff]  ;;  %v4091_v13 = vld [vmem:[#allocation4 + $0x8a8] sm:$0xff] }
 0x6d9   :  { %4640 = vmatprep.mubr.bf16.mxu0 %v9527_v21  ;;  %4701 = vmatprep.mubr.bf16.mxu1 %v9527_v21 }
 0x6db   :  { %4719 = vmatpush1.bf16.msra.mxu0 %v4146_v52  ;;  %4780 = vmatpush1.bf16.msra.mxu1 %v4148_v2  ;;  %v4093_v52 = vld [vmem:[#allocation4 + $0x8b8] sm:$0xff]  ;;  %v4090_v2 = vld [vmem:[#allocation4 + $0x8a0] sm:$0xff] }
 0x6dc   :  { %4720 = vmatprep.subr.bf16.mxu0 %v4211_v14  ;;  %4781 = vmatprep.subr.bf16.mxu1 %v4213_v38  ;;  %v4092_v14 = vld [vmem:[#allocation4 + $0x8b0] sm:$0xff]  ;;  %v4155_v38 = vld [vmem:[#allocation4 + $0xaa8] sm:$0xff] }
 0x6de   :  { %4641 = vmatmul.mubr.bf16.gmra.mrb[120].mxu0 %v9137_v48  ;;  %4702 = vmatmul.mubr.bf16.gmra.mrb[208].mxu1 %v9137_v48 }
 0x6df   :  { %4721 = vmatpush1.bf16.msra.mxu0 %v4210_v54  ;;  %4782 = vmatpush1.bf16.msra.mxu1 %v4212_v59  ;;  %v4157_v54 = vld [vmem:[#allocation4 + $0xab8] sm:$0xff]  ;;  %v4154_v59 = vld [vmem:[#allocation4 + $0xaa0] sm:$0xff] }
 0x6e0   :  { %4722 = vmatprep.subr.bf16.mxu0 %v4275_v33  ;;  %4783 = vmatprep.subr.bf16.mxu1 %v4277_v12  ;;  %v4156_v33 = vld [vmem:[#allocation4 + $0xab0] sm:$0xff]  ;;  %v4219_v12 = vld [vmem:[#allocation4 + $0xca8] sm:$0xff] }
 0x6e1   :  { %4740 = vmatprep.mubr.bf16.mxu0 %v9527_v21  ;;  %4801 = vmatprep.mubr.bf16.mxu1 %v9527_v21 }
 0x6e3   :  { %4723 = vmatpush1.bf16.msra.mxu0 %v4274_v32  ;;  %4784 = vmatpush1.bf16.msra.mxu1 %v4276_v34  ;;  %v4221_v32 = vld [vmem:[#allocation4 + $0xcb8] sm:$0xff]  ;;  %v4218_v34 = vld [vmem:[#allocation4 + $0xca0] sm:$0xff] }
 0x6e4   :  { %4830 = vmatprep.subr.bf16.mxu0 %v3831_v46  ;;  %4891 = vmatprep.subr.bf16.mxu1 %v3833_v61  ;;  %v4220_v46 = vld [vmem:[#allocation4 + $0xcb0] sm:$0xff]  ;;  %v4283_v61 = vld [vmem:[#allocation4 + $0xea8] sm:$0xff] }
 0x6e6   :  { %4741 = vmatmul.mubr.bf16.vlgmr.msra.gmra.mrb[124].mxu0 %v9119_v9  ;;  %4802 = vmatmul.mubr.bf16.vlgmr.msra.gmra.mrb[212].mxu1 %v9119_v9 }
 0x6e7   :  { %4831 = vmatpush1.bf16.msra.mxu0 %v3830_v44  ;;  %4892 = vmatpush1.bf16.msra.mxu1 %v3832_v19  ;;  %v4285_v44 = vld [vmem:[#allocation4 + $0xeb8] sm:$0xff]  ;;  %v4282_v19 = vld [vmem:[#allocation4 + $0xea0] sm:$0xff] }
 0x6e8   :  { %4832 = vmatprep.subr.bf16.mxu0 %v3895_v58  ;;  %4893 = vmatprep.subr.bf16.mxu1 %v3897_v41  ;;  %v4284_v58 = vld [vmem:[#allocation4 + $0xeb0] sm:$0xff]  ;;  %v3839_v41 = vld [vmem:[#allocation4 + $0xc8] sm:$0xff] }
 0x6e9   :  { %4748 = vmatprep.mubr.bf16.mxu0 %v9527_v21  ;;  %4809 = vmatprep.mubr.bf16.mxu1 %v9527_v21 }
 0x6eb   :  { %4833 = vmatpush1.bf16.msra.mxu0 %v3894_v24  ;;  %4894 = vmatpush1.bf16.msra.mxu1 %v3896_v43  ;;  %v3841_v24 = vld [vmem:[#allocation4 + $0xd8] sm:$0xff]  ;;  %v3838_v43 = vld [vmem:[#allocation4 + $0xc0] sm:$0xff] }
 0x6ec   :  { %4834 = vmatprep.subr.bf16.mxu0 %v3959_v60  ;;  %4895 = vmatprep.subr.bf16.mxu1 %v3961_v15  ;;  %v3840_v60 = vld [vmem:[#allocation4 + $0xd0] sm:$0xff]  ;;  %v3903_v15 = vld [vmem:[#allocation4 + $0x2c8] sm:$0xff] }
 0x6ee   :  { %4749 = vmatmul.mubr.bf16.gmra.mrb[128].mxu0 %v9125_v26  ;;  %4810 = vmatmul.mubr.bf16.gmra.mrb[216].mxu1 %v9125_v26 }
 0x6ef   :  { %4835 = vmatpush1.bf16.msra.mxu0 %v3958_v23  ;;  %4896 = vmatpush1.bf16.msra.mxu1 %v3960_v39  ;;  %v3905_v23 = vld [vmem:[#allocation4 + $0x2d8] sm:$0xff]  ;;  %v3902_v39 = vld [vmem:[#allocation4 + $0x2c0] sm:$0xff] }
 0x6f0   :  { %4836 = vmatprep.subr.bf16.mxu0 %v4023_v53  ;;  %4897 = vmatprep.subr.bf16.mxu1 %v4025_v27  ;;  %v3904_v53 = vld [vmem:[#allocation4 + $0x2d0] sm:$0xff]  ;;  %v3967_v27 = vld [vmem:[#allocation4 + $0x4c8] sm:$0xff] }
 0x6f1   :  { %4754 = vmatprep.mubr.bf16.mxu0 %v9527_v21  ;;  %4815 = vmatprep.mubr.bf16.mxu1 %v9527_v21 }
 0x6f3   :  { %4837 = vmatpush1.bf16.msra.mxu0 %v4022_v45  ;;  %4898 = vmatpush1.bf16.msra.mxu1 %v4024_v51  ;;  %v3969_v45 = vld [vmem:[#allocation4 + $0x4d8] sm:$0xff]  ;;  %v3966_v51 = vld [vmem:[#allocation4 + $0x4c0] sm:$0xff] }
 0x6f4   :  { %4838 = vmatprep.subr.bf16.mxu0 %v4087_v63  ;;  %4899 = vmatprep.subr.bf16.mxu1 %v4089_v40  ;;  %v3968_v63 = vld [vmem:[#allocation4 + $0x4d0] sm:$0xff]  ;;  %v4031_v40 = vld [vmem:[#allocation4 + $0x6c8] sm:$0xff] }
 0x6f6   :  { %4755 = vmatmul.mubr.bf16.gmra.mrb[132].mxu0 %v9131_v17  ;;  %4816 = vmatmul.mubr.bf16.gmra.mrb[220].mxu1 %v9131_v17 }
 0x6f7   :  { %4839 = vmatpush1.bf16.msra.mxu0 %v4086_v36  ;;  %4900 = vmatpush1.bf16.msra.mxu1 %v4088_v18  ;;  %v4033_v36 = vld [vmem:[#allocation4 + $0x6d8] sm:$0xff]  ;;  %v4030_v18 = vld [vmem:[#allocation4 + $0x6c0] sm:$0xff] }
 0x6f8   :  { %4840 = vmatprep.subr.bf16.mxu0 %v4151_v7  ;;  %4901 = vmatprep.subr.bf16.mxu1 %v4153_v37  ;;  %v4032_v7 = vld [vmem:[#allocation4 + $0x6d0] sm:$0xff]  ;;  %v4095_v37 = vld [vmem:[#allocation4 + $0x8c8] sm:$0xff] }
 0x6f9   :  { %4762 = vmatprep.mubr.bf16.mxu0 %v9527_v21  ;;  %4823 = vmatprep.mubr.bf16.mxu1 %v9527_v21 }
 0x6fb   :  { %4841 = vmatpush1.bf16.msra.mxu0 %v4150_v62  ;;  %4902 = vmatpush1.bf16.msra.mxu1 %v4152_v6  ;;  %v4097_v62 = vld [vmem:[#allocation4 + $0x8d8] sm:$0xff]  ;;  %v4094_v6 = vld [vmem:[#allocation4 + $0x8c0] sm:$0xff] }
 0x6fc   :  { %4842 = vmatprep.subr.bf16.mxu0 %v4215_v16  ;;  %4903 = vmatprep.subr.bf16.mxu1 %v4217_v3  ;;  %v4096_v16 = vld [vmem:[#allocation4 + $0x8d0] sm:$0xff]  ;;  %v4159_v3 = vld [vmem:[#allocation4 + $0xac8] sm:$0xff] }
 0x6fe   :  { %4763 = vmatmul.mubr.bf16.gmra.mrb[136].mxu0 %v9137_v48  ;;  %4824 = vmatmul.mubr.bf16.gmra.mrb[224].mxu1 %v9137_v48 }
 0x6ff   :  { %4843 = vmatpush1.bf16.msra.mxu0 %v4214_v35  ;;  %4904 = vmatpush1.bf16.msra.mxu1 %v4216_v8  ;;  %v4161_v35 = vld [vmem:[#allocation4 + $0xad8] sm:$0xff]  ;;  %v4158_v8 = vld [vmem:[#allocation4 + $0xac0] sm:$0xff] }
 0x700   :  { %4844 = vmatprep.subr.bf16.mxu0 %v4279_v1  ;;  %4905 = vmatprep.subr.bf16.mxu1 %v4281_v11  ;;  %v4160_v1 = vld [vmem:[#allocation4 + $0xad0] sm:$0xff]  ;;  %v4223_v11 = vld [vmem:[#allocation4 + $0xcc8] sm:$0xff] }
 0x701   :  { %4862 = vmatprep.mubr.bf16.mxu0 %v9527_v21  ;;  %4923 = vmatprep.mubr.bf16.mxu1 %v9527_v21 }
 0x703   :  { %4845 = vmatpush1.bf16.msra.mxu0 %v4278_v20  ;;  %4906 = vmatpush1.bf16.msra.mxu1 %v4280_v0  ;;  %v4225_v20 = vld [vmem:[#allocation4 + $0xcd8] sm:$0xff]  ;;  %v4222_v0 = vld [vmem:[#allocation4 + $0xcc0] sm:$0xff] }
 0x704   :  { %4952 = vmatprep.subr.bf16.mxu0 %v3835_v4  ;;  %5013 = vmatprep.subr.bf16.mxu1 %v3837_v10  ;;  %v4224_v4 = vld [vmem:[#allocation4 + $0xcd0] sm:$0xff]  ;;  %v4287_v10 = vld [vmem:[#allocation4 + $0xec8] sm:$0xff] }
 0x706   :  { %4863 = vmatmul.mubr.bf16.vlgmr.msra.gmra.mrb[140].mxu0 %v9119_v9  ;;  %4924 = vmatmul.mubr.bf16.vlgmr.msra.gmra.mrb[228].mxu1 %v9119_v9 }
 0x707   :  { %4953 = vmatpush1.bf16.msra.mxu0 %v3834_v22  ;;  %5014 = vmatpush1.bf16.msra.mxu1 %v3836_v31  ;;  %v4289_v22 = vld [vmem:[#allocation4 + $0xed8] sm:$0xff]  ;;  %v4286_v31 = vld [vmem:[#allocation4 + $0xec0] sm:$0xff] }
 0x708   :  { %4954 = vmatprep.subr.bf16.mxu0 %v3899_v56  ;;  %5015 = vmatprep.subr.bf16.mxu1 %v3901_v28  ;;  %v4288_v56 = vld [vmem:[#allocation4 + $0xed0] sm:$0xff]  ;;  %v3843_v28 = vld [vmem:[#allocation4 + $0xe8] sm:$0xff] }
 0x709   :  { %4870 = vmatprep.mubr.bf16.mxu0 %v9527_v21  ;;  %4931 = vmatprep.mubr.bf16.mxu1 %v9527_v21 }
 0x70b   :  { %4955 = vmatpush1.bf16.msra.mxu0 %v3898_v47  ;;  %5016 = vmatpush1.bf16.msra.mxu1 %v3900_v5  ;;  %v3845_v47 = vld [vmem:[#allocation4 + $0xf8] sm:$0xff]  ;;  %v3842_v5 = vld [vmem:[#allocation4 + $0xe0] sm:$0xff] }
 0x70c   :  { %4956 = vmatprep.subr.bf16.mxu0 %v3963_v42  ;;  %5017 = vmatprep.subr.bf16.mxu1 %v3965_v25  ;;  %v3844_v42 = vld [vmem:[#allocation4 + $0xf0] sm:$0xff]  ;;  %v3907_v25 = vld [vmem:[#allocation4 + $0x2e8] sm:$0xff] }
 0x70e   :  { %4871 = vmatmul.mubr.bf16.gmra.mrb[144].mxu0 %v9125_v26  ;;  %4932 = vmatmul.mubr.bf16.gmra.mrb[232].mxu1 %v9125_v26 }
 0x70f   :  { %4957 = vmatpush1.bf16.msra.mxu0 %v3962_v57  ;;  %5018 = vmatpush1.bf16.msra.mxu1 %v3964_v30  ;;  %v3909_v57 = vld [vmem:[#allocation4 + $0x2f8] sm:$0xff]  ;;  %v3906_v30 = vld [vmem:[#allocation4 + $0x2e0] sm:$0xff] }
 0x710   :  { %4958 = vmatprep.subr.bf16.mxu0 %v4027_v49  ;;  %5019 = vmatprep.subr.bf16.mxu1 %v4029_v50  ;;  %v3908_v49 = vld [vmem:[#allocation4 + $0x2f0] sm:$0xff]  ;;  %v3971_v50 = vld [vmem:[#allocation4 + $0x4e8] sm:$0xff] }
 0x711   :  { %4876 = vmatprep.mubr.bf16.mxu0 %v9527_v21  ;;  %4937 = vmatprep.mubr.bf16.mxu1 %v9527_v21 }
 0x713   :  { %4959 = vmatpush1.bf16.msra.mxu0 %v4026_v55  ;;  %5020 = vmatpush1.bf16.msra.mxu1 %v4028_v29  ;;  %v3973_v55 = vld [vmem:[#allocation4 + $0x4f8] sm:$0xff]  ;;  %v3970_v29 = vld [vmem:[#allocation4 + $0x4e0] sm:$0xff] }
 0x714   :  { %4960 = vmatprep.subr.bf16.mxu0 %v4091_v13  ;;  %5021 = vmatprep.subr.bf16.mxu1 %v4093_v52  ;;  %v3972_v13 = vld [vmem:[#allocation4 + $0x4f0] sm:$0xff]  ;;  %v4035_v52 = vld [vmem:[#allocation4 + $0x6e8] sm:$0xff] }
 0x716   :  { %4877 = vmatmul.mubr.bf16.gmra.mrb[148].mxu0 %v9131_v17  ;;  %4938 = vmatmul.mubr.bf16.gmra.mrb[236].mxu1 %v9131_v17 }
 0x717   :  { %4961 = vmatpush1.bf16.msra.mxu0 %v4090_v2  ;;  %5022 = vmatpush1.bf16.msra.mxu1 %v4092_v14  ;;  %v4037_v2 = vld [vmem:[#allocation4 + $0x6f8] sm:$0xff]  ;;  %v4034_v14 = vld [vmem:[#allocation4 + $0x6e0] sm:$0xff] }
 0x718   :  { %4962 = vmatprep.subr.bf16.mxu0 %v4155_v38  ;;  %5023 = vmatprep.subr.bf16.mxu1 %v4157_v54  ;;  %v4036_v38 = vld [vmem:[#allocation4 + $0x6f0] sm:$0xff]  ;;  %v4099_v54 = vld [vmem:[#allocation4 + $0x8e8] sm:$0xff] }
 0x719   :  { %4884 = vmatprep.mubr.bf16.mxu0 %v9527_v21  ;;  %4945 = vmatprep.mubr.bf16.mxu1 %v9527_v21 }
 0x71b   :  { %4963 = vmatpush1.bf16.msra.mxu0 %v4154_v59  ;;  %5024 = vmatpush1.bf16.msra.mxu1 %v4156_v33  ;;  %v4101_v59 = vld [vmem:[#allocation4 + $0x8f8] sm:$0xff]  ;;  %v4098_v33 = vld [vmem:[#allocation4 + $0x8e0] sm:$0xff] }
 0x71c   :  { %4964 = vmatprep.subr.bf16.mxu0 %v4219_v12  ;;  %5025 = vmatprep.subr.bf16.mxu1 %v4221_v32  ;;  %v4100_v12 = vld [vmem:[#allocation4 + $0x8f0] sm:$0xff]  ;;  %v4163_v32 = vld [vmem:[#allocation4 + $0xae8] sm:$0xff] }
 0x71e   :  { %4885 = vmatmul.mubr.bf16.gmra.mrb[152].mxu0 %v9137_v48  ;;  %4946 = vmatmul.mubr.bf16.gmra.mrb[240].mxu1 %v9137_v48 }
 0x71f   :  { %4965 = vmatpush1.bf16.msra.mxu0 %v4218_v34  ;;  %5026 = vmatpush1.bf16.msra.mxu1 %v4220_v46  ;;  %v4165_v34 = vld [vmem:[#allocation4 + $0xaf8] sm:$0xff]  ;;  %v4162_v46 = vld [vmem:[#allocation4 + $0xae0] sm:$0xff] }
 0x720   :  { %4966 = vmatprep.subr.bf16.mxu0 %v4283_v61  ;;  %5027 = vmatprep.subr.bf16.mxu1 %v4285_v44  ;;  %v4164_v61 = vld [vmem:[#allocation4 + $0xaf0] sm:$0xff] }
 0x721   :  { %4984 = vmatprep.mubr.bf16.mxu0 %v9527_v21  ;;  %5045 = vmatprep.mubr.bf16.mxu1 %v9527_v21 }
 0x723   :  { %4967 = vmatpush1.bf16.msra.mxu0 %v4282_v19  ;;  %5028 = vmatpush1.bf16.msra.mxu1 %v4284_v58  ;;  %v4227_v58 = vld [vmem:[#allocation4 + $0xce8] sm:$0xff] }
 0x724   :  { %5074 = vmatprep.subr.bf16.mxu0 %v3839_v41  ;;  %5135 = vmatprep.subr.bf16.mxu1 %v3841_v24  ;;  %v4229_v41 = vld [vmem:[#allocation4 + $0xcf8] sm:$0xff] }
 0x726   :  { %4985 = vmatmul.mubr.bf16.vlgmr.msra.gmra.mrb[156].mxu0 %v9119_v9  ;;  %5046 = vmatmul.mubr.bf16.vlgmr.msra.gmra.mrb[244].mxu1 %v9119_v9 }
 0x727   :  { %5075 = vmatpush1.bf16.msra.mxu0 %v3838_v43  ;;  %5136 = vmatpush1.bf16.msra.mxu1 %v3840_v60 }
 0x728   :  { %5076 = vmatprep.subr.bf16.mxu0 %v3903_v15  ;;  %5137 = vmatprep.subr.bf16.mxu1 %v3905_v23 }
 0x729   :  { %4992 = vmatprep.mubr.bf16.mxu0 %v9527_v21  ;;  %5053 = vmatprep.mubr.bf16.mxu1 %v9527_v21 }
 0x72b   :  { %5077 = vmatpush1.bf16.msra.mxu0 %v3902_v39  ;;  %5138 = vmatpush1.bf16.msra.mxu1 %v3904_v53 }
 0x72c   :  { %5078 = vmatprep.subr.bf16.mxu0 %v3967_v27  ;;  %5139 = vmatprep.subr.bf16.mxu1 %v3969_v45 }
 0x72e   :  { %4993 = vmatmul.mubr.bf16.gmra.mrb[160].mxu0 %v9125_v26  ;;  %5054 = vmatmul.mubr.bf16.gmra.mrb[248].mxu1 %v9125_v26 }
 0x72f   :  { %5079 = vmatpush1.bf16.msra.mxu0 %v3966_v51  ;;  %5140 = vmatpush1.bf16.msra.mxu1 %v3968_v63  ;;  %v4226_v51 = vld [vmem:[#allocation4 + $0xce0] sm:$0xff]  ;;  %v4228_v63 = vld [vmem:[#allocation4 + $0xcf0] sm:$0xff] }
 0x730   :  { %5080 = vmatprep.subr.bf16.mxu0 %v4031_v40  ;;  %5141 = vmatprep.subr.bf16.mxu1 %v4033_v36  ;;  %v4291_v36 = vld [vmem:[#allocation4 + $0xee8] sm:$0xff] }
 0x731   :  { %4998 = vmatprep.mubr.bf16.mxu0 %v9527_v21  ;;  %5059 = vmatprep.mubr.bf16.mxu1 %v9527_v21 }
 0x733   :  { %5081 = vmatpush1.bf16.msra.mxu0 %v4030_v18  ;;  %5142 = vmatpush1.bf16.msra.mxu1 %v4032_v7  ;;  %v4293_v18 = vld [vmem:[#allocation4 + $0xef8] sm:$0xff]  ;;  %v4290_v7 = vld [vmem:[#allocation4 + $0xee0] sm:$0xff] }
 0x734   :  { %5082 = vmatprep.subr.bf16.mxu0 %v4095_v37  ;;  %5143 = vmatprep.subr.bf16.mxu1 %v4097_v62  ;;  %v4292_v37 = vld [vmem:[#allocation4 + $0xef0] sm:$0xff] }
 0x736   :  { %4999 = vmatmul.mubr.bf16.gmra.mrb[164].mxu0 %v9131_v17  ;;  %5060 = vmatmul.mubr.bf16.gmra.mrb[252].mxu1 %v9131_v17 }
 0x737   :  { %5083 = vmatpush1.bf16.msra.mxu0 %v4094_v6  ;;  %5144 = vmatpush1.bf16.msra.mxu1 %v4096_v16  ;;  %v3847_v16 = vld [vmem:[#allocation4 + $0x108] sm:$0xff] }
 0x738   :  { %5084 = vmatprep.subr.bf16.mxu0 %v4159_v3  ;;  %5145 = vmatprep.subr.bf16.mxu1 %v4161_v35  ;;  %v3849_v3 = vld [vmem:[#allocation4 + $0x118] sm:$0xff] }
 0x739   :  { %5006 = vmatprep.mubr.bf16.mxu0 %v9527_v21  ;;  %5067 = vmatprep.mubr.bf16.mxu1 %v9527_v21 }
 0x73b   :  { %5085 = vmatpush1.bf16.msra.mxu0 %v4158_v8  ;;  %5146 = vmatpush1.bf16.msra.mxu1 %v4160_v1 }
 0x73c   :  { %5086 = vmatprep.subr.bf16.mxu0 %v4223_v11  ;;  %5147 = vmatprep.subr.bf16.mxu1 %v4225_v20 }
 0x73e   :  { %5007 = vmatmul.mubr.bf16.gmra.mrb[168].mxu0 %v9137_v48  ;;  %5068 = vmatmul.mubr.bf16.gmra.mrb[0].mxu1 %v9137_v48 }
 0x73f   :  { %5087 = vmatpush1.bf16.msra.mxu0 %v4222_v0  ;;  %5148 = vmatpush1.bf16.msra.mxu1 %v4224_v4  ;;  %v3846_v4 = vld [vmem:[#allocation4 + $0x100] sm:$0xff] }
 0x740   :  { %5088 = vmatprep.subr.bf16.mxu0 %v4287_v10  ;;  %5149 = vmatprep.subr.bf16.mxu1 %v4289_v22  ;;  %v3848_v10 = vld [vmem:[#allocation4 + $0x110] sm:$0xff]  ;;  %v3911_v22 = vld [vmem:[#allocation4 + $0x308] sm:$0xff] }
 0x741   :  { %5106 = vmatprep.mubr.bf16.mxu0 %v9527_v21  ;;  %5167 = vmatprep.mubr.bf16.mxu1 %v9527_v21 }
 0x743   :  { %5089 = vmatpush1.bf16.msra.mxu0 %v4286_v31  ;;  %5150 = vmatpush1.bf16.msra.mxu1 %v4288_v56  ;;  %v3913_v31 = vld [vmem:[#allocation4 + $0x318] sm:$0xff]  ;;  %v3910_v56 = vld [vmem:[#allocation4 + $0x300] sm:$0xff] }
 0x744   :  { %5196 = vmatprep.subr.bf16.mxu0 %v3843_v28  ;;  %5257 = vmatprep.subr.bf16.mxu1 %v3845_v47  ;;  %v3912_v28 = vld [vmem:[#allocation4 + $0x310] sm:$0xff] }
 0x746   :  { %5107 = vmatmul.mubr.bf16.vlgmr.msra.gmra.mrb[172].mxu0 %v9119_v9  ;;  %5168 = vmatmul.mubr.bf16.vlgmr.msra.gmra.mrb[4].mxu1 %v9119_v9 }
 0x747   :  { %5197 = vmatpush1.bf16.msra.mxu0 %v3842_v5  ;;  %5258 = vmatpush1.bf16.msra.mxu1 %v3844_v42  ;;  %v3975_v42 = vld [vmem:[#allocation4 + $0x508] sm:$0xff] }
 0x748   :  { %5198 = vmatprep.subr.bf16.mxu0 %v3907_v25  ;;  %5259 = vmatprep.subr.bf16.mxu1 %v3909_v57  ;;  %v3977_v25 = vld [vmem:[#allocation4 + $0x518] sm:$0xff] }
 0x749   :  { %5114 = vmatprep.mubr.bf16.mxu0 %v9527_v21  ;;  %5175 = vmatprep.mubr.bf16.mxu1 %v9527_v21 }
 0x74b   :  { %5199 = vmatpush1.bf16.msra.mxu0 %v3906_v30  ;;  %5260 = vmatpush1.bf16.msra.mxu1 %v3908_v49 }
 0x74c   :  { %5200 = vmatprep.subr.bf16.mxu0 %v3971_v50  ;;  %5261 = vmatprep.subr.bf16.mxu1 %v3973_v55 }
 0x74e   :  { %5115 = vmatmul.mubr.bf16.gmra.mrb[176].mxu0 %v9125_v26  ;;  %5176 = vmatmul.mubr.bf16.gmra.mrb[8].mxu1 %v9125_v26 }
 0x74f   :  { %5201 = vmatpush1.bf16.msra.mxu0 %v3970_v29  ;;  %5262 = vmatpush1.bf16.msra.mxu1 %v3972_v13 }
 0x750   :  { %5202 = vmatprep.subr.bf16.mxu0 %v4035_v52  ;;  %5263 = vmatprep.subr.bf16.mxu1 %v4037_v2 }
 0x751   :  { %5120 = vmatprep.mubr.bf16.mxu0 %v9527_v21  ;;  %5181 = vmatprep.mubr.bf16.mxu1 %v9527_v21 }
 0x753   :  { %5203 = vmatpush1.bf16.msra.mxu0 %v4034_v14  ;;  %5264 = vmatpush1.bf16.msra.mxu1 %v4036_v38  ;;  %v3974_v14 = vld [vmem:[#allocation4 + $0x500] sm:$0xff]  ;;  %v3976_v38 = vld [vmem:[#allocation4 + $0x510] sm:$0xff] }
 0x754   :  { %5204 = vmatprep.subr.bf16.mxu0 %v4099_v54  ;;  %5265 = vmatprep.subr.bf16.mxu1 %v4101_v59  ;;  %v4039_v59 = vld [vmem:[#allocation4 + $0x708] sm:$0xff] }
 0x756   :  { %5121 = vmatmul.mubr.bf16.gmra.mrb[180].mxu0 %v9131_v17  ;;  %5182 = vmatmul.mubr.bf16.gmra.mrb[12].mxu1 %v9131_v17 }
 0x757   :  { %5205 = vmatpush1.bf16.msra.mxu0 %v4098_v33  ;;  %5266 = vmatpush1.bf16.msra.mxu1 %v4100_v12  ;;  %v4041_v33 = vld [vmem:[#allocation4 + $0x718] sm:$0xff]  ;;  %v4038_v12 = vld [vmem:[#allocation4 + $0x700] sm:$0xff] }
 0x758   :  { %5206 = vmatprep.subr.bf16.mxu0 %v4163_v32  ;;  %5267 = vmatprep.subr.bf16.mxu1 %v4165_v34  ;;  %v4040_v32 = vld [vmem:[#allocation4 + $0x710] sm:$0xff] }
 0x759   :  { %v4376_v44 = vpop.f32.mrb[76].mxu0  ;;  %v4437_v19 = vpop.f32.mrb[164].mxu1  ;;  %5128 = vmatprep.mubr.bf16.mxu0 %v9527_v21  ;;  %5189 = vmatprep.mubr.bf16.mxu1 %v9527_v21 }
 0x75a   :  { %v6296_v24 = vrot.slane %v4437_v19, 1  ;;  %v4378_v43 = vpop.f32.mrb[77].mxu0  ;;  %v4439_v60 = vpop.f32.mrb[165].mxu1 }
 0x75b   :  { %v6297_v15 = vrot.slane %v4439_v60, 1  ;;  %5207 = vmatpush1.bf16.msra.mxu0 %v4162_v46  ;;  %v4380_v23 = vpop.f32.mrb[78].mxu0  ;;  %v4441_v39 = vpop.f32.mrb[166].mxu1  ;;  %5268 = vmatpush1.bf16.msra.mxu1 %v4164_v61  ;;  %v4103_v61 = vld [vmem:[#allocation4 + $0x908] sm:$0xff] }
 0x75c   :  { %v9235_v53 = vadd.f32 %v6296_v24, %v4376_v44  ;;  %v4381_v27 = vpop.f32.mrb[79].mxu0  ;;  %v4442_v45 = vpop.f32.mrb[167].mxu1  ;;  %5208 = vmatprep.subr.bf16.mxu0 %v4227_v58  ;;  %5269 = vmatprep.subr.bf16.mxu1 %v4229_v41  ;;  %v4105_v44 = vld [vmem:[#allocation4 + $0x918] sm:$0xff]  ;;  %v4104_v23 = vld [vmem:[#allocation4 + $0x910] sm:$0xff]  ;;  %v4167_v39 = vld [vmem:[#allocation4 + $0xb08] sm:$0xff] }
 0x75d   :  { %v9237_v40 = vadd.f32 %v6297_v15, %v4378_v43  ;;  %v4102_v15 = vld [vmem:[#allocation4 + $0x900] sm:$0xff]  ;;  %v4169_v27 = vld [vmem:[#allocation4 + $0xb18] sm:$0xff] }
 0x75e   :  { %5129 = vmatmul.mubr.bf16.gmra.mrb[184].mxu0 %v9137_v48  ;;  %5190 = vmatmul.mubr.bf16.gmra.mrb[16].mxu1 %v9137_v48  ;;  %v4166_v45 = vld [vmem:[#allocation4 + $0xb00] sm:$0xff] }
 0x75f   :  { %5209 = vmatpush1.bf16.msra.mxu0 %v4226_v51  ;;  %5270 = vmatpush1.bf16.msra.mxu1 %v4228_v63  ;;  %v4168_v51 = vld [vmem:[#allocation4 + $0xb10] sm:$0xff] }
 0x760   :  { %5210 = vmatprep.subr.bf16.mxu0 %v4291_v36  ;;  %5271 = vmatprep.subr.bf16.mxu1 %v4293_v18  ;;  %v4231_v18 = vld [vmem:[#allocation4 + $0xd08] sm:$0xff] }
 0x761   :  { %v4384_v62 = vpop.f32.mrb[80].mxu0  ;;  %v4445_v6 = vpop.f32.mrb[168].mxu1  ;;  %5228 = vmatprep.mubr.bf16.mxu0 %v9527_v21  ;;  %5289 = vmatprep.mubr.bf16.mxu1 %v9527_v21 }
 0x762   :  { %v4385_v35 = vpop.f32.mrb[81].mxu0  ;;  %v4446_v8 = vpop.f32.mrb[169].mxu1 }
 0x763   :  { %5211 = vmatpush1.bf16.msra.mxu0 %v4290_v7  ;;  %v4386_v1 = vpop.f32.mrb[82].mxu0  ;;  %v4447_v11 = vpop.f32.mrb[170].mxu1  ;;  %5272 = vmatpush1.bf16.msra.mxu1 %v4292_v37  ;;  %v4233_v7 = vld [vmem:[#allocation4 + $0xd18] sm:$0xff] }
 0x764   :  { %v4387_v20 = vpop.f32.mrb[83].mxu0  ;;  %v4448_v0 = vpop.f32.mrb[171].mxu1  ;;  %5318 = vmatprep.subr.bf16.mxu0 %v3847_v16  ;;  %5379 = vmatprep.subr.bf16.mxu1 %v3849_v3 }
 0x765   :  { %v4230_v0 = vld [vmem:[#allocation4 + $0xd00] sm:$0xff] }
 0x766   :  { %5229 = vmatmul.mubr.bf16.vlgmr.msra.gmra.mrb[188].mxu0 %v9119_v9  ;;  %5290 = vmatmul.mubr.bf16.vlgmr.msra.gmra.mrb[20].mxu1 %v9119_v9 }
 0x767   :  { %5319 = vmatpush1.bf16.msra.mxu0 %v3846_v4  ;;  %5380 = vmatpush1.bf16.msra.mxu1 %v3848_v10  ;;  %v4232_v4 = vld [vmem:[#allocation4 + $0xd10] sm:$0xff] }
 0x768   :  { %5320 = vmatprep.subr.bf16.mxu0 %v3911_v22  ;;  %5381 = vmatprep.subr.bf16.mxu1 %v3913_v31  ;;  %v4295_v31 = vld [vmem:[#allocation4 + $0xf08] sm:$0xff] }
 0x769   :  { %v4390_v47 = vpop.f32.mrb[84].mxu0  ;;  %v4451_v5 = vpop.f32.mrb[172].mxu1  ;;  %5236 = vmatprep.mubr.bf16.mxu0 %v9527_v21  ;;  %5297 = vmatprep.mubr.bf16.mxu1 %v9527_v21 }
 0x76a   :  { %v6526_v57 = vrot.slane %v4451_v5, 1  ;;  %v4392_v30 = vpop.f32.mrb[85].mxu0  ;;  %v4453_v49 = vpop.f32.mrb[173].mxu1  ;;  %v4296_v5 = vld [vmem:[#allocation4 + $0xf10] sm:$0xff] }
 0x76b   :  { %v6527_v50 = vrot.slane %v4453_v49, 1  ;;  %5321 = vmatpush1.bf16.msra.mxu0 %v3910_v56  ;;  %v4394_v55 = vpop.f32.mrb[86].mxu0  ;;  %v4455_v29 = vpop.f32.mrb[174].mxu1  ;;  %5382 = vmatpush1.bf16.msra.mxu1 %v3912_v28  ;;  %v4297_v56 = vld [vmem:[#allocation4 + $0xf18] sm:$0xff] }
 0x76c   :  { %v9247_v13 = vadd.f32 %v6526_v57, %v4390_v47  ;;  %v4395_v52 = vpop.f32.mrb[87].mxu0  ;;  %v4456_v2 = vpop.f32.mrb[175].mxu1  ;;  %5322 = vmatprep.subr.bf16.mxu0 %v3975_v42  ;;  %5383 = vmatprep.subr.bf16.mxu1 %v3977_v25  ;;  %v3853_v57 = vld [vmem:[#allocation4 + $0x138] sm:$0xff] }
 0x76d   :  { %v9249_v54 = vadd.f32 %v6527_v50, %v4392_v30  ;;  %v3850_v2 = vld [vmem:[#allocation4 + $0x120] sm:$0xff] }
 0x76e   :  { %5237 = vmatmul.mubr.bf16.gmra.mrb[192].mxu0 %v9125_v26  ;;  %5298 = vmatmul.mubr.bf16.gmra.mrb[24].mxu1 %v9125_v26 }
 0x76f   :  { %5323 = vmatpush1.bf16.msra.mxu0 %v3974_v14  ;;  %5384 = vmatpush1.bf16.msra.mxu1 %v3976_v38  ;;  %v3852_v14 = vld [vmem:[#allocation4 + $0x130] sm:$0xff]  ;;  %v3915_v38 = vld [vmem:[#allocation4 + $0x328] sm:$0xff] }
 0x770   :  { %5324 = vmatprep.subr.bf16.mxu0 %v4039_v59  ;;  %5385 = vmatprep.subr.bf16.mxu1 %v4041_v33  ;;  %v3917_v59 = vld [vmem:[#allocation4 + $0x338] sm:$0xff]  ;;  %v3914_v33 = vld [vmem:[#allocation4 + $0x320] sm:$0xff] }
 0x771   :  { %v4398_v34 = vpop.f32.mrb[88].mxu0  ;;  %v4459_v46 = vpop.f32.mrb[176].mxu1  ;;  %5242 = vmatprep.mubr.bf16.mxu0 %v9527_v21  ;;  %5303 = vmatprep.mubr.bf16.mxu1 %v9527_v21 }
 0x772   :  { %v4399_v19 = vpop.f32.mrb[89].mxu0  ;;  %v4460_v58 = vpop.f32.mrb[177].mxu1  ;;  %v3979_v46 = vld [vmem:[#allocation4 + $0x528] sm:$0xff] }
 0x773   :  { %5325 = vmatpush1.bf16.msra.mxu0 %v4038_v12  ;;  %v4400_v41 = vpop.f32.mrb[90].mxu0  ;;  %v4461_v24 = vpop.f32.mrb[178].mxu1  ;;  %5386 = vmatpush1.bf16.msra.mxu1 %v4040_v32  ;;  %v3916_v12 = vld [vmem:[#allocation4 + $0x330] sm:$0xff] }
 0x774   :  { %v4401_v43 = vpop.f32.mrb[91].mxu0  ;;  %v4462_v60 = vpop.f32.mrb[179].mxu1  ;;  %5326 = vmatprep.subr.bf16.mxu0 %v4103_v61  ;;  %5387 = vmatprep.subr.bf16.mxu1 %v4105_v44  ;;  %v3981_v61 = vld [vmem:[#allocation4 + $0x538] sm:$0xff] }
 0x776   :  { %5243 = vmatmul.mubr.bf16.gmra.mrb[196].mxu0 %v9131_v17  ;;  %5304 = vmatmul.mubr.bf16.gmra.mrb[28].mxu1 %v9131_v17 }
 0x777   :  { %5327 = vmatpush1.bf16.msra.mxu0 %v4102_v15  ;;  %5388 = vmatpush1.bf16.msra.mxu1 %v4104_v23 }
 0x778   :  { %5328 = vmatprep.subr.bf16.mxu0 %v4167_v39  ;;  %5389 = vmatprep.subr.bf16.mxu1 %v4169_v27  ;;  %v3978_v27 = vld [vmem:[#allocation4 + $0x520] sm:$0xff] }
 0x779   :  { %v4498_v63 = vpop.f32.mrb[92].mxu0  ;;  %v4559_v36 = vpop.f32.mrb[180].mxu1  ;;  %5250 = vmatprep.mubr.bf16.mxu0 %v9527_v21  ;;  %5311 = vmatprep.mubr.bf16.mxu1 %v9527_v21 }
 0x77a   :  { %v6304_v37 = vrot.slane %v4498_v63, 2  ;;  %v4500_v62 = vpop.f32.mrb[93].mxu0  ;;  %v4561_v6 = vpop.f32.mrb[181].mxu1  ;;  %v6312_v1 = vrot.slane %v4559_v36, 3  ;;  %v4043_v36 = vld [vmem:[#allocation4 + $0x728] sm:$0xff] }
 0x77b   :  { %v6305_v16 = vrot.slane %v4500_v62, 2  ;;  %5329 = vmatpush1.bf16.msra.mxu0 %v4166_v45  ;;  %v4502_v3 = vpop.f32.mrb[94].mxu0  ;;  %v4563_v35 = vpop.f32.mrb[182].mxu1  ;;  %5390 = vmatpush1.bf16.msra.mxu1 %v4168_v51  ;;  %v6313_v22 = vrot.slane %v4561_v6, 3  ;;  %v3980_v45 = vld [vmem:[#allocation4 + $0x530] sm:$0xff] }
 0x77c   :  { %v6308_v8 = vadd.f32 %v6304_v37, %v9235_v53  ;;  %v4503_v11 = vpop.f32.mrb[95].mxu0  ;;  %v4564_v20 = vpop.f32.mrb[183].mxu1  ;;  %5330 = vmatprep.subr.bf16.mxu0 %v4231_v18  ;;  %5391 = vmatprep.subr.bf16.mxu1 %v4233_v7  ;;  %v4294_v53 = vld [vmem:[#allocation4 + $0xf00] sm:$0xff]  ;;  %v4045_v18 = vld [vmem:[#allocation4 + $0x738] sm:$0xff]  ;;  %v4044_v62 = vld [vmem:[#allocation4 + $0x730] sm:$0xff] }
 0x77d   :  { %v6309_v10 = vadd.f32 %v6305_v16, %v9237_v40  ;;  %v3851_v40 = vld [vmem:[#allocation4 + $0x128] sm:$0xff]  ;;  %v4109_v3 = vld [vmem:[#allocation4 + $0x938] sm:$0xff] }
 0x77e   :  { %v9261_v28 = vadd.f32 %v6312_v1, %v6308_v8  ;;  %5251 = vmatmul.mubr.bf16.gmra.mrb[200].mxu0 %v9137_v48  ;;  %5312 = vmatmul.mubr.bf16.gmra.mrb[32].mxu1 %v9137_v48 }
 0x77f   :  { %v9265_v47 = vadd.f32 %v6313_v22, %v6309_v10  ;;  %5331 = vmatpush1.bf16.msra.mxu0 %v4230_v0  ;;  %5392 = vmatpush1.bf16.msra.mxu1 %v4232_v4  ;;  %v4106_v4 = vld [vmem:[#allocation4 + $0x920] sm:$0xff]  ;;  %v4108_v10 = vld [vmem:[#allocation4 + $0x930] sm:$0xff]  ;;  %v4171_v22 = vld [vmem:[#allocation4 + $0xb28] sm:$0xff] }
 0x780   :  { %5332 = vmatprep.subr.bf16.mxu0 %v4295_v31  ;;  %5393 = vmatprep.subr.bf16.mxu1 %v4297_v56  ;;  %v4173_v31 = vld [vmem:[#allocation4 + $0xb38] sm:$0xff]  ;;  %v4170_v56 = vld [vmem:[#allocation4 + $0xb20] sm:$0xff] }
 0x781   :  { %v4506_v42 = vpop.f32.mrb[96].mxu0  ;;  %v4567_v25 = vpop.f32.mrb[184].mxu1  ;;  %5350 = vmatprep.mubr.bf16.mxu0 %v9527_v21  ;;  %5411 = vmatprep.mubr.bf16.mxu1 %v9527_v21 }
 0x782   :  { %v4507_v30 = vpop.f32.mrb[97].mxu0  ;;  %v4568_v49 = vpop.f32.mrb[185].mxu1  ;;  %v4235_v25 = vld [vmem:[#allocation4 + $0xd28] sm:$0xff] }
 0x783   :  { %5333 = vmatpush1.bf16.msra.mxu0 %v4294_v53  ;;  %v4508_v50 = vpop.f32.mrb[98].mxu0  ;;  %v4569_v55 = vpop.f32.mrb[186].mxu1  ;;  %5394 = vmatpush1.bf16.msra.mxu1 %v4296_v5  ;;  %v4172_v53 = vld [vmem:[#allocation4 + $0xb30] sm:$0xff] }
 0x784   :  { %v4509_v29 = vpop.f32.mrb[99].mxu0  ;;  %v4570_v52 = vpop.f32.mrb[187].mxu1  ;;  %5440 = vmatprep.subr.bf16.mxu0 %v3851_v40  ;;  %5501 = vmatprep.subr.bf16.mxu1 %v3853_v57  ;;  %v4237_v40 = vld [vmem:[#allocation4 + $0xd38] sm:$0xff] }
 0x786   :  { %5351 = vmatmul.mubr.bf16.vlgmr.msra.gmra.mrb[204].mxu0 %v9119_v9  ;;  %5412 = vmatmul.mubr.bf16.vlgmr.msra.gmra.mrb[36].mxu1 %v9119_v9 }
 0x787   :  { %5441 = vmatpush1.bf16.msra.mxu0 %v3850_v2  ;;  %5502 = vmatpush1.bf16.msra.mxu1 %v3852_v14 }
 0x788   :  { %5442 = vmatprep.subr.bf16.mxu0 %v3915_v38  ;;  %5503 = vmatprep.subr.bf16.mxu1 %v3917_v59  ;;  %v4234_v59 = vld [vmem:[#allocation4 + $0xd20] sm:$0xff] }
 0x789   :  { %v4512_v32 = vpop.f32.mrb[100].mxu0  ;;  %v4573_v34 = vpop.f32.mrb[188].mxu1  ;;  %5356 = vmatprep.mubr.bf16.mxu0 %v9527_v21  ;;  %5417 = vmatprep.mubr.bf16.mxu1 %v9527_v21 }
 0x78a   :  { %v6534_v44 = vrot.slane %v4512_v32, 2  ;;  %v4514_v19 = vpop.f32.mrb[101].mxu0  ;;  %v4575_v58 = vpop.f32.mrb[189].mxu1  ;;  %v6542_v15 = vrot.slane %v4573_v34, 3  ;;  %v4299_v34 = vld [vmem:[#allocation4 + $0xf28] sm:$0xff] }
 0x78b   :  { %v6535_v41 = vrot.slane %v4514_v19, 2  ;;  %5443 = vmatpush1.bf16.msra.mxu0 %v3914_v33  ;;  %v4516_v24 = vpop.f32.mrb[102].mxu0  ;;  %v4577_v43 = vpop.f32.mrb[190].mxu1  ;;  %5504 = vmatpush1.bf16.msra.mxu1 %v3916_v12  ;;  %v6543_v63 = vrot.slane %v4575_v58, 3  ;;  %v4236_v33 = vld [vmem:[#allocation4 + $0xd30] sm:$0xff] }
 0x78c   :  { %v6538_v60 = vadd.f32 %v6534_v44, %v9247_v13  ;;  %v4517_v23 = vpop.f32.mrb[103].mxu0  ;;  %v4578_v39 = vpop.f32.mrb[191].mxu1  ;;  %5444 = vmatprep.subr.bf16.mxu0 %v3979_v46  ;;  %5505 = vmatprep.subr.bf16.mxu1 %v3981_v61  ;;  %v4042_v13 = vld [vmem:[#allocation4 + $0x720] sm:$0xff]  ;;  %v4301_v46 = vld [vmem:[#allocation4 + $0xf38] sm:$0xff]  ;;  %v4300_v19 = vld [vmem:[#allocation4 + $0xf30] sm:$0xff] }
 0x78d   :  { %v6539_v51 = vadd.f32 %v6535_v41, %v9249_v54  ;;  %v4107_v54 = vld [vmem:[#allocation4 + $0x928] sm:$0xff]  ;;  %v3857_v24 = vld [vmem:[#allocation4 + $0x158] sm:$0xff] }
 0x78e   :  { %v9275_v7 = vadd.f32 %v6542_v15, %v6538_v60  ;;  %5357 = vmatmul.mubr.bf16.gmra.mrb[208].mxu0 %v9125_v26  ;;  %5418 = vmatmul.mubr.bf16.gmra.mrb[40].mxu1 %v9125_v26 }
 0x78f   :  { %v9279_v37 = vadd.f32 %v6543_v63, %v6539_v51  ;;  %5445 = vmatpush1.bf16.msra.mxu0 %v3978_v27  ;;  %5506 = vmatpush1.bf16.msra.mxu1 %v3980_v45  ;;  %v3854_v45 = vld [vmem:[#allocation4 + $0x140] sm:$0xff]  ;;  %v3856_v51 = vld [vmem:[#allocation4 + $0x150] sm:$0xff]  ;;  %v3919_v63 = vld [vmem:[#allocation4 + $0x348] sm:$0xff] }
 0x790   :  { %5446 = vmatprep.subr.bf16.mxu0 %v4043_v36  ;;  %5507 = vmatprep.subr.bf16.mxu1 %v4045_v18  ;;  %v3921_v36 = vld [vmem:[#allocation4 + $0x358] sm:$0xff]  ;;  %v3918_v18 = vld [vmem:[#allocation4 + $0x340] sm:$0xff] }
 0x791   :  { %v4520_v6 = vpop.f32.mrb[104].mxu0  ;;  %v4581_v16 = vpop.f32.mrb[192].mxu1  ;;  %5364 = vmatprep.mubr.bf16.mxu0 %v9527_v21  ;;  %5425 = vmatprep.mubr.bf16.mxu1 %v9527_v21 }
 0x792   :  { %v4521_v35 = vpop.f32.mrb[105].mxu0  ;;  %v4582_v8 = vpop.f32.mrb[193].mxu1  ;;  %v3983_v16 = vld [vmem:[#allocation4 + $0x548] sm:$0xff] }
 0x793   :  { %5447 = vmatpush1.bf16.msra.mxu0 %v4042_v13  ;;  %v4522_v1 = vpop.f32.mrb[106].mxu0  ;;  %v4583_v11 = vpop.f32.mrb[194].mxu1  ;;  %5508 = vmatpush1.bf16.msra.mxu1 %v4044_v62  ;;  %v3920_v13 = vld [vmem:[#allocation4 + $0x350] sm:$0xff] }
 0x794   :  { %v4523_v20 = vpop.f32.mrb[107].mxu0  ;;  %v4584_v0 = vpop.f32.mrb[195].mxu1  ;;  %5448 = vmatprep.subr.bf16.mxu0 %v4107_v54  ;;  %5509 = vmatprep.subr.bf16.mxu1 %v4109_v3  ;;  %v3985_v54 = vld [vmem:[#allocation4 + $0x558] sm:$0xff] }
 0x796   :  { %5365 = vmatmul.mubr.bf16.gmra.mrb[212].mxu0 %v9131_v17  ;;  %5426 = vmatmul.mubr.bf16.gmra.mrb[44].mxu1 %v9131_v17 }
 0x797   :  { %5449 = vmatpush1.bf16.msra.mxu0 %v4106_v4  ;;  %5510 = vmatpush1.bf16.msra.mxu1 %v4108_v10 }
 0x798   :  { %5450 = vmatprep.subr.bf16.mxu0 %v4171_v22  ;;  %5511 = vmatprep.subr.bf16.mxu1 %v4173_v31  ;;  %v3982_v31 = vld [vmem:[#allocation4 + $0x540] sm:$0xff] }
 0x799   :  { %v4620_v5 = vpop.f32.mrb[108].mxu0  ;;  %v4681_v42 = vpop.f32.mrb[196].mxu1  ;;  %5370 = vmatprep.mubr.bf16.mxu0 %v9527_v21  ;;  %5431 = vmatprep.mubr.bf16.mxu1 %v9527_v21 }
 0x79a   :  { %v6320_v57 = vrot.slane %v4620_v5, 4  ;;  %v4622_v30 = vpop.f32.mrb[109].mxu0  ;;  %v4683_v49 = vpop.f32.mrb[197].mxu1  ;;  %v6328_v2 = vrot.slane %v4681_v42, 5  ;;  %v4047_v42 = vld [vmem:[#allocation4 + $0x748] sm:$0xff] }
 0x79b   :  { %v6321_v50 = vrot.slane %v4622_v30, 4  ;;  %5451 = vmatpush1.bf16.msra.mxu0 %v4170_v56  ;;  %v4624_v55 = vpop.f32.mrb[110].mxu0  ;;  %v4685_v29 = vpop.f32.mrb[198].mxu1  ;;  %5512 = vmatpush1.bf16.msra.mxu1 %v4172_v53  ;;  %v6329_v32 = vrot.slane %v4683_v49, 5  ;;  %v3984_v56 = vld [vmem:[#allocation4 + $0x550] sm:$0xff] }
 0x79c   :  { %v6324_v52 = vadd.f32 %v6320_v57, %v9261_v28  ;;  %v4625_v14 = vpop.f32.mrb[111].mxu0  ;;  %v4686_v38 = vpop.f32.mrb[199].mxu1  ;;  %5452 = vmatprep.subr.bf16.mxu0 %v4235_v25  ;;  %5513 = vmatprep.subr.bf16.mxu1 %v4237_v40  ;;  %v4298_v28 = vld [vmem:[#allocation4 + $0xf20] sm:$0xff]  ;;  %v4049_v25 = vld [vmem:[#allocation4 + $0x758] sm:$0xff]  ;;  %v4048_v30 = vld [vmem:[#allocation4 + $0x750] sm:$0xff] }
 0x79d   :  { %v6325_v12 = vadd.f32 %v6321_v50, %v9265_v47  ;;  %v3855_v47 = vld [vmem:[#allocation4 + $0x148] sm:$0xff]  ;;  %v4113_v55 = vld [vmem:[#allocation4 + $0x958] sm:$0xff] }
 0x79e   :  { %v9289_v61 = vadd.f32 %v6328_v2, %v6324_v52  ;;  %5371 = vmatmul.mubr.bf16.gmra.mrb[216].mxu0 %v9137_v48  ;;  %5432 = vmatmul.mubr.bf16.gmra.mrb[48].mxu1 %v9137_v48 }
 0x79f   :  { %v9293_v44 = vadd.f32 %v6329_v32, %v6325_v12  ;;  %5453 = vmatpush1.bf16.msra.mxu0 %v4234_v59  ;;  %5514 = vmatpush1.bf16.msra.mxu1 %v4236_v33  ;;  %v4110_v33 = vld [vmem:[#allocation4 + $0x940] sm:$0xff]  ;;  %v4112_v12 = vld [vmem:[#allocation4 + $0x950] sm:$0xff]  ;;  %v4175_v32 = vld [vmem:[#allocation4 + $0xb48] sm:$0xff] }
 0x7a0   :  { %5454 = vmatprep.subr.bf16.mxu0 %v4299_v34  ;;  %5515 = vmatprep.subr.bf16.mxu1 %v4301_v46  ;;  %v4177_v34 = vld [vmem:[#allocation4 + $0xb58] sm:$0xff]  ;;  %v4174_v46 = vld [vmem:[#allocation4 + $0xb40] sm:$0xff] }
 0x7a1   :  { %v4628_v58 = vpop.f32.mrb[112].mxu0  ;;  %v4689_v41 = vpop.f32.mrb[200].mxu1  ;;  %5472 = vmatprep.mubr.bf16.mxu0 %v9527_v21  ;;  %5533 = vmatprep.mubr.bf16.mxu1 %v9527_v21 }
 0x7a2   :  { %v4629_v43 = vpop.f32.mrb[113].mxu0  ;;  %v4690_v60 = vpop.f32.mrb[201].mxu1  ;;  %v4239_v41 = vld [vmem:[#allocation4 + $0xd48] sm:$0xff] }
 0x7a3   :  { %5455 = vmatpush1.bf16.msra.mxu0 %v4298_v28  ;;  %v4630_v15 = vpop.f32.mrb[114].mxu0  ;;  %v4691_v23 = vpop.f32.mrb[202].mxu1  ;;  %5516 = vmatpush1.bf16.msra.mxu1 %v4300_v19  ;;  %v4176_v28 = vld [vmem:[#allocation4 + $0xb50] sm:$0xff] }
 0x7a4   :  { %v4631_v39 = vpop.f32.mrb[115].mxu0  ;;  %v4692_v27 = vpop.f32.mrb[203].mxu1  ;;  %5562 = vmatprep.subr.bf16.mxu0 %v3855_v47  ;;  %5623 = vmatprep.subr.bf16.mxu1 %v3857_v24  ;;  %v4241_v47 = vld [vmem:[#allocation4 + $0xd58] sm:$0xff] }
 0x7a6   :  { %5473 = vmatmul.mubr.bf16.vlgmr.msra.gmra.mrb[220].mxu0 %v9119_v9  ;;  %5534 = vmatmul.mubr.bf16.vlgmr.msra.gmra.mrb[52].mxu1 %v9119_v9 }
 0x7a7   :  { %5563 = vmatpush1.bf16.msra.mxu0 %v3854_v45  ;;  %5624 = vmatpush1.bf16.msra.mxu1 %v3856_v51 }
 0x7a8   :  { %5564 = vmatprep.subr.bf16.mxu0 %v3919_v63  ;;  %5625 = vmatprep.subr.bf16.mxu1 %v3921_v36  ;;  %v4238_v36 = vld [vmem:[#allocation4 + $0xd40] sm:$0xff] }
 0x7a9   :  { %v4634_v62 = vpop.f32.mrb[116].mxu0  ;;  %v4695_v6 = vpop.f32.mrb[204].mxu1  ;;  %5478 = vmatprep.mubr.bf16.mxu0 %v9527_v21  ;;  %5539 = vmatprep.mubr.bf16.mxu1 %v9527_v21 }
 0x7aa   :  { %v6550_v3 = vrot.slane %v4634_v62, 4  ;;  %v4636_v35 = vpop.f32.mrb[117].mxu0  ;;  %v4697_v8 = vpop.f32.mrb[205].mxu1  ;;  %v6558_v4 = vrot.slane %v4695_v6, 5  ;;  %v4303_v6 = vld [vmem:[#allocation4 + $0xf48] sm:$0xff] }
 0x7ab   :  { %v6551_v1 = vrot.slane %v4636_v35, 4  ;;  %5565 = vmatpush1.bf16.msra.mxu0 %v3918_v18  ;;  %v4638_v11 = vpop.f32.mrb[118].mxu0  ;;  %v4699_v20 = vpop.f32.mrb[206].mxu1  ;;  %5626 = vmatpush1.bf16.msra.mxu1 %v3920_v13  ;;  %v6559_v5 = vrot.slane %v4697_v8, 5  ;;  %v4240_v18 = vld [vmem:[#allocation4 + $0xd50] sm:$0xff] }
 0x7ac   :  { %v6554_v0 = vadd.f32 %v6550_v3, %v9275_v7  ;;  %v4639_v10 = vpop.f32.mrb[119].mxu0  ;;  %v4700_v22 = vpop.f32.mrb[207].mxu1  ;;  %5566 = vmatprep.subr.bf16.mxu0 %v3983_v16  ;;  %5627 = vmatprep.subr.bf16.mxu1 %v3985_v54  ;;  %v4046_v7 = vld [vmem:[#allocation4 + $0x740] sm:$0xff]  ;;  %v4305_v16 = vld [vmem:[#allocation4 + $0xf58] sm:$0xff]  ;;  %v4304_v35 = vld [vmem:[#allocation4 + $0xf50] sm:$0xff] }
 0x7ad   :  { %v6555_v53 = vadd.f32 %v6551_v1, %v9279_v37  ;;  %v4111_v37 = vld [vmem:[#allocation4 + $0x948] sm:$0xff]  ;;  %v4302_v3 = vld [vmem:[#allocation4 + $0xf40] sm:$0xff]  ;;  %v3861_v11 = vld [vmem:[#allocation4 + $0x178] sm:$0xff] }
 0x7ae   :  { %v9303_v40 = vadd.f32 %v6558_v4, %v6554_v0  ;;  %5479 = vmatmul.mubr.bf16.gmra.mrb[224].mxu0 %v9125_v26  ;;  %5540 = vmatmul.mubr.bf16.gmra.mrb[56].mxu1 %v9125_v26 }
 0x7af   :  { %v9307_v57 = vadd.f32 %v6559_v5, %v6555_v53  ;;  %5567 = vmatpush1.bf16.msra.mxu0 %v3982_v31  ;;  %5628 = vmatpush1.bf16.msra.mxu1 %v3984_v56  ;;  %v3858_v56 = vld [vmem:[#allocation4 + $0x160] sm:$0xff]  ;;  %v3860_v53 = vld [vmem:[#allocation4 + $0x170] sm:$0xff]  ;;  %v3923_v5 = vld [vmem:[#allocation4 + $0x368] sm:$0xff] }
 0x7b0   :  { %5568 = vmatprep.subr.bf16.mxu0 %v4047_v42  ;;  %5629 = vmatprep.subr.bf16.mxu1 %v4049_v25  ;;  %v3925_v42 = vld [vmem:[#allocation4 + $0x378] sm:$0xff]  ;;  %v3922_v25 = vld [vmem:[#allocation4 + $0x360] sm:$0xff] }
 0x7b1   :  { %v4642_v49 = vpop.f32.mrb[120].mxu0  ;;  %v4703_v50 = vpop.f32.mrb[208].mxu1  ;;  %5486 = vmatprep.mubr.bf16.mxu0 %v9527_v21  ;;  %5547 = vmatprep.mubr.bf16.mxu1 %v9527_v21 }
 0x7b2   :  { %v4643_v29 = vpop.f32.mrb[121].mxu0  ;;  %v4704_v52 = vpop.f32.mrb[209].mxu1  ;;  %v3987_v50 = vld [vmem:[#allocation4 + $0x568] sm:$0xff] }
 0x7b3   :  { %5569 = vmatpush1.bf16.msra.mxu0 %v4046_v7  ;;  %v4644_v2 = vpop.f32.mrb[122].mxu0  ;;  %v4705_v14 = vpop.f32.mrb[210].mxu1  ;;  %5630 = vmatpush1.bf16.msra.mxu1 %v4048_v30  ;;  %v3924_v7 = vld [vmem:[#allocation4 + $0x370] sm:$0xff] }
 0x7b4   :  { %v4645_v38 = vpop.f32.mrb[123].mxu0  ;;  %v4706_v59 = vpop.f32.mrb[211].mxu1  ;;  %5570 = vmatprep.subr.bf16.mxu0 %v4111_v37  ;;  %5631 = vmatprep.subr.bf16.mxu1 %v4113_v55  ;;  %v3989_v37 = vld [vmem:[#allocation4 + $0x578] sm:$0xff] }
 0x7b6   :  { %5487 = vmatmul.mubr.bf16.gmra.mrb[228].mxu0 %v9131_v17  ;;  %5548 = vmatmul.mubr.bf16.gmra.mrb[60].mxu1 %v9131_v17 }
 0x7b7   :  { %5571 = vmatpush1.bf16.msra.mxu0 %v4110_v33  ;;  %5632 = vmatpush1.bf16.msra.mxu1 %v4112_v12 }
 0x7b8   :  { %5572 = vmatprep.subr.bf16.mxu0 %v4175_v32  ;;  %5633 = vmatprep.subr.bf16.mxu1 %v4177_v34  ;;  %v3986_v34 = vld [vmem:[#allocation4 + $0x560] sm:$0xff] }
 0x7b9   :  { %v4742_v19 = vpop.f32.mrb[124].mxu0  ;;  %v4803_v58 = vpop.f32.mrb[212].mxu1  ;;  %5492 = vmatprep.mubr.bf16.mxu0 %v9527_v21  ;;  %5553 = vmatprep.mubr.bf16.mxu1 %v9527_v21 }
 0x7ba   :  { %v6336_v24 = vrot.slane %v4742_v19, 6  ;;  %v4744_v43 = vpop.f32.mrb[125].mxu0  ;;  %v4805_v60 = vpop.f32.mrb[213].mxu1  ;;  %v6344_v45 = vrot.slane %v4803_v58, 7  ;;  %v4051_v58 = vld [vmem:[#allocation4 + $0x768] sm:$0xff] }
 0x7bb   :  { %v6337_v15 = vrot.slane %v4744_v43, 6  ;;  %5573 = vmatpush1.bf16.msra.mxu0 %v4174_v46  ;;  %v4746_v23 = vpop.f32.mrb[126].mxu0  ;;  %v4807_v39 = vpop.f32.mrb[214].mxu1  ;;  %5634 = vmatpush1.bf16.msra.mxu1 %v4176_v28  ;;  %v6345_v62 = vrot.slane %v4805_v60, 7  ;;  %v3988_v46 = vld [vmem:[#allocation4 + $0x570] sm:$0xff] }
 0x7bc   :  { %v6340_v27 = vadd.f32 %v6336_v24, %v9289_v61  ;;  %v4747_v51 = vpop.f32.mrb[127].mxu0  ;;  %v4808_v63 = vpop.f32.mrb[215].mxu1  ;;  %5574 = vmatprep.subr.bf16.mxu0 %v4239_v41  ;;  %5635 = vmatprep.subr.bf16.mxu1 %v4241_v47  ;;  %v4053_v41 = vld [vmem:[#allocation4 + $0x778] sm:$0xff]  ;;  %v4050_v24 = vld [vmem:[#allocation4 + $0x760] sm:$0xff]  ;;  %v4052_v43 = vld [vmem:[#allocation4 + $0x770] sm:$0xff] }
 0x7bd   :  { %v6341_v13 = vadd.f32 %v6337_v15, %v9293_v44  ;;  %v3859_v44 = vld [vmem:[#allocation4 + $0x168] sm:$0xff]  ;;  %v4117_v23 = vld [vmem:[#allocation4 + $0x978] sm:$0xff] }
 0x7be   :  { %5493 = vmatmul.mubr.bf16.gmra.mrb[232].mxu0 %v9137_v48  ;;  %5554 = vmatmul.mubr.bf16.gmra.mrb[64].mxu1 %v9137_v48  ;;  %v9319_v54 = vadd.f32 %v6344_v45, %v6340_v27 }
 0x7bf   :  { %5575 = vmatpush1.bf16.msra.mxu0 %v4238_v36  ;;  %5636 = vmatpush1.bf16.msra.mxu1 %v4240_v18  ;;  %v9321_v61 = vadd.f32 %v6345_v62, %v6341_v13  ;;  %v4114_v18 = vld [vmem:[#allocation4 + $0x960] sm:$0xff]  ;;  %v4116_v13 = vld [vmem:[#allocation4 + $0x970] sm:$0xff]  ;;  %v4179_v62 = vld [vmem:[#allocation4 + $0xb68] sm:$0xff] }
 0x7c0   :  { %5576 = vmatprep.subr.bf16.mxu0 %v4303_v6  ;;  %5637 = vmatprep.subr.bf16.mxu1 %v4305_v16  ;;  %v4181_v6 = vld [vmem:[#allocation4 + $0xb78] sm:$0xff]  ;;  %v4178_v16 = vld [vmem:[#allocation4 + $0xb60] sm:$0xff] }
 0x7c1   :  { %v4750_v8 = vpop.f32.mrb[128].mxu0  ;;  %v4811_v1 = vpop.f32.mrb[216].mxu1  ;;  %5594 = vmatprep.mubr.bf16.mxu0 %v9527_v21  ;;  %5655 = vmatprep.mubr.bf16.mxu1 %v9527_v21 }
 0x7c2   :  { %v4751_v20 = vpop.f32.mrb[129].mxu0  ;;  %v4812_v0 = vpop.f32.mrb[217].mxu1  ;;  %v4243_v1 = vld [vmem:[#allocation4 + $0xd68] sm:$0xff] }
 0x7c3   :  { %5577 = vmatpush1.bf16.msra.mxu0 %v4302_v3  ;;  %v4752_v4 = vpop.f32.mrb[130].mxu0  ;;  %v4813_v10 = vpop.f32.mrb[218].mxu1  ;;  %5638 = vmatpush1.bf16.msra.mxu1 %v4304_v35  ;;  %v4180_v3 = vld [vmem:[#allocation4 + $0xb70] sm:$0xff] }
 0x7c4   :  { %v4753_v22 = vpop.f32.mrb[131].mxu0  ;;  %v4814_v31 = vpop.f32.mrb[219].mxu1  ;;  %5684 = vmatprep.subr.bf16.mxu0 %v3859_v44  ;;  %5745 = vmatprep.subr.bf16.mxu1 %v3861_v11  ;;  %v4245_v44 = vld [vmem:[#allocation4 + $0xd78] sm:$0xff] }
 0x7c6   :  { %5595 = vmatmul.mubr.bf16.vlgmr.msra.gmra.mrb[236].mxu0 %v9119_v9  ;;  %5656 = vmatmul.mubr.bf16.vlgmr.msra.gmra.mrb[68].mxu1 %v9119_v9 }
 0x7c7   :  { %5685 = vmatpush1.bf16.msra.mxu0 %v3858_v56  ;;  %5746 = vmatpush1.bf16.msra.mxu1 %v3860_v53  ;;  %v4242_v53 = vld [vmem:[#allocation4 + $0xd60] sm:$0xff] }
 0x7c8   :  { %5686 = vmatprep.subr.bf16.mxu0 %v3923_v5  ;;  %5747 = vmatprep.subr.bf16.mxu1 %v3925_v42  ;;  %v4244_v5 = vld [vmem:[#allocation4 + $0xd70] sm:$0xff] }
 0x7c9   :  { %v4756_v30 = vpop.f32.mrb[132].mxu0  ;;  %v4817_v49 = vpop.f32.mrb[220].mxu1  ;;  %5600 = vmatprep.mubr.bf16.mxu0 %v9527_v21  ;;  %5661 = vmatprep.mubr.bf16.mxu1 %v9527_v21 }
 0x7ca   :  { %v6566_v55 = vrot.slane %v4756_v30, 6  ;;  %v4758_v29 = vpop.f32.mrb[133].mxu0  ;;  %v4819_v52 = vpop.f32.mrb[221].mxu1  ;;  %v6574_v33 = vrot.slane %v4817_v49, 7  ;;  %v4309_v30 = vld [vmem:[#allocation4 + $0xf78] sm:$0xff] }
 0x7cb   :  { %v6567_v2 = vrot.slane %v4758_v29, 6  ;;  %5687 = vmatpush1.bf16.msra.mxu0 %v3922_v25  ;;  %v4760_v14 = vpop.f32.mrb[134].mxu0  ;;  %v4821_v38 = vpop.f32.mrb[222].mxu1  ;;  %5748 = vmatpush1.bf16.msra.mxu1 %v3924_v7  ;;  %v6575_v19 = vrot.slane %v4819_v52, 7  ;;  %v4307_v7 = vld [vmem:[#allocation4 + $0xf68] sm:$0xff]  ;;  %v3865_v52 = vld [vmem:[#allocation4 + $0x198] sm:$0xff] }
 0x7cc   :  { %v6570_v59 = vadd.f32 %v6566_v55, %v9303_v40  ;;  %v4761_v12 = vpop.f32.mrb[135].mxu0  ;;  %v4822_v32 = vpop.f32.mrb[223].mxu1  ;;  %5688 = vmatprep.subr.bf16.mxu0 %v3987_v50  ;;  %5749 = vmatprep.subr.bf16.mxu1 %v3989_v37  ;;  %v4308_v37 = vld [vmem:[#allocation4 + $0xf70] sm:$0xff] }
 0x7cd   :  { %v6571_v28 = vadd.f32 %v6567_v2, %v9307_v57  ;;  %v4115_v57 = vld [vmem:[#allocation4 + $0x968] sm:$0xff]  ;;  %v3862_v32 = vld [vmem:[#allocation4 + $0x180] sm:$0xff] }
 0x7ce   :  { %5601 = vmatmul.mubr.bf16.gmra.mrb[240].mxu0 %v9125_v26  ;;  %5662 = vmatmul.mubr.bf16.gmra.mrb[72].mxu1 %v9125_v26  ;;  %v9333_v47 = vadd.f32 %v6574_v33, %v6570_v59 }
 0x7cf   :  { %5689 = vmatpush1.bf16.msra.mxu0 %v3986_v34  ;;  %5750 = vmatpush1.bf16.msra.mxu1 %v3988_v46  ;;  %v9335_v40 = vadd.f32 %v6575_v19, %v6571_v28  ;;  %v3864_v34 = vld [vmem:[#allocation4 + $0x190] sm:$0xff]  ;;  %v3927_v46 = vld [vmem:[#allocation4 + $0x388] sm:$0xff]  ;;  %v3929_v28 = vld [vmem:[#allocation4 + $0x398] sm:$0xff] }
 0x7d0   :  { %5690 = vmatprep.subr.bf16.mxu0 %v4051_v58  ;;  %5751 = vmatprep.subr.bf16.mxu1 %v4053_v41  ;;  %v3926_v19 = vld [vmem:[#allocation4 + $0x380] sm:$0xff]  ;;  %v3928_v58 = vld [vmem:[#allocation4 + $0x390] sm:$0xff] }
 0x7d1   :  { %v4764_v60 = vpop.f32.mrb[136].mxu0  ;;  %v4825_v15 = vpop.f32.mrb[224].mxu1  ;;  %5608 = vmatprep.mubr.bf16.mxu0 %v9527_v21  ;;  %5669 = vmatprep.mubr.bf16.mxu1 %v9527_v21 }
 0x7d2   :  { %v4765_v39 = vpop.f32.mrb[137].mxu0  ;;  %v4826_v27 = vpop.f32.mrb[225].mxu1  ;;  %v3993_v60 = vld [vmem:[#allocation4 + $0x598] sm:$0xff] }
 0x7d3   :  { %5691 = vmatpush1.bf16.msra.mxu0 %v4050_v24  ;;  %v4766_v45 = vpop.f32.mrb[138].mxu0  ;;  %v4827_v51 = vpop.f32.mrb[226].mxu1  ;;  %5752 = vmatpush1.bf16.msra.mxu1 %v4052_v43  ;;  %v3991_v43 = vld [vmem:[#allocation4 + $0x588] sm:$0xff] }
 0x7d4   :  { %v4767_v63 = vpop.f32.mrb[139].mxu0  ;;  %v4828_v36 = vpop.f32.mrb[227].mxu1  ;;  %5692 = vmatprep.subr.bf16.mxu0 %v4115_v57  ;;  %5753 = vmatprep.subr.bf16.mxu1 %v4117_v23 }
 0x7d5   :  { %v3990_v36 = vld [vmem:[#allocation4 + $0x580] sm:$0xff] }
 0x7d6   :  { %5609 = vmatmul.mubr.bf16.gmra.mrb[244].mxu0 %v9131_v17  ;;  %5670 = vmatmul.mubr.bf16.gmra.mrb[76].mxu1 %v9131_v17 }
 0x7d7   :  { %5693 = vmatpush1.bf16.msra.mxu0 %v4114_v18  ;;  %5754 = vmatpush1.bf16.msra.mxu1 %v4116_v13  ;;  %v3992_v18 = vld [vmem:[#allocation4 + $0x590] sm:$0xff] }
 0x7d8   :  { %5694 = vmatprep.subr.bf16.mxu0 %v4179_v62  ;;  %5755 = vmatprep.subr.bf16.mxu1 %v4181_v6  ;;  %v4055_v6 = vld [vmem:[#allocation4 + $0x788] sm:$0xff] }
 0x7d9   :  { %v4864_v35 = vpop.f32.mrb[140].mxu0  ;;  %v4925_v8 = vpop.f32.mrb[228].mxu1  ;;  %5614 = vmatprep.mubr.bf16.mxu0 %v9527_v21  ;;  %5675 = vmatprep.mubr.bf16.mxu1 %v9527_v21 }
 0x7da   :  { %v4865_v11 = vpop.f32.mrb[141].mxu0  ;;  %v4926_v20 = vpop.f32.mrb[229].mxu1  ;;  %v4056_v8 = vld [vmem:[#allocation4 + $0x790] sm:$0xff] }
 0x7db   :  { %5695 = vmatpush1.bf16.msra.mxu0 %v4178_v16  ;;  %v4866_v0 = vpop.f32.mrb[142].mxu0  ;;  %v4927_v4 = vpop.f32.mrb[230].mxu1  ;;  %5756 = vmatpush1.bf16.msra.mxu1 %v4180_v3  ;;  %v4057_v16 = vld [vmem:[#allocation4 + $0x798] sm:$0xff] }
 0x7dc   :  { %v6350_v10 = vadd.f32 %v9319_v54, %v4866_v0  ;;  %v6354_v22 = vrot.slane %v4927_v4, 1  ;;  %v4868_v31 = vpop.f32.mrb[143].mxu0  ;;  %v4929_v56 = vpop.f32.mrb[231].mxu1  ;;  %5696 = vmatprep.subr.bf16.mxu0 %v4243_v1  ;;  %5757 = vmatprep.subr.bf16.mxu1 %v4245_v44  ;;  %v4306_v54 = vld [vmem:[#allocation4 + $0xf60] sm:$0xff]  ;;  %v4121_v11 = vld [vmem:[#allocation4 + $0x998] sm:$0xff] }
 0x7dd   :  { %v6351_v42 = vadd.f32 %v9321_v61, %v4868_v31  ;;  %v6355_v25 = vrot.slane %v4929_v56, 1  ;;  %v3863_v61 = vld [vmem:[#allocation4 + $0x188] sm:$0xff]  ;;  %v4118_v56 = vld [vmem:[#allocation4 + $0x980] sm:$0xff] }
 0x7de   :  { %v9345_v49 = vadd.f32 %v6354_v22, %v6350_v10  ;;  %5615 = vmatmul.mubr.bf16.gmra.mrb[248].mxu0 %v9137_v48  ;;  %5676 = vmatmul.mubr.bf16.gmra.mrb[80].mxu1 %v9137_v48 }
 0x7df   :  { %v9349_v50 = vadd.f32 %v6355_v25, %v6351_v42  ;;  %5697 = vmatpush1.bf16.msra.mxu0 %v4242_v53  ;;  %5758 = vmatpush1.bf16.msra.mxu1 %v4244_v5  ;;  %v4120_v53 = vld [vmem:[#allocation4 + $0x990] sm:$0xff]  ;;  %v4183_v5 = vld [vmem:[#allocation4 + $0xb88] sm:$0xff]  ;;  %v4185_v42 = vld [vmem:[#allocation4 + $0xb98] sm:$0xff] }
 0x7e0   :  { %5698 = vmatprep.subr.bf16.mxu0 %v4307_v7  ;;  %5759 = vmatprep.subr.bf16.mxu1 %v4309_v30  ;;  %v4182_v25 = vld [vmem:[#allocation4 + $0xb80] sm:$0xff]  ;;  %v4184_v7 = vld [vmem:[#allocation4 + $0xb90] sm:$0xff] }
 0x7e1   :  { %v4872_v55 = vpop.f32.mrb[144].mxu0  ;;  %v4933_v29 = vpop.f32.mrb[232].mxu1  ;;  %5716 = vmatprep.mubr.bf16.mxu0 %v9527_v21  ;;  %5777 = vmatprep.mubr.bf16.mxu1 %v9527_v21 }
 0x7e2   :  { %v4873_v2 = vpop.f32.mrb[145].mxu0  ;;  %v4934_v14 = vpop.f32.mrb[233].mxu1  ;;  %v4249_v55 = vld [vmem:[#allocation4 + $0xd98] sm:$0xff] }
 0x7e3   :  { %5699 = vmatpush1.bf16.msra.mxu0 %v4306_v54  ;;  %v4874_v38 = vpop.f32.mrb[146].mxu0  ;;  %v4935_v59 = vpop.f32.mrb[234].mxu1  ;;  %5760 = vmatpush1.bf16.msra.mxu1 %v4308_v37  ;;  %v4247_v37 = vld [vmem:[#allocation4 + $0xd88] sm:$0xff] }
 0x7e4   :  { %v4875_v33 = vpop.f32.mrb[147].mxu0  ;;  %v4936_v12 = vpop.f32.mrb[235].mxu1  ;;  %5806 = vmatprep.subr.bf16.mxu0 %v3863_v61  ;;  %5867 = vmatprep.subr.bf16.mxu1 %v3865_v52 }
 0x7e5   :  { %v4246_v33 = vld [vmem:[#allocation4 + $0xd80] sm:$0xff]  ;;  %v4248_v12 = vld [vmem:[#allocation4 + $0xd90] sm:$0xff] }
 0x7e6   :  { %5717 = vmatmul.mubr.bf16.vlgmr.msra.gmra.mrb[252].mxu0 %v9119_v9  ;;  %5778 = vmatmul.mubr.bf16.vlgmr.msra.gmra.mrb[84].mxu1 %v9119_v9 }
 0x7e7   :  { %5807 = vmatpush1.bf16.msra.mxu0 %v3862_v32  ;;  %5868 = vmatpush1.bf16.msra.mxu1 %v3864_v34  ;;  %v4311_v34 = vld [vmem:[#allocation4 + $0xf88] sm:$0xff] }
 0x7e8   :  { %5808 = vmatprep.subr.bf16.mxu0 %v3927_v46  ;;  %5869 = vmatprep.subr.bf16.mxu1 %v3929_v28  ;;  %v4313_v46 = vld [vmem:[#allocation4 + $0xf98] sm:$0xff] }
 0x7e9   :  { %v4878_v41 = vpop.f32.mrb[148].mxu0  ;;  %v4939_v24 = vpop.f32.mrb[236].mxu1  ;;  %5722 = vmatprep.mubr.bf16.mxu0 %v9527_v21  ;;  %5783 = vmatprep.mubr.bf16.mxu1 %v9527_v21 }
 0x7ea   :  { %v4879_v15 = vpop.f32.mrb[149].mxu0  ;;  %v4940_v57 = vpop.f32.mrb[237].mxu1 }
 0x7eb   :  { %5809 = vmatpush1.bf16.msra.mxu0 %v3926_v19  ;;  %v4880_v23 = vpop.f32.mrb[150].mxu0  ;;  %v4941_v39 = vpop.f32.mrb[238].mxu1  ;;  %5870 = vmatpush1.bf16.msra.mxu1 %v3928_v58 }
 0x7ec   :  { %v6580_v27 = vadd.f32 %v9333_v47, %v4880_v23  ;;  %v6584_v45 = vrot.slane %v4941_v39, 1  ;;  %v4882_v51 = vpop.f32.mrb[151].mxu0  ;;  %v4943_v63 = vpop.f32.mrb[239].mxu1  ;;  %5810 = vmatprep.subr.bf16.mxu0 %v3991_v43  ;;  %5871 = vmatprep.subr.bf16.mxu1 %v3993_v60  ;;  %v4054_v47 = vld [vmem:[#allocation4 + $0x780] sm:$0xff]  ;;  %v4312_v60 = vld [vmem:[#allocation4 + $0xf90] sm:$0xff]  ;;  %v3867_v23 = vld [vmem:[#allocation4 + $0x1a8] sm:$0xff] }
 0x7ed   :  { %v6581_v13 = vadd.f32 %v9335_v40, %v4882_v51  ;;  %v6585_v62 = vrot.slane %v4943_v63, 1  ;;  %v4119_v40 = vld [vmem:[#allocation4 + $0x988] sm:$0xff]  ;;  %v4310_v43 = vld [vmem:[#allocation4 + $0xf80] sm:$0xff]  ;;  %v3869_v39 = vld [vmem:[#allocation4 + $0x1b8] sm:$0xff] }
 0x7ee   :  { %v9359_v3 = vadd.f32 %v6584_v45, %v6580_v27  ;;  %5723 = vmatmul.mubr.bf16.gmra.mrb[24].mxu0 %v9125_v26  ;;  %5784 = vmatmul.mubr.bf16.gmra.mrb[88].mxu1 %v9125_v26 }
 0x7ef   :  { %v9363_v35 = vadd.f32 %v6585_v62, %v6581_v13  ;;  %5811 = vmatpush1.bf16.msra.mxu0 %v3990_v36  ;;  %5872 = vmatpush1.bf16.msra.mxu1 %v3992_v18  ;;  %v3866_v18 = vld [vmem:[#allocation4 + $0x1a0] sm:$0xff]  ;;  %v3868_v13 = vld [vmem:[#allocation4 + $0x1b0] sm:$0xff]  ;;  %v3931_v62 = vld [vmem:[#allocation4 + $0x3a8] sm:$0xff] }
 0x7f0   :  { %5812 = vmatprep.subr.bf16.mxu0 %v4055_v6  ;;  %5873 = vmatprep.subr.bf16.mxu1 %v4057_v16  ;;  %v3933_v6 = vld [vmem:[#allocation4 + $0x3b8] sm:$0xff]  ;;  %v3930_v16 = vld [vmem:[#allocation4 + $0x3a0] sm:$0xff] }
 0x7f1   :  { %v4886_v1 = vpop.f32.mrb[152].mxu0  ;;  %v4947_v44 = vpop.f32.mrb[240].mxu1  ;;  %5730 = vmatprep.mubr.bf16.mxu0 %v9527_v21  ;;  %5791 = vmatprep.mubr.bf16.mxu1 %v9527_v21 }
 0x7f2   :  { %v4887_v20 = vpop.f32.mrb[153].mxu0  ;;  %v4948_v0 = vpop.f32.mrb[241].mxu1  ;;  %v3995_v44 = vld [vmem:[#allocation4 + $0x5a8] sm:$0xff] }
 0x7f3   :  { %5813 = vmatpush1.bf16.msra.mxu0 %v4054_v47  ;;  %v4888_v4 = vpop.f32.mrb[154].mxu0  ;;  %v4949_v10 = vpop.f32.mrb[242].mxu1  ;;  %5874 = vmatpush1.bf16.msra.mxu1 %v4056_v8  ;;  %v3932_v47 = vld [vmem:[#allocation4 + $0x3b0] sm:$0xff] }
 0x7f4   :  { %v4889_v22 = vpop.f32.mrb[155].mxu0  ;;  %v4950_v31 = vpop.f32.mrb[243].mxu1  ;;  %5814 = vmatprep.subr.bf16.mxu0 %v4119_v40  ;;  %5875 = vmatprep.subr.bf16.mxu1 %v4121_v11  ;;  %v3997_v40 = vld [vmem:[#allocation4 + $0x5b8] sm:$0xff] }
 0x7f6   :  { %5731 = vmatmul.mubr.bf16.gmra.mrb[28].mxu0 %v9131_v17  ;;  %5792 = vmatmul.mubr.bf16.gmra.mrb[92].mxu1 %v9131_v17 }
 0x7f7   :  { %5815 = vmatpush1.bf16.msra.mxu0 %v4118_v56  ;;  %5876 = vmatpush1.bf16.msra.mxu1 %v4120_v53  ;;  %v3994_v56 = vld [vmem:[#allocation4 + $0x5a0] sm:$0xff]  ;;  %v3996_v53 = vld [vmem:[#allocation4 + $0x5b0] sm:$0xff] }
 0x7f8   :  { %5816 = vmatprep.subr.bf16.mxu0 %v4183_v5  ;;  %5877 = vmatprep.subr.bf16.mxu1 %v4185_v42  ;;  %v4059_v42 = vld [vmem:[#allocation4 + $0x7a8] sm:$0xff] }
 0x7f9   :  { %v4986_v30 = vpop.f32.mrb[156].mxu0  ;;  %v5047_v54 = vpop.f32.mrb[244].mxu1  ;;  %5736 = vmatprep.mubr.bf16.mxu0 %v9527_v21  ;;  %5797 = vmatprep.mubr.bf16.mxu1 %v9527_v21 }
 0x7fa   :  { %v4987_v29 = vpop.f32.mrb[157].mxu0  ;;  %v5048_v61 = vpop.f32.mrb[245].mxu1 }
 0x7fb   :  { %5817 = vmatpush1.bf16.msra.mxu0 %v4182_v25  ;;  %v4988_v52 = vpop.f32.mrb[158].mxu0  ;;  %v5049_v2 = vpop.f32.mrb[246].mxu1  ;;  %5878 = vmatpush1.bf16.msra.mxu1 %v4184_v7  ;;  %v4061_v25 = vld [vmem:[#allocation4 + $0x7b8] sm:$0xff]  ;;  %v4058_v29 = vld [vmem:[#allocation4 + $0x7a0] sm:$0xff]  ;;  %v4060_v61 = vld [vmem:[#allocation4 + $0x7b0] sm:$0xff] }
 0x7fc   :  { %v6362_v14 = vrot.slane %v4988_v52, 2  ;;  %v4990_v38 = vpop.f32.mrb[159].mxu0  ;;  %v5051_v59 = vpop.f32.mrb[247].mxu1  ;;  %5818 = vmatprep.subr.bf16.mxu0 %v4247_v37  ;;  %5879 = vmatprep.subr.bf16.mxu1 %v4249_v55  ;;  %v6370_v19 = vrot.slane %v5049_v2, 3 }
 0x7fd   :  { %v6363_v32 = vrot.slane %v4990_v38, 2  ;;  %v6371_v41 = vrot.slane %v5051_v59, 3  ;;  %v4125_v38 = vld [vmem:[#allocation4 + $0x9b8] sm:$0xff] }
 0x7fe   :  { %v6366_v28 = vadd.f32 %v6362_v14, %v9345_v49  ;;  %5737 = vmatmul.mubr.bf16.gmra.mrb[0].mxu0 %v9137_v48  ;;  %5798 = vmatmul.mubr.bf16.gmra.mrb[96].mxu1 %v9137_v48  ;;  %v4123_v14 = vld [vmem:[#allocation4 + $0x9a8] sm:$0xff] }
 0x7ff   :  { %v6367_v58 = vadd.f32 %v6363_v32, %v9349_v50  ;;  %5819 = vmatpush1.bf16.msra.mxu0 %v4246_v33  ;;  %5880 = vmatpush1.bf16.msra.mxu1 %v4248_v12 }
 0x800   :  { %v9375_v24 = vadd.f32 %v6370_v19, %v6366_v28  ;;  %5820 = vmatprep.subr.bf16.mxu0 %v4311_v34  ;;  %5881 = vmatprep.subr.bf16.mxu1 %v4313_v46  ;;  %v4122_v46 = vld [vmem:[#allocation4 + $0x9a0] sm:$0xff]  ;;  %v4124_v28 = vld [vmem:[#allocation4 + $0x9b0] sm:$0xff]  ;;  %v4187_v19 = vld [vmem:[#allocation4 + $0xba8] sm:$0xff] }
 0x801   :  { %v9377_v15 = vadd.f32 %v6371_v41, %v6367_v58  ;;  %v4994_v57 = vpop.f32.mrb[160].mxu0  ;;  %v5055_v49 = vpop.f32.mrb[248].mxu1  ;;  %5838 = vmatprep.mubr.bf16.mxu0 %v9527_v21  ;;  %5899 = vmatprep.mubr.bf16.mxu1 %v9527_v21  ;;  %v4189_v58 = vld [vmem:[#allocation4 + $0xbb8] sm:$0xff]  ;;  %v4186_v41 = vld [vmem:[#allocation4 + $0xba0] sm:$0xff] }
 0x802   :  { %v4995_v50 = vpop.f32.mrb[161].mxu0  ;;  %v5056_v27 = vpop.f32.mrb[249].mxu1  ;;  %v4251_v49 = vld [vmem:[#allocation4 + $0xda8] sm:$0xff] }
 0x803   :  { %5821 = vmatpush1.bf16.msra.mxu0 %v4310_v43  ;;  %v4996_v45 = vpop.f32.mrb[162].mxu0  ;;  %v5057_v51 = vpop.f32.mrb[250].mxu1  ;;  %5882 = vmatpush1.bf16.msra.mxu1 %v4312_v60  ;;  %v4188_v43 = vld [vmem:[#allocation4 + $0xbb0] sm:$0xff] }
 0x804   :  { %v4997_v63 = vpop.f32.mrb[163].mxu0  ;;  %v5058_v36 = vpop.f32.mrb[251].mxu1  ;;  %5928 = vmatprep.subr.bf16.mxu0 %v3867_v23  ;;  %5989 = vmatprep.subr.bf16.mxu1 %v3869_v39  ;;  %v4253_v23 = vld [vmem:[#allocation4 + $0xdb8] sm:$0xff] }
 0x806   :  { %5839 = vmatmul.mubr.bf16.vlgmr.msra.gmra.mrb[4].mxu0 %v9119_v9  ;;  %5900 = vmatmul.mubr.bf16.vlgmr.msra.gmra.mrb[100].mxu1 %v9119_v9 }
 0x807   :  { %5929 = vmatpush1.bf16.msra.mxu0 %v3866_v18  ;;  %5990 = vmatpush1.bf16.msra.mxu1 %v3868_v13  ;;  %v4250_v18 = vld [vmem:[#allocation4 + $0xda0] sm:$0xff]  ;;  %v4252_v13 = vld [vmem:[#allocation4 + $0xdb0] sm:$0xff] }
 0x808   :  { %5930 = vmatprep.subr.bf16.mxu0 %v3931_v62  ;;  %5991 = vmatprep.subr.bf16.mxu1 %v3933_v6  ;;  %v4315_v6 = vld [vmem:[#allocation4 + $0xfa8] sm:$0xff] }
 0x809   :  { %v5000_v8 = vpop.f32.mrb[164].mxu0  ;;  %v5061_v1 = vpop.f32.mrb[252].mxu1  ;;  %5844 = vmatprep.mubr.bf16.mxu0 %v9527_v21  ;;  %5905 = vmatprep.mubr.bf16.mxu1 %v9527_v21 }
 0x80a   :  { %v5001_v11 = vpop.f32.mrb[165].mxu0  ;;  %v5062_v20 = vpop.f32.mrb[253].mxu1 }
 0x80b   :  { %5931 = vmatpush1.bf16.msra.mxu0 %v3930_v16  ;;  %v5002_v0 = vpop.f32.mrb[166].mxu0  ;;  %v5063_v4 = vpop.f32.mrb[254].mxu1  ;;  %5992 = vmatpush1.bf16.msra.mxu1 %v3932_v47  ;;  %v4317_v16 = vld [vmem:[#allocation4 + $0xfb8] sm:$0xff]  ;;  %v4314_v11 = vld [vmem:[#allocation4 + $0xfa0] sm:$0xff]  ;;  %v4316_v20 = vld [vmem:[#allocation4 + $0xfb0] sm:$0xff] }
 0x80c   :  { %v6592_v10 = vrot.slane %v5002_v0, 2  ;;  %v5004_v22 = vpop.f32.mrb[167].mxu0  ;;  %v5065_v31 = vpop.f32.mrb[255].mxu1  ;;  %5932 = vmatprep.subr.bf16.mxu0 %v3995_v44  ;;  %5993 = vmatprep.subr.bf16.mxu1 %v3997_v40  ;;  %v6600_v30 = vrot.slane %v5063_v4, 3 }
 0x80d   :  { %v6593_v5 = vrot.slane %v5004_v22, 2  ;;  %v6601_v37 = vrot.slane %v5065_v31, 3  ;;  %v3873_v22 = vld [vmem:[#allocation4 + $0x1d8] sm:$0xff] }
 0x80e   :  { %v6596_v7 = vadd.f32 %v6592_v10, %v9359_v3  ;;  %5845 = vmatmul.mubr.bf16.gmra.mrb[8].mxu0 %v9125_v26  ;;  %5906 = vmatmul.mubr.bf16.gmra.mrb[104].mxu1 %v9125_v26  ;;  %v3871_v10 = vld [vmem:[#allocation4 + $0x1c8] sm:$0xff] }
 0x80f   :  { %v6597_v54 = vadd.f32 %v6593_v5, %v9363_v35  ;;  %5933 = vmatpush1.bf16.msra.mxu0 %v3994_v56  ;;  %5994 = vmatpush1.bf16.msra.mxu1 %v3996_v53 }
 0x810   :  { %v9389_v55 = vadd.f32 %v6600_v30, %v6596_v7  ;;  %5934 = vmatprep.subr.bf16.mxu0 %v4059_v42  ;;  %5995 = vmatprep.subr.bf16.mxu1 %v4061_v25  ;;  %v3870_v25 = vld [vmem:[#allocation4 + $0x1c0] sm:$0xff]  ;;  %v3872_v7 = vld [vmem:[#allocation4 + $0x1d0] sm:$0xff]  ;;  %v3935_v30 = vld [vmem:[#allocation4 + $0x3c8] sm:$0xff] }
 0x811   :  { %v9391_v52 = vadd.f32 %v6601_v37, %v6597_v54  ;;  %v5008_v2 = vpop.f32.mrb[168].mxu0  ;;  %v5069_v3 = vpop.f32.mrb[0].mxu1  ;;  %5852 = vmatprep.mubr.bf16.mxu0 %v9527_v21  ;;  %5913 = vmatprep.mubr.bf16.mxu1 %v9527_v21  ;;  %v3937_v54 = vld [vmem:[#allocation4 + $0x3d8] sm:$0xff]  ;;  %v3934_v37 = vld [vmem:[#allocation4 + $0x3c0] sm:$0xff] }
 0x812   :  { %v5009_v35 = vpop.f32.mrb[169].mxu0  ;;  %v5070_v59 = vpop.f32.mrb[1].mxu1  ;;  %v3999_v3 = vld [vmem:[#allocation4 + $0x5c8] sm:$0xff] }
 0x813   :  { %5935 = vmatpush1.bf16.msra.mxu0 %v4058_v29  ;;  %v5010_v33 = vpop.f32.mrb[170].mxu0  ;;  %v5071_v12 = vpop.f32.mrb[2].mxu1  ;;  %5996 = vmatpush1.bf16.msra.mxu1 %v4060_v61  ;;  %v3936_v29 = vld [vmem:[#allocation4 + $0x3d0] sm:$0xff] }
 0x814   :  { %v5011_v32 = vpop.f32.mrb[171].mxu0  ;;  %v5072_v34 = vpop.f32.mrb[3].mxu1  ;;  %5936 = vmatprep.subr.bf16.mxu0 %v4123_v14  ;;  %5997 = vmatprep.subr.bf16.mxu1 %v4125_v38  ;;  %v4001_v14 = vld [vmem:[#allocation4 + $0x5d8] sm:$0xff] }
 0x816   :  { %5853 = vmatmul.mubr.bf16.gmra.mrb[12].mxu0 %v9131_v17  ;;  %5914 = vmatmul.mubr.bf16.gmra.mrb[108].mxu1 %v9131_v17 }
 0x817   :  { %5937 = vmatpush1.bf16.msra.mxu0 %v4122_v46  ;;  %5998 = vmatpush1.bf16.msra.mxu1 %v4124_v28  ;;  %v3998_v46 = vld [vmem:[#allocation4 + $0x5c0] sm:$0xff]  ;;  %v4000_v28 = vld [vmem:[#allocation4 + $0x5d0] sm:$0xff] }
 0x818   :  { %5938 = vmatprep.subr.bf16.mxu0 %v4187_v19  ;;  %5999 = vmatprep.subr.bf16.mxu1 %v4189_v58  ;;  %v4063_v58 = vld [vmem:[#allocation4 + $0x7c8] sm:$0xff] }
 0x819   :  { %v5108_v60 = vpop.f32.mrb[172].mxu0  ;;  %v5169_v57 = vpop.f32.mrb[4].mxu1  ;;  %5858 = vmatprep.mubr.bf16.mxu0 %v9527_v21  ;;  %5919 = vmatprep.mubr.bf16.mxu1 %v9527_v21 }
 0x81a   :  { %v5109_v39 = vpop.f32.mrb[173].mxu0  ;;  %v5170_v50 = vpop.f32.mrb[5].mxu1 }
 0x81b   :  { %5939 = vmatpush1.bf16.msra.mxu0 %v4186_v41  ;;  %v5110_v27 = vpop.f32.mrb[174].mxu0  ;;  %v5171_v45 = vpop.f32.mrb[6].mxu1  ;;  %6000 = vmatpush1.bf16.msra.mxu1 %v4188_v43  ;;  %v4065_v41 = vld [vmem:[#allocation4 + $0x7d8] sm:$0xff]  ;;  %v4062_v39 = vld [vmem:[#allocation4 + $0x7c0] sm:$0xff]  ;;  %v4064_v50 = vld [vmem:[#allocation4 + $0x7d0] sm:$0xff] }
 0x81c   :  { %v6378_v51 = vrot.slane %v5110_v27, 4  ;;  %v5112_v63 = vpop.f32.mrb[175].mxu0  ;;  %v5173_v36 = vpop.f32.mrb[7].mxu1  ;;  %5940 = vmatprep.subr.bf16.mxu0 %v4251_v49  ;;  %6001 = vmatprep.subr.bf16.mxu1 %v4253_v23  ;;  %v6386_v8 = vrot.slane %v5171_v45, 5 }
 0x81d   :  { %v6379_v62 = vrot.slane %v5112_v63, 4  ;;  %v6387_v44 = vrot.slane %v5173_v36, 5  ;;  %v4129_v63 = vld [vmem:[#allocation4 + $0x9d8] sm:$0xff] }
 0x81e   :  { %v6382_v47 = vadd.f32 %v6378_v51, %v9375_v24  ;;  %5859 = vmatmul.mubr.bf16.gmra.mrb[16].mxu0 %v9137_v48  ;;  %5920 = vmatmul.mubr.bf16.gmra.mrb[112].mxu1 %v9137_v48  ;;  %v4127_v51 = vld [vmem:[#allocation4 + $0x9c8] sm:$0xff] }
 0x81f   :  { %v6383_v1 = vadd.f32 %v6379_v62, %v9377_v15  ;;  %5941 = vmatpush1.bf16.msra.mxu0 %v4250_v18  ;;  %6002 = vmatpush1.bf16.msra.mxu1 %v4252_v13 }
 0x820   :  { %v9403_v40 = vadd.f32 %v6386_v8, %v6382_v47  ;;  %5942 = vmatprep.subr.bf16.mxu0 %v4315_v6  ;;  %6003 = vmatprep.subr.bf16.mxu1 %v4317_v16  ;;  %v4126_v16 = vld [vmem:[#allocation4 + $0x9c0] sm:$0xff]  ;;  %v4128_v47 = vld [vmem:[#allocation4 + $0x9d0] sm:$0xff]  ;;  %v4191_v8 = vld [vmem:[#allocation4 + $0xbc8] sm:$0xff] }
 0x821   :  { %v9405_v0 = vadd.f32 %v6387_v44, %v6383_v1  ;;  %v5116_v4 = vpop.f32.mrb[176].mxu0  ;;  %v5177_v24 = vpop.f32.mrb[8].mxu1  ;;  %5960 = vmatprep.mubr.bf16.mxu0 %v9527_v21  ;;  %6021 = vmatprep.mubr.bf16.mxu1 %v9527_v21  ;;  %v4193_v1 = vld [vmem:[#allocation4 + $0xbd8] sm:$0xff]  ;;  %v4190_v44 = vld [vmem:[#allocation4 + $0xbc0] sm:$0xff] }
 0x822   :  { %v5117_v15 = vpop.f32.mrb[177].mxu0  ;;  %v5178_v31 = vpop.f32.mrb[9].mxu1  ;;  %v4255_v24 = vld [vmem:[#allocation4 + $0xdc8] sm:$0xff] }
 0x823   :  { %5943 = vmatpush1.bf16.msra.mxu0 %v4314_v11  ;;  %v5118_v56 = vpop.f32.mrb[178].mxu0  ;;  %v5179_v53 = vpop.f32.mrb[10].mxu1  ;;  %6004 = vmatpush1.bf16.msra.mxu1 %v4316_v20  ;;  %v4192_v11 = vld [vmem:[#allocation4 + $0xbd0] sm:$0xff] }
 0x824   :  { %v5119_v5 = vpop.f32.mrb[179].mxu0  ;;  %v5180_v42 = vpop.f32.mrb[11].mxu1  ;;  %6050 = vmatprep.subr.bf16.mxu0 %v3871_v10  ;;  %6111 = vmatprep.subr.bf16.mxu1 %v3873_v22  ;;  %v4257_v10 = vld [vmem:[#allocation4 + $0xdd8] sm:$0xff] }
 0x826   :  { %5961 = vmatmul.mubr.bf16.vlgmr.msra.gmra.mrb[20].mxu0 %v9119_v9  ;;  %6022 = vmatmul.mubr.bf16.vlgmr.msra.gmra.mrb[116].mxu1 %v9119_v9 }
 0x827   :  { %6051 = vmatpush1.bf16.msra.mxu0 %v3870_v25  ;;  %6112 = vmatpush1.bf16.msra.mxu1 %v3872_v7  ;;  %v4254_v25 = vld [vmem:[#allocation4 + $0xdc0] sm:$0xff]  ;;  %v4256_v7 = vld [vmem:[#allocation4 + $0xdd0] sm:$0xff] }
 0x828   :  { %6052 = vmatprep.subr.bf16.mxu0 %v3935_v30  ;;  %6113 = vmatprep.subr.bf16.mxu1 %v3937_v54  ;;  %v4319_v54 = vld [vmem:[#allocation4 + $0xfc8] sm:$0xff] }
 0x829   :  { %v5122_v61 = vpop.f32.mrb[180].mxu0  ;;  %v5183_v2 = vpop.f32.mrb[12].mxu1  ;;  %5966 = vmatprep.mubr.bf16.mxu0 %v9527_v21  ;;  %6027 = vmatprep.mubr.bf16.mxu1 %v9527_v21 }
 0x82a   :  { %v5123_v38 = vpop.f32.mrb[181].mxu0  ;;  %v5184_v35 = vpop.f32.mrb[13].mxu1 }
 0x82b   :  { %6053 = vmatpush1.bf16.msra.mxu0 %v3934_v37  ;;  %v5124_v59 = vpop.f32.mrb[182].mxu0  ;;  %v5185_v33 = vpop.f32.mrb[14].mxu1  ;;  %6114 = vmatpush1.bf16.msra.mxu1 %v3936_v29  ;;  %v4321_v37 = vld [vmem:[#allocation4 + $0xfd8] sm:$0xff]  ;;  %v4320_v38 = vld [vmem:[#allocation4 + $0xfd0] sm:$0xff] }
 0x82c   :  { %v6608_v12 = vrot.slane %v5124_v59, 4  ;;  %v5126_v32 = vpop.f32.mrb[183].mxu0  ;;  %v5187_v34 = vpop.f32.mrb[15].mxu1  ;;  %6054 = vmatprep.subr.bf16.mxu0 %v3999_v3  ;;  %6115 = vmatprep.subr.bf16.mxu1 %v4001_v14  ;;  %v6616_v60 = vrot.slane %v5185_v33, 5  ;;  %v4318_v14 = vld [vmem:[#allocation4 + $0xfc0] sm:$0xff] }
 0x82d   :  { %v6609_v19 = vrot.slane %v5126_v32, 4  ;;  %v6617_v49 = vrot.slane %v5187_v34, 5 }
 0x82e   :  { %v6612_v43 = vadd.f32 %v6608_v12, %v9389_v55  ;;  %5967 = vmatmul.mubr.bf16.gmra.mrb[32].mxu0 %v9125_v26  ;;  %6028 = vmatmul.mubr.bf16.gmra.mrb[120].mxu1 %v9125_v26  ;;  %v3877_v12 = vld [vmem:[#allocation4 + $0x1f8] sm:$0xff] }
 0x82f   :  { %v6613_v57 = vadd.f32 %v6609_v19, %v9391_v52  ;;  %6055 = vmatpush1.bf16.msra.mxu0 %v3998_v46  ;;  %6116 = vmatpush1.bf16.msra.mxu1 %v4000_v28 }
 0x830   :  { %v9417_v23 = vadd.f32 %v6616_v60, %v6612_v43  ;;  %6056 = vmatprep.subr.bf16.mxu0 %v4063_v58  ;;  %6117 = vmatprep.subr.bf16.mxu1 %v4065_v41  ;;  %v3874_v41 = vld [vmem:[#allocation4 + $0x1e0] sm:$0xff]  ;;  %v3876_v43 = vld [vmem:[#allocation4 + $0x1f0] sm:$0xff]  ;;  %v3939_v60 = vld [vmem:[#allocation4 + $0x3e8] sm:$0xff] }
 0x831   :  { %v9419_v27 = vadd.f32 %v6617_v49, %v6613_v57  ;;  %v5130_v45 = vpop.f32.mrb[184].mxu0  ;;  %v5191_v55 = vpop.f32.mrb[16].mxu1  ;;  %5974 = vmatprep.mubr.bf16.mxu0 %v9527_v21  ;;  %6035 = vmatprep.mubr.bf16.mxu1 %v9527_v21  ;;  %v3941_v57 = vld [vmem:[#allocation4 + $0x3f8] sm:$0xff]  ;;  %v3938_v49 = vld [vmem:[#allocation4 + $0x3e0] sm:$0xff] }
 0x832   :  { %v5131_v52 = vpop.f32.mrb[185].mxu0  ;;  %v5192_v36 = vpop.f32.mrb[17].mxu1  ;;  %v4003_v55 = vld [vmem:[#allocation4 + $0x5e8] sm:$0xff] }
 0x833   :  { %6057 = vmatpush1.bf16.msra.mxu0 %v4062_v39  ;;  %v5132_v18 = vpop.f32.mrb[186].mxu0  ;;  %v5193_v13 = vpop.f32.mrb[18].mxu1  ;;  %6118 = vmatpush1.bf16.msra.mxu1 %v4064_v50  ;;  %v3940_v39 = vld [vmem:[#allocation4 + $0x3f0] sm:$0xff] }
 0x834   :  { %v5133_v62 = vpop.f32.mrb[187].mxu0  ;;  %v5194_v6 = vpop.f32.mrb[19].mxu1  ;;  %6058 = vmatprep.subr.bf16.mxu0 %v4127_v51  ;;  %6119 = vmatprep.subr.bf16.mxu1 %v4129_v63  ;;  %v4005_v51 = vld [vmem:[#allocation4 + $0x5f8] sm:$0xff] }
 0x836   :  { %5975 = vmatmul.mubr.bf16.gmra.mrb[36].mxu0 %v9131_v17  ;;  %6036 = vmatmul.mubr.bf16.gmra.mrb[124].mxu1 %v9131_v17 }
 0x837   :  { %6059 = vmatpush1.bf16.msra.mxu0 %v4126_v16  ;;  %6120 = vmatpush1.bf16.msra.mxu1 %v4128_v47  ;;  %v4002_v16 = vld [vmem:[#allocation4 + $0x5e0] sm:$0xff]  ;;  %v4004_v47 = vld [vmem:[#allocation4 + $0x5f0] sm:$0xff] }
 0x838   :  { %6060 = vmatprep.subr.bf16.mxu0 %v4191_v8  ;;  %6121 = vmatprep.subr.bf16.mxu1 %v4193_v1  ;;  %v4067_v1 = vld [vmem:[#allocation4 + $0x7e8] sm:$0xff] }
 0x839   :  { %v5230_v20 = vpop.f32.mrb[188].mxu0  ;;  %v5291_v4 = vpop.f32.mrb[20].mxu1  ;;  %5980 = vmatprep.mubr.bf16.mxu0 %v9527_v21  ;;  %6041 = vmatprep.mubr.bf16.mxu1 %v9527_v21 }
 0x83a   :  { %v5231_v22 = vpop.f32.mrb[189].mxu0  ;;  %v5292_v15 = vpop.f32.mrb[21].mxu1 }
 0x83b   :  { %6061 = vmatpush1.bf16.msra.mxu0 %v4190_v44  ;;  %v5232_v31 = vpop.f32.mrb[190].mxu0  ;;  %v5293_v56 = vpop.f32.mrb[22].mxu1  ;;  %6122 = vmatpush1.bf16.msra.mxu1 %v4192_v11  ;;  %v4069_v44 = vld [vmem:[#allocation4 + $0x7f8] sm:$0xff]  ;;  %v4068_v22 = vld [vmem:[#allocation4 + $0x7f0] sm:$0xff] }
 0x83c   :  { %v6394_v53 = vrot.slane %v5232_v31, 6  ;;  %v5234_v5 = vpop.f32.mrb[191].mxu0  ;;  %v5295_v42 = vpop.f32.mrb[23].mxu1  ;;  %6062 = vmatprep.subr.bf16.mxu0 %v4255_v24  ;;  %6123 = vmatprep.subr.bf16.mxu1 %v4257_v10  ;;  %v6402_v61 = vrot.slane %v5293_v56, 7  ;;  %v4066_v10 = vld [vmem:[#allocation4 + $0x7e0] sm:$0xff] }
 0x83d   :  { %v6395_v30 = vrot.slane %v5234_v5, 6  ;;  %v6403_v3 = vrot.slane %v5295_v42, 7 }
 0x83e   :  { %v6398_v29 = vadd.f32 %v6394_v53, %v9403_v40  ;;  %5981 = vmatmul.mubr.bf16.gmra.mrb[64].mxu0 %v9137_v48  ;;  %6042 = vmatmul.mubr.bf16.gmra.mrb[128].mxu1 %v9137_v48  ;;  %v3875_v40 = vld [vmem:[#allocation4 + $0x1e8] sm:$0xff]  ;;  %v4133_v53 = vld [vmem:[#allocation4 + $0x9f8] sm:$0xff] }
 0x83f   :  { %v6399_v2 = vadd.f32 %v6395_v30, %v9405_v0  ;;  %6063 = vmatpush1.bf16.msra.mxu0 %v4254_v25  ;;  %6124 = vmatpush1.bf16.msra.mxu1 %v4256_v7 }
 0x840   :  { %6064 = vmatprep.subr.bf16.mxu0 %v4319_v54  ;;  %6125 = vmatprep.subr.bf16.mxu1 %v4321_v37  ;;  %v9431_v35 = vadd.f32 %v6402_v61, %v6398_v29  ;;  %v4130_v37 = vld [vmem:[#allocation4 + $0x9e0] sm:$0xff]  ;;  %v4132_v29 = vld [vmem:[#allocation4 + $0x9f0] sm:$0xff]  ;;  %v4195_v61 = vld [vmem:[#allocation4 + $0xbe8] sm:$0xff] }
 0x841   :  { %v5238_v59 = vpop.f32.mrb[192].mxu0  ;;  %v5299_v33 = vpop.f32.mrb[24].mxu1  ;;  %6082 = vmatprep.mubr.bf16.mxu0 %v9527_v21  ;;  %6143 = vmatprep.mubr.bf16.mxu1 %v9527_v21  ;;  %v9435_v32 = vadd.f32 %v6403_v3, %v6399_v2  ;;  %v4197_v2 = vld [vmem:[#allocation4 + $0xbf8] sm:$0xff]  ;;  %v4194_v3 = vld [vmem:[#allocation4 + $0xbe0] sm:$0xff] }
 0x842   :  { %v5239_v0 = vpop.f32.mrb[193].mxu0  ;;  %v5300_v34 = vpop.f32.mrb[25].mxu1  ;;  %v4259_v33 = vld [vmem:[#allocation4 + $0xde8] sm:$0xff] }
 0x843   :  { %6065 = vmatpush1.bf16.msra.mxu0 %v4318_v14  ;;  %v5240_v46 = vpop.f32.mrb[194].mxu0  ;;  %v5301_v28 = vpop.f32.mrb[26].mxu1  ;;  %6126 = vmatpush1.bf16.msra.mxu1 %v4320_v38  ;;  %v4196_v14 = vld [vmem:[#allocation4 + $0xbf0] sm:$0xff] }
 0x844   :  { %v5241_v19 = vpop.f32.mrb[195].mxu0  ;;  %v5302_v58 = vpop.f32.mrb[27].mxu1  ;;  %6172 = vmatprep.subr.bf16.mxu0 %v3875_v40  ;;  %6233 = vmatprep.subr.bf16.mxu1 %v3877_v12  ;;  %v4261_v40 = vld [vmem:[#allocation4 + $0xdf8] sm:$0xff] }
 0x845   :  { %v4258_v58 = vld [vmem:[#allocation4 + $0xde0] sm:$0xff] }
 0x846   :  { %6083 = vmatmul.mubr.bf16.vlgmr.msra.gmra.mrb[68].mxu0 %v9119_v9  ;;  %6144 = vmatmul.mubr.bf16.vlgmr.msra.gmra.mrb[132].mxu1 %v9119_v9 }
 0x847   :  { %6173 = vmatpush1.bf16.msra.mxu0 %v3874_v41  ;;  %6234 = vmatpush1.bf16.msra.mxu1 %v3876_v43  ;;  %v4260_v41 = vld [vmem:[#allocation4 + $0xdf0] sm:$0xff]  ;;  %v4323_v43 = vld [vmem:[#allocation4 + $0xfe8] sm:$0xff] }
 0x848   :  { %6174 = vmatprep.subr.bf16.mxu0 %v3939_v60  ;;  %6235 = vmatprep.subr.bf16.mxu1 %v3941_v57  ;;  %v4325_v60 = vld [vmem:[#allocation4 + $0xff8] sm:$0xff]  ;;  %v4322_v57 = vld [vmem:[#allocation4 + $0xfe0] sm:$0xff] }
 0x849   :  { %v5244_v50 = vpop.f32.mrb[196].mxu0  ;;  %v5305_v45 = vpop.f32.mrb[28].mxu1  ;;  %6088 = vmatprep.mubr.bf16.mxu0 %v9527_v21  ;;  %6149 = vmatprep.mubr.bf16.mxu1 %v9527_v21 }
 0x84a   :  { %v5245_v63 = vpop.f32.mrb[197].mxu0  ;;  %v5306_v52 = vpop.f32.mrb[29].mxu1 }
 0x84b   :  { %6175 = vmatpush1.bf16.msra.mxu0 %v3938_v49  ;;  %v5246_v36 = vpop.f32.mrb[198].mxu0  ;;  %v5307_v18 = vpop.f32.mrb[30].mxu1  ;;  %6236 = vmatpush1.bf16.msra.mxu1 %v3940_v39  ;;  %v4324_v49 = vld [vmem:[#allocation4 + $0xff0] sm:$0xff] }
 0x84c   :  { %v6624_v13 = vrot.slane %v5246_v36, 6  ;;  %v5248_v62 = vpop.f32.mrb[199].mxu0  ;;  %v5309_v6 = vpop.f32.mrb[31].mxu1  ;;  %6176 = vmatprep.subr.bf16.mxu0 %v4003_v55  ;;  %6237 = vmatprep.subr.bf16.mxu1 %v4005_v51  ;;  %v6632_v20 = vrot.slane %v5307_v18, 7 }
 0x84d   :  { %v6625_v8 = vrot.slane %v5248_v62, 6  ;;  %v6633_v24 = vrot.slane %v5309_v6, 7 }
 0x84e   :  { %v6628_v11 = vadd.f32 %v6624_v13, %v9417_v23  ;;  %6089 = vmatmul.mubr.bf16.gmra.mrb[40].mxu0 %v9125_v26  ;;  %6150 = vmatmul.mubr.bf16.gmra.mrb[136].mxu1 %v9125_v26  ;;  %v4131_v23 = vld [vmem:[#allocation4 + $0x9e8] sm:$0xff] }
 0x84f   :  { %v6629_v4 = vadd.f32 %v6625_v8, %v9419_v27  ;;  %6177 = vmatpush1.bf16.msra.mxu0 %v4002_v16  ;;  %6238 = vmatpush1.bf16.msra.mxu1 %v4004_v47 }
 0x850   :  { %6178 = vmatprep.subr.bf16.mxu0 %v4067_v1  ;;  %6239 = vmatprep.subr.bf16.mxu1 %v4069_v44  ;;  %v9445_v15 = vadd.f32 %v6632_v20, %v6628_v11 }
 0x851   :  { %v5252_v31 = vpop.f32.mrb[200].mxu0  ;;  %v5313_v56 = vpop.f32.mrb[32].mxu1  ;;  %6096 = vmatprep.mubr.bf16.mxu0 %v9527_v21  ;;  %6157 = vmatprep.mubr.bf16.mxu1 %v9527_v21  ;;  %v9449_v5 = vadd.f32 %v6633_v24, %v6629_v4 }
 0x852   :  { %v5253_v27 = vpop.f32.mrb[201].mxu0  ;;  %v5314_v42 = vpop.f32.mrb[33].mxu1 }
 0x853   :  { %6179 = vmatpush1.bf16.msra.mxu0 %v4066_v10  ;;  %v5254_v25 = vpop.f32.mrb[202].mxu0  ;;  %v5315_v7 = vpop.f32.mrb[34].mxu1  ;;  %6240 = vmatpush1.bf16.msra.mxu1 %v4068_v22 }
 0x854   :  { %v5255_v30 = vpop.f32.mrb[203].mxu0  ;;  %v5316_v54 = vpop.f32.mrb[35].mxu1  ;;  %6180 = vmatprep.subr.bf16.mxu0 %v4131_v23  ;;  %6241 = vmatprep.subr.bf16.mxu1 %v4133_v53 }
 0x856   :  { %6097 = vmatmul.mubr.bf16.gmra.mrb[44].mxu0 %v9131_v17  ;;  %6158 = vmatmul.mubr.bf16.gmra.mrb[140].mxu1 %v9131_v17 }
 0x857   :  { %6181 = vmatpush1.bf16.msra.mxu0 %v4130_v37  ;;  %6242 = vmatpush1.bf16.msra.mxu1 %v4132_v29 }
 0x858   :  { %6182 = vmatprep.subr.bf16.mxu0 %v4195_v61  ;;  %6243 = vmatprep.subr.bf16.mxu1 %v4197_v2 }
 0x859   :  { %v5352_v38 = vpop.f32.mrb[204].mxu0  ;;  %v5413_v59 = vpop.f32.mrb[36].mxu1  ;;  %6102 = vmatprep.mubr.bf16.mxu0 %v9527_v21  ;;  %6163 = vmatprep.mubr.bf16.mxu1 %v9527_v21 }
 0x85a   :  { %v5353_v12 = vpop.f32.mrb[205].mxu0  ;;  %v5414_v0 = vpop.f32.mrb[37].mxu1 }
 0x85b   :  { %6183 = vmatpush1.bf16.msra.mxu0 %v4194_v3  ;;  %v5354_v34 = vpop.f32.mrb[206].mxu0  ;;  %v5415_v46 = vpop.f32.mrb[38].mxu1  ;;  %6244 = vmatpush1.bf16.msra.mxu1 %v4196_v14 }
 0x85c   :  { %v5355_v28 = vpop.f32.mrb[207].mxu0  ;;  %v5416_v19 = vpop.f32.mrb[39].mxu1  ;;  %6184 = vmatprep.subr.bf16.mxu0 %v4259_v33  ;;  %6245 = vmatprep.subr.bf16.mxu1 %v4261_v40 }
 0x85e   :  { %6103 = vmatmul.mubr.bf16.gmra.mrb[48].mxu0 %v9137_v48  ;;  %6164 = vmatmul.mubr.bf16.gmra.mrb[144].mxu1 %v9137_v48 }
 0x85f   :  { %6185 = vmatpush1.bf16.msra.mxu0 %v4258_v58  ;;  %6246 = vmatpush1.bf16.msra.mxu1 %v4260_v41 }
 0x860   :  { %6186 = vmatprep.subr.bf16.mxu0 %v4323_v43  ;;  %6247 = vmatprep.subr.bf16.mxu1 %v4325_v60 }
 0x861   :  { %v5358_v39 = vpop.f32.mrb[208].mxu0  ;;  %v5419_v50 = vpop.f32.mrb[40].mxu1  ;;  %6204 = vmatprep.mubr.bf16.mxu0 %v9527_v21  ;;  %6265 = vmatprep.mubr.bf16.mxu1 %v9527_v21 }
 0x862   :  { %v6408_v45 = vadd.f32 %v9431_v35, %v5358_v39  ;;  %v6412_v55 = vrot.slane %v5419_v50, 1  ;;  %v5360_v51 = vpop.f32.mrb[209].mxu0  ;;  %v5421_v63 = vpop.f32.mrb[41].mxu1 }
 0x863   :  { %v6409_v52 = vadd.f32 %v9435_v32, %v5360_v51  ;;  %v6413_v36 = vrot.slane %v5421_v63, 1  ;;  %6187 = vmatpush1.bf16.msra.mxu0 %v4322_v57  ;;  %v5362_v18 = vpop.f32.mrb[210].mxu0  ;;  %v5423_v13 = vpop.f32.mrb[42].mxu1  ;;  %6248 = vmatpush1.bf16.msra.mxu1 %v4324_v49 }
 0x864   :  { %v6416_v62 = vadd.f32 %v6412_v55, %v6408_v45  ;;  %v5363_v6 = vpop.f32.mrb[211].mxu0  ;;  %v5424_v16 = vpop.f32.mrb[43].mxu1 }
 0x865   :  { %v6417_v47 = vadd.f32 %v6413_v36, %v6409_v52 }
 0x866   :  { %6205 = vmatmul.mubr.bf16.vlgmr.msra.gmra.mrb[52].mxu0 %v9119_v9  ;;  %6266 = vmatmul.mubr.bf16.vlgmr.msra.gmra.mrb[148].mxu1 %v9119_v9 }
 0x867   :  { %6210 = vmatprep.mubr.bf16.mxu0 %v9527_v21  ;;  %6271 = vmatprep.mubr.bf16.mxu1 %v9527_v21 }
 0x869   :  { %v5366_v35 = vpop.f32.mrb[212].mxu0  ;;  %v5427_v8 = vpop.f32.mrb[44].mxu1 }
 0x86a   :  { %v5367_v32 = vpop.f32.mrb[213].mxu0  ;;  %v5428_v1 = vpop.f32.mrb[45].mxu1 }
 0x86b   :  { %v5368_v44 = vpop.f32.mrb[214].mxu0  ;;  %v5429_v11 = vpop.f32.mrb[46].mxu1 }
 0x86c   :  { %v5369_v20 = vpop.f32.mrb[215].mxu0  ;;  %v5430_v4 = vpop.f32.mrb[47].mxu1 }
 0x86e   :  { %6211 = vmatmul.mubr.bf16.gmra.mrb[56].mxu0 %v9125_v26  ;;  %6272 = vmatmul.mubr.bf16.gmra.mrb[152].mxu1 %v9125_v26 }
 0x86f   :  { %6218 = vmatprep.mubr.bf16.mxu0 %v9527_v21  ;;  %6279 = vmatprep.mubr.bf16.mxu1 %v9527_v21 }
 0x871   :  { %v5372_v9 = vpop.f32.mrb[216].mxu0  ;;  %v5433_v24 = vpop.f32.mrb[48].mxu1 }
 0x872   :  { %v6638_v10 = vadd.f32 %v9445_v15, %v5372_v9  ;;  %v6642_v22 = vrot.slane %v5433_v24, 1  ;;  %v5374_v31 = vpop.f32.mrb[217].mxu0  ;;  %v5435_v56 = vpop.f32.mrb[49].mxu1 }
 0x873   :  { %v6639_v23 = vadd.f32 %v9449_v5, %v5374_v31  ;;  %v6643_v53 = vrot.slane %v5435_v56, 1  ;;  %v5376_v27 = vpop.f32.mrb[218].mxu0  ;;  %v5437_v42 = vpop.f32.mrb[50].mxu1 }
 0x874   :  { %v6646_v25 = vadd.f32 %v6642_v22, %v6638_v10  ;;  %v5377_v7 = vpop.f32.mrb[219].mxu0  ;;  %v5438_v30 = vpop.f32.mrb[51].mxu1 }
 0x875   :  { %v6647_v26 = vadd.f32 %v6643_v53, %v6639_v23 }
 0x876   :  { %6219 = vmatmul.mubr.bf16.gmra.mrb[60].mxu0 %v9131_v17  ;;  %6280 = vmatmul.mubr.bf16.gmra.mrb[156].mxu1 %v9131_v17 }
 0x877   :  { %6224 = vmatprep.mubr.bf16.mxu0 %v9527_v21  ;;  %6285 = vmatprep.mubr.bf16.mxu1 %v9527_v21 }
 0x879   :  { %v5474_v15 = vpop.f32.mrb[220].mxu0  ;;  %v5535_v54 = vpop.f32.mrb[52].mxu1 }
 0x87a   :  { %v5475_v37 = vpop.f32.mrb[221].mxu0  ;;  %v5536_v29 = vpop.f32.mrb[53].mxu1 }
 0x87b   :  { %v5476_v5 = vpop.f32.mrb[222].mxu0  ;;  %v5537_v61 = vpop.f32.mrb[54].mxu1 }
 0x87c   :  { %v5477_v2 = vpop.f32.mrb[223].mxu0  ;;  %v5538_v3 = vpop.f32.mrb[55].mxu1 }
 0x87e   :  { %6225 = vmatmul.mubr.bf16.gmra.mrb[72].mxu0 %v9137_v48  ;;  %6286 = vmatmul.mubr.bf16.gmra.mrb[160].mxu1 %v9137_v48 }
 0x881   :  { %v5480_v14 = vpop.f32.mrb[224].mxu0  ;;  %v5541_v38 = vpop.f32.mrb[56].mxu1 }
 0x882   :  { %v6420_v59 = vrot.slane %v5480_v14, 2  ;;  %v5482_v17 = vpop.f32.mrb[225].mxu0  ;;  %v5543_v33 = vpop.f32.mrb[57].mxu1  ;;  %v6428_v34 = vrot.slane %v5541_v38, 3 }
 0x883   :  { %v6421_v40 = vrot.slane %v5482_v17, 2  ;;  %v5484_v12 = vpop.f32.mrb[226].mxu0  ;;  %v5545_v21 = vpop.f32.mrb[58].mxu1  ;;  %v6429_v58 = vrot.slane %v5543_v33, 3 }
 0x884   :  { %v6424_v0 = vadd.f32 %v6420_v59, %v6416_v62  ;;  %v5485_v46 = vpop.f32.mrb[227].mxu0  ;;  %v5546_v28 = vpop.f32.mrb[59].mxu1 }
 0x885   :  { %v6425_v19 = vadd.f32 %v6421_v40, %v6417_v47 }
 0x886   :  { %v6432_v41 = vadd.f32 %v6428_v34, %v6424_v0 }
 0x887   :  { %v6433_v43 = vadd.f32 %v6429_v58, %v6425_v19 }
 0x889   :  { %v5488_v60 = vpop.f32.mrb[228].mxu0  ;;  %v5549_v57 = vpop.f32.mrb[60].mxu1 }
 0x88a   :  { %v5489_v49 = vpop.f32.mrb[229].mxu0  ;;  %v5550_v48 = vpop.f32.mrb[61].mxu1 }
 0x88b   :  { %v5490_v39 = vpop.f32.mrb[230].mxu0  ;;  %v5551_v50 = vpop.f32.mrb[62].mxu1 }
 0x88c   :  { %v5491_v45 = vpop.f32.mrb[231].mxu0  ;;  %v5552_v55 = vpop.f32.mrb[63].mxu1 }
 0x891   :  { %v5494_v51 = vpop.f32.mrb[232].mxu0  ;;  %v5555_v63 = vpop.f32.mrb[64].mxu1 }
 0x892   :  { %v6650_v52 = vrot.slane %v5494_v51, 2  ;;  %v5496_v36 = vpop.f32.mrb[233].mxu0  ;;  %v5557_v18 = vpop.f32.mrb[65].mxu1  ;;  %v6658_v47 = vrot.slane %v5555_v63, 3 }
 0x893   :  { %v6651_v13 = vrot.slane %v5496_v36, 2  ;;  %v5498_v62 = vpop.f32.mrb[234].mxu0  ;;  %v5559_v6 = vpop.f32.mrb[66].mxu1  ;;  %v6659_v1 = vrot.slane %v5557_v18, 3 }
 0x894   :  { %v6654_v16 = vadd.f32 %v6650_v52, %v6646_v25  ;;  %v5499_v35 = vpop.f32.mrb[235].mxu0  ;;  %v5560_v8 = vpop.f32.mrb[67].mxu1 }
 0x895   :  { %v6655_v32 = vadd.f32 %v6651_v13, %v6647_v26 }
 0x896   :  { %v6662_v44 = vadd.f32 %v6658_v47, %v6654_v16 }
 0x897   :  { %v6663_v11 = vadd.f32 %v6659_v1, %v6655_v32 }
 0x899   :  { %v5596_v20 = vpop.f32.mrb[236].mxu0  ;;  %v5657_v4 = vpop.f32.mrb[68].mxu1 }
 0x89a   :  { %v5597_v9 = vpop.f32.mrb[237].mxu0  ;;  %v5658_v24 = vpop.f32.mrb[69].mxu1 }
 0x89b   :  { %v5598_v10 = vpop.f32.mrb[238].mxu0  ;;  %v5659_v22 = vpop.f32.mrb[70].mxu1 }
 0x89c   :  { %v5599_v31 = vpop.f32.mrb[239].mxu0  ;;  %v5660_v56 = vpop.f32.mrb[71].mxu1 }
 0x8a1   :  { %v5602_v23 = vpop.f32.mrb[240].mxu0  ;;  %v5663_v53 = vpop.f32.mrb[72].mxu1 }
 0x8a2   :  { %v6436_v27 = vrot.slane %v5602_v23, 4  ;;  %v5604_v42 = vpop.f32.mrb[241].mxu0  ;;  %v5665_v25 = vpop.f32.mrb[73].mxu1  ;;  %v6444_v54 = vrot.slane %v5663_v53, 5 }
 0x8a3   :  { %v6437_v7 = vrot.slane %v5604_v42, 4  ;;  %v5606_v30 = vpop.f32.mrb[242].mxu0  ;;  %v5667_v15 = vpop.f32.mrb[74].mxu1  ;;  %v6445_v61 = vrot.slane %v5665_v25, 5 }
 0x8a4   :  { %v6440_v26 = vadd.f32 %v6436_v27, %v6432_v41  ;;  %v5607_v37 = vpop.f32.mrb[243].mxu0  ;;  %v5668_v29 = vpop.f32.mrb[75].mxu1 }
 0x8a5   :  { %v6441_v5 = vadd.f32 %v6437_v7, %v6433_v43 }
 0x8a6   :  { %v6448_v2 = vadd.f32 %v6444_v54, %v6440_v26 }
 0x8a7   :  { %v6449_v3 = vadd.f32 %v6445_v61, %v6441_v5 }
 0x8a9   :  { %v5610_v14 = vpop.f32.mrb[244].mxu0  ;;  %v5671_v38 = vpop.f32.mrb[76].mxu1 }
 0x8aa   :  { %v5611_v59 = vpop.f32.mrb[245].mxu0  ;;  %v5672_v17 = vpop.f32.mrb[77].mxu1 }
 0x8ab   :  { %v5612_v33 = vpop.f32.mrb[246].mxu0  ;;  %v5673_v40 = vpop.f32.mrb[78].mxu1 }
 0x8ac   :  { %v5613_v12 = vpop.f32.mrb[247].mxu0  ;;  %v5674_v21 = vpop.f32.mrb[79].mxu1 }
 0x8b1   :  { %v5616_v0 = vpop.f32.mrb[248].mxu0  ;;  %v5677_v34 = vpop.f32.mrb[80].mxu1 }
 0x8b2   :  { %v6666_v46 = vrot.slane %v5616_v0, 4  ;;  %v5618_v28 = vpop.f32.mrb[249].mxu0  ;;  %v5679_v19 = vpop.f32.mrb[81].mxu1  ;;  %v6674_v57 = vrot.slane %v5677_v34, 5 }
 0x8b3   :  { %v6667_v58 = vrot.slane %v5618_v28, 4  ;;  %v5620_v41 = vpop.f32.mrb[250].mxu0  ;;  %v5681_v60 = vpop.f32.mrb[82].mxu1  ;;  %v6675_v50 = vrot.slane %v5679_v19, 5 }
 0x8b4   :  { %v6670_v43 = vadd.f32 %v6666_v46, %v6662_v44  ;;  %v5621_v49 = vpop.f32.mrb[251].mxu0  ;;  %v5682_v48 = vpop.f32.mrb[83].mxu1 }
 0x8b5   :  { %v6671_v39 = vadd.f32 %v6667_v58, %v6663_v11 }
 0x8b6   :  { %v6678_v45 = vadd.f32 %v6674_v57, %v6670_v43 }
 0x8b7   :  { %v6679_v55 = vadd.f32 %v6675_v50, %v6671_v39 }
 0x8b9   :  { %v5718_v51 = vpop.f32.mrb[252].mxu0  ;;  %v5779_v63 = vpop.f32.mrb[84].mxu1 }
 0x8ba   :  { %v5719_v52 = vpop.f32.mrb[253].mxu0  ;;  %v5780_v36 = vpop.f32.mrb[85].mxu1 }
 0x8bb   :  { %v5720_v18 = vpop.f32.mrb[254].mxu0  ;;  %v5781_v13 = vpop.f32.mrb[86].mxu1 }
 0x8bc   :  { %v5721_v62 = vpop.f32.mrb[255].mxu0  ;;  %v5782_v6 = vpop.f32.mrb[87].mxu1 }
 0x8c1   :  { %v5724_v16 = vpop.f32.mrb[24].mxu0  ;;  %v5785_v47 = vpop.f32.mrb[88].mxu1 }
 0x8c2   :  { %v6452_v35 = vrot.slane %v5724_v16, 6  ;;  %v5726_v8 = vpop.f32.mrb[25].mxu0  ;;  %v5787_v32 = vpop.f32.mrb[89].mxu1  ;;  %v6460_v4 = vrot.slane %v5785_v47, 7 }
 0x8c3   :  { %v6453_v1 = vrot.slane %v5726_v8, 6  ;;  %v5728_v44 = vpop.f32.mrb[26].mxu0  ;;  %v5789_v20 = vpop.f32.mrb[90].mxu1  ;;  %v6461_v22 = vrot.slane %v5787_v32, 7 }
 0x8c4   :  { %v6456_v11 = vadd.f32 %v6452_v35, %v6448_v2  ;;  %v5729_v9 = vpop.f32.mrb[27].mxu0  ;;  %v5790_v24 = vpop.f32.mrb[91].mxu1 }
 0x8c5   :  { %v6457_v10 = vadd.f32 %v6453_v1, %v6449_v3 }
 0x8c6   :  { %v6464_v31 = vadd.f32 %v6460_v4, %v6456_v11 }
 0x8c7   :  { %v6465_v56 = vadd.f32 %v6461_v22, %v6457_v10 }
 0x8c9   :  { %v5732_v23 = vpop.f32.mrb[28].mxu0  ;;  %v5793_v53 = vpop.f32.mrb[92].mxu1 }
 0x8ca   :  { %v5733_v27 = vpop.f32.mrb[29].mxu0  ;;  %v5794_v42 = vpop.f32.mrb[93].mxu1 }
 0x8cb   :  { %v5734_v25 = vpop.f32.mrb[30].mxu0  ;;  %v5795_v7 = vpop.f32.mrb[94].mxu1 }
 0x8cc   :  { %v5735_v30 = vpop.f32.mrb[31].mxu0  ;;  %v5796_v15 = vpop.f32.mrb[95].mxu1 }
 0x8d1   :  { %v5738_v26 = vpop.f32.mrb[0].mxu0  ;;  %v5799_v54 = vpop.f32.mrb[96].mxu1 }
 0x8d2   :  { %v6682_v37 = vrot.slane %v5738_v26, 6  ;;  %v5740_v29 = vpop.f32.mrb[1].mxu0  ;;  %v5801_v5 = vpop.f32.mrb[97].mxu1  ;;  %v6690_v38 = vrot.slane %v5799_v54, 7 }
 0x8d3   :  { %v6683_v61 = vrot.slane %v5740_v29, 6  ;;  %v5742_v2 = vpop.f32.mrb[2].mxu0  ;;  %v5803_v14 = vpop.f32.mrb[98].mxu1  ;;  %v6691_v40 = vrot.slane %v5801_v5, 7 }
 0x8d4   :  { %v6686_v3 = vadd.f32 %v6682_v37, %v6678_v45  ;;  %v5743_v59 = vpop.f32.mrb[3].mxu0  ;;  %v5804_v17 = vpop.f32.mrb[99].mxu1 }
 0x8d5   :  { %v6687_v33 = vadd.f32 %v6683_v61, %v6679_v55 }
 0x8d6   :  { %v6694_v12 = vadd.f32 %v6690_v38, %v6686_v3 }
 0x8d7   :  { %v6695_v21 = vadd.f32 %v6691_v40, %v6687_v33 }
 0x8d9   :  { %v5840_v0 = vpop.f32.mrb[4].mxu0  ;;  %v5901_v34 = vpop.f32.mrb[100].mxu1 }
 0x8da   :  { %v5841_v46 = vpop.f32.mrb[5].mxu0  ;;  %v5902_v28 = vpop.f32.mrb[101].mxu1 }
 0x8db   :  { %v5842_v19 = vpop.f32.mrb[6].mxu0  ;;  %v5903_v58 = vpop.f32.mrb[102].mxu1 }
 0x8dc   :  { %v5843_v41 = vpop.f32.mrb[7].mxu0  ;;  %v5904_v60 = vpop.f32.mrb[103].mxu1 }
 0x8e1   :  { %v5846_v43 = vpop.f32.mrb[8].mxu0  ;;  %v5907_v57 = vpop.f32.mrb[104].mxu1 }
 0x8e2   :  { %v5847_v49 = vpop.f32.mrb[9].mxu0  ;;  %v5908_v48 = vpop.f32.mrb[105].mxu1 }
 0x8e3   :  { %v5848_v39 = vpop.f32.mrb[10].mxu0  ;;  %v5909_v50 = vpop.f32.mrb[106].mxu1 }
 0x8e4   :  { %v6466_v45 = vadd.f32 %v6464_v31, %v5848_v39  ;;  %v6470_v51 = vrot.slane %v5909_v50, 1  ;;  %v5850_v55 = vpop.f32.mrb[11].mxu0  ;;  %v5911_v63 = vpop.f32.mrb[107].mxu1 }
 0x8e5   :  { %v6467_v52 = vadd.f32 %v6465_v56, %v5850_v55  ;;  %v6471_v36 = vrot.slane %v5911_v63, 1 }
 0x8e6   :  { %v6474_v18 = vadd.f32 %v6470_v51, %v6466_v45 }
 0x8e7   :  { %v6475_v13 = vadd.f32 %v6471_v36, %v6467_v52 }
 0x8e9   :  { %v5854_v62 = vpop.f32.mrb[12].mxu0  ;;  %v5915_v6 = vpop.f32.mrb[108].mxu1 }
 0x8ea   :  { %v5855_v16 = vpop.f32.mrb[13].mxu0  ;;  %v5916_v47 = vpop.f32.mrb[109].mxu1 }
 0x8eb   :  { %v5856_v35 = vpop.f32.mrb[14].mxu0  ;;  %v5917_v8 = vpop.f32.mrb[110].mxu1 }
 0x8ec   :  { %v5857_v32 = vpop.f32.mrb[15].mxu0  ;;  %v5918_v1 = vpop.f32.mrb[111].mxu1 }
 0x8f1   :  { %v5860_v44 = vpop.f32.mrb[16].mxu0  ;;  %v5921_v20 = vpop.f32.mrb[112].mxu1 }
 0x8f2   :  { %v5861_v11 = vpop.f32.mrb[17].mxu0  ;;  %v5922_v4 = vpop.f32.mrb[113].mxu1 }
 0x8f3   :  { %v5862_v9 = vpop.f32.mrb[18].mxu0  ;;  %v5923_v24 = vpop.f32.mrb[114].mxu1 }
 0x8f4   :  { %v6696_v10 = vadd.f32 %v6694_v12, %v5862_v9  ;;  %v6700_v22 = vrot.slane %v5923_v24, 1  ;;  %v5864_v31 = vpop.f32.mrb[19].mxu0  ;;  %v5925_v56 = vpop.f32.mrb[115].mxu1 }
 0x8f5   :  { %v6697_v23 = vadd.f32 %v6695_v21, %v5864_v31  ;;  %v6701_v53 = vrot.slane %v5925_v56, 1 }
 0x8f6   :  { %v6704_v27 = vadd.f32 %v6700_v22, %v6696_v10 }
 0x8f7   :  { %v6705_v42 = vadd.f32 %v6701_v53, %v6697_v23 }
 0x8f9   :  { %v5962_v25 = vpop.f32.mrb[20].mxu0  ;;  %v6023_v7 = vpop.f32.mrb[116].mxu1 }
 0x8fa   :  { %v5963_v30 = vpop.f32.mrb[21].mxu0  ;;  %v6024_v15 = vpop.f32.mrb[117].mxu1 }
 0x8fb   :  { %v5964_v26 = vpop.f32.mrb[22].mxu0  ;;  %v6025_v54 = vpop.f32.mrb[118].mxu1 }
 0x8fc   :  { %v5965_v37 = vpop.f32.mrb[23].mxu0  ;;  %v6026_v29 = vpop.f32.mrb[119].mxu1 }
 0x901   :  { %v5968_v5 = vpop.f32.mrb[32].mxu0  ;;  %v6029_v61 = vpop.f32.mrb[120].mxu1 }
 0x902   :  { %v5969_v2 = vpop.f32.mrb[33].mxu0  ;;  %v6030_v14 = vpop.f32.mrb[121].mxu1 }
 0x903   :  { %v5970_v3 = vpop.f32.mrb[34].mxu0  ;;  %v6031_v38 = vpop.f32.mrb[122].mxu1 }
 0x904   :  { %v6478_v59 = vrot.slane %v5970_v3, 2  ;;  %v5972_v17 = vpop.f32.mrb[35].mxu0  ;;  %v6033_v33 = vpop.f32.mrb[123].mxu1  ;;  %v6486_v21 = vrot.slane %v6031_v38, 3 }
 0x905   :  { %v6479_v40 = vrot.slane %v5972_v17, 2  ;;  %v6487_v34 = vrot.slane %v6033_v33, 3 }
 0x906   :  { %v6482_v12 = vadd.f32 %v6478_v59, %v6474_v18 }
 0x907   :  { %v6483_v0 = vadd.f32 %v6479_v40, %v6475_v13 }
 0x908   :  { %v6490_v46 = vadd.f32 %v6486_v21, %v6482_v12 }
 0x909   :  { %v6491_v28 = vadd.f32 %v6487_v34, %v6483_v0  ;;  %v5976_v19 = vpop.f32.mrb[36].mxu0  ;;  %v6037_v58 = vpop.f32.mrb[124].mxu1 }
 0x90a   :  { %v5977_v41 = vpop.f32.mrb[37].mxu0  ;;  %v6038_v60 = vpop.f32.mrb[125].mxu1 }
 0x90b   :  { %v5978_v43 = vpop.f32.mrb[38].mxu0  ;;  %v6039_v57 = vpop.f32.mrb[126].mxu1 }
 0x90c   :  { %v5979_v49 = vpop.f32.mrb[39].mxu0  ;;  %v6040_v48 = vpop.f32.mrb[127].mxu1 }
 0x911   :  { %v5982_v39 = vpop.f32.mrb[64].mxu0  ;;  %v6043_v50 = vpop.f32.mrb[128].mxu1 }
 0x912   :  { %v5983_v45 = vpop.f32.mrb[65].mxu0  ;;  %v6044_v51 = vpop.f32.mrb[129].mxu1 }
 0x913   :  { %v5984_v55 = vpop.f32.mrb[66].mxu0  ;;  %v6045_v63 = vpop.f32.mrb[130].mxu1 }
 0x914   :  { %v6708_v52 = vrot.slane %v5984_v55, 2  ;;  %v5986_v36 = vpop.f32.mrb[67].mxu0  ;;  %v6047_v18 = vpop.f32.mrb[131].mxu1  ;;  %v6716_v6 = vrot.slane %v6045_v63, 3 }
 0x915   :  { %v6709_v13 = vrot.slane %v5986_v36, 2  ;;  %v6717_v47 = vrot.slane %v6047_v18, 3 }
 0x916   :  { %v6712_v62 = vadd.f32 %v6708_v52, %v6704_v27 }
 0x917   :  { %v6713_v16 = vadd.f32 %v6709_v13, %v6705_v42 }
 0x918   :  { %v6720_v35 = vadd.f32 %v6716_v6, %v6712_v62 }
 0x919   :  { %v6721_v8 = vadd.f32 %v6717_v47, %v6713_v16  ;;  %v6084_v32 = vpop.f32.mrb[68].mxu0  ;;  %v6145_v1 = vpop.f32.mrb[132].mxu1 }
 0x91a   :  { %v6085_v44 = vpop.f32.mrb[69].mxu0  ;;  %v6146_v20 = vpop.f32.mrb[133].mxu1 }
 0x91b   :  { %v6086_v11 = vpop.f32.mrb[70].mxu0  ;;  %v6147_v4 = vpop.f32.mrb[134].mxu1 }
 0x91c   :  { %v6087_v9 = vpop.f32.mrb[71].mxu0  ;;  %v6148_v24 = vpop.f32.mrb[135].mxu1 }
 0x921   :  { %v6090_v10 = vpop.f32.mrb[40].mxu0  ;;  %v6151_v22 = vpop.f32.mrb[136].mxu1 }
 0x922   :  { %v6091_v31 = vpop.f32.mrb[41].mxu0  ;;  %v6152_v56 = vpop.f32.mrb[137].mxu1 }
 0x923   :  { %v6092_v23 = vpop.f32.mrb[42].mxu0  ;;  %v6153_v53 = vpop.f32.mrb[138].mxu1 }
 0x924   :  { %v6494_v27 = vrot.slane %v6092_v23, 4  ;;  %v6094_v25 = vpop.f32.mrb[43].mxu0  ;;  %v6155_v42 = vpop.f32.mrb[139].mxu1  ;;  %v6502_v15 = vrot.slane %v6153_v53, 5 }
 0x925   :  { %v6495_v7 = vrot.slane %v6094_v25, 4  ;;  %v6503_v54 = vrot.slane %v6155_v42, 5 }
 0x926   :  { %v6498_v30 = vadd.f32 %v6494_v27, %v6490_v46 }
 0x927   :  { %v6499_v26 = vadd.f32 %v6495_v7, %v6491_v28 }
 0x928   :  { %v6506_v37 = vadd.f32 %v6502_v15, %v6498_v30 }
 0x929   :  { %v6507_v29 = vadd.f32 %v6503_v54, %v6499_v26  ;;  %v6098_v5 = vpop.f32.mrb[44].mxu0  ;;  %v6159_v61 = vpop.f32.mrb[140].mxu1 }
 0x92a   :  { %v6099_v2 = vpop.f32.mrb[45].mxu0  ;;  %v6160_v14 = vpop.f32.mrb[141].mxu1 }
 0x92b   :  { %v6100_v3 = vpop.f32.mrb[46].mxu0  ;;  %v6161_v38 = vpop.f32.mrb[142].mxu1 }
 0x92c   :  { %v6101_v59 = vpop.f32.mrb[47].mxu0  ;;  %v6162_v17 = vpop.f32.mrb[143].mxu1  ;;  %v6762_v3 = vld [vmem:[#allocation14] sm:$0x3]  ;;  %v7721_v38 = vmov 1983009808  }
 0x92d   :  { %v6780_v59 = vunpack.c.l.s4 %v7721_v38 }
 0x931   :  { %v6104_v33 = vpop.f32.mrb[48].mxu0  ;;  %v6165_v40 = vpop.f32.mrb[144].mxu1 }
 0x932   :  { %v6105_v12 = vpop.f32.mrb[49].mxu0  ;;  %v6166_v21 = vpop.f32.mrb[145].mxu1 }
 0x933   :  { %v6106_v0 = vpop.f32.mrb[50].mxu0  ;;  %v6167_v34 = vpop.f32.mrb[146].mxu1  ;;  %v9536_v12 = vld [vmem:[#allocation24_spill] sm:$0xff] }
 0x934   :  { %v6724_v46 = vrot.slane %v6106_v0, 4  ;;  %v6108_v19 = vpop.f32.mrb[51].mxu0  ;;  %v6169_v28 = vpop.f32.mrb[147].mxu1  ;;  %v6732_v60 = vrot.slane %v6167_v34, 5  ;;  %v6767_v21 = vrot.slane %v6762_v3, %v9536_v12 }
 0x935   :  { %v6725_v58 = vrot.slane %v6108_v19, 4  ;;  %v6733_v57 = vrot.slane %v6169_v28, 5  ;;  %v6781_v28 = vunpack.c.0.s8 %v6780_v59 }
 0x936   :  { %v6728_v41 = vadd.f32 %v6724_v46, %v6720_v35  ;;  %v9537_v46 = vld [vmem:[#allocation25_spill] sm:$0xff] }
 0x937   :  { %v6729_v43 = vadd.f32 %v6725_v58, %v6721_v8  ;;  %v6771_v19 = vrot.slane %v6762_v3, %v9537_v46 }
 0x938   :  { %v6736_v49 = vadd.f32 %v6732_v60, %v6728_v41 }
 0x939   :  { %v6737_v48 = vadd.f32 %v6733_v57, %v6729_v43  ;;  %v6206_v39 = vpop.f32.mrb[52].mxu0  ;;  %v6267_v50 = vpop.f32.mrb[148].mxu1 }
 0x93a   :  { %v6207_v45 = vpop.f32.mrb[53].mxu0  ;;  %v6268_v51 = vpop.f32.mrb[149].mxu1 }
 0x93b   :  { %v6208_v55 = vpop.f32.mrb[54].mxu0  ;;  %v6269_v63 = vpop.f32.mrb[150].mxu1 }
 0x93c   :  { %v6209_v52 = vpop.f32.mrb[55].mxu0  ;;  %v6270_v36 = vpop.f32.mrb[151].mxu1 }
 0x941   :  { %v6212_v18 = vpop.f32.mrb[56].mxu0  ;;  %v6273_v13 = vpop.f32.mrb[152].mxu1 }
 0x942   :  { %v6213_v62 = vpop.f32.mrb[57].mxu0  ;;  %v6274_v6 = vpop.f32.mrb[153].mxu1 }
 0x943   :  { %v6214_v16 = vpop.f32.mrb[58].mxu0  ;;  %v6275_v47 = vpop.f32.mrb[154].mxu1 }
 0x944   :  { %v6510_v35 = vrot.slane %v6214_v16, 6  ;;  %v6216_v32 = vpop.f32.mrb[59].mxu0  ;;  %v6277_v8 = vpop.f32.mrb[155].mxu1  ;;  %v6518_v20 = vrot.slane %v6275_v47, 7 }
 0x945   :  { %v6511_v1 = vrot.slane %v6216_v32, 6  ;;  %v6519_v4 = vrot.slane %v6277_v8, 7 }
 0x946   :  { %v6514_v44 = vadd.f32 %v6510_v35, %v6506_v37 }
 0x947   :  { %v6515_v11 = vadd.f32 %v6511_v1, %v6507_v29 }
 0x948   :  { %v6522_v9 = vadd.f32 %v6518_v20, %v6514_v44 }
 0x949   :  { %v6523_v24 = vadd.f32 %v6519_v4, %v6515_v11  ;;  %v6220_v10 = vpop.f32.mrb[60].mxu0  ;;  %v6281_v22 = vpop.f32.mrb[156].mxu1 }
 0x94a   :  { %v6221_v31 = vpop.f32.mrb[61].mxu0  ;;  %v6282_v56 = vpop.f32.mrb[157].mxu1 }
 0x94b   :  { %v6222_v23 = vpop.f32.mrb[62].mxu0  ;;  %v6283_v53 = vpop.f32.mrb[158].mxu1 }
 0x94c   :  { %v6223_v27 = vpop.f32.mrb[63].mxu0  ;;  %v6284_v25 = vpop.f32.mrb[159].mxu1 }
 0x951   :  { %v6226_v42 = vpop.f32.mrb[72].mxu0  ;;  %v6287_v7 = vpop.f32.mrb[160].mxu1 }
 0x952   :  { %v6227_v30 = vpop.f32.mrb[73].mxu0  ;;  %v6288_v15 = vpop.f32.mrb[161].mxu1 }
 0x953   :  { %v6228_v26 = vpop.f32.mrb[74].mxu0  ;;  %v6289_v54 = vpop.f32.mrb[162].mxu1 }
 0x954   :  { %v6740_v37 = vrot.slane %v6228_v26, 6  ;;  %v6230_v5 = vpop.f32.mrb[75].mxu0  ;;  %v6291_v29 = vpop.f32.mrb[163].mxu1  ;;  %v6748_v14 = vrot.slane %v6289_v54, 7 }
 0x955   :  { %v6741_v61 = vrot.slane %v6230_v5, 6  ;;  %v6749_v33 = vrot.slane %v6291_v29, 7 }
 0x956   :  { %v6744_v2 = vadd.f32 %v6740_v37, %v6736_v49  ;;  %v9538_v49 = vld [vmem:[#allocation23_spill] sm:$0xff] }
 0x957   :  { %v6745_v17 = vadd.f32 %v6741_v61, %v6737_v48  ;;  %v6784_v39 = vsub.s32 %v6781_v28, %v9538_v49 }
 0x958   :  { %v6752_v40 = vadd.f32 %v6748_v14, %v6744_v2 }
 0x959   :  { %v6753_v0 = vadd.f32 %v6749_v33, %v6745_v17 }
 0x95a   :  { %v6756_v34 = vrot.slane %v6752_v40, 7 }
 0x95b   :  { %v6757_v58 = vrot.slane %v6753_v0, 7 }
 0x95c   :  { %v6760_v41 = vsel %vm774_vm2, %v6522_v9, %v6756_v34 }
 0x95d   :  { %v6774_v60 = vadd.f32 %v6767_v21, %v6760_v41  ;;  %v6761_v43 = vsel %vm774_vm2, %v6523_v24, %v6757_v58 }
 0x95e   :  { %v6775_v57 = vadd.f32 %v6771_v19, %v6761_v43 }
 0x960   :  { %v6778_v48 = vcombine.low %v6774_v60, %v6775_v57 }
 0x962   :  { %v6785_v50 = vrot.slane %v6778_v48, %v6784_v39 }
 0x964   :  { %6790 = vst.msk [vmem:[#allocation15] sm:$0xf] %vm6789_vm11, %v6785_v50 }
 0x965   :  { %7681 = shalt.err (!%p7678_p2)
}
 0x966   :  { %s7682_s23 = scalar_lea.hbm %s9501_s7, 64 }
 0x967   :  { %p7683_p3 = scmp.ne.s32.totalorder %s9501_s7, %s7682_s23  ;;  %p7686_p4 = scmp.lt.u32.totalorder %s7682_s23, %s9501_s7 }
 0x969   :  { %p7688_p5 = pnand %p7686_p4, %p7683_p3 }
 0x96b   :  { %7691 = shalt.err (!%p7688_p5)
}
 0x96c   :  { %6800 = dma.vmem_to_hbm [thread:$0]  %s6798_s21, 64, %s9501_s7, [#allocation8]  }
 0x96d   :  { %7700 = dma.done.wait [#allocation8], 64  }
 0x96e   :  { %7701 = vsyncadd [#allocation8], 4294967232 }
 0x96f   :  { %6804 = vsyncpa [#allocation7], 1 }
 0x970   :  { %6805 = vsyncpa [#allocation10], 1 }
 0x971   :  { %6806 = vsyncpa [#allocation13], 1 }
 0x972   :  { %6807 = vsyncpa [#allocation8], 1 }
 0x973   :  { %6808 = vsyncmov [#allocation5] }
 0x976   :  { %s6809_s5 = vpop.sfrf %6808 }
 0x977   :  { %p6974_p6 = scmp.ne.s32.totalorder %s6809_s5, 0 }
 0x979   :  { %6813 = shalt.err (%p6974_p6)  }

</bundles_post_ra>
